<compile_context>
chip_gen: v7x
topology: tpu7x:2x2x1
jax: 0.10.0
libtpu: 0.0.40
codegen_flags: <defaults>
</compile_context>

<pallas_src>
import functools

import numpy as np
import jax
import jax.numpy as jnp
from jax import lax
from jax.experimental import pallas as pl
from jax.experimental.pallas import tpu as pltpu


# ----------------------------------------------------------------------------
# Fused kernel
# ----------------------------------------------------------------------------
def _hexnet_kernel(x_ref, stem_w_ref, stem_b_ref, res_w_ref, res_b_ref,
                   ap_ref, sp_ref, av_ref, sv_ref,
                   vt_ref, wv_ref, e_ref, pb_ref, vb_ref, imask_ref,
                   policy_ref, value_ref,
                   act_ref,
                   *, KK, M0, NBP, num_blocks, shifts):
    f32 = jnp.float32
    C = act_ref.shape[1]
    RT = act_ref.shape[0]
    imask = imask_ref[...]                            # (NBP, 1) 1.0 on interior rows

    # Zero the margin rows of the activation scratch once; the in-board halo rows
    # are kept zero by multiplying each layer's output with the interior mask.
    act_ref[0:M0, :] = jnp.zeros((M0, C), act_ref.dtype)
    act_ref[M0 + NBP:, :] = jnp.zeros((RT - M0 - NBP, C), act_ref.dtype)

    def conv_taps(window, w_ref, base):
        # window(s): contiguous (NBP, Cin) row window at static offset s.
        # One bf16 MXU matmul per tap, f32 accumulation (acc initialised by tap 0).
        acc = None
        for t in range(KK):
            win = window(shifts[t]).astype(jnp.bfloat16)
            contrib = jnp.dot(win, w_ref[base + t], preferred_element_type=f32)
            acc = contrib if acc is None else acc + contrib
        return acc                                    # (NBP, Cout) f32

    # ---- stem ConvBlock: conv + folded BN + ReLU ----
    pre = conv_taps(lambda s: x_ref[M0 + s:M0 + s + NBP, :], stem_w_ref, 0)
    y = jnp.maximum(pre + stem_b_ref[...], 0.0) * imask          # (NBP, C) f32
    act_ref[M0:M0 + NBP, :] = y.astype(act_ref.dtype)

    # ---- residual tower ----
    for b in range(num_blocks):
        resid = y
        pre = conv_taps(lambda s: act_ref[M0 + s:M0 + s + NBP, :],
                        res_w_ref, (2 * b) * KK)
        y = jnp.maximum(pre + res_b_ref[2 * b], 0.0) * imask
        act_ref[M0:M0 + NBP, :] = y.astype(act_ref.dtype)
        pre = conv_taps(lambda s: act_ref[M0 + s:M0 + s + NBP, :],
                        res_w_ref, (2 * b + 1) * KK)
        y = jnp.maximum(pre + res_b_ref[2 * b + 1] + resid, 0.0) * imask
        act_ref[M0:M0 + NBP, :] = y.astype(act_ref.dtype)

    # ---- heads: 1x1 ConvBlock + (flatten + Linear) fused, no reshapes ----
    y_bf = y.astype(jnp.bfloat16)
    e_mat = e_ref[...]                                            # (NB, NBP) 0/1

    ph = jnp.maximum(jnp.dot(y_bf, ap_ref[...], preferred_element_type=f32)
                     + sp_ref[...], 0.0)                          # (NBP, 2)
    t_mat = ph[:, 0:1] * vt_ref[0] + ph[:, 1:2] * vt_ref[1]       # (NBP, P)
    policy_ref[...] = jnp.dot(e_mat, t_mat, preferred_element_type=f32) + pb_ref[...]

    vh = jnp.maximum(jnp.dot(y_bf, av_ref[...], preferred_element_type=f32)
                     + sv_ref[...], 0.0)                          # (NBP, 1)
    value_ref[...] = jnp.tanh(
        jnp.dot(e_mat, vh * wv_ref[...], preferred_element_type=f32) + vb_ref[...])


# ----------------------------------------------------------------------------
# Wrapper: layout prep, weight packing, BlockSpecs, grid
# ----------------------------------------------------------------------------
def _spec_full(shape):
    zero = (0,) * len(shape)
    return pl.BlockSpec(tuple(shape), lambda g, _z=zero: _z)


def hexnet_forward(params, x_nchw):
    """PyTorch-convention NCHW input -> (policy, value), single fused Pallas kernel."""
    N, Cin, H, W = x_nchw.shape
    C = params["conv"]["w"].shape[-1]
    KH, KW = params["conv"]["w"].shape[0], params["conv"]["w"].shape[1]
    KK = KH * KW
    pad = (KH - 1) // 2                              # 'same' padding (HexNet default)
    Hp, Wp = H + 2 * pad, W + 2 * pad
    HpWp, HW = Hp * Wp, H * W
    P = params["p_fc_w"].shape[1]
    Rb = len(params["res"])

    # batch -> G parallel chunks (keeps both v7x TensorCores busy); boards inside a
    # chunk are folded into the matmul M dimension.
    G = 2 if (N % 2 == 0 and N >= 2) else 1
    NB = N // G
    NBP = NB * HpWp
    max_shift = pad * Wp + pad
    M0 = ((max_shift + 7) // 8) * 8                  # sublane-aligned margin
    RT = M0 + NBP + M0
    shifts = tuple((ky - pad) * Wp + (kx - pad) for ky in range(KH) for kx in range(KW))

    f32, bf16 = jnp.float32, jnp.bfloat16

    # one-time input prep: NCHW -> padded NHWC rows, chunked, with zero margins
    x = jnp.transpose(x_nchw, (0, 2, 3, 1)).astype(f32)
    x = jnp.pad(x, ((0, 0), (pad, pad), (pad, pad), (0, 0)))
    x = x.reshape(N, HpWp, Cin).reshape(G, NBP, Cin)
    x = jnp.pad(x, ((0, 0), (M0, RT - M0 - NBP), (0, 0)))          # (G, RT, Cin)

    # fold BN scale into conv weights; pack tower weights as stacked per-tap matrices
    def fold_w(p):
        return (p["w"] * p["scale"]).astype(bf16)

    stem_w = fold_w(params["conv"]).reshape(KK, Cin, C)
    stem_b = params["conv"]["shift"].reshape(1, C).astype(f32)
    res_w = jnp.concatenate(
        [fold_w(blk[c]).reshape(KK, C, C)
         for blk in params["res"] for c in ("c1", "c2")], axis=0)   # (Rb*2*KK, C, C)
    res_b = jnp.stack(
        [blk[c]["shift"].reshape(1, C).astype(f32)
         for blk in params["res"] for c in ("c1", "c2")], axis=0)   # (Rb*2, 1, C)

    ap = fold_w(params["p_conv"]).reshape(C, 2)
    sp = params["p_conv"]["shift"].reshape(1, 2).astype(f32)
    av = fold_w(params["v_conv"]).reshape(C, 1)
    sv = params["v_conv"]["shift"].reshape(1, 1).astype(f32)

    # geometry constants (per padded row): interior mask, board-aggregation matrix,
    # and FC weights gathered per padded row (consumes the torch NCHW flatten order)
    rr = np.arange(NBP)
    within = rr % HpWp
    yp, xp = within // Wp, within % Wp
    interior = (yp >= pad) & (yp < pad + H) & (xp >= pad) & (xp < pad + W)
    pos = np.where(interior, (yp - pad) * W + (xp - pad), 0)
    board = rr // HpWp
    interior_col = jnp.asarray(interior.astype(np.float32)).reshape(NBP, 1)
    imask = interior_col
    e_mat = jnp.asarray(((board[None, :] == np.arange(NB)[:, None])
                         & interior[None, :]).astype(np.float32))   # (NB, NBP)

    p_fc_w = params["p_fc_w"].astype(f32)
    vt = jnp.stack([jnp.take(p_fc_w, c * HW + pos, axis=0) * interior_col
                    for c in range(2)], axis=0)                     # (2, NBP, P)
    wv = jnp.take(params["v_fc_w"].astype(f32), pos, axis=0) * interior_col  # (NBP, 1)
    pb = params["p_fc_b"].reshape(1, P).astype(f32)
    vb = params["v_fc_b"].reshape(1, 1).astype(f32)

    kernel = functools.partial(_hexnet_kernel, KK=KK, M0=M0, NBP=NBP,
                               num_blocks=Rb, shifts=shifts)

    policy3, value3 = pl.pallas_call(
        kernel,
        out_shape=(jax.ShapeDtypeStruct((G, NB, P), f32),
                   jax.ShapeDtypeStruct((G, NB, 1), f32)),
        grid=(G,),
        in_specs=[
            pl.BlockSpec((None, RT, Cin), lambda g: (g, 0, 0)),
            _spec_full(stem_w.shape), _spec_full(stem_b.shape),
            _spec_full(res_w.shape), _spec_full(res_b.shape),
            _spec_full(ap.shape), _spec_full(sp.shape),
            _spec_full(av.shape), _spec_full(sv.shape),
            _spec_full(vt.shape), _spec_full(wv.shape),
            _spec_full(e_mat.shape), _spec_full(pb.shape), _spec_full(vb.shape),
            _spec_full(imask.shape),
        ],
        out_specs=(pl.BlockSpec((None, NB, P), lambda g: (g, 0, 0)),
                   pl.BlockSpec((None, NB, 1), lambda g: (g, 0, 0))),
        scratch_shapes=[pltpu.VMEM((RT, C), f32)],
        compiler_params=pltpu.CompilerParams(dimension_semantics=("parallel",)),
    )(x, stem_w, stem_b, res_w, res_b, ap, sp, av, sv, vt, wv, e_mat, pb, vb, imask)

    return policy3.reshape(N, P), value3.reshape(N, 1)


# ----------------------------------------------------------------------------
# Pure-XLA reference (for correctness checking only)
# ----------------------------------------------------------------------------
def hexnet_reference(params, x_nchw):
    x = jnp.transpose(x_nchw, (0, 2, 3, 1)).astype(jnp.float32)
    N = x.shape[0]

    def conv_bn(x, p, padding, relu):
        y = lax.conv_general_dilated(
            x, p["w"], (1, 1), [(padding, padding), (padding, padding)],
            dimension_numbers=("NHWC", "HWIO", "NHWC"))
        y = y * p["scale"] + p["shift"]
        return jnp.maximum(y, 0.0) if relu else y

    x = conv_bn(x, params["conv"], 1, True)
    for blk in params["res"]:
        r = x
        x = conv_bn(x, blk["c1"], 1, True)
        x = jnp.maximum(conv_bn(x, blk["c2"], 1, False) + r, 0.0)
    ph = conv_bn(x, params["p_conv"], 0, True)
    policy = jnp.transpose(ph, (0, 3, 1, 2)).reshape(N, -1) @ params["p_fc_w"] + params["p_fc_b"]
    vh = conv_bn(x, params["v_conv"], 0, True)
    value = jnp.tanh(jnp.transpose(vh, (0, 3, 1, 2)).reshape(N, -1) @ params["v_fc_w"]
                     + params["v_fc_b"])
    return policy, value


# ----------------------------------------------------------------------------
# Parameter construction (deterministic, synthetic; BN folded to scale/shift)
# ----------------------------------------------------------------------------
def _fold_bn(conv_bias, gamma, beta, running_mean, running_var, eps=1e-5):
    scale = gamma / jnp.sqrt(running_var + eps)
    shift = (conv_bias - running_mean) * scale + beta
    return scale, shift


def _make_conv_block(key, cin, cout, k):
    kw, kb, kg, kbeta = jax.random.split(key, 4)
    w = 0.1 * jax.random.normal(kw, (k, k, cin, cout), jnp.float32)
    bias = 0.1 * jax.random.normal(kb, (cout,), jnp.float32)
    gamma = 1.0 + 0.05 * jax.random.normal(kg, (cout,), jnp.float32)
    beta = 0.05 * jax.random.normal(kbeta, (cout,), jnp.float32)
    running_mean = jnp.zeros((cout,), jnp.float32)
    running_var = jnp.ones((cout,), jnp.float32)
    scale, shift = _fold_bn(bias, gamma, beta, running_mean, running_var)
    return {"w": w, "scale": scale, "shift": shift}


def init_hexnet_params(key, size, in_channels, num_residual_blocks, num_filters,
                       policy_output_dim, kernel_size=3):
    keys = jax.random.split(key, 3 + 2 * num_residual_blocks + 4)
    it = iter(keys)
    params = {}
    params["conv"] = _make_conv_block(next(it), in_channels, num_filters, kernel_size)
    params["res"] = []
    for _ in range(num_residual_blocks):
        blk = {
            "c1": _make_conv_block(next(it), num_filters, num_filters, kernel_size),
            "c2": _make_conv_block(next(it), num_filters, num_filters, kernel_size),
        }
        params["res"].append(blk)
    params["p_conv"] = _make_conv_block(next(it), num_filters, 2, 1)
    params["v_conv"] = _make_conv_block(next(it), num_filters, 1, 1)
    kpw, kvw = next(it), next(it)
    params["p_fc_w"] = 0.1 * jax.random.normal(kpw, (2 * size * size, policy_output_dim), jnp.float32)
    params["p_fc_b"] = 0.05 * jax.random.normal(jax.random.fold_in(kpw, 1), (policy_output_dim,), jnp.float32)
    params["v_fc_w"] = 0.1 * jax.random.normal(kvw, (size * size, 1), jnp.float32)
    params["v_fc_b"] = 0.05 * jax.random.normal(jax.random.fold_in(kvw, 1), (1,), jnp.float32)
    return params


# ----------------------------------------------------------------------------
if __name__ == "__main__":
    size = 8
    in_channels = 4
    num_residual_blocks = 2
    num_filters = 32
    policy_output_dim = size * size          # 64
    batch = 2

    key = jax.random.PRNGKey(0)
    k_params, k_x = jax.random.split(key)

    params = init_hexnet_params(k_params, size, in_channels, num_residual_blocks,
                                num_filters, policy_output_dim, kernel_size=3)

    # PyTorch-convention input: NCHW
    x = jax.random.normal(k_x, (batch, in_channels, size, size), jnp.float32)

    policy, value = jax.jit(hexnet_forward)(params, x)
    policy = jax.block_until_ready(policy)
    value = jax.block_until_ready(value)

    assert policy.shape == (batch, policy_output_dim)
    assert value.shape == (batch, 1)
    assert bool(jnp.all(jnp.isfinite(policy))) and bool(jnp.all(jnp.isfinite(value)))
    assert bool(jnp.all(jnp.abs(value) <= 1.0))

    # correctness check vs. a pure-XLA reference (tolerance covers the bf16 MXU path)
    ref_policy, ref_value = jax.jit(hexnet_reference)(params, x)
    p_err = float(jnp.max(jnp.abs(policy - ref_policy)))
    v_err = float(jnp.max(jnp.abs(value - ref_value)))
    assert p_err < 0.15 and v_err < 0.15, (p_err, v_err)

    print("KERNEL_OK")
</pallas_src>

<mosaic_0001>
module attributes {stable_mosaic.version = 11 : i64} {
  func.func @_hexnet_kernel(%arg0: i32, %arg1: memref<1x132x4xf32, #tpu.memory_space<vmem>>, %arg2: memref<9x4x32xbf16, #tpu.memory_space<vmem>>, %arg3: memref<1x32xf32, #tpu.memory_space<vmem>>, %arg4: memref<36x32x32xbf16, #tpu.memory_space<vmem>>, %arg5: memref<4x1x32xf32, #tpu.memory_space<vmem>>, %arg6: memref<32x2xbf16, #tpu.memory_space<vmem>>, %arg7: memref<1x2xf32, #tpu.memory_space<vmem>>, %arg8: memref<32x1xbf16, #tpu.memory_space<vmem>>, %arg9: memref<1x1xf32, #tpu.memory_space<vmem>>, %arg10: memref<2x100x64xf32, #tpu.memory_space<vmem>>, %arg11: memref<100x1xf32, #tpu.memory_space<vmem>>, %arg12: memref<1x100xf32, #tpu.memory_space<vmem>>, %arg13: memref<1x64xf32, #tpu.memory_space<vmem>>, %arg14: memref<1x1xf32, #tpu.memory_space<vmem>>, %arg15: memref<100x1xf32, #tpu.memory_space<vmem>>, %arg16: memref<1x1x64xf32, #tpu.memory_space<vmem>>, %arg17: memref<1x1x1xf32, #tpu.memory_space<vmem>>, %arg18: memref<132x32xf32, #tpu.memory_space<vmem>>) attributes {dimension_semantics = [#tpu.dimension_semantics<parallel>], iteration_bounds = array<i64: 2>, scalar_prefetch = 0 : i64, scratch_operands = 1 : i64, tpu.core_type = #tpu.core_type<tc>, window_params = [{transform_indices = @transform_0, window_bounds = array<i64: 1, 132, 4>}, {pipeline_mode = #tpu.pipeline_mode<synchronous>, transform_indices = @transform_1, window_bounds = array<i64: 9, 4, 32>}, {pipeline_mode = #tpu.pipeline_mode<synchronous>, transform_indices = @transform_2, window_bounds = array<i64: 1, 32>}, {pipeline_mode = #tpu.pipeline_mode<synchronous>, transform_indices = @transform_3, window_bounds = array<i64: 36, 32, 32>}, {pipeline_mode = #tpu.pipeline_mode<synchronous>, transform_indices = @transform_4, window_bounds = array<i64: 4, 1, 32>}, {pipeline_mode = #tpu.pipeline_mode<synchronous>, transform_indices = @transform_5, window_bounds = array<i64: 32, 2>}, {pipeline_mode = #tpu.pipeline_mode<synchronous>, transform_indices = @transform_6, window_bounds = array<i64: 1, 2>}, {pipeline_mode = #tpu.pipeline_mode<synchronous>, transform_indices = @transform_7, window_bounds = array<i64: 32, 1>}, {pipeline_mode = #tpu.pipeline_mode<synchronous>, transform_indices = @transform_8, window_bounds = array<i64: 1, 1>}, {pipeline_mode = #tpu.pipeline_mode<synchronous>, transform_indices = @transform_9, window_bounds = array<i64: 2, 100, 64>}, {pipeline_mode = #tpu.pipeline_mode<synchronous>, transform_indices = @transform_10, window_bounds = array<i64: 100, 1>}, {pipeline_mode = #tpu.pipeline_mode<synchronous>, transform_indices = @transform_11, window_bounds = array<i64: 1, 100>}, {pipeline_mode = #tpu.pipeline_mode<synchronous>, transform_indices = @transform_12, window_bounds = array<i64: 1, 64>}, {pipeline_mode = #tpu.pipeline_mode<synchronous>, transform_indices = @transform_13, window_bounds = array<i64: 1, 1>}, {pipeline_mode = #tpu.pipeline_mode<synchronous>, transform_indices = @transform_14, window_bounds = array<i64: 100, 1>}, {transform_indices = @transform_15, window_bounds = array<i64: 1, 1, 64>}, {transform_indices = @transform_16, window_bounds = array<i64: 1, 1, 1>}]} {
    %c0 = arith.constant 0 : index
    %c0_0 = arith.constant 0 : index
    %0 = vector.load %arg15[%c0, %c0_0] : memref<100x1xf32, #tpu.memory_space<vmem>>, vector<100x1xf32>
    %cst = arith.constant 0.000000e+00 : f32
    %1 = vector.broadcast %cst : f32 to vector<16x32xf32>
    %c0_1 = arith.constant 0 : index
    %c0_2 = arith.constant 0 : index
    %2 = vector.load %arg18[%c0_1, %c0_2] : memref<132x32xf32, #tpu.memory_space<vmem>>, vector<16x32xf32>
    tpu.vector_store %arg18[%c0_1, %c0_2], %1 {strides = array<i32>} : memref<132x32xf32, #tpu.memory_space<vmem>>, vector<16x32xf32>,
    %cst_3 = arith.constant 0.000000e+00 : f32
    %3 = vector.broadcast %cst_3 : f32 to vector<16x32xf32>
    %c116 = arith.constant 116 : index
    %c0_4 = arith.constant 0 : index
    %4 = vector.load %arg18[%c116, %c0_4] : memref<132x32xf32, #tpu.memory_space<vmem>>, vector<16x32xf32>
    tpu.vector_store %arg18[%c116, %c0_4], %3 {strides = array<i32>} : memref<132x32xf32, #tpu.memory_space<vmem>>, vector<16x32xf32>,
    %c0_5 = arith.constant 0 : index
    %c5 = arith.constant 5 : index
    %c0_6 = arith.constant 0 : index
    %5 = vector.load %arg1[%c0_5, %c5, %c0_6] : memref<1x132x4xf32, #tpu.memory_space<vmem>>, vector<1x100x4xf32>
    %6 = vector.shape_cast %5 : vector<1x100x4xf32> to vector<100x4xf32>
    %7 = arith.truncf %6 : vector<100x4xf32> to vector<100x4xbf16>
    %c0_7 = arith.constant 0 : index
    %c0_8 = arith.constant 0 : index
    %c0_9 = arith.constant 0 : index
    %8 = vector.load %arg2[%c0_7, %c0_8, %c0_9] : memref<9x4x32xbf16, #tpu.memory_space<vmem>>, vector<1x4x32xbf16>
    %9 = vector.shape_cast %8 : vector<1x4x32xbf16> to vector<4x32xbf16>
    %cst_10 = arith.constant dense<0.000000e+00> : vector<100x32xf32>
    %10 = tpu.matmul %7, %9, %cst_10 {dimension_numbers = #tpu.dot_dimension_numbers<[1], [0], [0], [1], [0, 0, 1, 1], [], []>} : vector<100x4xbf16>, vector<4x32xbf16>, vector<100x32xf32> -> vector<100x32xf32>
    %c0_11 = arith.constant 0 : index
    %c6 = arith.constant 6 : index
    %c0_12 = arith.constant 0 : index
    %11 = vector.load %arg1[%c0_11, %c6, %c0_12] : memref<1x132x4xf32, #tpu.memory_space<vmem>>, vector<1x100x4xf32>
    %12 = vector.shape_cast %11 : vector<1x100x4xf32> to vector<100x4xf32>
    %13 = arith.truncf %12 : vector<100x4xf32> to vector<100x4xbf16>
    %c1 = arith.constant 1 : index
    %c0_13 = arith.constant 0 : index
    %c0_14 = arith.constant 0 : index
    %14 = vector.load %arg2[%c1, %c0_13, %c0_14] : memref<9x4x32xbf16, #tpu.memory_space<vmem>>, vector<1x4x32xbf16>
    %15 = vector.shape_cast %14 : vector<1x4x32xbf16> to vector<4x32xbf16>
    %cst_15 = arith.constant dense<0.000000e+00> : vector<100x32xf32>
    %16 = tpu.matmul %13, %15, %cst_15 {dimension_numbers = #tpu.dot_dimension_numbers<[1], [0], [0], [1], [0, 0, 1, 1], [], []>} : vector<100x4xbf16>, vector<4x32xbf16>, vector<100x32xf32> -> vector<100x32xf32>
    %17 = arith.addf %10, %16 : vector<100x32xf32>
    %c0_16 = arith.constant 0 : index
    %c7 = arith.constant 7 : index
    %c0_17 = arith.constant 0 : index
    %18 = vector.load %arg1[%c0_16, %c7, %c0_17] : memref<1x132x4xf32, #tpu.memory_space<vmem>>, vector<1x100x4xf32>
    %19 = vector.shape_cast %18 : vector<1x100x4xf32> to vector<100x4xf32>
    %20 = arith.truncf %19 : vector<100x4xf32> to vector<100x4xbf16>
    %c2 = arith.constant 2 : index
    %c0_18 = arith.constant 0 : index
    %c0_19 = arith.constant 0 : index
    %21 = vector.load %arg2[%c2, %c0_18, %c0_19] : memref<9x4x32xbf16, #tpu.memory_space<vmem>>, vector<1x4x32xbf16>
    %22 = vector.shape_cast %21 : vector<1x4x32xbf16> to vector<4x32xbf16>
    %cst_20 = arith.constant dense<0.000000e+00> : vector<100x32xf32>
    %23 = tpu.matmul %20, %22, %cst_20 {dimension_numbers = #tpu.dot_dimension_numbers<[1], [0], [0], [1], [0, 0, 1, 1], [], []>} : vector<100x4xbf16>, vector<4x32xbf16>, vector<100x32xf32> -> vector<100x32xf32>
    %24 = arith.addf %17, %23 : vector<100x32xf32>
    %c0_21 = arith.constant 0 : index
    %c15 = arith.constant 15 : index
    %c0_22 = arith.constant 0 : index
    %25 = vector.load %arg1[%c0_21, %c15, %c0_22] : memref<1x132x4xf32, #tpu.memory_space<vmem>>, vector<1x100x4xf32>
    %26 = vector.shape_cast %25 : vector<1x100x4xf32> to vector<100x4xf32>
    %27 = arith.truncf %26 : vector<100x4xf32> to vector<100x4xbf16>
    %c3 = arith.constant 3 : index
    %c0_23 = arith.constant 0 : index
    %c0_24 = arith.constant 0 : index
    %28 = vector.load %arg2[%c3, %c0_23, %c0_24] : memref<9x4x32xbf16, #tpu.memory_space<vmem>>, vector<1x4x32xbf16>
    %29 = vector.shape_cast %28 : vector<1x4x32xbf16> to vector<4x32xbf16>
    %cst_25 = arith.constant dense<0.000000e+00> : vector<100x32xf32>
    %30 = tpu.matmul %27, %29, %cst_25 {dimension_numbers = #tpu.dot_dimension_numbers<[1], [0], [0], [1], [0, 0, 1, 1], [], []>} : vector<100x4xbf16>, vector<4x32xbf16>, vector<100x32xf32> -> vector<100x32xf32>
    %31 = arith.addf %24, %30 : vector<100x32xf32>
    %c0_26 = arith.constant 0 : index
    %c16 = arith.constant 16 : index
    %c0_27 = arith.constant 0 : index
    %32 = vector.load %arg1[%c0_26, %c16, %c0_27] : memref<1x132x4xf32, #tpu.memory_space<vmem>>, vector<1x100x4xf32>
    %33 = vector.shape_cast %32 : vector<1x100x4xf32> to vector<100x4xf32>
    %34 = arith.truncf %33 : vector<100x4xf32> to vector<100x4xbf16>
    %c4 = arith.constant 4 : index
    %c0_28 = arith.constant 0 : index
    %c0_29 = arith.constant 0 : index
    %35 = vector.load %arg2[%c4, %c0_28, %c0_29] : memref<9x4x32xbf16, #tpu.memory_space<vmem>>, vector<1x4x32xbf16>
    %36 = vector.shape_cast %35 : vector<1x4x32xbf16> to vector<4x32xbf16>
    %cst_30 = arith.constant dense<0.000000e+00> : vector<100x32xf32>
    %37 = tpu.matmul %34, %36, %cst_30 {dimension_numbers = #tpu.dot_dimension_numbers<[1], [0], [0], [1], [0, 0, 1, 1], [], []>} : vector<100x4xbf16>, vector<4x32xbf16>, vector<100x32xf32> -> vector<100x32xf32>
    %38 = arith.addf %31, %37 : vector<100x32xf32>
    %c0_31 = arith.constant 0 : index
    %c17 = arith.constant 17 : index
    %c0_32 = arith.constant 0 : index
    %39 = vector.load %arg1[%c0_31, %c17, %c0_32] : memref<1x132x4xf32, #tpu.memory_space<vmem>>, vector<1x100x4xf32>
    %40 = vector.shape_cast %39 : vector<1x100x4xf32> to vector<100x4xf32>
    %41 = arith.truncf %40 : vector<100x4xf32> to vector<100x4xbf16>
    %c5_33 = arith.constant 5 : index
    %c0_34 = arith.constant 0 : index
    %c0_35 = arith.constant 0 : index
    %42 = vector.load %arg2[%c5_33, %c0_34, %c0_35] : memref<9x4x32xbf16, #tpu.memory_space<vmem>>, vector<1x4x32xbf16>
    %43 = vector.shape_cast %42 : vector<1x4x32xbf16> to vector<4x32xbf16>
    %cst_36 = arith.constant dense<0.000000e+00> : vector<100x32xf32>
    %44 = tpu.matmul %41, %43, %cst_36 {dimension_numbers = #tpu.dot_dimension_numbers<[1], [0], [0], [1], [0, 0, 1, 1], [], []>} : vector<100x4xbf16>, vector<4x32xbf16>, vector<100x32xf32> -> vector<100x32xf32>
    %45 = arith.addf %38, %44 : vector<100x32xf32>
    %c0_37 = arith.constant 0 : index
    %c25 = arith.constant 25 : index
    %c0_38 = arith.constant 0 : index
    %46 = vector.load %arg1[%c0_37, %c25, %c0_38] : memref<1x132x4xf32, #tpu.memory_space<vmem>>, vector<1x100x4xf32>
    %47 = vector.shape_cast %46 : vector<1x100x4xf32> to vector<100x4xf32>
    %48 = arith.truncf %47 : vector<100x4xf32> to vector<100x4xbf16>
    %c6_39 = arith.constant 6 : index
    %c0_40 = arith.constant 0 : index
    %c0_41 = arith.constant 0 : index
    %49 = vector.load %arg2[%c6_39, %c0_40, %c0_41] : memref<9x4x32xbf16, #tpu.memory_space<vmem>>, vector<1x4x32xbf16>
    %50 = vector.shape_cast %49 : vector<1x4x32xbf16> to vector<4x32xbf16>
    %cst_42 = arith.constant dense<0.000000e+00> : vector<100x32xf32>
    %51 = tpu.matmul %48, %50, %cst_42 {dimension_numbers = #tpu.dot_dimension_numbers<[1], [0], [0], [1], [0, 0, 1, 1], [], []>} : vector<100x4xbf16>, vector<4x32xbf16>, vector<100x32xf32> -> vector<100x32xf32>
    %52 = arith.addf %45, %51 : vector<100x32xf32>
    %c0_43 = arith.constant 0 : index
    %c26 = arith.constant 26 : index
    %c0_44 = arith.constant 0 : index
    %53 = vector.load %arg1[%c0_43, %c26, %c0_44] : memref<1x132x4xf32, #tpu.memory_space<vmem>>, vector<1x100x4xf32>
    %54 = vector.shape_cast %53 : vector<1x100x4xf32> to vector<100x4xf32>
    %55 = arith.truncf %54 : vector<100x4xf32> to vector<100x4xbf16>
    %c7_45 = arith.constant 7 : index
    %c0_46 = arith.constant 0 : index
    %c0_47 = arith.constant 0 : index
    %56 = vector.load %arg2[%c7_45, %c0_46, %c0_47] : memref<9x4x32xbf16, #tpu.memory_space<vmem>>, vector<1x4x32xbf16>
    %57 = vector.shape_cast %56 : vector<1x4x32xbf16> to vector<4x32xbf16>
    %cst_48 = arith.constant dense<0.000000e+00> : vector<100x32xf32>
    %58 = tpu.matmul %55, %57, %cst_48 {dimension_numbers = #tpu.dot_dimension_numbers<[1], [0], [0], [1], [0, 0, 1, 1], [], []>} : vector<100x4xbf16>, vector<4x32xbf16>, vector<100x32xf32> -> vector<100x32xf32>
    %59 = arith.addf %52, %58 : vector<100x32xf32>
    %c0_49 = arith.constant 0 : index
    %c27 = arith.constant 27 : index
    %c0_50 = arith.constant 0 : index
    %60 = vector.load %arg1[%c0_49, %c27, %c0_50] : memref<1x132x4xf32, #tpu.memory_space<vmem>>, vector<1x100x4xf32>
    %61 = vector.shape_cast %60 : vector<1x100x4xf32> to vector<100x4xf32>
    %62 = arith.truncf %61 : vector<100x4xf32> to vector<100x4xbf16>
    %c8 = arith.constant 8 : index
    %c0_51 = arith.constant 0 : index
    %c0_52 = arith.constant 0 : index
    %63 = vector.load %arg2[%c8, %c0_51, %c0_52] : memref<9x4x32xbf16, #tpu.memory_space<vmem>>, vector<1x4x32xbf16>
    %64 = vector.shape_cast %63 : vector<1x4x32xbf16> to vector<4x32xbf16>
    %cst_53 = arith.constant dense<0.000000e+00> : vector<100x32xf32>
    %65 = tpu.matmul %62, %64, %cst_53 {dimension_numbers = #tpu.dot_dimension_numbers<[1], [0], [0], [1], [0, 0, 1, 1], [], []>} : vector<100x4xbf16>, vector<4x32xbf16>, vector<100x32xf32> -> vector<100x32xf32>
    %66 = arith.addf %59, %65 : vector<100x32xf32>
    %c0_54 = arith.constant 0 : index
    %c0_55 = arith.constant 0 : index
    %67 = vector.load %arg3[%c0_54, %c0_55] : memref<1x32xf32, #tpu.memory_space<vmem>>, vector<1x32xf32>
    %68 = vector.broadcast %67 : vector<1x32xf32> to vector<100x32xf32>
    %69 = arith.addf %66, %68 : vector<100x32xf32>
    %cst_56 = arith.constant 0.000000e+00 : f32
    %70 = vector.broadcast %cst_56 : f32 to vector<100x32xf32>
    %71 = arith.maximumf %69, %70 : vector<100x32xf32>
    %72 = vector.broadcast %0 : vector<100x1xf32> to vector<100x32xf32>
    %73 = arith.mulf %71, %72 : vector<100x32xf32>
    %c16_57 = arith.constant 16 : index
    %c0_58 = arith.constant 0 : index
    %74 = vector.load %arg18[%c16_57, %c0_58] : memref<132x32xf32, #tpu.memory_space<vmem>>, vector<100x32xf32>
    tpu.vector_store %arg18[%c16_57, %c0_58], %73 {strides = array<i32>} : memref<132x32xf32, #tpu.memory_space<vmem>>, vector<100x32xf32>,
    %c5_59 = arith.constant 5 : index
    %c0_60 = arith.constant 0 : index
    %75 = vector.load %arg18[%c5_59, %c0_60] : memref<132x32xf32, #tpu.memory_space<vmem>>, vector<100x32xf32>
    %76 = arith.truncf %75 : vector<100x32xf32> to vector<100x32xbf16>
    %c0_61 = arith.constant 0 : index
    %c0_62 = arith.constant 0 : index
    %c0_63 = arith.constant 0 : index
    %77 = vector.load %arg4[%c0_61, %c0_62, %c0_63] : memref<36x32x32xbf16, #tpu.memory_space<vmem>>, vector<1x32x32xbf16>
    %78 = vector.shape_cast %77 : vector<1x32x32xbf16> to vector<32x32xbf16>
    %cst_64 = arith.constant dense<0.000000e+00> : vector<100x32xf32>
    %79 = tpu.matmul %76, %78, %cst_64 {dimension_numbers = #tpu.dot_dimension_numbers<[1], [0], [0], [1], [0, 0, 1, 1], [], []>} : vector<100x32xbf16>, vector<32x32xbf16>, vector<100x32xf32> -> vector<100x32xf32>
    %c6_65 = arith.constant 6 : index
    %c0_66 = arith.constant 0 : index
    %80 = vector.load %arg18[%c6_65, %c0_66] : memref<132x32xf32, #tpu.memory_space<vmem>>, vector<100x32xf32>
    %81 = arith.truncf %80 : vector<100x32xf32> to vector<100x32xbf16>
    %c1_67 = arith.constant 1 : index
    %c0_68 = arith.constant 0 : index
    %c0_69 = arith.constant 0 : index
    %82 = vector.load %arg4[%c1_67, %c0_68, %c0_69] : memref<36x32x32xbf16, #tpu.memory_space<vmem>>, vector<1x32x32xbf16>
    %83 = vector.shape_cast %82 : vector<1x32x32xbf16> to vector<32x32xbf16>
    %cst_70 = arith.constant dense<0.000000e+00> : vector<100x32xf32>
    %84 = tpu.matmul %81, %83, %cst_70 {dimension_numbers = #tpu.dot_dimension_numbers<[1], [0], [0], [1], [0, 0, 1, 1], [], []>} : vector<100x32xbf16>, vector<32x32xbf16>, vector<100x32xf32> -> vector<100x32xf32>
    %85 = arith.addf %79, %84 : vector<100x32xf32>
    %c7_71 = arith.constant 7 : index
    %c0_72 = arith.constant 0 : index
    %86 = vector.load %arg18[%c7_71, %c0_72] : memref<132x32xf32, #tpu.memory_space<vmem>>, vector<100x32xf32>
    %87 = arith.truncf %86 : vector<100x32xf32> to vector<100x32xbf16>
    %c2_73 = arith.constant 2 : index
    %c0_74 = arith.constant 0 : index
    %c0_75 = arith.constant 0 : index
    %88 = vector.load %arg4[%c2_73, %c0_74, %c0_75] : memref<36x32x32xbf16, #tpu.memory_space<vmem>>, vector<1x32x32xbf16>
    %89 = vector.shape_cast %88 : vector<1x32x32xbf16> to vector<32x32xbf16>
    %cst_76 = arith.constant dense<0.000000e+00> : vector<100x32xf32>
    %90 = tpu.matmul %87, %89, %cst_76 {dimension_numbers = #tpu.dot_dimension_numbers<[1], [0], [0], [1], [0, 0, 1, 1], [], []>} : vector<100x32xbf16>, vector<32x32xbf16>, vector<100x32xf32> -> vector<100x32xf32>
    %91 = arith.addf %85, %90 : vector<100x32xf32>
    %c15_77 = arith.constant 15 : index
    %c0_78 = arith.constant 0 : index
    %92 = vector.load %arg18[%c15_77, %c0_78] : memref<132x32xf32, #tpu.memory_space<vmem>>, vector<100x32xf32>
    %93 = arith.truncf %92 : vector<100x32xf32> to vector<100x32xbf16>
    %c3_79 = arith.constant 3 : index
    %c0_80 = arith.constant 0 : index
    %c0_81 = arith.constant 0 : index
    %94 = vector.load %arg4[%c3_79, %c0_80, %c0_81] : memref<36x32x32xbf16, #tpu.memory_space<vmem>>, vector<1x32x32xbf16>
    %95 = vector.shape_cast %94 : vector<1x32x32xbf16> to vector<32x32xbf16>
    %cst_82 = arith.constant dense<0.000000e+00> : vector<100x32xf32>
    %96 = tpu.matmul %93, %95, %cst_82 {dimension_numbers = #tpu.dot_dimension_numbers<[1], [0], [0], [1], [0, 0, 1, 1], [], []>} : vector<100x32xbf16>, vector<32x32xbf16>, vector<100x32xf32> -> vector<100x32xf32>
    %97 = arith.addf %91, %96 : vector<100x32xf32>
    %c16_83 = arith.constant 16 : index
    %c0_84 = arith.constant 0 : index
    %98 = vector.load %arg18[%c16_83, %c0_84] : memref<132x32xf32, #tpu.memory_space<vmem>>, vector<100x32xf32>
    %99 = arith.truncf %98 : vector<100x32xf32> to vector<100x32xbf16>
    %c4_85 = arith.constant 4 : index
    %c0_86 = arith.constant 0 : index
    %c0_87 = arith.constant 0 : index
    %100 = vector.load %arg4[%c4_85, %c0_86, %c0_87] : memref<36x32x32xbf16, #tpu.memory_space<vmem>>, vector<1x32x32xbf16>
    %101 = vector.shape_cast %100 : vector<1x32x32xbf16> to vector<32x32xbf16>
    %cst_88 = arith.constant dense<0.000000e+00> : vector<100x32xf32>
    %102 = tpu.matmul %99, %101, %cst_88 {dimension_numbers = #tpu.dot_dimension_numbers<[1], [0], [0], [1], [0, 0, 1, 1], [], []>} : vector<100x32xbf16>, vector<32x32xbf16>, vector<100x32xf32> -> vector<100x32xf32>
    %103 = arith.addf %97, %102 : vector<100x32xf32>
    %c17_89 = arith.constant 17 : index
    %c0_90 = arith.constant 0 : index
    %104 = vector.load %arg18[%c17_89, %c0_90] : memref<132x32xf32, #tpu.memory_space<vmem>>, vector<100x32xf32>
    %105 = arith.truncf %104 : vector<100x32xf32> to vector<100x32xbf16>
    %c5_91 = arith.constant 5 : index
    %c0_92 = arith.constant 0 : index
    %c0_93 = arith.constant 0 : index
    %106 = vector.load %arg4[%c5_91, %c0_92, %c0_93] : memref<36x32x32xbf16, #tpu.memory_space<vmem>>, vector<1x32x32xbf16>
    %107 = vector.shape_cast %106 : vector<1x32x32xbf16> to vector<32x32xbf16>
    %cst_94 = arith.constant dense<0.000000e+00> : vector<100x32xf32>
    %108 = tpu.matmul %105, %107, %cst_94 {dimension_numbers = #tpu.dot_dimension_numbers<[1], [0], [0], [1], [0, 0, 1, 1], [], []>} : vector<100x32xbf16>, vector<32x32xbf16>, vector<100x32xf32> -> vector<100x32xf32>
    %109 = arith.addf %103, %108 : vector<100x32xf32>
    %c25_95 = arith.constant 25 : index
    %c0_96 = arith.constant 0 : index
    %110 = vector.load %arg18[%c25_95, %c0_96] : memref<132x32xf32, #tpu.memory_space<vmem>>, vector<100x32xf32>
    %111 = arith.truncf %110 : vector<100x32xf32> to vector<100x32xbf16>
    %c6_97 = arith.constant 6 : index
    %c0_98 = arith.constant 0 : index
    %c0_99 = arith.constant 0 : index
    %112 = vector.load %arg4[%c6_97, %c0_98, %c0_99] : memref<36x32x32xbf16, #tpu.memory_space<vmem>>, vector<1x32x32xbf16>
    %113 = vector.shape_cast %112 : vector<1x32x32xbf16> to vector<32x32xbf16>
    %cst_100 = arith.constant dense<0.000000e+00> : vector<100x32xf32>
    %114 = tpu.matmul %111, %113, %cst_100 {dimension_numbers = #tpu.dot_dimension_numbers<[1], [0], [0], [1], [0, 0, 1, 1], [], []>} : vector<100x32xbf16>, vector<32x32xbf16>, vector<100x32xf32> -> vector<100x32xf32>
    %115 = arith.addf %109, %114 : vector<100x32xf32>
    %c26_101 = arith.constant 26 : index
    %c0_102 = arith.constant 0 : index
    %116 = vector.load %arg18[%c26_101, %c0_102] : memref<132x32xf32, #tpu.memory_space<vmem>>, vector<100x32xf32>
    %117 = arith.truncf %116 : vector<100x32xf32> to vector<100x32xbf16>
    %c7_103 = arith.constant 7 : index
    %c0_104 = arith.constant 0 : index
    %c0_105 = arith.constant 0 : index
    %118 = vector.load %arg4[%c7_103, %c0_104, %c0_105] : memref<36x32x32xbf16, #tpu.memory_space<vmem>>, vector<1x32x32xbf16>
    %119 = vector.shape_cast %118 : vector<1x32x32xbf16> to vector<32x32xbf16>
    %cst_106 = arith.constant dense<0.000000e+00> : vector<100x32xf32>
    %120 = tpu.matmul %117, %119, %cst_106 {dimension_numbers = #tpu.dot_dimension_numbers<[1], [0], [0], [1], [0, 0, 1, 1], [], []>} : vector<100x32xbf16>, vector<32x32xbf16>, vector<100x32xf32> -> vector<100x32xf32>
    %121 = arith.addf %115, %120 : vector<100x32xf32>
    %c27_107 = arith.constant 27 : index
    %c0_108 = arith.constant 0 : index
    %122 = vector.load %arg18[%c27_107, %c0_108] : memref<132x32xf32, #tpu.memory_space<vmem>>, vector<100x32xf32>
    %123 = arith.truncf %122 : vector<100x32xf32> to vector<100x32xbf16>
    %c8_109 = arith.constant 8 : index
    %c0_110 = arith.constant 0 : index
    %c0_111 = arith.constant 0 : index
    %124 = vector.load %arg4[%c8_109, %c0_110, %c0_111] : memref<36x32x32xbf16, #tpu.memory_space<vmem>>, vector<1x32x32xbf16>
    %125 = vector.shape_cast %124 : vector<1x32x32xbf16> to vector<32x32xbf16>
    %cst_112 = arith.constant dense<0.000000e+00> : vector<100x32xf32>
    %126 = tpu.matmul %123, %125, %cst_112 {dimension_numbers = #tpu.dot_dimension_numbers<[1], [0], [0], [1], [0, 0, 1, 1], [], []>} : vector<100x32xbf16>, vector<32x32xbf16>, vector<100x32xf32> -> vector<100x32xf32>
    %127 = arith.addf %121, %126 : vector<100x32xf32>
    %c0_113 = arith.constant 0 : index
    %c0_114 = arith.constant 0 : index
    %c0_115 = arith.constant 0 : index
    %128 = vector.load %arg5[%c0_113, %c0_114, %c0_115] : memref<4x1x32xf32, #tpu.memory_space<vmem>>, vector<1x1x32xf32>
    %129 = vector.shape_cast %128 : vector<1x1x32xf32> to vector<1x32xf32>
    %130 = vector.broadcast %129 : vector<1x32xf32> to vector<100x32xf32>
    %131 = arith.addf %127, %130 : vector<100x32xf32>
    %cst_116 = arith.constant 0.000000e+00 : f32
    %132 = vector.broadcast %cst_116 : f32 to vector<100x32xf32>
    %133 = arith.maximumf %131, %132 : vector<100x32xf32>
    %134 = vector.broadcast %0 : vector<100x1xf32> to vector<100x32xf32>
    %135 = arith.mulf %133, %134 : vector<100x32xf32>
    %c16_117 = arith.constant 16 : index
    %c0_118 = arith.constant 0 : index
    %136 = vector.load %arg18[%c16_117, %c0_118] : memref<132x32xf32, #tpu.memory_space<vmem>>, vector<100x32xf32>
    tpu.vector_store %arg18[%c16_117, %c0_118], %135 {strides = array<i32>} : memref<132x32xf32, #tpu.memory_space<vmem>>, vector<100x32xf32>,
    %c5_119 = arith.constant 5 : index
    %c0_120 = arith.constant 0 : index
    %137 = vector.load %arg18[%c5_119, %c0_120] : memref<132x32xf32, #tpu.memory_space<vmem>>, vector<100x32xf32>
    %138 = arith.truncf %137 : vector<100x32xf32> to vector<100x32xbf16>
    %c9 = arith.constant 9 : index
    %c0_121 = arith.constant 0 : index
    %c0_122 = arith.constant 0 : index
    %139 = vector.load %arg4[%c9, %c0_121, %c0_122] : memref<36x32x32xbf16, #tpu.memory_space<vmem>>, vector<1x32x32xbf16>
    %140 = vector.shape_cast %139 : vector<1x32x32xbf16> to vector<32x32xbf16>
    %cst_123 = arith.constant dense<0.000000e+00> : vector<100x32xf32>
    %141 = tpu.matmul %138, %140, %cst_123 {dimension_numbers = #tpu.dot_dimension_numbers<[1], [0], [0], [1], [0, 0, 1, 1], [], []>} : vector<100x32xbf16>, vector<32x32xbf16>, vector<100x32xf32> -> vector<100x32xf32>
    %c6_124 = arith.constant 6 : index
    %c0_125 = arith.constant 0 : index
    %142 = vector.load %arg18[%c6_124, %c0_125] : memref<132x32xf32, #tpu.memory_space<vmem>>, vector<100x32xf32>
    %143 = arith.truncf %142 : vector<100x32xf32> to vector<100x32xbf16>
    %c10 = arith.constant 10 : index
    %c0_126 = arith.constant 0 : index
    %c0_127 = arith.constant 0 : index
    %144 = vector.load %arg4[%c10, %c0_126, %c0_127] : memref<36x32x32xbf16, #tpu.memory_space<vmem>>, vector<1x32x32xbf16>
    %145 = vector.shape_cast %144 : vector<1x32x32xbf16> to vector<32x32xbf16>
    %cst_128 = arith.constant dense<0.000000e+00> : vector<100x32xf32>
    %146 = tpu.matmul %143, %145, %cst_128 {dimension_numbers = #tpu.dot_dimension_numbers<[1], [0], [0], [1], [0, 0, 1, 1], [], []>} : vector<100x32xbf16>, vector<32x32xbf16>, vector<100x32xf32> -> vector<100x32xf32>
    %147 = arith.addf %141, %146 : vector<100x32xf32>
    %c7_129 = arith.constant 7 : index
    %c0_130 = arith.constant 0 : index
    %148 = vector.load %arg18[%c7_129, %c0_130] : memref<132x32xf32, #tpu.memory_space<vmem>>, vector<100x32xf32>
    %149 = arith.truncf %148 : vector<100x32xf32> to vector<100x32xbf16>
    %c11 = arith.constant 11 : index
    %c0_131 = arith.constant 0 : index
    %c0_132 = arith.constant 0 : index
    %150 = vector.load %arg4[%c11, %c0_131, %c0_132] : memref<36x32x32xbf16, #tpu.memory_space<vmem>>, vector<1x32x32xbf16>
    %151 = vector.shape_cast %150 : vector<1x32x32xbf16> to vector<32x32xbf16>
    %cst_133 = arith.constant dense<0.000000e+00> : vector<100x32xf32>
    %152 = tpu.matmul %149, %151, %cst_133 {dimension_numbers = #tpu.dot_dimension_numbers<[1], [0], [0], [1], [0, 0, 1, 1], [], []>} : vector<100x32xbf16>, vector<32x32xbf16>, vector<100x32xf32> -> vector<100x32xf32>
    %153 = arith.addf %147, %152 : vector<100x32xf32>
    %c15_134 = arith.constant 15 : index
    %c0_135 = arith.constant 0 : index
    %154 = vector.load %arg18[%c15_134, %c0_135] : memref<132x32xf32, #tpu.memory_space<vmem>>, vector<100x32xf32>
    %155 = arith.truncf %154 : vector<100x32xf32> to vector<100x32xbf16>
    %c12 = arith.constant 12 : index
    %c0_136 = arith.constant 0 : index
    %c0_137 = arith.constant 0 : index
    %156 = vector.load %arg4[%c12, %c0_136, %c0_137] : memref<36x32x32xbf16, #tpu.memory_space<vmem>>, vector<1x32x32xbf16>
    %157 = vector.shape_cast %156 : vector<1x32x32xbf16> to vector<32x32xbf16>
    %cst_138 = arith.constant dense<0.000000e+00> : vector<100x32xf32>
    %158 = tpu.matmul %155, %157, %cst_138 {dimension_numbers = #tpu.dot_dimension_numbers<[1], [0], [0], [1], [0, 0, 1, 1], [], []>} : vector<100x32xbf16>, vector<32x32xbf16>, vector<100x32xf32> -> vector<100x32xf32>
    %159 = arith.addf %153, %158 : vector<100x32xf32>
    %c16_139 = arith.constant 16 : index
    %c0_140 = arith.constant 0 : index
    %160 = vector.load %arg18[%c16_139, %c0_140] : memref<132x32xf32, #tpu.memory_space<vmem>>, vector<100x32xf32>
    %161 = arith.truncf %160 : vector<100x32xf32> to vector<100x32xbf16>
    %c13 = arith.constant 13 : index
    %c0_141 = arith.constant 0 : index
    %c0_142 = arith.constant 0 : index
    %162 = vector.load %arg4[%c13, %c0_141, %c0_142] : memref<36x32x32xbf16, #tpu.memory_space<vmem>>, vector<1x32x32xbf16>
    %163 = vector.shape_cast %162 : vector<1x32x32xbf16> to vector<32x32xbf16>
    %cst_143 = arith.constant dense<0.000000e+00> : vector<100x32xf32>
    %164 = tpu.matmul %161, %163, %cst_143 {dimension_numbers = #tpu.dot_dimension_numbers<[1], [0], [0], [1], [0, 0, 1, 1], [], []>} : vector<100x32xbf16>, vector<32x32xbf16>, vector<100x32xf32> -> vector<100x32xf32>
    %165 = arith.addf %159, %164 : vector<100x32xf32>
    %c17_144 = arith.constant 17 : index
    %c0_145 = arith.constant 0 : index
    %166 = vector.load %arg18[%c17_144, %c0_145] : memref<132x32xf32, #tpu.memory_space<vmem>>, vector<100x32xf32>
    %167 = arith.truncf %166 : vector<100x32xf32> to vector<100x32xbf16>
    %c14 = arith.constant 14 : index
    %c0_146 = arith.constant 0 : index
    %c0_147 = arith.constant 0 : index
    %168 = vector.load %arg4[%c14, %c0_146, %c0_147] : memref<36x32x32xbf16, #tpu.memory_space<vmem>>, vector<1x32x32xbf16>
    %169 = vector.shape_cast %168 : vector<1x32x32xbf16> to vector<32x32xbf16>
    %cst_148 = arith.constant dense<0.000000e+00> : vector<100x32xf32>
    %170 = tpu.matmul %167, %169, %cst_148 {dimension_numbers = #tpu.dot_dimension_numbers<[1], [0], [0], [1], [0, 0, 1, 1], [], []>} : vector<100x32xbf16>, vector<32x32xbf16>, vector<100x32xf32> -> vector<100x32xf32>
    %171 = arith.addf %165, %170 : vector<100x32xf32>
    %c25_149 = arith.constant 25 : index
    %c0_150 = arith.constant 0 : index
    %172 = vector.load %arg18[%c25_149, %c0_150] : memref<132x32xf32, #tpu.memory_space<vmem>>, vector<100x32xf32>
    %173 = arith.truncf %172 : vector<100x32xf32> to vector<100x32xbf16>
    %c15_151 = arith.constant 15 : index
    %c0_152 = arith.constant 0 : index
    %c0_153 = arith.constant 0 : index
    %174 = vector.load %arg4[%c15_151, %c0_152, %c0_153] : memref<36x32x32xbf16, #tpu.memory_space<vmem>>, vector<1x32x32xbf16>
    %175 = vector.shape_cast %174 : vector<1x32x32xbf16> to vector<32x32xbf16>
    %cst_154 = arith.constant dense<0.000000e+00> : vector<100x32xf32>
    %176 = tpu.matmul %173, %175, %cst_154 {dimension_numbers = #tpu.dot_dimension_numbers<[1], [0], [0], [1], [0, 0, 1, 1], [], []>} : vector<100x32xbf16>, vector<32x32xbf16>, vector<100x32xf32> -> vector<100x32xf32>
    %177 = arith.addf %171, %176 : vector<100x32xf32>
    %c26_155 = arith.constant 26 : index
    %c0_156 = arith.constant 0 : index
    %178 = vector.load %arg18[%c26_155, %c0_156] : memref<132x32xf32, #tpu.memory_space<vmem>>, vector<100x32xf32>
    %179 = arith.truncf %178 : vector<100x32xf32> to vector<100x32xbf16>
    %c16_157 = arith.constant 16 : index
    %c0_158 = arith.constant 0 : index
    %c0_159 = arith.constant 0 : index
    %180 = vector.load %arg4[%c16_157, %c0_158, %c0_159] : memref<36x32x32xbf16, #tpu.memory_space<vmem>>, vector<1x32x32xbf16>
    %181 = vector.shape_cast %180 : vector<1x32x32xbf16> to vector<32x32xbf16>
    %cst_160 = arith.constant dense<0.000000e+00> : vector<100x32xf32>
    %182 = tpu.matmul %179, %181, %cst_160 {dimension_numbers = #tpu.dot_dimension_numbers<[1], [0], [0], [1], [0, 0, 1, 1], [], []>} : vector<100x32xbf16>, vector<32x32xbf16>, vector<100x32xf32> -> vector<100x32xf32>
    %183 = arith.addf %177, %182 : vector<100x32xf32>
    %c27_161 = arith.constant 27 : index
    %c0_162 = arith.constant 0 : index
    %184 = vector.load %arg18[%c27_161, %c0_162] : memref<132x32xf32, #tpu.memory_space<vmem>>, vector<100x32xf32>
    %185 = arith.truncf %184 : vector<100x32xf32> to vector<100x32xbf16>
    %c17_163 = arith.constant 17 : index
    %c0_164 = arith.constant 0 : index
    %c0_165 = arith.constant 0 : index
    %186 = vector.load %arg4[%c17_163, %c0_164, %c0_165] : memref<36x32x32xbf16, #tpu.memory_space<vmem>>, vector<1x32x32xbf16>
    %187 = vector.shape_cast %186 : vector<1x32x32xbf16> to vector<32x32xbf16>
    %cst_166 = arith.constant dense<0.000000e+00> : vector<100x32xf32>
    %188 = tpu.matmul %185, %187, %cst_166 {dimension_numbers = #tpu.dot_dimension_numbers<[1], [0], [0], [1], [0, 0, 1, 1], [], []>} : vector<100x32xbf16>, vector<32x32xbf16>, vector<100x32xf32> -> vector<100x32xf32>
    %189 = arith.addf %183, %188 : vector<100x32xf32>
    %c1_167 = arith.constant 1 : index
    %c0_168 = arith.constant 0 : index
    %c0_169 = arith.constant 0 : index
    %190 = vector.load %arg5[%c1_167, %c0_168, %c0_169] : memref<4x1x32xf32, #tpu.memory_space<vmem>>, vector<1x1x32xf32>
    %191 = vector.shape_cast %190 : vector<1x1x32xf32> to vector<1x32xf32>
    %192 = vector.broadcast %191 : vector<1x32xf32> to vector<100x32xf32>
    %193 = arith.addf %189, %192 : vector<100x32xf32>
    %194 = arith.addf %193, %73 : vector<100x32xf32>
    %cst_170 = arith.constant 0.000000e+00 : f32
    %195 = vector.broadcast %cst_170 : f32 to vector<100x32xf32>
    %196 = arith.maximumf %194, %195 : vector<100x32xf32>
    %197 = vector.broadcast %0 : vector<100x1xf32> to vector<100x32xf32>
    %198 = arith.mulf %196, %197 : vector<100x32xf32>
    %c16_171 = arith.constant 16 : index
    %c0_172 = arith.constant 0 : index
    %199 = vector.load %arg18[%c16_171, %c0_172] : memref<132x32xf32, #tpu.memory_space<vmem>>, vector<100x32xf32>
    tpu.vector_store %arg18[%c16_171, %c0_172], %198 {strides = array<i32>} : memref<132x32xf32, #tpu.memory_space<vmem>>, vector<100x32xf32>,
    %c5_173 = arith.constant 5 : index
    %c0_174 = arith.constant 0 : index
    %200 = vector.load %arg18[%c5_173, %c0_174] : memref<132x32xf32, #tpu.memory_space<vmem>>, vector<100x32xf32>
    %201 = arith.truncf %200 : vector<100x32xf32> to vector<100x32xbf16>
    %c18 = arith.constant 18 : index
    %c0_175 = arith.constant 0 : index
    %c0_176 = arith.constant 0 : index
    %202 = vector.load %arg4[%c18, %c0_175, %c0_176] : memref<36x32x32xbf16, #tpu.memory_space<vmem>>, vector<1x32x32xbf16>
    %203 = vector.shape_cast %202 : vector<1x32x32xbf16> to vector<32x32xbf16>
    %cst_177 = arith.constant dense<0.000000e+00> : vector<100x32xf32>
    %204 = tpu.matmul %201, %203, %cst_177 {dimension_numbers = #tpu.dot_dimension_numbers<[1], [0], [0], [1], [0, 0, 1, 1], [], []>} : vector<100x32xbf16>, vector<32x32xbf16>, vector<100x32xf32> -> vector<100x32xf32>
    %c6_178 = arith.constant 6 : index
    %c0_179 = arith.constant 0 : index
    %205 = vector.load %arg18[%c6_178, %c0_179] : memref<132x32xf32, #tpu.memory_space<vmem>>, vector<100x32xf32>
    %206 = arith.truncf %205 : vector<100x32xf32> to vector<100x32xbf16>
    %c19 = arith.constant 19 : index
    %c0_180 = arith.constant 0 : index
    %c0_181 = arith.constant 0 : index
    %207 = vector.load %arg4[%c19, %c0_180, %c0_181] : memref<36x32x32xbf16, #tpu.memory_space<vmem>>, vector<1x32x32xbf16>
    %208 = vector.shape_cast %207 : vector<1x32x32xbf16> to vector<32x32xbf16>
    %cst_182 = arith.constant dense<0.000000e+00> : vector<100x32xf32>
    %209 = tpu.matmul %206, %208, %cst_182 {dimension_numbers = #tpu.dot_dimension_numbers<[1], [0], [0], [1], [0, 0, 1, 1], [], []>} : vector<100x32xbf16>, vector<32x32xbf16>, vector<100x32xf32> -> vector<100x32xf32>
    %210 = arith.addf %204, %209 : vector<100x32xf32>
    %c7_183 = arith.constant 7 : index
    %c0_184 = arith.constant 0 : index
    %211 = vector.load %arg18[%c7_183, %c0_184] : memref<132x32xf32, #tpu.memory_space<vmem>>, vector<100x32xf32>
    %212 = arith.truncf %211 : vector<100x32xf32> to vector<100x32xbf16>
    %c20 = arith.constant 20 : index
    %c0_185 = arith.constant 0 : index
    %c0_186 = arith.constant 0 : index
    %213 = vector.load %arg4[%c20, %c0_185, %c0_186] : memref<36x32x32xbf16, #tpu.memory_space<vmem>>, vector<1x32x32xbf16>
    %214 = vector.shape_cast %213 : vector<1x32x32xbf16> to vector<32x32xbf16>
    %cst_187 = arith.constant dense<0.000000e+00> : vector<100x32xf32>
    %215 = tpu.matmul %212, %214, %cst_187 {dimension_numbers = #tpu.dot_dimension_numbers<[1], [0], [0], [1], [0, 0, 1, 1], [], []>} : vector<100x32xbf16>, vector<32x32xbf16>, vector<100x32xf32> -> vector<100x32xf32>
    %216 = arith.addf %210, %215 : vector<100x32xf32>
    %c15_188 = arith.constant 15 : index
    %c0_189 = arith.constant 0 : index
    %217 = vector.load %arg18[%c15_188, %c0_189] : memref<132x32xf32, #tpu.memory_space<vmem>>, vector<100x32xf32>
    %218 = arith.truncf %217 : vector<100x32xf32> to vector<100x32xbf16>
    %c21 = arith.constant 21 : index
    %c0_190 = arith.constant 0 : index
    %c0_191 = arith.constant 0 : index
    %219 = vector.load %arg4[%c21, %c0_190, %c0_191] : memref<36x32x32xbf16, #tpu.memory_space<vmem>>, vector<1x32x32xbf16>
    %220 = vector.shape_cast %219 : vector<1x32x32xbf16> to vector<32x32xbf16>
    %cst_192 = arith.constant dense<0.000000e+00> : vector<100x32xf32>
    %221 = tpu.matmul %218, %220, %cst_192 {dimension_numbers = #tpu.dot_dimension_numbers<[1], [0], [0], [1], [0, 0, 1, 1], [], []>} : vector<100x32xbf16>, vector<32x32xbf16>, vector<100x32xf32> -> vector<100x32xf32>
    %222 = arith.addf %216, %221 : vector<100x32xf32>
    %c16_193 = arith.constant 16 : index
    %c0_194 = arith.constant 0 : index
    %223 = vector.load %arg18[%c16_193, %c0_194] : memref<132x32xf32, #tpu.memory_space<vmem>>, vector<100x32xf32>
    %224 = arith.truncf %223 : vector<100x32xf32> to vector<100x32xbf16>
    %c22 = arith.constant 22 : index
    %c0_195 = arith.constant 0 : index
    %c0_196 = arith.constant 0 : index
    %225 = vector.load %arg4[%c22, %c0_195, %c0_196] : memref<36x32x32xbf16, #tpu.memory_space<vmem>>, vector<1x32x32xbf16>
    %226 = vector.shape_cast %225 : vector<1x32x32xbf16> to vector<32x32xbf16>
    %cst_197 = arith.constant dense<0.000000e+00> : vector<100x32xf32>
    %227 = tpu.matmul %224, %226, %cst_197 {dimension_numbers = #tpu.dot_dimension_numbers<[1], [0], [0], [1], [0, 0, 1, 1], [], []>} : vector<100x32xbf16>, vector<32x32xbf16>, vector<100x32xf32> -> vector<100x32xf32>
    %228 = arith.addf %222, %227 : vector<100x32xf32>
    %c17_198 = arith.constant 17 : index
    %c0_199 = arith.constant 0 : index
    %229 = vector.load %arg18[%c17_198, %c0_199] : memref<132x32xf32, #tpu.memory_space<vmem>>, vector<100x32xf32>
    %230 = arith.truncf %229 : vector<100x32xf32> to vector<100x32xbf16>
    %c23 = arith.constant 23 : index
    %c0_200 = arith.constant 0 : index
    %c0_201 = arith.constant 0 : index
    %231 = vector.load %arg4[%c23, %c0_200, %c0_201] : memref<36x32x32xbf16, #tpu.memory_space<vmem>>, vector<1x32x32xbf16>
    %232 = vector.shape_cast %231 : vector<1x32x32xbf16> to vector<32x32xbf16>
    %cst_202 = arith.constant dense<0.000000e+00> : vector<100x32xf32>
    %233 = tpu.matmul %230, %232, %cst_202 {dimension_numbers = #tpu.dot_dimension_numbers<[1], [0], [0], [1], [0, 0, 1, 1], [], []>} : vector<100x32xbf16>, vector<32x32xbf16>, vector<100x32xf32> -> vector<100x32xf32>
    %234 = arith.addf %228, %233 : vector<100x32xf32>
    %c25_203 = arith.constant 25 : index
    %c0_204 = arith.constant 0 : index
    %235 = vector.load %arg18[%c25_203, %c0_204] : memref<132x32xf32, #tpu.memory_space<vmem>>, vector<100x32xf32>
    %236 = arith.truncf %235 : vector<100x32xf32> to vector<100x32xbf16>
    %c24 = arith.constant 24 : index
    %c0_205 = arith.constant 0 : index
    %c0_206 = arith.constant 0 : index
    %237 = vector.load %arg4[%c24, %c0_205, %c0_206] : memref<36x32x32xbf16, #tpu.memory_space<vmem>>, vector<1x32x32xbf16>
    %238 = vector.shape_cast %237 : vector<1x32x32xbf16> to vector<32x32xbf16>
    %cst_207 = arith.constant dense<0.000000e+00> : vector<100x32xf32>
    %239 = tpu.matmul %236, %238, %cst_207 {dimension_numbers = #tpu.dot_dimension_numbers<[1], [0], [0], [1], [0, 0, 1, 1], [], []>} : vector<100x32xbf16>, vector<32x32xbf16>, vector<100x32xf32> -> vector<100x32xf32>
    %240 = arith.addf %234, %239 : vector<100x32xf32>
    %c26_208 = arith.constant 26 : index
    %c0_209 = arith.constant 0 : index
    %241 = vector.load %arg18[%c26_208, %c0_209] : memref<132x32xf32, #tpu.memory_space<vmem>>, vector<100x32xf32>
    %242 = arith.truncf %241 : vector<100x32xf32> to vector<100x32xbf16>
    %c25_210 = arith.constant 25 : index
    %c0_211 = arith.constant 0 : index
    %c0_212 = arith.constant 0 : index
    %243 = vector.load %arg4[%c25_210, %c0_211, %c0_212] : memref<36x32x32xbf16, #tpu.memory_space<vmem>>, vector<1x32x32xbf16>
    %244 = vector.shape_cast %243 : vector<1x32x32xbf16> to vector<32x32xbf16>
    %cst_213 = arith.constant dense<0.000000e+00> : vector<100x32xf32>
    %245 = tpu.matmul %242, %244, %cst_213 {dimension_numbers = #tpu.dot_dimension_numbers<[1], [0], [0], [1], [0, 0, 1, 1], [], []>} : vector<100x32xbf16>, vector<32x32xbf16>, vector<100x32xf32> -> vector<100x32xf32>
    %246 = arith.addf %240, %245 : vector<100x32xf32>
    %c27_214 = arith.constant 27 : index
    %c0_215 = arith.constant 0 : index
    %247 = vector.load %arg18[%c27_214, %c0_215] : memref<132x32xf32, #tpu.memory_space<vmem>>, vector<100x32xf32>
    %248 = arith.truncf %247 : vector<100x32xf32> to vector<100x32xbf16>
    %c26_216 = arith.constant 26 : index
    %c0_217 = arith.constant 0 : index
    %c0_218 = arith.constant 0 : index
    %249 = vector.load %arg4[%c26_216, %c0_217, %c0_218] : memref<36x32x32xbf16, #tpu.memory_space<vmem>>, vector<1x32x32xbf16>
    %250 = vector.shape_cast %249 : vector<1x32x32xbf16> to vector<32x32xbf16>
    %cst_219 = arith.constant dense<0.000000e+00> : vector<100x32xf32>
    %251 = tpu.matmul %248, %250, %cst_219 {dimension_numbers = #tpu.dot_dimension_numbers<[1], [0], [0], [1], [0, 0, 1, 1], [], []>} : vector<100x32xbf16>, vector<32x32xbf16>, vector<100x32xf32> -> vector<100x32xf32>
    %252 = arith.addf %246, %251 : vector<100x32xf32>
    %c2_220 = arith.constant 2 : index
    %c0_221 = arith.constant 0 : index
    %c0_222 = arith.constant 0 : index
    %253 = vector.load %arg5[%c2_220, %c0_221, %c0_222] : memref<4x1x32xf32, #tpu.memory_space<vmem>>, vector<1x1x32xf32>
    %254 = vector.shape_cast %253 : vector<1x1x32xf32> to vector<1x32xf32>
    %255 = vector.broadcast %254 : vector<1x32xf32> to vector<100x32xf32>
    %256 = arith.addf %252, %255 : vector<100x32xf32>
    %cst_223 = arith.constant 0.000000e+00 : f32
    %257 = vector.broadcast %cst_223 : f32 to vector<100x32xf32>
    %258 = arith.maximumf %256, %257 : vector<100x32xf32>
    %259 = vector.broadcast %0 : vector<100x1xf32> to vector<100x32xf32>
    %260 = arith.mulf %258, %259 : vector<100x32xf32>
    %c16_224 = arith.constant 16 : index
    %c0_225 = arith.constant 0 : index
    %261 = vector.load %arg18[%c16_224, %c0_225] : memref<132x32xf32, #tpu.memory_space<vmem>>, vector<100x32xf32>
    tpu.vector_store %arg18[%c16_224, %c0_225], %260 {strides = array<i32>} : memref<132x32xf32, #tpu.memory_space<vmem>>, vector<100x32xf32>,
    %c5_226 = arith.constant 5 : index
    %c0_227 = arith.constant 0 : index
    %262 = vector.load %arg18[%c5_226, %c0_227] : memref<132x32xf32, #tpu.memory_space<vmem>>, vector<100x32xf32>
    %263 = arith.truncf %262 : vector<100x32xf32> to vector<100x32xbf16>
    %c27_228 = arith.constant 27 : index
    %c0_229 = arith.constant 0 : index
    %c0_230 = arith.constant 0 : index
    %264 = vector.load %arg4[%c27_228, %c0_229, %c0_230] : memref<36x32x32xbf16, #tpu.memory_space<vmem>>, vector<1x32x32xbf16>
    %265 = vector.shape_cast %264 : vector<1x32x32xbf16> to vector<32x32xbf16>
    %cst_231 = arith.constant dense<0.000000e+00> : vector<100x32xf32>
    %266 = tpu.matmul %263, %265, %cst_231 {dimension_numbers = #tpu.dot_dimension_numbers<[1], [0], [0], [1], [0, 0, 1, 1], [], []>} : vector<100x32xbf16>, vector<32x32xbf16>, vector<100x32xf32> -> vector<100x32xf32>
    %c6_232 = arith.constant 6 : index
    %c0_233 = arith.constant 0 : index
    %267 = vector.load %arg18[%c6_232, %c0_233] : memref<132x32xf32, #tpu.memory_space<vmem>>, vector<100x32xf32>
    %268 = arith.truncf %267 : vector<100x32xf32> to vector<100x32xbf16>
    %c28 = arith.constant 28 : index
    %c0_234 = arith.constant 0 : index
    %c0_235 = arith.constant 0 : index
    %269 = vector.load %arg4[%c28, %c0_234, %c0_235] : memref<36x32x32xbf16, #tpu.memory_space<vmem>>, vector<1x32x32xbf16>
    %270 = vector.shape_cast %269 : vector<1x32x32xbf16> to vector<32x32xbf16>
    %cst_236 = arith.constant dense<0.000000e+00> : vector<100x32xf32>
    %271 = tpu.matmul %268, %270, %cst_236 {dimension_numbers = #tpu.dot_dimension_numbers<[1], [0], [0], [1], [0, 0, 1, 1], [], []>} : vector<100x32xbf16>, vector<32x32xbf16>, vector<100x32xf32> -> vector<100x32xf32>
    %272 = arith.addf %266, %271 : vector<100x32xf32>
    %c7_237 = arith.constant 7 : index
    %c0_238 = arith.constant 0 : index
    %273 = vector.load %arg18[%c7_237, %c0_238] : memref<132x32xf32, #tpu.memory_space<vmem>>, vector<100x32xf32>
    %274 = arith.truncf %273 : vector<100x32xf32> to vector<100x32xbf16>
    %c29 = arith.constant 29 : index
    %c0_239 = arith.constant 0 : index
    %c0_240 = arith.constant 0 : index
    %275 = vector.load %arg4[%c29, %c0_239, %c0_240] : memref<36x32x32xbf16, #tpu.memory_space<vmem>>, vector<1x32x32xbf16>
    %276 = vector.shape_cast %275 : vector<1x32x32xbf16> to vector<32x32xbf16>
    %cst_241 = arith.constant dense<0.000000e+00> : vector<100x32xf32>
    %277 = tpu.matmul %274, %276, %cst_241 {dimension_numbers = #tpu.dot_dimension_numbers<[1], [0], [0], [1], [0, 0, 1, 1], [], []>} : vector<100x32xbf16>, vector<32x32xbf16>, vector<100x32xf32> -> vector<100x32xf32>
    %278 = arith.addf %272, %277 : vector<100x32xf32>
    %c15_242 = arith.constant 15 : index
    %c0_243 = arith.constant 0 : index
    %279 = vector.load %arg18[%c15_242, %c0_243] : memref<132x32xf32, #tpu.memory_space<vmem>>, vector<100x32xf32>
    %280 = arith.truncf %279 : vector<100x32xf32> to vector<100x32xbf16>
    %c30 = arith.constant 30 : index
    %c0_244 = arith.constant 0 : index
    %c0_245 = arith.constant 0 : index
    %281 = vector.load %arg4[%c30, %c0_244, %c0_245] : memref<36x32x32xbf16, #tpu.memory_space<vmem>>, vector<1x32x32xbf16>
    %282 = vector.shape_cast %281 : vector<1x32x32xbf16> to vector<32x32xbf16>
    %cst_246 = arith.constant dense<0.000000e+00> : vector<100x32xf32>
    %283 = tpu.matmul %280, %282, %cst_246 {dimension_numbers = #tpu.dot_dimension_numbers<[1], [0], [0], [1], [0, 0, 1, 1], [], []>} : vector<100x32xbf16>, vector<32x32xbf16>, vector<100x32xf32> -> vector<100x32xf32>
    %284 = arith.addf %278, %283 : vector<100x32xf32>
    %c16_247 = arith.constant 16 : index
    %c0_248 = arith.constant 0 : index
    %285 = vector.load %arg18[%c16_247, %c0_248] : memref<132x32xf32, #tpu.memory_space<vmem>>, vector<100x32xf32>
    %286 = arith.truncf %285 : vector<100x32xf32> to vector<100x32xbf16>
    %c31 = arith.constant 31 : index
    %c0_249 = arith.constant 0 : index
    %c0_250 = arith.constant 0 : index
    %287 = vector.load %arg4[%c31, %c0_249, %c0_250] : memref<36x32x32xbf16, #tpu.memory_space<vmem>>, vector<1x32x32xbf16>
    %288 = vector.shape_cast %287 : vector<1x32x32xbf16> to vector<32x32xbf16>
    %cst_251 = arith.constant dense<0.000000e+00> : vector<100x32xf32>
    %289 = tpu.matmul %286, %288, %cst_251 {dimension_numbers = #tpu.dot_dimension_numbers<[1], [0], [0], [1], [0, 0, 1, 1], [], []>} : vector<100x32xbf16>, vector<32x32xbf16>, vector<100x32xf32> -> vector<100x32xf32>
    %290 = arith.addf %284, %289 : vector<100x32xf32>
    %c17_252 = arith.constant 17 : index
    %c0_253 = arith.constant 0 : index
    %291 = vector.load %arg18[%c17_252, %c0_253] : memref<132x32xf32, #tpu.memory_space<vmem>>, vector<100x32xf32>
    %292 = arith.truncf %291 : vector<100x32xf32> to vector<100x32xbf16>
    %c32 = arith.constant 32 : index
    %c0_254 = arith.constant 0 : index
    %c0_255 = arith.constant 0 : index
    %293 = vector.load %arg4[%c32, %c0_254, %c0_255] : memref<36x32x32xbf16, #tpu.memory_space<vmem>>, vector<1x32x32xbf16>
    %294 = vector.shape_cast %293 : vector<1x32x32xbf16> to vector<32x32xbf16>
    %cst_256 = arith.constant dense<0.000000e+00> : vector<100x32xf32>
    %295 = tpu.matmul %292, %294, %cst_256 {dimension_numbers = #tpu.dot_dimension_numbers<[1], [0], [0], [1], [0, 0, 1, 1], [], []>} : vector<100x32xbf16>, vector<32x32xbf16>, vector<100x32xf32> -> vector<100x32xf32>
    %296 = arith.addf %290, %295 : vector<100x32xf32>
    %c25_257 = arith.constant 25 : index
    %c0_258 = arith.constant 0 : index
    %297 = vector.load %arg18[%c25_257, %c0_258] : memref<132x32xf32, #tpu.memory_space<vmem>>, vector<100x32xf32>
    %298 = arith.truncf %297 : vector<100x32xf32> to vector<100x32xbf16>
    %c33 = arith.constant 33 : index
    %c0_259 = arith.constant 0 : index
    %c0_260 = arith.constant 0 : index
    %299 = vector.load %arg4[%c33, %c0_259, %c0_260] : memref<36x32x32xbf16, #tpu.memory_space<vmem>>, vector<1x32x32xbf16>
    %300 = vector.shape_cast %299 : vector<1x32x32xbf16> to vector<32x32xbf16>
    %cst_261 = arith.constant dense<0.000000e+00> : vector<100x32xf32>
    %301 = tpu.matmul %298, %300, %cst_261 {dimension_numbers = #tpu.dot_dimension_numbers<[1], [0], [0], [1], [0, 0, 1, 1], [], []>} : vector<100x32xbf16>, vector<32x32xbf16>, vector<100x32xf32> -> vector<100x32xf32>
    %302 = arith.addf %296, %301 : vector<100x32xf32>
    %c26_262 = arith.constant 26 : index
    %c0_263 = arith.constant 0 : index
    %303 = vector.load %arg18[%c26_262, %c0_263] : memref<132x32xf32, #tpu.memory_space<vmem>>, vector<100x32xf32>
    %304 = arith.truncf %303 : vector<100x32xf32> to vector<100x32xbf16>
    %c34 = arith.constant 34 : index
    %c0_264 = arith.constant 0 : index
    %c0_265 = arith.constant 0 : index
    %305 = vector.load %arg4[%c34, %c0_264, %c0_265] : memref<36x32x32xbf16, #tpu.memory_space<vmem>>, vector<1x32x32xbf16>
    %306 = vector.shape_cast %305 : vector<1x32x32xbf16> to vector<32x32xbf16>
    %cst_266 = arith.constant dense<0.000000e+00> : vector<100x32xf32>
    %307 = tpu.matmul %304, %306, %cst_266 {dimension_numbers = #tpu.dot_dimension_numbers<[1], [0], [0], [1], [0, 0, 1, 1], [], []>} : vector<100x32xbf16>, vector<32x32xbf16>, vector<100x32xf32> -> vector<100x32xf32>
    %308 = arith.addf %302, %307 : vector<100x32xf32>
    %c27_267 = arith.constant 27 : index
    %c0_268 = arith.constant 0 : index
    %309 = vector.load %arg18[%c27_267, %c0_268] : memref<132x32xf32, #tpu.memory_space<vmem>>, vector<100x32xf32>
    %310 = arith.truncf %309 : vector<100x32xf32> to vector<100x32xbf16>
    %c35 = arith.constant 35 : index
    %c0_269 = arith.constant 0 : index
    %c0_270 = arith.constant 0 : index
    %311 = vector.load %arg4[%c35, %c0_269, %c0_270] : memref<36x32x32xbf16, #tpu.memory_space<vmem>>, vector<1x32x32xbf16>
    %312 = vector.shape_cast %311 : vector<1x32x32xbf16> to vector<32x32xbf16>
    %cst_271 = arith.constant dense<0.000000e+00> : vector<100x32xf32>
    %313 = tpu.matmul %310, %312, %cst_271 {dimension_numbers = #tpu.dot_dimension_numbers<[1], [0], [0], [1], [0, 0, 1, 1], [], []>} : vector<100x32xbf16>, vector<32x32xbf16>, vector<100x32xf32> -> vector<100x32xf32>
    %314 = arith.addf %308, %313 : vector<100x32xf32>
    %c3_272 = arith.constant 3 : index
    %c0_273 = arith.constant 0 : index
    %c0_274 = arith.constant 0 : index
    %315 = vector.load %arg5[%c3_272, %c0_273, %c0_274] : memref<4x1x32xf32, #tpu.memory_space<vmem>>, vector<1x1x32xf32>
    %316 = vector.shape_cast %315 : vector<1x1x32xf32> to vector<1x32xf32>
    %317 = vector.broadcast %316 : vector<1x32xf32> to vector<100x32xf32>
    %318 = arith.addf %314, %317 : vector<100x32xf32>
    %319 = arith.addf %318, %198 : vector<100x32xf32>
    %cst_275 = arith.constant 0.000000e+00 : f32
    %320 = vector.broadcast %cst_275 : f32 to vector<100x32xf32>
    %321 = arith.maximumf %319, %320 : vector<100x32xf32>
    %322 = vector.broadcast %0 : vector<100x1xf32> to vector<100x32xf32>
    %323 = arith.mulf %321, %322 : vector<100x32xf32>
    %c16_276 = arith.constant 16 : index
    %c0_277 = arith.constant 0 : index
    %324 = vector.load %arg18[%c16_276, %c0_277] : memref<132x32xf32, #tpu.memory_space<vmem>>, vector<100x32xf32>
    tpu.vector_store %arg18[%c16_276, %c0_277], %323 {strides = array<i32>} : memref<132x32xf32, #tpu.memory_space<vmem>>, vector<100x32xf32>,
    %325 = arith.truncf %323 : vector<100x32xf32> to vector<100x32xbf16>
    %c0_278 = arith.constant 0 : index
    %c0_279 = arith.constant 0 : index
    %326 = vector.load %arg12[%c0_278, %c0_279] : memref<1x100xf32, #tpu.memory_space<vmem>>, vector<1x100xf32>
    %c0_280 = arith.constant 0 : index
    %c0_281 = arith.constant 0 : index
    %327 = vector.load %arg6[%c0_280, %c0_281] : memref<32x2xbf16, #tpu.memory_space<vmem>>, vector<32x2xbf16>
    %cst_282 = arith.constant dense<0.000000e+00> : vector<100x2xf32>
    %328 = tpu.matmul %325, %327, %cst_282 {dimension_numbers = #tpu.dot_dimension_numbers<[1], [0], [0], [1], [0, 0, 1, 1], [], []>} : vector<100x32xbf16>, vector<32x2xbf16>, vector<100x2xf32> -> vector<100x2xf32>
    %c0_283 = arith.constant 0 : index
    %c0_284 = arith.constant 0 : index
    %329 = vector.load %arg7[%c0_283, %c0_284] : memref<1x2xf32, #tpu.memory_space<vmem>>, vector<1x2xf32>
    %330 = vector.broadcast %329 : vector<1x2xf32> to vector<100x2xf32>
    %331 = arith.addf %328, %330 : vector<100x2xf32>
    %cst_285 = arith.constant 0.000000e+00 : f32
    %332 = vector.broadcast %cst_285 : f32 to vector<100x2xf32>
    %333 = arith.maximumf %331, %332 : vector<100x2xf32>
    %334 = vector.extract_strided_slice %333 {offsets = [0, 0], sizes = [100, 1], strides = [1, 1]} : vector<100x2xf32> to vector<100x1xf32>
    %c0_286 = arith.constant 0 : index
    %c0_287 = arith.constant 0 : index
    %c0_288 = arith.constant 0 : index
    %335 = vector.load %arg10[%c0_286, %c0_287, %c0_288] : memref<2x100x64xf32, #tpu.memory_space<vmem>>, vector<1x100x64xf32>
    %336 = vector.shape_cast %335 : vector<1x100x64xf32> to vector<100x64xf32>
    %337 = vector.broadcast %334 : vector<100x1xf32> to vector<100x64xf32>
    %338 = arith.mulf %337, %336 : vector<100x64xf32>
    %339 = vector.extract_strided_slice %333 {offsets = [0, 1], sizes = [100, 1], strides = [1, 1]} : vector<100x2xf32> to vector<100x1xf32>
    %c1_289 = arith.constant 1 : index
    %c0_290 = arith.constant 0 : index
    %c0_291 = arith.constant 0 : index
    %340 = vector.load %arg10[%c1_289, %c0_290, %c0_291] : memref<2x100x64xf32, #tpu.memory_space<vmem>>, vector<1x100x64xf32>
    %341 = vector.shape_cast %340 : vector<1x100x64xf32> to vector<100x64xf32>
    %342 = vector.broadcast %339 : vector<100x1xf32> to vector<100x64xf32>
    %343 = arith.mulf %342, %341 : vector<100x64xf32>
    %344 = arith.addf %338, %343 : vector<100x64xf32>
    %cst_292 = arith.constant dense<0.000000e+00> : vector<1x64xf32>
    %345 = tpu.matmul %326, %344, %cst_292 {dimension_numbers = #tpu.dot_dimension_numbers<[1], [0], [0], [1], [0, 0, 1, 1], [], []>} : vector<1x100xf32>, vector<100x64xf32>, vector<1x64xf32> -> vector<1x64xf32>
    %c0_293 = arith.constant 0 : index
    %c0_294 = arith.constant 0 : index
    %346 = vector.load %arg13[%c0_293, %c0_294] : memref<1x64xf32, #tpu.memory_space<vmem>>, vector<1x64xf32>
    %347 = arith.addf %345, %346 : vector<1x64xf32>
    %c0_295 = arith.constant 0 : index
    %c0_296 = arith.constant 0 : index
    %c0_297 = arith.constant 0 : index
    %348 = vector.load %arg16[%c0_295, %c0_296, %c0_297] : memref<1x1x64xf32, #tpu.memory_space<vmem>>, vector<1x1x64xf32>
    %349 = vector.shape_cast %348 : vector<1x1x64xf32> to vector<1x64xf32>
    %350 = vector.shape_cast %347 : vector<1x64xf32> to vector<1x1x64xf32>
    tpu.vector_store %arg16[%c0_295, %c0_296, %c0_297], %350 {strides = array<i32>} : memref<1x1x64xf32, #tpu.memory_space<vmem>>, vector<1x1x64xf32>,
    %c0_298 = arith.constant 0 : index
    %c0_299 = arith.constant 0 : index
    %351 = vector.load %arg8[%c0_298, %c0_299] : memref<32x1xbf16, #tpu.memory_space<vmem>>, vector<32x1xbf16>
    %cst_300 = arith.constant dense<0.000000e+00> : vector<100x1xf32>
    %352 = tpu.matmul %325, %351, %cst_300 {dimension_numbers = #tpu.dot_dimension_numbers<[1], [0], [0], [1], [0, 0, 1, 1], [], []>} : vector<100x32xbf16>, vector<32x1xbf16>, vector<100x1xf32> -> vector<100x1xf32>
    %c0_301 = arith.constant 0 : index
    %c0_302 = arith.constant 0 : index
    %353 = vector.load %arg9[%c0_301, %c0_302] : memref<1x1xf32, #tpu.memory_space<vmem>>, vector<1x1xf32>
    %354 = vector.broadcast %353 : vector<1x1xf32> to vector<100x1xf32>
    %355 = arith.addf %352, %354 : vector<100x1xf32>
    %cst_303 = arith.constant 0.000000e+00 : f32
    %356 = vector.broadcast %cst_303 : f32 to vector<100x1xf32>
    %357 = arith.maximumf %355, %356 : vector<100x1xf32>
    %c0_304 = arith.constant 0 : index
    %c0_305 = arith.constant 0 : index
    %358 = vector.load %arg11[%c0_304, %c0_305] : memref<100x1xf32, #tpu.memory_space<vmem>>, vector<100x1xf32>
    %359 = arith.mulf %357, %358 : vector<100x1xf32>
    %cst_306 = arith.constant dense<0.000000e+00> : vector<1x1xf32>
    %360 = tpu.matmul %326, %359, %cst_306 {dimension_numbers = #tpu.dot_dimension_numbers<[1], [0], [0], [1], [0, 0, 1, 1], [], []>} : vector<1x100xf32>, vector<100x1xf32>, vector<1x1xf32> -> vector<1x1xf32>
    %c0_307 = arith.constant 0 : index
    %c0_308 = arith.constant 0 : index
    %361 = vector.load %arg14[%c0_307, %c0_308] : memref<1x1xf32, #tpu.memory_space<vmem>>, vector<1x1xf32>
    %362 = arith.addf %360, %361 : vector<1x1xf32>
    %363 = math.tanh %362 : vector<1x1xf32>
    %c0_309 = arith.constant 0 : index
    %c0_310 = arith.constant 0 : index
    %c0_311 = arith.constant 0 : index
    %364 = vector.load %arg17[%c0_309, %c0_310, %c0_311] : memref<1x1x1xf32, #tpu.memory_space<vmem>>, vector<1x1x1xf32>
    %365 = vector.shape_cast %364 : vector<1x1x1xf32> to vector<1x1xf32>
    %366 = vector.shape_cast %363 : vector<1x1xf32> to vector<1x1x1xf32>
    tpu.vector_store %arg17[%c0_309, %c0_310, %c0_311], %366 {strides = array<i32>} : memref<1x1x1xf32, #tpu.memory_space<vmem>>, vector<1x1x1xf32>,
    return
  }
  func.func @transform_0(%arg0: i32) -> (i32, i32, i32) {
    %c0_i32 = arith.constant 0 : i32
    %c0_i32_0 = arith.constant 0 : i32
    %c0_i32_1 = arith.constant 0 : i32
    return %arg0, %c0_i32, %c0_i32_0 : i32, i32, i32
  }
  func.func @transform_1(%arg0: i32) -> (i32, i32, i32) {
    %c0_i32 = arith.constant 0 : i32
    %c0_i32_0 = arith.constant 0 : i32
    %c0_i32_1 = arith.constant 0 : i32
    %c0_i32_2 = arith.constant 0 : i32
    return %c0_i32, %c0_i32_0, %c0_i32_1 : i32, i32, i32
  }
  func.func @transform_2(%arg0: i32) -> (i32, i32) {
    %c0_i32 = arith.constant 0 : i32
    %c0_i32_0 = arith.constant 0 : i32
    %c0_i32_1 = arith.constant 0 : i32
    return %c0_i32, %c0_i32_0 : i32, i32
  }
  func.func @transform_3(%arg0: i32) -> (i32, i32, i32) {
    %c0_i32 = arith.constant 0 : i32
    %c0_i32_0 = arith.constant 0 : i32
    %c0_i32_1 = arith.constant 0 : i32
    %c0_i32_2 = arith.constant 0 : i32
    return %c0_i32, %c0_i32_0, %c0_i32_1 : i32, i32, i32
  }
  func.func @transform_4(%arg0: i32) -> (i32, i32, i32) {
    %c0_i32 = arith.constant 0 : i32
    %c0_i32_0 = arith.constant 0 : i32
    %c0_i32_1 = arith.constant 0 : i32
    %c0_i32_2 = arith.constant 0 : i32
    return %c0_i32, %c0_i32_0, %c0_i32_1 : i32, i32, i32
  }
  func.func @transform_5(%arg0: i32) -> (i32, i32) {
    %c0_i32 = arith.constant 0 : i32
    %c0_i32_0 = arith.constant 0 : i32
    %c0_i32_1 = arith.constant 0 : i32
    return %c0_i32, %c0_i32_0 : i32, i32
  }
  func.func @transform_6(%arg0: i32) -> (i32, i32) {
    %c0_i32 = arith.constant 0 : i32
    %c0_i32_0 = arith.constant 0 : i32
    %c0_i32_1 = arith.constant 0 : i32
    return %c0_i32, %c0_i32_0 : i32, i32
  }
  func.func @transform_7(%arg0: i32) -> (i32, i32) {
    %c0_i32 = arith.constant 0 : i32
    %c0_i32_0 = arith.constant 0 : i32
    %c0_i32_1 = arith.constant 0 : i32
    return %c0_i32, %c0_i32_0 : i32, i32
  }
  func.func @transform_8(%arg0: i32) -> (i32, i32) {
    %c0_i32 = arith.constant 0 : i32
    %c0_i32_0 = arith.constant 0 : i32
    %c0_i32_1 = arith.constant 0 : i32
    return %c0_i32, %c0_i32_0 : i32, i32
  }
  func.func @transform_9(%arg0: i32) -> (i32, i32, i32) {
    %c0_i32 = arith.constant 0 : i32
    %c0_i32_0 = arith.constant 0 : i32
    %c0_i32_1 = arith.constant 0 : i32
    %c0_i32_2 = arith.constant 0 : i32
    return %c0_i32, %c0_i32_0, %c0_i32_1 : i32, i32, i32
  }
  func.func @transform_10(%arg0: i32) -> (i32, i32) {
    %c0_i32 = arith.constant 0 : i32
    %c0_i32_0 = arith.constant 0 : i32
    %c0_i32_1 = arith.constant 0 : i32
    return %c0_i32, %c0_i32_0 : i32, i32
  }
  func.func @transform_11(%arg0: i32) -> (i32, i32) {
    %c0_i32 = arith.constant 0 : i32
    %c0_i32_0 = arith.constant 0 : i32
    %c0_i32_1 = arith.constant 0 : i32
    return %c0_i32, %c0_i32_0 : i32, i32
  }
  func.func @transform_12(%arg0: i32) -> (i32, i32) {
    %c0_i32 = arith.constant 0 : i32
    %c0_i32_0 = arith.constant 0 : i32
    %c0_i32_1 = arith.constant 0 : i32
    return %c0_i32, %c0_i32_0 : i32, i32
  }
  func.func @transform_13(%arg0: i32) -> (i32, i32) {
    %c0_i32 = arith.constant 0 : i32
    %c0_i32_0 = arith.constant 0 : i32
    %c0_i32_1 = arith.constant 0 : i32
    return %c0_i32, %c0_i32_0 : i32, i32
  }
  func.func @transform_14(%arg0: i32) -> (i32, i32) {
    %c0_i32 = arith.constant 0 : i32
    %c0_i32_0 = arith.constant 0 : i32
    %c0_i32_1 = arith.constant 0 : i32
    return %c0_i32, %c0_i32_0 : i32, i32
  }
  func.func @transform_15(%arg0: i32) -> (i32, i32, i32) {
    %c0_i32 = arith.constant 0 : i32
    %c0_i32_0 = arith.constant 0 : i32
    %c0_i32_1 = arith.constant 0 : i32
    return %arg0, %c0_i32, %c0_i32_0 : i32, i32, i32
  }
  func.func @transform_16(%arg0: i32) -> (i32, i32, i32) {
    %c0_i32 = arith.constant 0 : i32
    %c0_i32_0 = arith.constant 0 : i32
    %c0_i32_1 = arith.constant 0 : i32
    return %arg0, %c0_i32, %c0_i32_0 : i32, i32, i32
  }
}

</mosaic_0001>

<bundles_post_ra>
// kernel: hexnet_forward.1
= control target key start
LH: loop header
LB: loop body
LE: loop exit
PB: predicated region body
PF: predicated region fallthrough
CT: control target
= control target key end

     0   :  { %s14660_s0 = inlined_call_operand.vmem [shape: f32[2,132,4], index: 0, kind: input, shape index: {}]   ;;  %s14661_s1 = inlined_call_operand.vmem [shape: bf16[9,4,32], index: 1, kind: input, shape index: {}]   ;;  %s14662_s2 = inlined_call_operand.vmem [shape: f32[1,32], index: 2, kind: input, shape index: {}]   ;;  %s14663_s3 = inlined_call_operand.vmem [shape: bf16[36,32,32], index: 3, kind: input, shape index: {}]   ;;  %s14664_s4 = inlined_call_operand.vmem [shape: f32[4,1,32], index: 4, kind: input, shape index: {}]   ;;  %s14665_s5 = inlined_call_operand.vmem [shape: bf16[32,2], index: 5, kind: input, shape index: {}]   ;;  %s14666_s6 = inlined_call_operand.vmem [shape: f32[1,2], index: 6, kind: input, shape index: {}]   ;;  %s14667_s7 = inlined_call_operand.vmem [shape: bf16[32,1], index: 7, kind: input, shape index: {}]   ;;  %s14668_s8 = inlined_call_operand.<no memory space> [shape: f32[1,1], index: 8, kind: input, shape index: {}]   ;;  %s14669_s9 = inlined_call_operand.vmem [shape: f32[2,100,64], index: 9, kind: input, shape index: {}]   ;;  %s14670_s10 = inlined_call_operand.vmem [shape: f32[100,1], index: 10, kind: input, shape index: {}]   ;;  %s14671_s11 = inlined_call_operand.vmem [shape: f32[1,100], index: 11, kind: input, shape index: {}]   ;;  %s14672_s12 = inlined_call_operand.vmem [shape: f32[1,64], index: 12, kind: input, shape index: {}]   ;;  %s14673_s14 = inlined_call_operand.vmem [shape: f32[100,1], index: 14, kind: input, shape index: {}]   ;;  %s14674_s15 = inlined_call_operand.hbm [shape: f32[2,1,64], index: 15, kind: output, shape index: {0}]   ;;  %s14675_s16 = inlined_call_operand.vmem [shape: f32[2,1,1], index: 16, kind: output, shape index: {1}]   ;;  %s14676_s13 = inlined_call_operand.<no memory space> [shape: f32[1,1], index: 13, kind: input, shape index: {}]  }
   0x1   :  { %14677 = sst [smem:[#allocation9_spill]] %s14660_s0  ;;  %v22_v0 = vstv %s14668_s8  ;;  %v24_v1 = vstv %s14676_s13 }
   0x2   :  { %14678 = sst [smem:[#allocation10_spill]] %s14661_s1  ;;  %23 = vst [vmem:[#allocation3] sm:$0x1] %v22_v0  ;;  %25 = vst [vmem:[#allocation4] sm:$0x1] %v24_v1 }
   0x3   :  { %14679 = sst [smem:[#allocation11_spill]] %s14662_s2 }
   0x4   :  { %14680 = sst [smem:[#allocation12_spill]] %s14663_s3 }
   0x5   :  { %26 = vsyncpa [#allocation6], 0 }
   0x6   :  { %28 = vsyncpa [#allocation6 + $0x1], 0  ;;  %s11507_s25 = smov 0   ;;  %s11509_s26 = smov 0  }
   0x7   :  { %s11511_s27 = smov 0   ;;  %s11513_s28 = smov 0  }
   0x8 LB: > { %s11528_s8 = sadd.s32 4294967295, %s11408_s28   ;;  %s8595_s13 = sadd.s32 4294967294, %s11408_s28   ;;  %s11408_s28 = sphi %s11513_s28, %s14692_s28   ;;  %s11404_s27 = sphi %s11511_s27, %s14691_s27   ;;  %s11400_s26 = sphi %s11509_s26, %s14690_s26   ;;  %s11396_s25 = sphi %s11507_s25, %s14689_s25  }
   0x9   : > { %s11532_s29 = sadd.s32 1, %s11408_s28   ;;  %s361_s30 = sadd.s32 1, %s11404_s27 }
   0xa   : > { %s358_s0 = ssub.s32 %s11408_s28, %s11532_s29  ;;  %p371_p0 = scmp.ne.s32.totalorder %s11404_s27, %s11400_s26 }
   0xb   : > { %p359_p1 = scmp.eq.s32.totalorder %s358_s0, 0  ;;  %p372_p2 = scmp.eq.s32.totalorder %s11528_s8, 1 }
   0xc   : > { %p377_p3 = scmp.ne.s32.totalorder %s11400_s26, %s11396_s25  ;;  %p378_p4 = scmp.eq.s32.totalorder %s8595_s13, 1 }
   0xd   : > { %s11543_s17 = scalar_select %p359_p1, %s11404_s27, %s361_s30  }
   0xe   : > { %p11545_p5 = por %p372_p2, %p371_p0  ;;  %p11549_p6 = por %p378_p4, %p377_p3 }
   0xf   : > { %14681 = sst [smem:[#allocation8_spill]] %s11543_s17  ;;  %p8598_p7 = scmp.ge.s32.totalorder %s11408_s28, 1 }
  0x10   : > { %p472_p8 = scmp.lt.s32.totalorder %s11408_s28, 3 }
  0x12   : > { %p473_p9 = pnand %p8598_p7, %p472_p8 }
  0x13   : > { %s14684_s1 = sld [smem:[#allocation10_spill]] (!%p473_p9)  ;;  %vm616_vm0 = vcmask (!%p473_p9), 1041408   ;;  %p524_p10 = scmp.lt.s32.totalorder (!%p473_p9), %s11528_s8, 1  ;;  %v11410_v3 = vmov (!%p473_p9), 0.0   ;;  %vm11411_vm1 = vmmov (!%p473_p9), 0   ;;  %vm594_vm2 = vcmask (!%p473_p9), 31744  }
  0x14   : > { %476 = sbr.rel (%p473_p9) target bundleno = 2981 (0xba5), region = 80  ;;  %9625 = vmatprep.subr.bf16.mxu0 (!%p473_p9), %v11410_v3  ;;  %9627 = vmatprep.mubr.msk.bf16.mxu0 (!%p473_p9), %vm11411_vm1, %v11410_v3  ;;  %s14685_s20 = sld [smem:[#allocation9_spill]] (!%p473_p9)  ;;  %vm546_vm3 = vcmask (!%p473_p9), 261120   ;;  %vm1972_vm4 = vcmask (!%p473_p9), 257024   ;;  %vm8199_vm5 = vcmask (!%p473_p9), 1043456   ;;  %vm8195_vm6 = vcmask (!%p473_p9), 818176  }
  0x15   : > { %11205 = vmatprep.subr.bf16.mxu1 (!%p473_p9), %v11410_v3  ;;  %9661 = vmatprep.mubr.msk.bf16.mxu1 (!%p473_p9), %vm11411_vm1, %v11410_v3  ;;  %s14686_s3 = sld [smem:[#allocation12_spill]] (!%p473_p9)  ;;  %547 = vst.msk [vmem:[#allocation2] sm:$0xff] (!%p473_p9), %vm546_vm3, %v11410_v3  ;;  %548 = vst.msk [vmem:[#allocation2 + $0x8] sm:$0xff] (!%p473_p9), %vm546_vm3, %v11410_v3  ;;  %s14687_s2 = sld [smem:[#allocation11_spill]] (!%p473_p9)  ;;  %vm8273_vm7 = vcmask (!%p473_p9), 516096  }
  0x16   : > { %549 = vst.msk [vmem:[#allocation2 + $0x74] sm:$0xff] (!%p473_p9), %vm546_vm3, %v11410_v3  ;;  %550 = vst.msk [vmem:[#allocation2 + $0x7c] sm:$0xff] (!%p473_p9), %vm546_vm3, %v11410_v3  ;;  %s517_s0 = sand.u32 (!%p473_p9), 1, %s11400_s26   ;;  %s9180_s23 = sshll.u32 (!%p473_p9), %s11528_s8, 4 }
  0x19   : > { %v8600_v2 = vld [vmem:[%s14684_s1 + $0x2] sm:$0x3] (!%p473_p9)  ;;  %v571_v5 = vld [vmem:[%s14684_s1] sm:$0x3] (!%p473_p9)  ;;  %v8623_v9 = vld [vmem:[%s14684_s1 + $0x6] sm:$0x3] (!%p473_p9) }
  0x1a   : > { %v618_v4 = vsel (!%p473_p9), %vm616_vm0, %v8600_v2, 0  ;;  %v730_v6 = vsel (!%p473_p9), %vm616_vm0, %v571_v5, 0  ;;  %v1011_v14 = vsel (!%p473_p9), %vm616_vm0, %v8623_v9, 0  ;;  %v8615_v45 = vld [vmem:[%s14684_s1 + $0x4] sm:$0x3] (!%p473_p9) }
  0x1b   : > { %9626 = vmatpush3.bf16.msra.mxu0 %v618_v4  ;;  %s11567_s24 = scalar_select %p524_p10, %s11528_s8, 1  ;;  %11206 = vmatpush3.bf16.msra.mxu1 %v730_v6  ;;  %v8639_v48 = vld [vmem:[%s14684_s1 + $0xa] sm:$0x3]  ;;  %v864_v53 = vsel %vm616_vm0, %v8615_v45, 0  ;;  %v8631_v58 = vld [vmem:[%s14684_s1 + $0x8] sm:$0x3] }
  0x1c   : > { %9655 = vmatprep.subr.bf16.mxu0 %v11410_v3  ;;  %9715 = vmatprep.subr.bf16.mxu1 %v11410_v3  ;;  %v1305_v54 = vsel %vm616_vm0, %v8639_v48, 0  ;;  %v1158_v61 = vsel %vm616_vm0, %v8631_v58, 0  ;;  %s11415_s8 = smov [#allocation5]  }
  0x1d   : > { %s11207_s13 = smul.u32 136, %s11567_s24 }
  0x1f   : > { %s11579_s21 = scalar_lea.vmem %s14685_s20, %s11207_s13  ;;  %s518_s13 = scalar_lea.vmem [#allocation5], %s517_s0 }
  0x20   : > { %v572_v7 = vld [vmem:[%s11579_s21 + $0x6] sm:$0xff]  ;;  %v573_v8 = vld [vmem:[%s11579_s21 + $0xe] sm:$0xff]  ;;  %v554_v12 = vld [vmem:[%s11579_s21 + $0x1d] sm:$0xff]  ;;  %s8503_s20 = scalar_lea.sflag [#allocation6], %s517_s0 }
  0x21   : > { %v585_v10 = vpack.c.bf16 %v573_v8, %v572_v7  ;;  %v553_v11 = vld [vmem:[%s11579_s21 + $0x15] sm:$0xff]  ;;  %v575_v16 = vld [vmem:[%s11579_s21 + $0x1e] sm:$0xff]  ;;  %v556_v18 = vld [vmem:[%s11579_s21 + $0x2d] sm:$0xff] }
  0x22   : > { %v565_v13 = vpack.c.bf16 %v554_v12, %v553_v11  ;;  %v574_v15 = vld [vmem:[%s11579_s21 + $0x16] sm:$0xff]  ;;  %v555_v17 = vld [vmem:[%s11579_s21 + $0x25] sm:$0xff]  ;;  %v577_v22 = vld [vmem:[%s11579_s21 + $0x2e] sm:$0xff] }
  0x23   : > { %9628 = vmatmul.mubr.msk.bf16.vlgmr.msra.gmra.mrb[0].mxu0 %vm594_vm2, %v585_v10  ;;  %v586_v19 = vpack.c.bf16 %v575_v16, %v574_v15  ;;  %v566_v20 = vpack.c.bf16 %v556_v18, %v555_v17  ;;  %v576_v21 = vld [vmem:[%s11579_s21 + $0x26] sm:$0xff]  ;;  %v557_v23 = vld [vmem:[%s11579_s21 + $0x35] sm:$0xff]  ;;  %v558_v24 = vld [vmem:[%s11579_s21 + $0x3d] sm:$0xff] }
  0x24   : > { %9631 = vmatprep.mubr.msk.bf16.mxu0 %vm11411_vm1, %v11410_v3  ;;  %9662 = vmatmul.mubr.msk.bf16.vlgmr.msra.gmra.mrb[0].mxu1 %vm594_vm2, %v565_v13  ;;  %v587_v25 = vpack.c.bf16 %v577_v22, %v576_v21  ;;  %v567_v26 = vpack.c.bf16 %v558_v24, %v557_v23  ;;  %v578_v27 = vld [vmem:[%s11579_s21 + $0x36] sm:$0xff]  ;;  %v579_v28 = vld [vmem:[%s11579_s21 + $0x3e] sm:$0xff]  ;;  %v560_v30 = vld [vmem:[%s11579_s21 + $0x4d] sm:$0xff] }
  0x25   : > { %9656 = vmatpush3.bf16.msra.mxu0 %v730_v6  ;;  %9665 = vmatprep.mubr.msk.bf16.mxu1 %vm11411_vm1, %v11410_v3  ;;  %v559_v29 = vld [vmem:[%s11579_s21 + $0x45] sm:$0xff]  ;;  %v588_v31 = vpack.c.bf16 %v579_v28, %v578_v27  ;;  %v581_v34 = vld [vmem:[%s11579_s21 + $0x4e] sm:$0xff]  ;;  %v562_v36 = vld [vmem:[%s11579_s21 + $0x5d] sm:$0xff] }
  0x26   : > { %9685 = vmatprep.subr.bf16.mxu0 %v11410_v3  ;;  %9716 = vmatpush3.bf16.msra.mxu1 %v1011_v14  ;;  %v568_v32 = vpack.c.bf16 %v560_v30, %v559_v29  ;;  %v580_v33 = vld [vmem:[%s11579_s21 + $0x46] sm:$0xff]  ;;  %v561_v35 = vld [vmem:[%s11579_s21 + $0x55] sm:$0xff]  ;;  %v583_v40 = vld [vmem:[%s11579_s21 + $0x5e] sm:$0xff] }
  0x27   : > { %9775 = vmatprep.subr.bf16.mxu1 %v11410_v3  ;;  %v589_v37 = vpack.c.bf16 %v581_v34, %v580_v33  ;;  %v569_v38 = vpack.c.bf16 %v562_v36, %v561_v35  ;;  %v582_v39 = vld [vmem:[%s11579_s21 + $0x56] sm:$0xff]  ;;  %v563_v41 = vld [vmem:[%s11579_s21 + $0x65] sm:$0xf]  ;;  %v552_v52 = vld [vmem:[%s11579_s21 + $0xd] sm:$0xff] }
  0x28   : > { %v590_v42 = vpack.c.bf16 %v583_v40, %v582_v39  ;;  %v570_v43 = vpack.c.bf16 %v563_v41, %v563_v41  ;;  %v584_v44 = vld [vmem:[%s11579_s21 + $0x66] sm:$0xf]  ;;  %v821_v46 = vld [vmem:[%s11579_s21 + $0xf] sm:$0xff]  ;;  %v968_v47 = vld [vmem:[%s11579_s21 + $0x17] sm:$0xff] }
  0x29   : > { %v591_v49 = vpack.c.bf16 %v584_v44, %v584_v44  ;;  %v980_v50 = vpack.c.bf16 %v968_v47, %v821_v46  ;;  %v551_v51 = vld [vmem:[%s11579_s21 + $0x5] sm:$0xff]  ;;  %v972_v62 = vld [vmem:[%s11579_s21 + $0x37] sm:$0xff]  ;;  %v825_v63 = vld [vmem:[%s11579_s21 + $0x2f] sm:$0xff] }
  0x2a   : > { %v970_v55 = vld [vmem:[%s11579_s21 + $0x27] sm:$0xff]  ;;  %v823_v56 = vld [vmem:[%s11579_s21 + $0x1f] sm:$0xff]  ;;  %v564_v57 = vpack.c.bf16 %v552_v52, %v551_v51  ;;  %v982_v1 = vpack.c.bf16 %v972_v62, %v825_v63  ;;  %v976_v7 = vld [vmem:[%s11579_s21 + $0x57] sm:$0xff] }
  0x2b   : > { %9632 = vmatmul.mubr.msk.bf16.gmra.mrb[4].mxu0 %vm594_vm2, %v586_v19  ;;  %v981_v59 = vpack.c.bf16 %v970_v55, %v823_v56  ;;  %v820_v60 = vld [vmem:[%s11579_s21 + $0x7] sm:$0xff]  ;;  %v827_v4 = vld [vmem:[%s11579_s21 + $0x3f] sm:$0xff]  ;;  %v834_v5 = vpack.c.bf16 %v823_v56, %v968_v47  ;;  %v835_v8 = vpack.c.bf16 %v825_v63, %v970_v55  ;;  %v829_v9 = vld [vmem:[%s11579_s21 + $0x4f] sm:$0xff] }
  0x2c   : > { %9635 = vmatprep.mubr.msk.bf16.mxu0 %vm11411_vm1, %v11410_v3  ;;  %9666 = vmatmul.mubr.msk.bf16.gmra.mrb[4].mxu1 %vm594_vm2, %v566_v20  ;;  %v833_v0 = vpack.c.bf16 %v821_v46, %v820_v60  ;;  %v974_v2 = vld [vmem:[%s11579_s21 + $0x47] sm:$0xff]  ;;  %v984_v10 = vpack.c.bf16 %v976_v7, %v829_v9  ;;  %v836_v12 = vpack.c.bf16 %v827_v4, %v972_v62  ;;  %v831_v13 = vld [vmem:[%s11579_s21 + $0x5f] sm:$0xff]  ;;  %v979_v15 = vld [vmem:[%s11579_s21 + $0x6f] sm:$0xf] }
  0x2d   : > { %9669 = vmatprep.mubr.msk.bf16.mxu1 %vm11411_vm1, %v11410_v3  ;;  %v983_v6 = vpack.c.bf16 %v974_v2, %v827_v4  ;;  %v978_v11 = vld [vmem:[%s11579_s21 + $0x67] sm:$0xff]  ;;  %v837_v16 = vpack.c.bf16 %v829_v9, %v974_v2  ;;  %v986_v17 = vpack.c.bf16 %v979_v15, %v979_v15  ;;  %v1261_v18 = vld [vmem:[%s11579_s21 + $0x11] sm:$0xff]  ;;  %v11722_v19 = vld [vmem:[%s11579_s21 + $0x19] sm:$0xff]  ;;  %v838_v20 = vpack.c.bf16 %v831_v13, %v976_v7 }
  0x2e   : > { %v985_v14 = vpack.c.bf16 %v978_v11, %v831_v13  ;;  %v8655_v21 = vld [vmem:[%s14684_s1 + $0xe] sm:$0x3]  ;;  %v1274_v22 = vpack.c.bf16 %v11722_v19, %v1261_v18  ;;  %v832_v24 = vld [vmem:[%s11579_s21 + $0x67] sm:$0xf]  ;;  %v1114_v29 = vld [vmem:[%s11579_s21 + $0x10] sm:$0xff]  ;;  %v11412_v9 = vmov 0  }
  0x2f   : > { %v1599_v23 = vsel %vm616_vm0, %v8655_v21, 0  ;;  %v839_v27 = vpack.c.bf16 %v832_v24, %v832_v24  ;;  %v1115_v30 = vld [vmem:[%s11579_s21 + $0x18] sm:$0xff]  ;;  %v11775_v39 = vld [vmem:[%s11579_s21 + $0x41] sm:$0xff]  ;;  %v11778_v40 = vld [vmem:[%s11579_s21 + $0x49] sm:$0xff]  ;;  %11252 = vset.pattern.permute.xlu0 %v11412_v9  ;;  %11253 = vset.pattern.permute.xlu1 %v11412_v9 }
  0x30   : > { %v11760_v33 = vld [vmem:[%s11579_s21 + $0x39] sm:$0xff]  ;;  %v1127_v34 = vpack.c.bf16 %v1115_v30, %v1114_v29  ;;  %v11791_v45 = vld [vmem:[%s11579_s21 + $0x51] sm:$0xff]  ;;  %v11807_v51 = vld [vmem:[%s11579_s21 + $0x61] sm:$0xff] }
  0x31   : > { %v1119_v44 = vld [vmem:[%s11579_s21 + $0x38] sm:$0xff]  ;;  %v11810_v52 = vld [vmem:[%s11579_s21 + $0x69] sm:$0xff]  ;;  %v1124_v60 = vld [vmem:[%s11579_s21 + $0x60] sm:$0xff] }
  0x32   : > { %v11794_v46 = vld [vmem:[%s11579_s21 + $0x59] sm:$0xff]  ;;  %v1122_v55 = vld [vmem:[%s11579_s21 + $0x50] sm:$0xff]  ;;  %v1556_v63 = vld [vmem:[%s11579_s21 + $0x22] sm:$0xff] }
  0x33   : > { %9636 = vmatmul.mubr.msk.bf16.gmra.mrb[8].mxu0 %vm594_vm2, %v587_v25  ;;  %v11737_v25 = vld [vmem:[%s11579_s21 + $0x21] sm:$0xff]  ;;  %v1278_v48 = vpack.c.bf16 %v11794_v46, %v11791_v45  ;;  %v1123_v56 = vld [vmem:[%s11579_s21 + $0x58] sm:$0xff]  ;;  %v1126_v2 = vld [vmem:[%s11579_s21 + $0x70] sm:$0xf] }
  0x34   : > { %9639 = vmatprep.mubr.msk.bf16.mxu0 %vm11411_vm1, %v11410_v3  ;;  %9670 = vmatmul.mubr.msk.bf16.gmra.mrb[8].mxu1 %vm594_vm2, %v567_v26  ;;  %v11740_v26 = vld [vmem:[%s11579_s21 + $0x29] sm:$0xff]  ;;  %v1131_v58 = vpack.c.bf16 %v1123_v56, %v1122_v55  ;;  %v1555_v62 = vld [vmem:[%s11579_s21 + $0x1a] sm:$0xff]  ;;  %v1421_v13 = vpack.c.bf16 %v11737_v25, %v11722_v19  ;;  %v1562_v19 = vld [vmem:[%s11579_s21 + $0x52] sm:$0xff] }
  0x35   : > { %9673 = vmatprep.mubr.msk.bf16.mxu1 %vm11411_vm1, %v11410_v3  ;;  %v1275_v28 = vpack.c.bf16 %v11740_v26, %v11737_v25  ;;  %v1557_v4 = vld [vmem:[%s11579_s21 + $0x2a] sm:$0xff]  ;;  %v1559_v11 = vld [vmem:[%s11579_s21 + $0x3a] sm:$0xff] }
  0x36   : > { %v1561_v18 = vld [vmem:[%s11579_s21 + $0x4a] sm:$0xff]  ;;  %v536_v24 = vld [vmem:[%s14673_s14 + $0x18] sm:$0xff]  ;;  %v541_v25 = vld [vmem:[%s14673_s14 + $0x40] sm:$0xff] }
  0x37   : > { %v535_v21 = vld [vmem:[%s14673_s14 + $0x10] sm:$0xff]  ;;  %v538_v29 = vld [vmem:[%s14673_s14 + $0x28] sm:$0xff] }
  0x38   : > { %1894 = vperm.xlu1 %11253, %v535_v21   ;;  %v543_v30 = vld [vmem:[%s14673_s14 + $0x50] sm:$0xff] }
  0x3b   : > { %9640 = vmatmul.mubr.msk.bf16.gmra.mrb[12].mxu0 %vm594_vm2, %v588_v31  ;;  %v8647_v31 = vld [vmem:[%s14684_s1 + $0xc] sm:$0x3] }
  0x3c   : > { %9643 = vmatprep.mubr.msk.bf16.mxu0 %vm11411_vm1, %v11410_v3  ;;  %9674 = vmatmul.mubr.msk.bf16.gmra.mrb[12].mxu1 %vm594_vm2, %v568_v32  ;;  %v11757_v32 = vld [vmem:[%s11579_s21 + $0x31] sm:$0xff]  ;;  %v1452_v35 = vsel %vm616_vm0, %v8647_v31, 0 }
  0x3d   : > { %9677 = vmatprep.mubr.msk.bf16.mxu1 %vm11411_vm1, %v11410_v3  ;;  %v1276_v36 = vpack.c.bf16 %v11760_v33, %v11757_v32  ;;  %1899 = vperm.xlu1 %11253, %v536_v24  }
  0x41   : > { %1909 = vperm.xlu1 %11253, %v538_v29   ;;  %v1706_v29 = vld [vmem:[%s11579_s21 + $0x3b] sm:$0xff] }
  0x43   : > { %9644 = vmatmul.mubr.msk.bf16.gmra.mrb[16].mxu0 %vm594_vm2, %v589_v37  ;;  %v1116_v37 = vld [vmem:[%s11579_s21 + $0x20] sm:$0xff] }
  0x44   : > { %9647 = vmatprep.mubr.msk.bf16.mxu0 %vm11411_vm1, %v11410_v3  ;;  %9678 = vmatmul.mubr.msk.bf16.gmra.mrb[16].mxu1 %vm594_vm2, %v569_v38  ;;  %v1117_v38 = vld [vmem:[%s11579_s21 + $0x28] sm:$0xff] }
  0x45   : > { %9681 = vmatprep.mubr.msk.bf16.mxu1 %vm11411_vm1, %v11410_v3  ;;  %v1128_v41 = vpack.c.bf16 %v1117_v38, %v1116_v37  ;;  %v542_v37 = vld [vmem:[%s14673_s14 + $0x48] sm:$0xff] }
  0x4b   : > { %9648 = vmatmul.mubr.msk.bf16.gmra.mrb[20].mxu0 %vm594_vm2, %v590_v42  ;;  %v1277_v42 = vpack.c.bf16 %v11778_v40, %v11775_v39 }
  0x4c   : > { %9651 = vmatprep.mubr.msk.bf16.mxu0 %vm11411_vm1, %v11410_v3  ;;  %9682 = vmatmul.mubr.msk.bf16.gmra.mrb[20].mxu1 %vm594_vm2, %v570_v43  ;;  %v1118_v43 = vld [vmem:[%s11579_s21 + $0x30] sm:$0xff] }
  0x4d   : > { %9717 = vmatprep.mubr.msk.bf16.mxu1 %vm11411_vm1, %v11410_v3  ;;  %v1129_v47 = vpack.c.bf16 %v1119_v44, %v1118_v43  ;;  %v1419_v43 = vld [vmem:[%s11579_s21 + $0x71] sm:$0xff] }
  0x53   : > { %9652 = vmatmul.mubr.msk.bf16.gmra.mrb[24].mxu0 %vm594_vm2, %v591_v49  ;;  %v1120_v49 = vld [vmem:[%s11579_s21 + $0x40] sm:$0xff] }
  0x54   : > { %9657 = vmatprep.mubr.msk.bf16.mxu0 %vm11411_vm1, %v11410_v3  ;;  %9718 = vmatmul.mubr.msk.bf16.vlgmr.msra.gmra.mrb[24].mxu1 %vm594_vm2, %v980_v50  ;;  %v1121_v50 = vld [vmem:[%s11579_s21 + $0x48] sm:$0xff] }
  0x55   : > { %9721 = vmatprep.mubr.msk.bf16.mxu1 %vm11411_vm1, %v11410_v3  ;;  %9776 = vmatpush3.bf16.msra.mxu1 %v1305_v54  ;;  %v1279_v54 = vpack.c.bf16 %v11810_v52, %v11807_v51 }
  0x56   : > { %9835 = vmatprep.subr.bf16.mxu1 %v11410_v3 }
  0x5b   : > { %9658 = vmatmul.mubr.msk.bf16.vlgmr.msra.gmra.mrb[28].mxu0 %vm594_vm2, %v564_v57  ;;  %v1273_v57 = vld [vmem:[%s11579_s21 + $0x71] sm:$0xf] }
  0x5c   : > { %9686 = vmatpush3.bf16.msra.mxu0 %v864_v53  ;;  %9687 = vmatprep.mubr.msk.bf16.mxu0 %vm11411_vm1, %v11410_v3  ;;  %v1130_v53 = vpack.c.bf16 %v1121_v50, %v1120_v49 }
  0x5d   : > { %9745 = vmatprep.subr.bf16.mxu0 %v11410_v3  ;;  %9722 = vmatmul.mubr.msk.bf16.gmra.mrb[28].mxu1 %vm594_vm2, %v981_v59  ;;  %v1280_v59 = vpack.c.bf16 %v1273_v57, %v1273_v57 }
  0x5e   : > { %9725 = vmatprep.mubr.msk.bf16.mxu1 %vm11411_vm1, %v11410_v3 }
  0x63   : > { %9688 = vmatmul.mubr.msk.bf16.vlgmr.msra.gmra.mrb[32].mxu0 %vm594_vm2, %v833_v0 }
  0x64   : > { %9691 = vmatprep.mubr.msk.bf16.mxu0 %vm11411_vm1, %v11410_v3  ;;  %9746 = vmatpush3.bf16.msra.mxu0 %v1158_v61  ;;  %v1125_v61 = vld [vmem:[%s11579_s21 + $0x68] sm:$0xff] }
  0x65   : > { %9726 = vmatmul.mubr.msk.bf16.gmra.mrb[32].mxu1 %vm594_vm2, %v982_v1  ;;  %9805 = vmatprep.subr.bf16.mxu0 %v11410_v3  ;;  %v1132_v0 = vpack.c.bf16 %v1125_v61, %v1124_v60  ;;  %v1568_v1 = vpack.c.bf16 %v1556_v63, %v1555_v62 }
  0x66   : > { %9729 = vmatprep.mubr.msk.bf16.mxu1 %vm11411_vm1, %v11410_v3 }
  0x6b   : > { %9692 = vmatmul.mubr.msk.bf16.gmra.mrb[36].mxu0 %vm594_vm2, %v834_v5  ;;  %v1558_v5 = vld [vmem:[%s11579_s21 + $0x32] sm:$0xff] }
  0x6c   : > { %9695 = vmatprep.mubr.msk.bf16.mxu0 %vm11411_vm1, %v11410_v3  ;;  %v1569_v7 = vpack.c.bf16 %v1558_v5, %v1557_v4 }
  0x6d   : > { %9730 = vmatmul.mubr.msk.bf16.gmra.mrb[36].mxu1 %vm594_vm2, %v983_v6  ;;  %v1133_v6 = vpack.c.bf16 %v1126_v2, %v1126_v2  ;;  %v1703_v2 = vld [vmem:[%s11579_s21 + $0x23] sm:$0xff] }
  0x6e   : > { %9733 = vmatprep.mubr.msk.bf16.mxu1 %vm11411_vm1, %v11410_v3 }
  0x73   : > { %9696 = vmatmul.mubr.msk.bf16.gmra.mrb[40].mxu0 %vm594_vm2, %v835_v8  ;;  %v533_v8 = vld [vmem:[%s14673_s14] sm:$0xff] }
  0x74   : > { %9699 = vmatprep.mubr.msk.bf16.mxu0 %vm11411_vm1, %v11410_v3  ;;  %1884 = vperm.xlu0 %11252, %v533_v8  }
  0x75   : > { %9734 = vmatmul.mubr.msk.bf16.gmra.mrb[40].mxu1 %vm594_vm2, %v984_v10  ;;  %v8663_v10 = vld [vmem:[%s14684_s1 + $0x10] sm:$0x3]  ;;  %s8518_s1 = sshll.u32 %s518_s13, 4  ;;  %s14616_s1 = int_to_ptr.vmem [resolvable:$true] %s8518_s1 }
  0x76   : > { %9737 = vmatprep.mubr.msk.bf16.mxu1 %vm11411_vm1, %v11410_v3  ;;  %v1746_v15 = vsel %vm616_vm0, %v8663_v10, 0  ;;  %s11346_s22 = scalar_lea.vmem %s14616_s1, 16 }
  0x77   : > { %p11347_p11 = scmp.ne.s32.totalorder %s14616_s1, %s11346_s22 }
  0x79   : > { %p11348_p12 = pnand %p11347_p11, %p11545_p5 }
  0x7b   : > { %9700 = vmatmul.mubr.msk.bf16.gmra.mrb[44].mxu0 %vm594_vm2, %v836_v12  ;;  %v1560_v12 = vld [vmem:[%s11579_s21 + $0x42] sm:$0xff]  ;;  %p11349_p13 = pneg %p11348_p12 }
  0x7c   : > { %9703 = vmatprep.mubr.msk.bf16.mxu0 %vm11411_vm1, %v11410_v3 }
  0x7d   : > { %9738 = vmatmul.mubr.msk.bf16.gmra.mrb[44].mxu1 %vm594_vm2, %v985_v14  ;;  %v534_v14 = vld [vmem:[%s14673_s14 + $0x8] sm:$0xff] }
  0x7e   : > { %9741 = vmatprep.mubr.msk.bf16.mxu1 %vm11411_vm1, %v11410_v3  ;;  %1889 = vperm.xlu0 %11252, %v534_v14  }
  0x83   : > { %9704 = vmatmul.mubr.msk.bf16.gmra.mrb[48].mxu0 %vm594_vm2, %v837_v16  ;;  %v1570_v16 = vpack.c.bf16 %v1560_v12, %v1559_v11 }
  0x84   : > { %9707 = vmatprep.mubr.msk.bf16.mxu0 %vm11411_vm1, %v11410_v3 }
  0x85   : > { %9742 = vmatmul.mubr.msk.bf16.gmra.mrb[48].mxu1 %vm594_vm2, %v986_v17  ;;  %v537_v17 = vld [vmem:[%s14673_s14 + $0x20] sm:$0xff] }
  0x86   : > { %9777 = vmatprep.mubr.msk.bf16.mxu1 %vm11411_vm1, %v11410_v3  ;;  %1904 = vperm.xlu0 %11252, %v537_v17   ;;  %v1705_v17 = vld [vmem:[%s11579_s21 + $0x33] sm:$0xff] }
  0x8b   : > { %9708 = vmatmul.mubr.msk.bf16.gmra.mrb[52].mxu0 %vm594_vm2, %v838_v20  ;;  %v1422_v20 = vpack.c.bf16 %v11757_v32, %v11740_v26  ;;  %v1563_v26 = vld [vmem:[%s11579_s21 + $0x5a] sm:$0xff] }
  0x8c   : > { %9711 = vmatprep.mubr.msk.bf16.mxu0 %vm11411_vm1, %v11410_v3  ;;  %v540_v32 = vld [vmem:[%s14673_s14 + $0x38] sm:$0xff] }
  0x8d   : > { %9778 = vmatmul.mubr.msk.bf16.vlgmr.msra.gmra.mrb[52].mxu1 %vm594_vm2, %v1274_v22  ;;  %v539_v22 = vld [vmem:[%s14673_s14 + $0x30] sm:$0xff]  ;;  %1919 = vperm.xlu1 %11253, %v540_v32  }
  0x8e   : > { %9781 = vmatprep.mubr.msk.bf16.mxu1 %vm11411_vm1, %v11410_v3  ;;  %9836 = vmatpush3.bf16.msra.mxu1 %v1599_v23  ;;  %v1571_v23 = vpack.c.bf16 %v1562_v19, %v1561_v18 }
  0x8f   : > { %9895 = vmatprep.subr.bf16.mxu1 %v11410_v3  ;;  %1914 = vperm.xlu0 %11252, %v539_v22  }
  0x91   : > { %1929 = vperm.xlu1 %11253, %v542_v37  }
  0x93   : > { %9712 = vmatmul.mubr.msk.bf16.gmra.mrb[56].mxu0 %vm594_vm2, %v839_v27  ;;  %v1564_v27 = vld [vmem:[%s11579_s21 + $0x62] sm:$0xff]  ;;  %1924 = vperm.xlu0 %11252, %v541_v25  }
  0x94   : > { %9747 = vmatprep.mubr.msk.bf16.mxu0 %vm11411_vm1, %v11410_v3  ;;  %v1572_v31 = vpack.c.bf16 %v1564_v27, %v1563_v26 }
  0x95   : > { %9782 = vmatmul.mubr.msk.bf16.gmra.mrb[56].mxu1 %vm594_vm2, %v1275_v28  ;;  %v1423_v28 = vpack.c.bf16 %v11775_v39, %v11760_v33  ;;  %v545_v33 = vld [vmem:[%s14673_s14 + $0x60] sm:$0xf]  ;;  %v544_v39 = vld [vmem:[%s14673_s14 + $0x58] sm:$0xff] }
  0x96   : > { %9785 = vmatprep.mubr.msk.bf16.mxu1 %vm11411_vm1, %v11410_v3  ;;  %1939 = vperm.xlu1 %11253, %v544_v39  }
  0x97   : > { %1934 = vperm.xlu0 %11252, %v543_v30   ;;  %v1707_v30 = vld [vmem:[%s11579_s21 + $0x43] sm:$0xff] }
  0x9b   : > { %9748 = vmatmul.mubr.msk.bf16.vlgmr.msra.gmra.mrb[60].mxu0 %vm594_vm2, %v1127_v34  ;;  %v1565_v34 = vld [vmem:[%s11579_s21 + $0x6a] sm:$0xff]  ;;  %1944 = vperm.xlu0 %11252, %v545_v33  }
  0x9c   : > { %9751 = vmatprep.mubr.msk.bf16.mxu0 %vm11411_vm1, %v11410_v3  ;;  %9806 = vmatpush3.bf16.msra.mxu0 %v1452_v35  ;;  %v1566_v35 = vld [vmem:[%s11579_s21 + $0x72] sm:$0xff] }
  0x9d   : > { %9786 = vmatmul.mubr.msk.bf16.gmra.mrb[60].mxu1 %vm594_vm2, %v1276_v36  ;;  %9865 = vmatprep.subr.bf16.mxu0 %v11410_v3  ;;  %v1424_v36 = vpack.c.bf16 %v11791_v45, %v11778_v40  ;;  %v1573_v38 = vpack.c.bf16 %v1566_v35, %v1565_v34  ;;  %v1567_v40 = vld [vmem:[%s11579_s21 + $0x7a] sm:$0xf]  ;;  %v1717_v34 = vpack.c.bf16 %v1707_v30, %v1706_v29 }
  0x9e   : > { %9789 = vmatprep.mubr.msk.bf16.mxu1 %vm11411_vm1, %v11410_v3 }
  0xa3   : > { %9752 = vmatmul.mubr.msk.bf16.gmra.mrb[64].mxu0 %vm594_vm2, %v1128_v41  ;;  %v1425_v41 = vpack.c.bf16 %v11807_v51, %v11794_v46 }
  0xa4   : > { %9755 = vmatprep.mubr.msk.bf16.mxu0 %vm11411_vm1, %v11410_v3 }
  0xa5   : > { %9790 = vmatmul.mubr.msk.bf16.gmra.mrb[64].mxu1 %vm594_vm2, %v1277_v42  ;;  %v1574_v42 = vpack.c.bf16 %v1567_v40, %v1567_v40 }
  0xa6   : > { %9793 = vmatprep.mubr.msk.bf16.mxu1 %vm11411_vm1, %v11410_v3 }
  0xab   : > { %9756 = vmatmul.mubr.msk.bf16.gmra.mrb[68].mxu0 %vm594_vm2, %v1129_v47  ;;  %v1426_v47 = vpack.c.bf16 %v1419_v43, %v11810_v52  ;;  %v1709_v43 = vld [vmem:[%s11579_s21 + $0x53] sm:$0xff] }
  0xac   : > { %9759 = vmatprep.mubr.msk.bf16.mxu0 %vm11411_vm1, %v11410_v3 }
  0xad   : > { %9794 = vmatmul.mubr.msk.bf16.gmra.mrb[68].mxu1 %vm594_vm2, %v1278_v48 }
  0xae   : > { %9797 = vmatprep.mubr.msk.bf16.mxu1 %vm11411_vm1, %v11410_v3 }
  0xb3   : > { %9760 = vmatmul.mubr.msk.bf16.gmra.mrb[72].mxu0 %vm594_vm2, %v1130_v53 }
  0xb4   : > { %9763 = vmatprep.mubr.msk.bf16.mxu0 %vm11411_vm1, %v11410_v3 }
  0xb5   : > { %9798 = vmatmul.mubr.msk.bf16.gmra.mrb[72].mxu1 %vm594_vm2, %v1279_v54  ;;  %v1420_v54 = vld [vmem:[%s11579_s21 + $0x79] sm:$0xf] }
  0xb6   : > { %9801 = vmatprep.mubr.msk.bf16.mxu1 %vm11411_vm1, %v11410_v3  ;;  %v1427_v52 = vpack.c.bf16 %v1420_v54, %v1420_v54 }
  0xbb   : > { %9764 = vmatmul.mubr.msk.bf16.gmra.mrb[76].mxu0 %vm594_vm2, %v1131_v58 }
  0xbc   : > { %9767 = vmatprep.mubr.msk.bf16.mxu0 %vm11411_vm1, %v11410_v3 }
  0xbd   : > { %9802 = vmatmul.mubr.msk.bf16.gmra.mrb[76].mxu1 %vm594_vm2, %v1280_v59 }
  0xbe   : > { %9837 = vmatprep.mubr.msk.bf16.mxu1 %vm11411_vm1, %v11410_v3 }
  0xc3   : > { %9768 = vmatmul.mubr.msk.bf16.gmra.mrb[80].mxu0 %vm594_vm2, %v1132_v0 }
  0xc4   : > { %9771 = vmatprep.mubr.msk.bf16.mxu0 %vm11411_vm1, %v11410_v3 }
  0xc5   : > { %9838 = vmatmul.mubr.msk.bf16.vlgmr.msra.gmra.mrb[80].mxu1 %vm594_vm2, %v1568_v1  ;;  %v1702_v1 = vld [vmem:[%s11579_s21 + $0x1b] sm:$0xff] }
  0xc6   : > { %9841 = vmatprep.mubr.msk.bf16.mxu1 %vm11411_vm1, %v11410_v3 }
  0xcb   : > { %9772 = vmatmul.mubr.msk.bf16.gmra.mrb[84].mxu0 %vm594_vm2, %v1133_v6 }
  0xcc   : > { %9807 = vmatprep.mubr.msk.bf16.mxu0 %vm11411_vm1, %v11410_v3 }
  0xcd   : > { %9842 = vmatmul.mubr.msk.bf16.gmra.mrb[84].mxu1 %vm594_vm2, %v1569_v7  ;;  %v1715_v7 = vpack.c.bf16 %v1703_v2, %v1702_v1 }
  0xce   : > { %9845 = vmatprep.mubr.msk.bf16.mxu1 %vm11411_vm1, %v11410_v3 }
  0xd3   : > { %9808 = vmatmul.mubr.msk.bf16.vlgmr.msra.gmra.mrb[88].mxu0 %vm594_vm2, %v1421_v13 }
  0xd4   : > { %9811 = vmatprep.mubr.msk.bf16.mxu0 %vm11411_vm1, %v11410_v3  ;;  %9866 = vmatpush3.bf16.msra.mxu0 %v1746_v15 }
  0xd5   : > { %9846 = vmatmul.mubr.msk.bf16.gmra.mrb[88].mxu1 %vm594_vm2, %v1570_v16  ;;  %9927 = vmatprep.subr.bf16.mxu0 %v11410_v3  ;;  %v1704_v16 = vld [vmem:[%s11579_s21 + $0x2b] sm:$0xff] }
  0xd6   : > { %9849 = vmatprep.mubr.msk.bf16.mxu1 %vm11411_vm1, %v11410_v3  ;;  %v1716_v21 = vpack.c.bf16 %v1705_v17, %v1704_v16 }
  0xdb   : > { %9812 = vmatmul.mubr.msk.bf16.gmra.mrb[92].mxu0 %vm594_vm2, %v1422_v20 }
  0xdc   : > { %9815 = vmatprep.mubr.msk.bf16.mxu0 %vm11411_vm1, %v11410_v3 }
  0xdd   : > { %9850 = vmatmul.mubr.msk.bf16.gmra.mrb[92].mxu1 %vm594_vm2, %v1571_v23 }
  0xde   : > { %9853 = vmatprep.mubr.msk.bf16.mxu1 %vm11411_vm1, %v11410_v3 }
  0xe3   : > { %9816 = vmatmul.mubr.msk.bf16.gmra.mrb[96].mxu0 %vm594_vm2, %v1423_v28 }
  0xe4   : > { %9819 = vmatprep.mubr.msk.bf16.mxu0 %vm11411_vm1, %v11410_v3 }
  0xe5   : > { %9854 = vmatmul.mubr.msk.bf16.gmra.mrb[96].mxu1 %vm594_vm2, %v1572_v31 }
  0xe6   : > { %9857 = vmatprep.mubr.msk.bf16.mxu1 %vm11411_vm1, %v11410_v3 }
  0xeb   : > { %9820 = vmatmul.mubr.msk.bf16.gmra.mrb[100].mxu0 %vm594_vm2, %v1424_v36 }
  0xec   : > { %9823 = vmatprep.mubr.msk.bf16.mxu0 %vm11411_vm1, %v11410_v3 }
  0xed   : > { %9858 = vmatmul.mubr.msk.bf16.gmra.mrb[100].mxu1 %vm594_vm2, %v1573_v38 }
  0xee   : > { %9861 = vmatprep.mubr.msk.bf16.mxu1 %vm11411_vm1, %v11410_v3 }
  0xf3   : > { %9824 = vmatmul.mubr.msk.bf16.gmra.mrb[104].mxu0 %vm594_vm2, %v1425_v41 }
  0xf4   : > { %9827 = vmatprep.mubr.msk.bf16.mxu0 %vm11411_vm1, %v11410_v3 }
  0xf5   : > { %9862 = vmatmul.mubr.msk.bf16.gmra.mrb[104].mxu1 %vm594_vm2, %v1574_v42  ;;  %v1708_v42 = vld [vmem:[%s11579_s21 + $0x4b] sm:$0xff] }
  0xf6   : > { %v11942_v44 = vpop.f32.mrb[0].mxu0  ;;  %9899 = vmatprep.mubr.msk.bf16.mxu1 %vm11411_vm1, %v11410_v3 }
  0xf7   : > { %v9629_v45 = vpop.f32.mrb[1].mxu0  ;;  %v774_v48 = vpop.f32.mrb[0].mxu1 }
  0xf8   : > { %v11947_v46 = vpop.f32.mrb[2].mxu0  ;;  %v9663_v49 = vpop.f32.mrb[1].mxu1 }
  0xf9   : > { %v9630_v50 = vpop.f32.mrb[3].mxu0  ;;  %v777_v51 = vpop.f32.mrb[2].mxu1  ;;  %v1718_v49 = vpack.c.bf16 %v1709_v43, %v1708_v42 }
  0xfa   : > { %v9664_v53 = vpop.f32.mrb[3].mxu1 }
  0xfb   : > { %9828 = vmatmul.mubr.msk.bf16.gmra.mrb[108].mxu0 %vm594_vm2, %v1426_v47 }
  0xfc   : > { %9831 = vmatprep.mubr.msk.bf16.mxu0 %vm11411_vm1, %v11410_v3 }
  0xfe   : > { %v662_v55 = vpop.f32.mrb[4].mxu0 }
  0xff   : > { %v11953_v56 = vadd.f32 %v774_v48, %v662_v55  ;;  %v9633_v57 = vpop.f32.mrb[5].mxu0  ;;  %v782_v58 = vpop.f32.mrb[4].mxu1 }
 0x100   : > { %v665_v59 = vpop.f32.mrb[6].mxu0  ;;  %v9667_v60 = vpop.f32.mrb[5].mxu1 }
 0x101   : > { %v11955_v61 = vadd.f32 %v777_v51, %v665_v59  ;;  %v9634_v62 = vpop.f32.mrb[7].mxu0  ;;  %v785_v63 = vpop.f32.mrb[6].mxu1  ;;  %v1711_v59 = vld [vmem:[%s11579_s21 + $0x63] sm:$0xff] }
 0x102   : > { %v9668_v0 = vpop.f32.mrb[7].mxu1 }
 0x103   : > { %9832 = vmatmul.mubr.msk.bf16.gmra.mrb[112].mxu0 %vm594_vm2, %v1427_v52 }
 0x104   : > { %9867 = vmatprep.mubr.msk.bf16.mxu0 %vm11411_vm1, %v11410_v3 }
 0x106   : > { %v670_v4 = vpop.f32.mrb[8].mxu0 }
 0x107   : > { %v11962_v5 = vadd.f32 %v782_v58, %v670_v4  ;;  %v9637_v6 = vpop.f32.mrb[9].mxu0  ;;  %v790_v8 = vpop.f32.mrb[8].mxu1  ;;  %v1710_v58 = vld [vmem:[%s11579_s21 + $0x5b] sm:$0xff] }
 0x108   : > { %v673_v10 = vpop.f32.mrb[10].mxu0  ;;  %v9671_v11 = vpop.f32.mrb[9].mxu1  ;;  %v1719_v0 = vpack.c.bf16 %v1711_v59, %v1710_v58 }
 0x109   : > { %v11964_v12 = vadd.f32 %v785_v63, %v673_v10  ;;  %v9638_v13 = vpop.f32.mrb[11].mxu0  ;;  %v793_v14 = vpop.f32.mrb[10].mxu1  ;;  %v1712_v10 = vld [vmem:[%s11579_s21 + $0x6b] sm:$0xff]  ;;  %v1713_v11 = vld [vmem:[%s11579_s21 + $0x73] sm:$0xff] }
 0x10a   : > { %v9672_v15 = vpop.f32.mrb[11].mxu1  ;;  %v1720_v16 = vpack.c.bf16 %v1713_v11, %v1712_v10 }
 0x10b   : > { %9868 = vmatmul.mubr.msk.bf16.vlgmr.msra.gmra.mrb[116].mxu0 %vm594_vm2, %v1715_v7 }
 0x10c   : > { %9871 = vmatprep.mubr.msk.bf16.mxu0 %vm11411_vm1, %v11410_v3 }
 0x10e   : > { %v678_v18 = vpop.f32.mrb[12].mxu0 }
 0x10f   : > { %v11971_v19 = vadd.f32 %v790_v8, %v678_v18  ;;  %v9641_v20 = vpop.f32.mrb[13].mxu0  ;;  %v798_v22 = vpop.f32.mrb[12].mxu1 }
 0x110   : > { %v681_v23 = vpop.f32.mrb[14].mxu0  ;;  %v9675_v24 = vpop.f32.mrb[13].mxu1 }
 0x111   : > { %v11973_v25 = vadd.f32 %v793_v14, %v681_v23  ;;  %v9642_v26 = vpop.f32.mrb[15].mxu0  ;;  %v801_v27 = vpop.f32.mrb[14].mxu1 }
 0x112   : > { %v9676_v28 = vpop.f32.mrb[15].mxu1  ;;  %v1714_v26 = vld [vmem:[%s11579_s21 + $0x7b] sm:$0xf]  ;;  %s14614_s21 = scalar_lea.hbm %s14674_s15, %s9180_s23 }
 0x113   : > { %9872 = vmatmul.mubr.msk.bf16.gmra.mrb[120].mxu0 %vm594_vm2, %v1716_v21 }
 0x114   : > { %9875 = vmatprep.mubr.msk.bf16.mxu0 %vm11411_vm1, %v11410_v3 }
 0x116   : > { %v686_v31 = vpop.f32.mrb[16].mxu0 }
 0x117   : > { %v11980_v32 = vadd.f32 %v798_v22, %v686_v31  ;;  %v9645_v33 = vpop.f32.mrb[17].mxu0  ;;  %v806_v35 = vpop.f32.mrb[16].mxu1 }
 0x118   : > { %v689_v36 = vpop.f32.mrb[18].mxu0  ;;  %v9679_v37 = vpop.f32.mrb[17].mxu1 }
 0x119   : > { %v11982_v38 = vadd.f32 %v801_v27, %v689_v36  ;;  %v9646_v39 = vpop.f32.mrb[19].mxu0  ;;  %v809_v40 = vpop.f32.mrb[18].mxu1 }
 0x11a   : > { %v9680_v41 = vpop.f32.mrb[19].mxu1 }
 0x11b   : > { %9876 = vmatmul.mubr.msk.bf16.gmra.mrb[124].mxu0 %vm594_vm2, %v1717_v34 }
 0x11c   : > { %9879 = vmatprep.mubr.msk.bf16.mxu0 %vm11411_vm1, %v11410_v3 }
 0x11e   : > { %v694_v45 = vpop.f32.mrb[20].mxu0 }
 0x11f   : > { %v11989_v47 = vadd.f32 %v806_v35, %v694_v45  ;;  %v9649_v48 = vpop.f32.mrb[21].mxu0  ;;  %v814_v50 = vpop.f32.mrb[20].mxu1 }
 0x120   : > { %v697_v51 = vpop.f32.mrb[22].mxu0  ;;  %v9683_v53 = vpop.f32.mrb[21].mxu1 }
 0x121   : > { %v11991_v54 = vadd.f32 %v809_v40, %v697_v51  ;;  %v9650_v55 = vpop.f32.mrb[23].mxu0  ;;  %v817_v57 = vpop.f32.mrb[22].mxu1 }
 0x122   : > { %v9684_v52 = vpop.f32.mrb[23].mxu1 }
 0x123   : > { %9880 = vmatmul.mubr.msk.bf16.gmra.mrb[128].mxu0 %vm594_vm2, %v1718_v49  ;;  %v11268_v52 = vld [vmem:[%s14686_s3 + $0x10] sm:$0xff]  }
 0x124   : > { %9883 = vmatprep.mubr.msk.bf16.mxu0 %vm11411_vm1, %v11410_v3  ;;  %9896 = vmatpush3.bf16.msra.mxu1 %v11268_v52 }
 0x125   : > { %9897 = vmatprep.subr.bf16.mxu1 %v11410_v3 }
 0x126   : > { %v702_v60 = vpop.f32.mrb[24].mxu0 }
 0x127   : > { %v11998_v62 = vadd.f32 %v814_v50, %v702_v60  ;;  %v9653_v63 = vpop.f32.mrb[25].mxu0  ;;  %v1047_v1 = vpop.f32.mrb[24].mxu1 }
 0x128   : > { %v705_v2 = vpop.f32.mrb[26].mxu0  ;;  %v9719_v4 = vpop.f32.mrb[25].mxu1 }
 0x129   : > { %v9654_v6 = vpop.f32.mrb[27].mxu0  ;;  %v1050_v7 = vpop.f32.mrb[26].mxu1 }
 0x12a   : > { %v9720_v8 = vpop.f32.mrb[27].mxu1 }
 0x12b   : > { %9884 = vmatmul.mubr.msk.bf16.gmra.mrb[132].mxu0 %vm594_vm2, %v1719_v0 }
 0x12c   : > { %9887 = vmatprep.mubr.msk.bf16.mxu0 %vm11411_vm1, %v11410_v3 }
 0x12e   : > { %v766_v13 = vpop.f32.mrb[28].mxu0 }
 0x12f   : > { %v767_v14 = vadd.f32 %v766_v13, %v11942_v44  ;;  %v9659_v15 = vpop.f32.mrb[29].mxu0  ;;  %v1721_v44 = vpack.c.bf16 %v1714_v26, %v1714_v26 }
 0x130   : > { %v769_v17 = vpop.f32.mrb[30].mxu0  ;;  %v1055_v18 = vpop.f32.mrb[28].mxu1 }
 0x131   : > { %v770_v20 = vadd.f32 %v769_v17, %v11947_v46  ;;  %v9660_v21 = vpop.f32.mrb[31].mxu0  ;;  %v9723_v22 = vpop.f32.mrb[29].mxu1 }
 0x132   : > { %v1058_v23 = vpop.f32.mrb[30].mxu1 }
 0x133   : > { %9888 = vmatmul.mubr.msk.bf16.gmra.mrb[136].mxu0 %vm594_vm2, %v1720_v16  ;;  %v9724_v24 = vpop.f32.mrb[31].mxu1 }
 0x134   : > { %9891 = vmatprep.mubr.msk.bf16.mxu0 %vm11411_vm1, %v11410_v3 }
 0x136   : > { %v900_v27 = vpop.f32.mrb[32].mxu0 }
 0x137   : > { %v954_v28 = vadd.f32 %v900_v27, %v767_v14  ;;  %v9689_v29 = vpop.f32.mrb[33].mxu0 }
 0x138   : > { %v903_v30 = vpop.f32.mrb[34].mxu0  ;;  %v1063_v31 = vpop.f32.mrb[32].mxu1 }
 0x139   : > { %v955_v33 = vadd.f32 %v903_v30, %v770_v20  ;;  %v12011_v34 = vadd.f32 %v1047_v1, %v954_v28  ;;  %v9690_v46 = vpop.f32.mrb[35].mxu0  ;;  %v9727_v35 = vpop.f32.mrb[33].mxu1 }
 0x13a   : > { %v1066_v36 = vpop.f32.mrb[34].mxu1 }
 0x13b   : > { %v12013_v37 = vadd.f32 %v1050_v7, %v955_v33  ;;  %9892 = vmatmul.mubr.msk.bf16.gmra.mrb[140].mxu0 %vm594_vm2, %v1721_v44  ;;  %v9728_v39 = vpop.f32.mrb[35].mxu1 }
 0x13c   : > { %9931 = vmatprep.mubr.msk.bf16.mxu0 %vm11411_vm1, %v11410_v3 }
 0x13e   : > { %v908_v40 = vpop.f32.mrb[36].mxu0 }
 0x13f   : > { %v956_v41 = vadd.f32 %v908_v40, %v11953_v56  ;;  %v9693_v42 = vpop.f32.mrb[37].mxu0 }
 0x140   : > { %v911_v43 = vpop.f32.mrb[38].mxu0  ;;  %v1071_v45 = vpop.f32.mrb[36].mxu1 }
 0x141   : > { %v957_v48 = vadd.f32 %v911_v43, %v11955_v61  ;;  %v12020_v49 = vadd.f32 %v1055_v18, %v956_v41  ;;  %v9694_v50 = vpop.f32.mrb[39].mxu0  ;;  %v9731_v51 = vpop.f32.mrb[37].mxu1 }
 0x142   : > { %v1074_v53 = vpop.f32.mrb[38].mxu1 }
 0x143   : > { %v12022_v55 = vadd.f32 %v1058_v23, %v957_v48  ;;  %v9732_v57 = vpop.f32.mrb[39].mxu1 }
 0x146   : > { %v916_v58 = vpop.f32.mrb[40].mxu0 }
 0x147   : > { %v958_v56 = vadd.f32 %v916_v58, %v11962_v5  ;;  %v9697_v59 = vpop.f32.mrb[41].mxu0 }
 0x148   : > { %v919_v61 = vpop.f32.mrb[42].mxu0  ;;  %v1079_v60 = vpop.f32.mrb[40].mxu1  ;;  %v11271_v59 = vld [vmem:[%s14686_s3 + $0x8] sm:$0xff]  }
 0x149   : > { %v959_v63 = vadd.f32 %v919_v61, %v11964_v12  ;;  %v12030_v0 = vadd.f32 %v1063_v31, %v958_v56  ;;  %v9698_v1 = vpop.f32.mrb[43].mxu0  ;;  %v9735_v2 = vpop.f32.mrb[41].mxu1 }
 0x14a   : > { %v1082_v4 = vpop.f32.mrb[42].mxu1 }
 0x14b   : > { %v12032_v6 = vadd.f32 %v1066_v36, %v959_v63  ;;  %v9736_v7 = vpop.f32.mrb[43].mxu1 }
 0x14e   : > { %v924_v8 = vpop.f32.mrb[44].mxu0 }
 0x14f   : > { %v960_v10 = vadd.f32 %v924_v8, %v11971_v19  ;;  %v9701_v11 = vpop.f32.mrb[45].mxu0 }
 0x150   : > { %v927_v13 = vpop.f32.mrb[46].mxu0  ;;  %v1087_v14 = vpop.f32.mrb[44].mxu1 }
 0x151   : > { %v961_v5 = vadd.f32 %v927_v13, %v11973_v25  ;;  %v12036_v15 = vadd.f32 %v1071_v45, %v960_v10  ;;  %v9702_v16 = vpop.f32.mrb[47].mxu0  ;;  %v9739_v12 = vpop.f32.mrb[45].mxu1 }
 0x152   : > { %v1090_v17 = vpop.f32.mrb[46].mxu1 }
 0x153   : > { %v12038_v18 = vadd.f32 %v1074_v53, %v961_v5  ;;  %v9740_v20 = vpop.f32.mrb[47].mxu1 }
 0x156   : > { %v932_v21 = vpop.f32.mrb[48].mxu0 }
 0x157   : > { %v962_v22 = vadd.f32 %v932_v21, %v11980_v32  ;;  %v9705_v23 = vpop.f32.mrb[49].mxu0 }
 0x158   : > { %v935_v24 = vpop.f32.mrb[50].mxu0  ;;  %v1095_v26 = vpop.f32.mrb[48].mxu1 }
 0x159   : > { %v963_v19 = vadd.f32 %v935_v24, %v11982_v38  ;;  %v12042_v27 = vadd.f32 %v1079_v60, %v962_v22  ;;  %v9706_v28 = vpop.f32.mrb[51].mxu0  ;;  %v9743_v25 = vpop.f32.mrb[49].mxu1 }
 0x15a   : > { %v1098_v29 = vpop.f32.mrb[50].mxu1 }
 0x15b   : > { %v12052_v32 = vadd.f32 %v1082_v4, %v963_v19  ;;  %v9744_v38 = vpop.f32.mrb[51].mxu1 }
 0x15e   : > { %v940_v44 = vpop.f32.mrb[52].mxu0 }
 0x15f   : > { %v964_v30 = vadd.f32 %v940_v44, %v11989_v47  ;;  %v9709_v31 = vpop.f32.mrb[53].mxu0  ;;  %v11269_v47 = vld [vmem:[%s14686_s3 + $0x18] sm:$0xff]  }
 0x160   : > { %v943_v33 = vpop.f32.mrb[54].mxu0  ;;  %v1341_v46 = vpop.f32.mrb[52].mxu1  ;;  %9898 = vmatpush3.bf16.msra.mxu1 %v11269_v47 }
 0x161   : > { %v965_v35 = vadd.f32 %v943_v33, %v11991_v54  ;;  %v12056_v36 = vadd.f32 %v1087_v14, %v964_v30  ;;  %v9710_v39 = vpop.f32.mrb[55].mxu0  ;;  %v9779_v40 = vpop.f32.mrb[53].mxu1  ;;  %v11270_v54 = vld [vmem:[%s14686_s3] sm:$0xff]   ;;  %9959 = vmatprep.subr.bf16.mxu1 %v11410_v3 }
 0x162   : > { %v1344_v41 = vpop.f32.mrb[54].mxu1  ;;  %9928 = vmatpush3.bf16.msra.mxu0 %v11270_v54 }
 0x163   : > { %v12058_v42 = vadd.f32 %v1090_v17, %v965_v35  ;;  %v9780_v43 = vpop.f32.mrb[55].mxu1  ;;  %9929 = vmatprep.subr.bf16.mxu0 %v11410_v3 }
 0x166   : > { %v948_v45 = vpop.f32.mrb[56].mxu0  ;;  %9930 = vmatpush3.bf16.msra.mxu0 %v11271_v59 }
 0x167   : > { %v966_v48 = vadd.f32 %v948_v45, %v11998_v62  ;;  %v9713_v50 = vpop.f32.mrb[57].mxu0  ;;  %9991 = vmatprep.subr.bf16.mxu0 %v11410_v3 }
 0x168   : > { %v951_v51 = vpop.f32.mrb[58].mxu0  ;;  %v1349_v53 = vpop.f32.mrb[56].mxu1 }
 0x169   : > { %v12067_v57 = vadd.f32 %v1095_v26, %v966_v48  ;;  %v9714_v52 = vpop.f32.mrb[59].mxu0  ;;  %v9783_v58 = vpop.f32.mrb[57].mxu1 }
 0x16a   : > { %v1352_v56 = vpop.f32.mrb[58].mxu1 }
 0x16b   : > { %v9784_v62 = vpop.f32.mrb[59].mxu1 }
 0x16e   : > { %v1194_v61 = vpop.f32.mrb[60].mxu0 }
 0x16f   : > { %v1248_v60 = vadd.f32 %v1194_v61, %v12011_v34  ;;  %v9749_v63 = vpop.f32.mrb[61].mxu0 }
 0x170   : > { %v1197_v1 = vpop.f32.mrb[62].mxu0  ;;  %v1357_v2 = vpop.f32.mrb[60].mxu1 }
 0x171   : > { %v1249_v4 = vadd.f32 %v1197_v1, %v12013_v37  ;;  %v12077_v7 = vadd.f32 %v1341_v46, %v1248_v60  ;;  %v9750_v8 = vpop.f32.mrb[63].mxu0  ;;  %v9787_v10 = vpop.f32.mrb[61].mxu1 }
 0x172   : > { %v1360_v11 = vpop.f32.mrb[62].mxu1 }
 0x173   : > { %v12079_v13 = vadd.f32 %v1344_v41, %v1249_v4  ;;  %v9788_v14 = vpop.f32.mrb[63].mxu1 }
 0x176   : > { %v1202_v5 = vpop.f32.mrb[64].mxu0 }
 0x177   : > { %v1250_v16 = vadd.f32 %v1202_v5, %v12020_v49  ;;  %v9753_v12 = vpop.f32.mrb[65].mxu0 }
 0x178   : > { %v1205_v34 = vpop.f32.mrb[66].mxu0  ;;  %v1365_v17 = vpop.f32.mrb[64].mxu1 }
 0x179   : > { %v1251_v20 = vadd.f32 %v1205_v34, %v12022_v55  ;;  %v12083_v21 = vadd.f32 %v1349_v53, %v1250_v16  ;;  %v9754_v22 = vpop.f32.mrb[67].mxu0  ;;  %v9791_v37 = vpop.f32.mrb[65].mxu1 }
 0x17a   : > { %v1368_v23 = vpop.f32.mrb[66].mxu1 }
 0x17b   : > { %v12085_v24 = vadd.f32 %v1352_v56, %v1251_v20  ;;  %v9792_v26 = vpop.f32.mrb[67].mxu1 }
 0x17e   : > { %v1210_v19 = vpop.f32.mrb[68].mxu0 }
 0x17f   : > { %v1252_v28 = vadd.f32 %v1210_v19, %v12030_v0  ;;  %v9757_v25 = vpop.f32.mrb[69].mxu0 }
 0x180   : > { %v1213_v29 = vpop.f32.mrb[70].mxu0  ;;  %v1373_v38 = vpop.f32.mrb[68].mxu1 }
 0x181   : > { %v1253_v49 = vadd.f32 %v1213_v29, %v12032_v6  ;;  %v12089_v44 = vadd.f32 %v1357_v2, %v1252_v28  ;;  %v9758_v30 = vpop.f32.mrb[71].mxu0  ;;  %v9795_v55 = vpop.f32.mrb[69].mxu1 }
 0x182   : > { %v1376_v31 = vpop.f32.mrb[70].mxu1 }
 0x183   : > { %v12091_v33 = vadd.f32 %v1360_v11, %v1253_v49  ;;  %v9796_v46 = vpop.f32.mrb[71].mxu1 }
 0x186   : > { %v1218_v35 = vpop.f32.mrb[72].mxu0 }
 0x187   : > { %v1254_v39 = vadd.f32 %v1218_v35, %v12036_v15  ;;  %v9761_v40 = vpop.f32.mrb[73].mxu0 }
 0x188   : > { %v1221_v41 = vpop.f32.mrb[74].mxu0  ;;  %v1381_v43 = vpop.f32.mrb[72].mxu1 }
 0x189   : > { %v1255_v0 = vadd.f32 %v1221_v41, %v12038_v18  ;;  %v12095_v45 = vadd.f32 %v1365_v17, %v1254_v39  ;;  %v9762_v48 = vpop.f32.mrb[75].mxu0  ;;  %v9799_v6 = vpop.f32.mrb[73].mxu1 }
 0x18a   : > { %v1384_v50 = vpop.f32.mrb[74].mxu1 }
 0x18b   : > { %v12097_v47 = vadd.f32 %v1368_v23, %v1255_v0  ;;  %v9800_v51 = vpop.f32.mrb[75].mxu1 }
 0x18e   : > { %v1226_v53 = vpop.f32.mrb[76].mxu0 }
 0x18f   : > { %v1256_v54 = vadd.f32 %v1226_v53, %v12042_v27  ;;  %v9765_v52 = vpop.f32.mrb[77].mxu0 }
 0x190   : > { %v1229_v58 = vpop.f32.mrb[78].mxu0  ;;  %v1389_v56 = vpop.f32.mrb[76].mxu1 }
 0x191   : > { %v1257_v15 = vadd.f32 %v1229_v58, %v12052_v32  ;;  %v12101_v62 = vadd.f32 %v1373_v38, %v1256_v54  ;;  %v9766_v59 = vpop.f32.mrb[79].mxu0  ;;  %v9803_v18 = vpop.f32.mrb[77].mxu1 }
 0x192   : > { %v1392_v61 = vpop.f32.mrb[78].mxu1 }
 0x193   : > { %v12103_v60 = vadd.f32 %v1376_v31, %v1257_v15  ;;  %v9804_v63 = vpop.f32.mrb[79].mxu1 }
 0x196   : > { %v1234_v1 = vpop.f32.mrb[80].mxu0 }
 0x197   : > { %v1258_v2 = vadd.f32 %v1234_v1, %v12056_v36  ;;  %v9769_v4 = vpop.f32.mrb[81].mxu0 }
 0x198   : > { %v1237_v8 = vpop.f32.mrb[82].mxu0  ;;  %v1635_v10 = vpop.f32.mrb[80].mxu1 }
 0x199   : > { %v1259_v27 = vadd.f32 %v1237_v8, %v12058_v42  ;;  %v12107_v11 = vadd.f32 %v1381_v43, %v1258_v2  ;;  %v9770_v14 = vpop.f32.mrb[83].mxu0  ;;  %v9839_v32 = vpop.f32.mrb[81].mxu1 }
 0x19a   : > { %v1638_v5 = vpop.f32.mrb[82].mxu1 }
 0x19b   : > { %v12109_v16 = vadd.f32 %v1384_v50, %v1259_v27  ;;  %v9840_v12 = vpop.f32.mrb[83].mxu1 }
 0x19e   : > { %v1242_v34 = vpop.f32.mrb[84].mxu0 }
 0x19f   : > { %v1260_v17 = vadd.f32 %v1242_v34, %v12067_v57  ;;  %v9773_v20 = vpop.f32.mrb[85].mxu0 }
 0x1a0   : > { %v1245_v22 = vpop.f32.mrb[86].mxu0  ;;  %v1643_v37 = vpop.f32.mrb[84].mxu1 }
 0x1a1   : > { %v12112_v36 = vadd.f32 %v1389_v56, %v1260_v17  ;;  %v9774_v23 = vpop.f32.mrb[87].mxu0  ;;  %v9843_v26 = vpop.f32.mrb[85].mxu1 }
 0x1a2   : > { %v1646_v19 = vpop.f32.mrb[86].mxu1 }
 0x1a3   : > { %v9844_v42 = vpop.f32.mrb[87].mxu1 }
 0x1a6   : > { %v1488_v28 = vpop.f32.mrb[88].mxu0 }
 0x1a7   : > { %v1542_v25 = vadd.f32 %v1488_v28, %v12077_v7  ;;  %v9809_v29 = vpop.f32.mrb[89].mxu0 }
 0x1a8   : > { %v1491_v38 = vpop.f32.mrb[90].mxu0  ;;  %v1651_v49 = vpop.f32.mrb[88].mxu1 }
 0x1a9   : > { %v1543_v30 = vadd.f32 %v1491_v38, %v12079_v13  ;;  %v12116_v55 = vadd.f32 %v1635_v10, %v1542_v25  ;;  %v9810_v57 = vpop.f32.mrb[91].mxu0  ;;  %v9847_v31 = vpop.f32.mrb[89].mxu1 }
 0x1aa   : > { %v1654_v46 = vpop.f32.mrb[90].mxu1 }
 0x1ab   : > { %v12118_v35 = vadd.f32 %v1638_v5, %v1543_v30  ;;  %v9848_v39 = vpop.f32.mrb[91].mxu1 }
 0x1ae   : > { %v1496_v40 = vpop.f32.mrb[92].mxu0 }
 0x1af   : > { %v1544_v41 = vadd.f32 %v1496_v40, %v12083_v21  ;;  %v9813_v43 = vpop.f32.mrb[93].mxu0 }
 0x1b0   : > { %v1499_v0 = vpop.f32.mrb[94].mxu0  ;;  %v1659_v48 = vpop.f32.mrb[92].mxu1 }
 0x1b1   : > { %v1545_v7 = vadd.f32 %v1499_v0, %v12085_v24  ;;  %v12122_v6 = vadd.f32 %v1643_v37, %v1544_v41  ;;  %v9814_v50 = vpop.f32.mrb[95].mxu0  ;;  %v9851_v13 = vpop.f32.mrb[93].mxu1 }
 0x1b2   : > { %v1662_v51 = vpop.f32.mrb[94].mxu1  ;;  %v12159_v13 = vpop.permute.xlu0 %1884 }
 0x1b3   : > { %v12124_v53 = vadd.f32 %v1646_v19, %v1545_v7  ;;  %v9852_v54 = vpop.f32.mrb[95].mxu1 }
 0x1b6   : > { %v1504_v52 = vpop.f32.mrb[96].mxu0 }
 0x1b7   : > { %v1546_v58 = vadd.f32 %v1504_v52, %v12089_v44  ;;  %v9817_v56 = vpop.f32.mrb[97].mxu0 }
 0x1b8   : > { %v1507_v15 = vpop.f32.mrb[98].mxu0  ;;  %v1667_v59 = vpop.f32.mrb[96].mxu1 }
 0x1b9   : > { %v1547_v21 = vadd.f32 %v1507_v15, %v12091_v33  ;;  %v12128_v18 = vadd.f32 %v1651_v49, %v1546_v58  ;;  %v9818_v61 = vpop.f32.mrb[99].mxu0  ;;  %v9855_v24 = vpop.f32.mrb[97].mxu1 }
 0x1ba   : > { %v1670_v63 = vpop.f32.mrb[98].mxu1 }
 0x1bb   : > { %v12130_v1 = vadd.f32 %v1654_v46, %v1547_v21  ;;  %v9856_v2 = vpop.f32.mrb[99].mxu1  ;;  %v12167_v21 = vpop.permute.xlu0 %1889 }
 0x1be   : > { %v1512_v4 = vpop.f32.mrb[100].mxu0 }
 0x1bf   : > { %v1548_v8 = vadd.f32 %v1512_v4, %v12095_v45  ;;  %v9821_v10 = vpop.f32.mrb[101].mxu0 }
 0x1c0   : > { %v1515_v27 = vpop.f32.mrb[102].mxu0  ;;  %v1675_v14 = vpop.f32.mrb[100].mxu1 }
 0x1c1   : > { %v1549_v44 = vadd.f32 %v1515_v27, %v12097_v47  ;;  %v12134_v32 = vadd.f32 %v1659_v48, %v1548_v8  ;;  %v9822_v5 = vpop.f32.mrb[103].mxu0  ;;  %v9859_v33 = vpop.f32.mrb[101].mxu1 }
 0x1c2   : > { %v1678_v12 = vpop.f32.mrb[102].mxu1  ;;  %v1974_v5 = vld [vmem:[#allocation2 + $0x5] sm:$0xff] }
 0x1c3   : > { %v12136_v34 = vadd.f32 %v1662_v51, %v1549_v44  ;;  %v9860_v17 = vpop.f32.mrb[103].mxu1  ;;  %v1998_v44 = vld [vmem:[#allocation2 + $0x6] sm:$0xff] }
 0x1c6   : > { %v1520_v20 = vpop.f32.mrb[104].mxu0 }
 0x1c7   : > { %v1550_v22 = vadd.f32 %v1520_v20, %v12101_v62  ;;  %v9825_v37 = vpop.f32.mrb[105].mxu0 }
 0x1c8   : > { %v1523_v23 = vpop.f32.mrb[106].mxu0  ;;  %v1683_v26 = vpop.f32.mrb[104].mxu1 }
 0x1c9   : > { %v1551_v45 = vadd.f32 %v1523_v23, %v12103_v60  ;;  %v12140_v19 = vadd.f32 %v1667_v59, %v1550_v22  ;;  %v9826_v42 = vpop.f32.mrb[107].mxu0  ;;  %v9863_v47 = vpop.f32.mrb[105].mxu1 }
 0x1ca   : > { %v1686_v28 = vpop.f32.mrb[106].mxu1  ;;  %v11272_v42 = vld [vmem:[%s14686_s3 + $0x20] sm:$0xff]   ;;  %v11274_v47 = vld [vmem:[%s14686_s3 + $0x30] sm:$0xff]  }
 0x1cb   : > { %v12142_v25 = vadd.f32 %v1670_v63, %v1551_v45  ;;  %v9864_v29 = vpop.f32.mrb[107].mxu1  ;;  %v12175_v63 = vpop.permute.xlu1 %1894 }
 0x1ce   : > { %v1528_v38 = vpop.f32.mrb[108].mxu0 }
 0x1cf   : > { %v1552_v49 = vadd.f32 %v1528_v38, %v12107_v11  ;;  %v9829_v30 = vpop.f32.mrb[109].mxu0  ;;  %v12156_v11 = vld [vmem:[%s14687_s2] ss:$0 sm:$0xff]  ;;  %s11350_s2 = sshll.u32 %s11415_s8, 4  ;;  %s11351_s2 = int_to_ptr.vmem [resolvable:$false] %s11350_s2 }
 0x1d0   : > { %v1531_v57 = vpop.f32.mrb[110].mxu0  ;;  %p11353_p0 = scmp.lt.s32.totalorder %s14616_s1, %s11351_s2 }
 0x1d1   : > { %v1553_v62 = vadd.f32 %v1531_v57, %v12109_v16  ;;  %v12146_v31 = vadd.f32 %v1675_v14, %v1552_v49  ;;  %v9830_v46 = vpop.f32.mrb[111].mxu0  ;;  %v11273_v57 = vld [vmem:[%s14686_s3 + $0x28] sm:$0xff]  }
 0x1d3   : > { %v12148_v39 = vadd.f32 %v1678_v12, %v1553_v62  ;;  %v12185_v12 = vpop.permute.xlu1 %1899  ;;  %v11275_v62 = vld [vmem:[%s14686_s3 + $0x38] sm:$0xff]  }
 0x1d6   : > { %v1536_v60 = vpop.f32.mrb[112].mxu0 }
 0x1d7   : > { %v1554_v40 = vadd.f32 %v1536_v60, %v12112_v36  ;;  %v9833_v41 = vpop.f32.mrb[113].mxu0 }
 0x1d8   : > { %v1539_v43 = vpop.f32.mrb[114].mxu0  ;;  %v12223_v41 = vpop.permute.xlu1 %1909 }
 0x1d9   : > { %v12151_v0 = vadd.f32 %v1683_v26, %v1554_v40  ;;  %v9834_v48 = vpop.f32.mrb[115].mxu0 }
 0x1de   : > { %v1782_v7 = vpop.f32.mrb[116].mxu0 }
 0x1df   : > { %v1836_v16 = vadd.f32 %v1782_v7, %v12116_v55  ;;  %v9869_v50 = vpop.f32.mrb[117].mxu0 }
 0x1e0   : > { %v1785_v51 = vpop.f32.mrb[118].mxu0 }
 0x1e1   : > { %v1856_v54 = vadd.f32 %v12156_v11, %v1836_v16  ;;  %v1837_v36 = vadd.f32 %v1785_v51, %v12118_v35  ;;  %v9870_v52 = vpop.f32.mrb[119].mxu0 }
 0x1e3   : > { %v1869_v58 = vmax.f32 %v1856_v54, 0.0  ;;  %v1857_v56 = vadd.f32 %v12156_v11, %v1837_v36 }
 0x1e5   : > { %v12165_v15 = vmul.f32 %v12159_v13, %v1869_v58  ;;  %v1870_v59 = vmax.f32 %v1857_v56, 0.0 }
 0x1e6   : > { %v1790_v61 = vpop.f32.mrb[120].mxu0 }
 0x1e7   : > { %1960 = vst.msk [vmem:[#allocation2 + $0x10] sm:$0xff] %vm546_vm3, %v12165_v15  ;;  %v12172_v55 = vmul.f32 %v12167_v21, %v1870_v59  ;;  %v1838_v24 = vadd.f32 %v1790_v61, %v12122_v6  ;;  %v9873_v35 = vpop.f32.mrb[121].mxu0 }
 0x1e8   : > { %v1793_v2 = vpop.f32.mrb[122].mxu0 }
 0x1e9   : > { %1961 = vst.msk [vmem:[#allocation2 + $0x18] sm:$0xff] %vm546_vm3, %v12172_v55  ;;  %v1858_v4 = vadd.f32 %v12156_v11, %v1838_v24  ;;  %v1839_v8 = vadd.f32 %v1793_v2, %v12124_v53  ;;  %v9874_v10 = vpop.f32.mrb[123].mxu0 }
 0x1eb   : > { %v1871_v27 = vmax.f32 %v1858_v4, 0.0  ;;  %v1859_v14 = vadd.f32 %v12156_v11, %v1839_v8  ;;  %v12249_v8 = vpop.permute.xlu1 %1919 }
 0x1ed   : > { %v12183_v33 = vmul.f32 %v12175_v63, %v1871_v27  ;;  %v1872_v6 = vmax.f32 %v1859_v14, 0.0 }
 0x1ee   : > { %v1798_v17 = vpop.f32.mrb[124].mxu0  ;;  %v1999_v20 = vld [vmem:[#allocation2 + $0xe] sm:$0xff] }
 0x1ef   : > { %v1975_v22 = vld [vmem:[#allocation2 + $0xd] sm:$0xff]  ;;  %1962 = vst.msk [vmem:[#allocation2 + $0x20] sm:$0xff] %vm546_vm3, %v12183_v33  ;;  %v12190_v53 = vmul.f32 %v12185_v12, %v1872_v6  ;;  %v1840_v37 = vadd.f32 %v1798_v17, %v12128_v18  ;;  %v9877_v23 = vpop.f32.mrb[125].mxu0  ;;  %v2011_v26 = vpack.c.bf16 %v1999_v20, %v1998_v44 }
 0x1f0   : > { %v1987_v45 = vpack.c.bf16 %v1975_v22, %v1974_v5  ;;  %v1801_v28 = vpop.f32.mrb[126].mxu0  ;;  %v2000_v40 = vld [vmem:[#allocation2 + $0x16] sm:$0xff] }
 0x1f1   : > { %1963 = vst.msk [vmem:[#allocation2 + $0x28] sm:$0xff] %vm546_vm3, %v12190_v53  ;;  %v1860_v29 = vadd.f32 %v12156_v11, %v1840_v37  ;;  %v1841_v38 = vadd.f32 %v1801_v28, %v12130_v1  ;;  %v9878_v18 = vpop.f32.mrb[127].mxu0  ;;  %9900 = vmatmul.mubr.msk.bf16.vlgmr.msra.gmra.mrb[108].mxu1 %vm546_vm3, %v2011_v26  ;;  %v12213_v1 = vpop.permute.xlu0 %1904  ;;  %v1976_v7 = vld [vmem:[#allocation2 + $0x15] sm:$0xff] }
 0x1f2   : > { %9932 = vmatmul.mubr.msk.bf16.vlgmr.msra.gmra.mrb[144].mxu0 %vm546_vm3, %v1987_v45  ;;  %9903 = vmatprep.mubr.msk.bf16.mxu1 %vm11411_vm1, %v11410_v3 }
 0x1f3   : > { %9935 = vmatprep.mubr.msk.bf16.mxu0 %vm11411_vm1, %v11410_v3  ;;  %v1873_v49 = vmax.f32 %v1860_v29, 0.0  ;;  %v1861_v30 = vadd.f32 %v12156_v11, %v1841_v38  ;;  %9960 = vmatpush3.bf16.msra.mxu1 %v11272_v42  ;;  %v12273_v38 = vpop.permute.xlu1 %1929 }
 0x1f4   : > { %9992 = vmatpush3.bf16.msra.mxu0 %v11274_v47  ;;  %9961 = vmatprep.subr.bf16.mxu1 %v11410_v3 }
 0x1f5   : > { %9993 = vmatprep.subr.bf16.mxu0 %v11410_v3  ;;  %v12221_v46 = vmul.f32 %v12213_v1, %v1873_v49  ;;  %v1874_v60 = vmax.f32 %v1861_v30, 0.0  ;;  %v12244_v35 = vpop.permute.xlu0 %1914 }
 0x1f6   : > { %v1806_v43 = vpop.f32.mrb[128].mxu0  ;;  %v2001_v48 = vld [vmem:[#allocation2 + $0x1e] sm:$0xff] }
 0x1f7   : > { %v1977_v16 = vld [vmem:[#allocation2 + $0x1d] sm:$0xff]  ;;  %1964 = vst.msk [vmem:[#allocation2 + $0x30] sm:$0xff] %vm546_vm3, %v12221_v46  ;;  %v12228_v50 = vmul.f32 %v12223_v41, %v1874_v60  ;;  %v1842_v51 = vadd.f32 %v1806_v43, %v12134_v32  ;;  %v9881_v54 = vpop.f32.mrb[129].mxu0  ;;  %v2012_v36 = vpack.c.bf16 %v2001_v48, %v2000_v40  ;;  %9962 = vmatpush3.bf16.msra.mxu1 %v11273_v57 }
 0x1f8   : > { %v1988_v52 = vpack.c.bf16 %v1977_v16, %v1976_v7  ;;  %v1809_v58 = vpop.f32.mrb[130].mxu0  ;;  %9994 = vmatpush3.bf16.msra.mxu0 %v11275_v62  ;;  %10023 = vmatprep.subr.bf16.mxu1 %v11410_v3  ;;  %v2002_v4 = vld [vmem:[#allocation2 + $0x26] sm:$0xff] }
 0x1f9   : > { %1965 = vst.msk [vmem:[#allocation2 + $0x38] sm:$0xff] %vm546_vm3, %v12228_v50  ;;  %v1862_v56 = vadd.f32 %v12156_v11, %v1842_v51  ;;  %v1843_v59 = vadd.f32 %v1809_v58, %v12136_v34  ;;  %v9882_v61 = vpop.f32.mrb[131].mxu0  ;;  %9904 = vmatmul.mubr.msk.bf16.gmra.mrb[112].mxu1 %vm546_vm3, %v2012_v36  ;;  %10055 = vmatprep.subr.bf16.mxu0 %v11410_v3  ;;  %v1978_v14 = vld [vmem:[#allocation2 + $0x25] sm:$0xff]  ;;  %v12268_v47 = vpop.permute.xlu0 %1924 }
 0x1fa   : > { %9936 = vmatmul.mubr.msk.bf16.gmra.mrb[148].mxu0 %vm546_vm3, %v1988_v52  ;;  %9907 = vmatprep.mubr.msk.bf16.mxu1 %vm11411_vm1, %v11410_v3 }
 0x1fb   : > { %9939 = vmatprep.mubr.msk.bf16.mxu0 %vm11411_vm1, %v11410_v3  ;;  %v1875_v32 = vmax.f32 %v1862_v56, 0.0  ;;  %v1863_v24 = vadd.f32 %v12156_v11, %v1843_v59  ;;  %v12297_v59 = vpop.permute.xlu1 %1939 }
 0x1fd   : > { %v12247_v34 = vmul.f32 %v12244_v35, %v1875_v32  ;;  %v1876_v2 = vmax.f32 %v1863_v24, 0.0  ;;  %v12292_v52 = vpop.permute.xlu0 %1934 }
 0x1fe   : > { %v1814_v10 = vpop.f32.mrb[132].mxu0  ;;  %v2003_v27 = vld [vmem:[#allocation2 + $0x2e] sm:$0xff] }
 0x1ff   : > { %v1979_v44 = vld [vmem:[#allocation2 + $0x2d] sm:$0xff]  ;;  %1966 = vst.msk [vmem:[#allocation2 + $0x40] sm:$0xff] %vm546_vm3, %v12247_v34  ;;  %v12254_v5 = vmul.f32 %v12249_v8, %v1876_v2  ;;  %v1844_v6 = vadd.f32 %v1814_v10, %v12140_v19  ;;  %v9885_v17 = vpop.f32.mrb[133].mxu0  ;;  %v2013_v20 = vpack.c.bf16 %v2003_v27, %v2002_v4 }
 0x200   : > { %v1989_v22 = vpack.c.bf16 %v1979_v44, %v1978_v14  ;;  %v1817_v37 = vpop.f32.mrb[134].mxu0  ;;  %v2004_v29 = vld [vmem:[#allocation2 + $0x36] sm:$0xff] }
 0x201   : > { %1967 = vst.msk [vmem:[#allocation2 + $0x48] sm:$0xff] %vm546_vm3, %v12254_v5  ;;  %v1864_v23 = vadd.f32 %v12156_v11, %v1844_v6  ;;  %v1845_v26 = vadd.f32 %v1817_v37, %v12142_v25  ;;  %v9886_v45 = vpop.f32.mrb[135].mxu0  ;;  %9908 = vmatmul.mubr.msk.bf16.gmra.mrb[116].mxu1 %vm546_vm3, %v2013_v20  ;;  %v1980_v30 = vld [vmem:[#allocation2 + $0x35] sm:$0xff] }
 0x202   : > { %9940 = vmatmul.mubr.msk.bf16.gmra.mrb[152].mxu0 %vm546_vm3, %v1989_v22  ;;  %9911 = vmatprep.mubr.msk.bf16.mxu1 %vm11411_vm1, %v11410_v3  ;;  %v12314_v22 = vpop.permute.xlu0 %1944 }
 0x203   : > { %9943 = vmatprep.mubr.msk.bf16.mxu0 %vm11411_vm1, %v11410_v3  ;;  %v1877_v19 = vmax.f32 %v1864_v23, 0.0  ;;  %v1865_v42 = vadd.f32 %v12156_v11, %v1845_v26 }
 0x205   : > { %v12271_v28 = vmul.f32 %v12268_v47, %v1877_v19  ;;  %v1878_v25 = vmax.f32 %v1865_v42, 0.0 }
 0x206   : > { %v1822_v18 = vpop.f32.mrb[136].mxu0  ;;  %v2005_v49 = vld [vmem:[#allocation2 + $0x3e] sm:$0xff] }
 0x207   : > { %v1981_v57 = vld [vmem:[#allocation2 + $0x3d] sm:$0xff]  ;;  %1968 = vst.msk [vmem:[#allocation2 + $0x50] sm:$0xff] %vm546_vm3, %v12271_v28  ;;  %v12278_v62 = vmul.f32 %v12273_v38, %v1878_v25  ;;  %v1846_v60 = vadd.f32 %v1822_v18, %v12146_v31  ;;  %v9889_v40 = vpop.f32.mrb[137].mxu0  ;;  %v2014_v43 = vpack.c.bf16 %v2005_v49, %v2004_v29 }
 0x208   : > { %v1990_v48 = vpack.c.bf16 %v1981_v57, %v1980_v30  ;;  %v1825_v7 = vpop.f32.mrb[138].mxu0  ;;  %v2006_v56 = vld [vmem:[#allocation2 + $0x46] sm:$0xff]  ;;  %v2266_v57 = vld [vmem:[#allocation2 + $0xf] sm:$0xff] }
 0x209   : > { %1969 = vst.msk [vmem:[#allocation2 + $0x58] sm:$0xff] %vm546_vm3, %v12278_v62  ;;  %v1866_v16 = vadd.f32 %v12156_v11, %v1846_v60  ;;  %v1847_v51 = vadd.f32 %v1825_v7, %v12148_v39  ;;  %v9890_v54 = vpop.f32.mrb[139].mxu0  ;;  %9912 = vmatmul.mubr.msk.bf16.gmra.mrb[120].mxu1 %vm546_vm3, %v2014_v43  ;;  %v1982_v24 = vld [vmem:[#allocation2 + $0x45] sm:$0xff]  ;;  %v2425_v60 = vld [vmem:[#allocation2 + $0x17] sm:$0xff] }
 0x20a   : > { %9944 = vmatmul.mubr.msk.bf16.gmra.mrb[156].mxu0 %vm546_vm3, %v1990_v48  ;;  %9915 = vmatprep.mubr.msk.bf16.mxu1 %vm11411_vm1, %v11410_v3  ;;  %v2265_v30 = vld [vmem:[#allocation2 + $0x7] sm:$0xff]  ;;  %v2437_v43 = vpack.c.bf16 %v2425_v60, %v2266_v57  ;;  %v11278_v7 = vld [vmem:[%s14686_s3 + $0x50] sm:$0xff]   ;;  %v2268_v54 = vld [vmem:[#allocation2 + $0x1f] sm:$0xff] }
 0x20b   : > { %9947 = vmatprep.mubr.msk.bf16.mxu0 %vm11411_vm1, %v11410_v3  ;;  %v1879_v31 = vmax.f32 %v1866_v16, 0.0  ;;  %v1867_v36 = vadd.f32 %v12156_v11, %v1847_v51  ;;  %v2278_v40 = vpack.c.bf16 %v2266_v57, %v2265_v30  ;;  %v11276_v48 = vld [vmem:[%s14686_s3 + $0x40] sm:$0xff]   ;;  %v11277_v16 = vld [vmem:[%s14686_s3 + $0x48] sm:$0xff]   ;;  %v11279_v51 = vld [vmem:[%s14686_s3 + $0x58] sm:$0xff]  }
 0x20c   : > { %v2742_v30 = vld [vmem:[#allocation2 + $0x11] sm:$0xff] }
 0x20d   : > { %v12295_v58 = vmul.f32 %v12292_v52, %v1879_v31  ;;  %v1880_v39 = vmax.f32 %v1867_v36, 0.0  ;;  %v2427_v31 = vld [vmem:[#allocation2 + $0x27] sm:$0xff]  ;;  %v2279_v36 = vpack.c.bf16 %v2268_v54, %v2425_v60 }
 0x20e   : > { %v1830_v61 = vpop.f32.mrb[140].mxu0  ;;  %v2007_v32 = vld [vmem:[#allocation2 + $0x4e] sm:$0xff] }
 0x20f   : > { %v1983_v2 = vld [vmem:[#allocation2 + $0x4d] sm:$0xff]  ;;  %1970 = vst.msk [vmem:[#allocation2 + $0x60] sm:$0xff] %vm546_vm3, %v12295_v58  ;;  %v12302_v4 = vmul.f32 %v12297_v59, %v1880_v39  ;;  %v1848_v10 = vadd.f32 %v1830_v61, %v12151_v0  ;;  %v2015_v27 = vpack.c.bf16 %v2007_v32, %v2006_v56  ;;  %v9893_v44 = vpop.f32.mrb[141].mxu0  ;;  %v2438_v39 = vpack.c.bf16 %v2427_v31, %v2268_v54  ;;  %v2429_v61 = vld [vmem:[#allocation2 + $0x37] sm:$0xff]  ;;  %v2585_v54 = vld [vmem:[#allocation2 + $0x20] sm:$0xff] }
 0x210   : > { %v1991_v14 = vpack.c.bf16 %v1983_v2, %v1982_v24  ;;  %v1833_v6 = vpop.f32.mrb[142].mxu0  ;;  %v2008_v23 = vld [vmem:[#allocation2 + $0x56] sm:$0xff]  ;;  %v2272_v2 = vld [vmem:[#allocation2 + $0x3f] sm:$0xff] }
 0x211   : > { %1971 = vst.msk [vmem:[#allocation2 + $0x68] sm:$0xff] %vm546_vm3, %v12302_v4  ;;  %v1868_v17 = vadd.f32 %v12156_v11, %v1848_v10  ;;  %9916 = vmatmul.mubr.msk.bf16.gmra.mrb[124].mxu1 %vm546_vm3, %v2015_v27  ;;  %v9894_v20 = vpop.f32.mrb[143].mxu0  ;;  %v1984_v26 = vld [vmem:[#allocation2 + $0x55] sm:$0xff]  ;;  %v2431_v10 = vld [vmem:[#allocation2 + $0x47] sm:$0xff]  ;;  %v2281_v27 = vpack.c.bf16 %v2272_v2, %v2429_v61 }
 0x212   : > { %9948 = vmatmul.mubr.msk.bf16.gmra.mrb[160].mxu0 %vm546_vm3, %v1991_v14  ;;  %9919 = vmatprep.mubr.msk.bf16.mxu1 %vm11411_vm1, %v11410_v3  ;;  %v2270_v56 = vld [vmem:[#allocation2 + $0x2f] sm:$0xff]  ;;  %v2440_v14 = vpack.c.bf16 %v2431_v10, %v2272_v2  ;;  %v2433_v6 = vld [vmem:[#allocation2 + $0x57] sm:$0xff] }
 0x213   : > { %9951 = vmatprep.mubr.msk.bf16.mxu0 %vm11411_vm1, %v11410_v3  ;;  %v1881_v0 = vmax.f32 %v1868_v17, 0.0  ;;  %v2280_v32 = vpack.c.bf16 %v2270_v56, %v2427_v31  ;;  %v2439_v24 = vpack.c.bf16 %v2429_v61, %v2270_v56  ;;  %v2274_v44 = vld [vmem:[#allocation2 + $0x4f] sm:$0xff]  ;;  %v12416_v31 = vld [vmem:[#allocation2 + $0x21] sm:$0xff]  ;;  %v2588_v56 = vld [vmem:[#allocation2 + $0x38] sm:$0xff] }
 0x214   : > { %v2282_v17 = vpack.c.bf16 %v2274_v44, %v2431_v10  ;;  %v2441_v20 = vpack.c.bf16 %v2433_v6, %v2274_v44  ;;  %v12428_v61 = vld [vmem:[#allocation2 + $0x39] sm:$0xff] }
 0x215   : > { %v12317_v37 = vmul.f32 %v12314_v22, %v1881_v0  ;;  %v2589_v44 = vld [vmem:[#allocation2 + $0x40] sm:$0xff] }
 0x216   : > { %v2009_v11 = vld [vmem:[#allocation2 + $0x5e] sm:$0xff] }
 0x217   : > { %v1985_v45 = vld [vmem:[#allocation2 + $0x5d] sm:$0xff]  ;;  %1973 = vst.msk [vmem:[#allocation2 + $0x70] sm:$0xf] %vm1972_vm4, %v12317_v37  ;;  %v2016_v19 = vpack.c.bf16 %v2009_v11, %v2008_v23 }
 0x218   : > { %v1992_v42 = vpack.c.bf16 %v1985_v45, %v1984_v26  ;;  %v2010_v25 = vld [vmem:[#allocation2 + $0x66] sm:$0xf] }
 0x219   : > { %9920 = vmatmul.mubr.msk.bf16.gmra.mrb[128].mxu1 %vm546_vm3, %v2016_v19  ;;  %v1986_v29 = vld [vmem:[#allocation2 + $0x65] sm:$0xf]  ;;  %v2017_v18 = vpack.c.bf16 %v2010_v25, %v2010_v25 }
 0x21a   : > { %9952 = vmatmul.mubr.msk.bf16.gmra.mrb[164].mxu0 %vm546_vm3, %v1992_v42  ;;  %9923 = vmatprep.mubr.msk.bf16.mxu1 %vm11411_vm1, %v11410_v3  ;;  %v1993_v49 = vpack.c.bf16 %v1986_v29, %v1986_v29  ;;  %v2276_v0 = vld [vmem:[#allocation2 + $0x5f] sm:$0xff]  ;;  %v2435_v23 = vld [vmem:[#allocation2 + $0x67] sm:$0xff] }
 0x21b   : > { %9955 = vmatprep.mubr.msk.bf16.mxu0 %vm11411_vm1, %v11410_v3  ;;  %v2283_v11 = vpack.c.bf16 %v2276_v0, %v2433_v6  ;;  %v2442_v26 = vpack.c.bf16 %v2435_v23, %v2276_v0  ;;  %v2277_v45 = vld [vmem:[#allocation2 + $0x67] sm:$0xf]  ;;  %v2584_v29 = vld [vmem:[#allocation2 + $0x18] sm:$0xff] }
 0x21c   : > { %v2284_v42 = vpack.c.bf16 %v2277_v45, %v2277_v45  ;;  %v2748_v6 = vld [vmem:[#allocation2 + $0x41] sm:$0xff]  ;;  %v2592_v0 = vld [vmem:[#allocation2 + $0x58] sm:$0xff] }
 0x21d   : > { %v12449_v23 = vld [vmem:[#allocation2 + $0x59] sm:$0xff] }
 0x21e   : > { %v2436_v19 = vld [vmem:[#allocation2 + $0x6f] sm:$0xf] }
 0x21f   : > { %v2443_v25 = vpack.c.bf16 %v2436_v19, %v2436_v19 }
 0x221   : > { %9924 = vmatmul.mubr.msk.bf16.gmra.mrb[132].mxu1 %vm546_vm3, %v2017_v18  ;;  %v12391_v18 = vld [vmem:[#allocation2 + $0x19] sm:$0xff] }
 0x222   : > { %9956 = vmatmul.mubr.msk.bf16.gmra.mrb[168].mxu0 %vm546_vm3, %v1993_v49  ;;  %9963 = vmatprep.mubr.msk.bf16.mxu1 %vm11411_vm1, %v11410_v3  ;;  %v2583_v49 = vld [vmem:[#allocation2 + $0x10] sm:$0xff]  ;;  %v2755_v60 = vpack.c.bf16 %v12391_v18, %v2742_v30 }
 0x223   : > { %9995 = vmatprep.mubr.msk.bf16.mxu0 %vm11411_vm1, %v11410_v3  ;;  %v2596_v57 = vpack.c.bf16 %v2584_v29, %v2583_v49  ;;  %v2593_v29 = vld [vmem:[#allocation2 + $0x60] sm:$0xff] }
 0x224   : > { %v2752_v49 = vld [vmem:[#allocation2 + $0x61] sm:$0xff] }
 0x229   : > { %9964 = vmatmul.mubr.msk.bf16.vlgmr.msra.gmra.mrb[136].mxu1 %vm546_vm3, %v2278_v40  ;;  %v11280_v40 = vld [vmem:[%s14686_s3 + $0x60] sm:$0xff]  }
 0x22a   : > { %9996 = vmatmul.mubr.msk.bf16.vlgmr.msra.gmra.mrb[172].mxu0 %vm546_vm3, %v2437_v43  ;;  %9967 = vmatprep.mubr.msk.bf16.mxu1 %vm11411_vm1, %v11410_v3  ;;  %v11282_v43 = vld [vmem:[%s14686_s3 + $0x70] sm:$0xff]  }
 0x22b   : > { %9999 = vmatprep.mubr.msk.bf16.mxu0 %vm11411_vm1, %v11410_v3  ;;  %10024 = vmatpush3.bf16.msra.mxu1 %v11276_v48  ;;  %v11281_v48 = vld [vmem:[%s14686_s3 + $0x68] sm:$0xff]  }
 0x22c   : > { %10056 = vmatpush3.bf16.msra.mxu0 %v11278_v7  ;;  %10025 = vmatprep.subr.bf16.mxu1 %v11410_v3  ;;  %v11283_v7 = vld [vmem:[%s14686_s3 + $0x78] sm:$0xff]  }
 0x22d   : > { %10057 = vmatprep.subr.bf16.mxu0 %v11410_v3 }
 0x22f   : > { %10026 = vmatpush3.bf16.msra.mxu1 %v11277_v16  ;;  %v2586_v16 = vld [vmem:[#allocation2 + $0x28] sm:$0xff] }
 0x230   : > { %10058 = vmatpush3.bf16.msra.mxu0 %v11279_v51  ;;  %10087 = vmatprep.subr.bf16.mxu1 %v11410_v3  ;;  %v12412_v51 = vld [vmem:[#allocation2 + $0x29] sm:$0xff] }
 0x231   : > { %10119 = vmatprep.subr.bf16.mxu0 %v11410_v3  ;;  %9968 = vmatmul.mubr.msk.bf16.gmra.mrb[140].mxu1 %vm546_vm3, %v2279_v36  ;;  %v2597_v36 = vpack.c.bf16 %v2586_v16, %v2585_v54  ;;  %v3060_v16 = vld [vmem:[#allocation2 + $0x1a] sm:$0xff]  ;;  %v2914_v54 = vpack.c.bf16 %v12416_v31, %v12391_v18  ;;  %v11285_v18 = vld [vmem:[%s14686_s3 + $0x88] sm:$0xff]  }
 0x232   : > { %10000 = vmatmul.mubr.msk.bf16.gmra.mrb[176].mxu0 %vm546_vm3, %v2438_v39  ;;  %9971 = vmatprep.mubr.msk.bf16.mxu1 %vm11411_vm1, %v11410_v3  ;;  %v2756_v39 = vpack.c.bf16 %v12412_v51, %v12416_v31  ;;  %v3063_v31 = vld [vmem:[#allocation2 + $0x32] sm:$0xff] }
 0x233   : > { %10003 = vmatprep.mubr.msk.bf16.mxu0 %vm11411_vm1, %v11410_v3 }
 0x239   : > { %9972 = vmatmul.mubr.msk.bf16.gmra.mrb[144].mxu1 %vm546_vm3, %v2280_v32  ;;  %v2587_v32 = vld [vmem:[#allocation2 + $0x30] sm:$0xff] }
 0x23a   : > { %10004 = vmatmul.mubr.msk.bf16.gmra.mrb[180].mxu0 %vm546_vm3, %v2439_v24  ;;  %9975 = vmatprep.mubr.msk.bf16.mxu1 %vm11411_vm1, %v11410_v3  ;;  %v12430_v24 = vld [vmem:[#allocation2 + $0x31] sm:$0xff]  ;;  %v2598_v2 = vpack.c.bf16 %v2588_v56, %v2587_v32 }
 0x23b   : > { %10007 = vmatprep.mubr.msk.bf16.mxu0 %vm11411_vm1, %v11410_v3  ;;  %v2757_v10 = vpack.c.bf16 %v12428_v61, %v12430_v24  ;;  %v3062_v56 = vld [vmem:[#allocation2 + $0x2a] sm:$0xff]  ;;  %v2915_v32 = vpack.c.bf16 %v12430_v24, %v12412_v51  ;;  %v3067_v51 = vld [vmem:[#allocation2 + $0x52] sm:$0xff] }
 0x23c   : > { %v3066_v24 = vld [vmem:[#allocation2 + $0x4a] sm:$0xff] }
 0x241   : > { %9976 = vmatmul.mubr.msk.bf16.gmra.mrb[148].mxu1 %vm546_vm3, %v2281_v27  ;;  %v2590_v27 = vld [vmem:[#allocation2 + $0x48] sm:$0xff] }
 0x242   : > { %10008 = vmatmul.mubr.msk.bf16.gmra.mrb[184].mxu0 %vm546_vm3, %v2440_v14  ;;  %9979 = vmatprep.mubr.msk.bf16.mxu1 %vm11411_vm1, %v11410_v3  ;;  %v12440_v14 = vld [vmem:[#allocation2 + $0x49] sm:$0xff] }
 0x243   : > { %10011 = vmatprep.mubr.msk.bf16.mxu0 %vm11411_vm1, %v11410_v3 }
 0x249   : > { %9980 = vmatmul.mubr.msk.bf16.gmra.mrb[152].mxu1 %vm546_vm3, %v2282_v17  ;;  %v2599_v17 = vpack.c.bf16 %v2590_v27, %v2589_v44  ;;  %v3064_v27 = vld [vmem:[#allocation2 + $0x3a] sm:$0xff]  ;;  %v2916_v44 = vpack.c.bf16 %v2748_v6, %v12428_v61  ;;  %v3069_v61 = vld [vmem:[#allocation2 + $0x62] sm:$0xff] }
 0x24a   : > { %10012 = vmatmul.mubr.msk.bf16.gmra.mrb[188].mxu0 %vm546_vm3, %v2441_v20  ;;  %9983 = vmatprep.mubr.msk.bf16.mxu1 %vm11411_vm1, %v11410_v3  ;;  %v2758_v20 = vpack.c.bf16 %v12440_v14, %v2748_v6  ;;  %v3068_v6 = vld [vmem:[#allocation2 + $0x5a] sm:$0xff] }
 0x24b   : > { %10015 = vmatprep.mubr.msk.bf16.mxu0 %vm11411_vm1, %v11410_v3 }
 0x251   : > { %9984 = vmatmul.mubr.msk.bf16.gmra.mrb[156].mxu1 %vm546_vm3, %v2283_v11  ;;  %v2591_v11 = vld [vmem:[#allocation2 + $0x50] sm:$0xff] }
 0x252   : > { %10016 = vmatmul.mubr.msk.bf16.gmra.mrb[192].mxu0 %vm546_vm3, %v2442_v26  ;;  %9987 = vmatprep.mubr.msk.bf16.mxu1 %vm11411_vm1, %v11410_v3  ;;  %v2750_v26 = vld [vmem:[#allocation2 + $0x51] sm:$0xff]  ;;  %v2600_v45 = vpack.c.bf16 %v2592_v0, %v2591_v11  ;;  %v3076_v0 = vpack.c.bf16 %v3067_v51, %v3066_v24  ;;  %v2918_v11 = vpack.c.bf16 %v2752_v49, %v12449_v23 }
 0x253   : > { %10019 = vmatprep.mubr.msk.bf16.mxu0 %vm11411_vm1, %v11410_v3  ;;  %v2759_v19 = vpack.c.bf16 %v12449_v23, %v2750_v26  ;;  %v2913_v23 = vld [vmem:[#allocation2 + $0x79] sm:$0xf] }
 0x259   : > { %9988 = vmatmul.mubr.msk.bf16.gmra.mrb[160].mxu1 %vm546_vm3, %v2284_v42  ;;  %v2594_v42 = vld [vmem:[#allocation2 + $0x68] sm:$0xff] }
 0x25a   : > { %10020 = vmatmul.mubr.msk.bf16.gmra.mrb[196].mxu0 %vm546_vm3, %v2443_v25  ;;  %10027 = vmatprep.mubr.msk.bf16.mxu1 %vm11411_vm1, %v11410_v3  ;;  %v12458_v25 = vld [vmem:[#allocation2 + $0x69] sm:$0xff]  ;;  %v2601_v30 = vpack.c.bf16 %v2594_v42, %v2593_v29 }
 0x25b   : > { %10059 = vmatprep.mubr.msk.bf16.mxu0 %vm11411_vm1, %v11410_v3 }
 0x261   : > { %10028 = vmatmul.mubr.msk.bf16.vlgmr.msra.gmra.mrb[164].mxu1 %vm546_vm3, %v2596_v57  ;;  %v2760_v57 = vpack.c.bf16 %v12458_v25, %v2752_v49  ;;  %v3072_v49 = vld [vmem:[#allocation2 + $0x7a] sm:$0xf] }
 0x262   : > { %10060 = vmatmul.mubr.msk.bf16.vlgmr.msra.gmra.mrb[200].mxu0 %vm546_vm3, %v2755_v60  ;;  %10031 = vmatprep.mubr.msk.bf16.mxu1 %vm11411_vm1, %v11410_v3  ;;  %v2595_v60 = vld [vmem:[#allocation2 + $0x70] sm:$0xf] }
 0x263   : > { %10063 = vmatprep.mubr.msk.bf16.mxu0 %vm11411_vm1, %v11410_v3  ;;  %10088 = vmatpush3.bf16.msra.mxu1 %v11280_v40  ;;  %v2754_v40 = vld [vmem:[#allocation2 + $0x71] sm:$0xf] }
 0x264   : > { %10120 = vmatpush3.bf16.msra.mxu0 %v11282_v43  ;;  %10089 = vmatprep.subr.bf16.mxu1 %v11410_v3  ;;  %v2602_v43 = vpack.c.bf16 %v2595_v60, %v2595_v60 }
 0x265   : > { %10121 = vmatprep.subr.bf16.mxu0 %v11410_v3 }
 0x267   : > { %10090 = vmatpush3.bf16.msra.mxu1 %v11281_v48  ;;  %v2761_v48 = vpack.c.bf16 %v2754_v40, %v2754_v40 }
 0x268   : > { %10122 = vmatpush3.bf16.msra.mxu0 %v11283_v7  ;;  %10151 = vmatprep.subr.bf16.mxu1 %v11410_v3  ;;  %v3061_v7 = vld [vmem:[#allocation2 + $0x22] sm:$0xff] }
 0x269   : > { %10183 = vmatprep.subr.bf16.mxu0 %v11410_v3  ;;  %10032 = vmatmul.mubr.msk.bf16.gmra.mrb[168].mxu1 %vm546_vm3, %v2597_v36  ;;  %v3073_v36 = vpack.c.bf16 %v3061_v7, %v3060_v16 }
 0x26a   : > { %10064 = vmatmul.mubr.msk.bf16.gmra.mrb[204].mxu0 %vm546_vm3, %v2756_v39  ;;  %10035 = vmatprep.mubr.msk.bf16.mxu1 %vm11411_vm1, %v11410_v3  ;;  %v11284_v39 = vld [vmem:[%s14686_s3 + $0x80] sm:$0xff]  }
 0x26b   : > { %10067 = vmatprep.mubr.msk.bf16.mxu0 %vm11411_vm1, %v11410_v3 }
 0x271   : > { %10036 = vmatmul.mubr.msk.bf16.gmra.mrb[172].mxu1 %vm546_vm3, %v2598_v2  ;;  %v3074_v2 = vpack.c.bf16 %v3063_v31, %v3062_v56  ;;  %v3220_v56 = vld [vmem:[#allocation2 + $0x23] sm:$0xff] }
 0x272   : > { %10068 = vmatmul.mubr.msk.bf16.gmra.mrb[208].mxu0 %vm546_vm3, %v2757_v10  ;;  %10039 = vmatprep.mubr.msk.bf16.mxu1 %vm11411_vm1, %v11410_v3  ;;  %v3065_v10 = vld [vmem:[#allocation2 + $0x42] sm:$0xff] }
 0x273   : > { %10071 = vmatprep.mubr.msk.bf16.mxu0 %vm11411_vm1, %v11410_v3 }
 0x279   : > { %10040 = vmatmul.mubr.msk.bf16.gmra.mrb[176].mxu1 %vm546_vm3, %v2599_v17  ;;  %v3075_v17 = vpack.c.bf16 %v3065_v10, %v3064_v27 }
 0x27a   : > { %10072 = vmatmul.mubr.msk.bf16.gmra.mrb[212].mxu0 %vm546_vm3, %v2758_v20  ;;  %10043 = vmatprep.mubr.msk.bf16.mxu1 %vm11411_vm1, %v11410_v3  ;;  %v2917_v20 = vpack.c.bf16 %v2750_v26, %v12440_v14  ;;  %v2912_v14 = vld [vmem:[#allocation2 + $0x71] sm:$0xff] }
 0x27b   : > { %10075 = vmatprep.mubr.msk.bf16.mxu0 %vm11411_vm1, %v11410_v3  ;;  %v3070_v26 = vld [vmem:[#allocation2 + $0x6a] sm:$0xff]  ;;  %v2919_v42 = vpack.c.bf16 %v2912_v14, %v12458_v25  ;;  %v2920_v25 = vpack.c.bf16 %v2913_v23, %v2913_v23 }
 0x281   : > { %10044 = vmatmul.mubr.msk.bf16.gmra.mrb[180].mxu1 %vm546_vm3, %v2600_v45  ;;  %v3077_v45 = vpack.c.bf16 %v3069_v61, %v3068_v6 }
 0x282   : > { %10076 = vmatmul.mubr.msk.bf16.gmra.mrb[216].mxu0 %vm546_vm3, %v2759_v19  ;;  %10047 = vmatprep.mubr.msk.bf16.mxu1 %vm11411_vm1, %v11410_v3  ;;  %v3071_v19 = vld [vmem:[#allocation2 + $0x72] sm:$0xff] }
 0x283   : > { %10079 = vmatprep.mubr.msk.bf16.mxu0 %vm11411_vm1, %v11410_v3  ;;  %v3078_v29 = vpack.c.bf16 %v3071_v19, %v3070_v26 }
 0x289   : > { %10048 = vmatmul.mubr.msk.bf16.gmra.mrb[184].mxu1 %vm546_vm3, %v2601_v30 }
 0x28a   : > { %10080 = vmatmul.mubr.msk.bf16.gmra.mrb[220].mxu0 %vm546_vm3, %v2760_v57  ;;  %10051 = vmatprep.mubr.msk.bf16.mxu1 %vm11411_vm1, %v11410_v3 }
 0x28b   : > { %10083 = vmatprep.mubr.msk.bf16.mxu0 %vm11411_vm1, %v11410_v3 }
 0x291   : > { %10052 = vmatmul.mubr.msk.bf16.gmra.mrb[188].mxu1 %vm546_vm3, %v2602_v43 }
 0x292   : > { %10084 = vmatmul.mubr.msk.bf16.gmra.mrb[224].mxu0 %vm546_vm3, %v2761_v48  ;;  %10091 = vmatprep.mubr.msk.bf16.mxu1 %vm11411_vm1, %v11410_v3  ;;  %v3079_v48 = vpack.c.bf16 %v3072_v49, %v3072_v49 }
 0x293   : > { %10123 = vmatprep.mubr.msk.bf16.mxu0 %vm11411_vm1, %v11410_v3 }
 0x299   : > { %10092 = vmatmul.mubr.msk.bf16.vlgmr.msra.gmra.mrb[192].mxu1 %vm546_vm3, %v2914_v54 }
 0x29a   : > { %10124 = vmatmul.mubr.msk.bf16.vlgmr.msra.gmra.mrb[228].mxu0 %vm546_vm3, %v3073_v36  ;;  %10095 = vmatprep.mubr.msk.bf16.mxu1 %vm11411_vm1, %v11410_v3 }
 0x29b   : > { %10127 = vmatprep.mubr.msk.bf16.mxu0 %vm11411_vm1, %v11410_v3  ;;  %10152 = vmatpush3.bf16.msra.mxu1 %v11284_v39 }
 0x29c   : > { %10153 = vmatprep.subr.bf16.mxu1 %v11410_v3 }
 0x29f   : > { %10154 = vmatpush3.bf16.msra.mxu1 %v11285_v18 }
 0x2a0   : > { %10215 = vmatprep.subr.bf16.mxu1 %v11410_v3 }
 0x2a1   : > { %10096 = vmatmul.mubr.msk.bf16.gmra.mrb[196].mxu1 %vm546_vm3, %v2915_v32 }
 0x2a2   : > { %10128 = vmatmul.mubr.msk.bf16.gmra.mrb[232].mxu0 %vm546_vm3, %v3074_v2  ;;  %10099 = vmatprep.mubr.msk.bf16.mxu1 %vm11411_vm1, %v11410_v3 }
 0x2a3   : > { %10131 = vmatprep.mubr.msk.bf16.mxu0 %vm11411_vm1, %v11410_v3 }
 0x2a9   : > { %10100 = vmatmul.mubr.msk.bf16.gmra.mrb[200].mxu1 %vm546_vm3, %v2916_v44 }
 0x2aa   : > { %10132 = vmatmul.mubr.msk.bf16.gmra.mrb[236].mxu0 %vm546_vm3, %v3075_v17  ;;  %10103 = vmatprep.mubr.msk.bf16.mxu1 %vm11411_vm1, %v11410_v3  ;;  %v3219_v17 = vld [vmem:[#allocation2 + $0x1b] sm:$0xff] }
 0x2ab   : > { %10135 = vmatprep.mubr.msk.bf16.mxu0 %vm11411_vm1, %v11410_v3 }
 0x2b1   : > { %10104 = vmatmul.mubr.msk.bf16.gmra.mrb[204].mxu1 %vm546_vm3, %v2917_v20 }
 0x2b2   : > { %10136 = vmatmul.mubr.msk.bf16.gmra.mrb[240].mxu0 %vm546_vm3, %v3076_v0  ;;  %10107 = vmatprep.mubr.msk.bf16.mxu1 %vm11411_vm1, %v11410_v3  ;;  %v3232_v0 = vpack.c.bf16 %v3220_v56, %v3219_v17  ;;  %v3226_v17 = vld [vmem:[#allocation2 + $0x53] sm:$0xff] }
 0x2b3   : > { %10139 = vmatprep.mubr.msk.bf16.mxu0 %vm11411_vm1, %v11410_v3 }
 0x2b9   : > { %10108 = vmatmul.mubr.msk.bf16.gmra.mrb[208].mxu1 %vm546_vm3, %v2918_v11  ;;  %v3222_v11 = vld [vmem:[#allocation2 + $0x33] sm:$0xff] }
 0x2ba   : > { %10140 = vmatmul.mubr.msk.bf16.gmra.mrb[244].mxu0 %vm546_vm3, %v3077_v45  ;;  %10111 = vmatprep.mubr.msk.bf16.mxu1 %vm11411_vm1, %v11410_v3 }
 0x2bb   : > { %10143 = vmatprep.mubr.msk.bf16.mxu0 %vm11411_vm1, %v11410_v3 }
 0x2c1   : > { %10112 = vmatmul.mubr.msk.bf16.gmra.mrb[212].mxu1 %vm546_vm3, %v2919_v42 }
 0x2c2   : > { %10144 = vmatmul.mubr.msk.bf16.gmra.mrb[248].mxu0 %vm546_vm3, %v3078_v29  ;;  %10115 = vmatprep.mubr.msk.bf16.mxu1 %vm11411_vm1, %v11410_v3  ;;  %v3221_v29 = vld [vmem:[#allocation2 + $0x2b] sm:$0xff] }
 0x2c3   : > { %10147 = vmatprep.mubr.msk.bf16.mxu0 %vm11411_vm1, %v11410_v3 }
 0x2c4   : > { %v2090_v30 = vpop.f32.mrb[108].mxu1 }
 0x2c5   : > { %v2211_v57 = vpop.f32.mrb[144].mxu0  ;;  %v9901_v40 = vpop.f32.mrb[109].mxu1 }
 0x2c6   : > { %v12525_v60 = vadd.f32 %v2211_v57, %v2090_v30  ;;  %v9933_v43 = vpop.f32.mrb[145].mxu0  ;;  %v2093_v7 = vpop.f32.mrb[110].mxu1  ;;  %v3233_v57 = vpack.c.bf16 %v3222_v11, %v3221_v29  ;;  %v3225_v11 = vld [vmem:[#allocation2 + $0x4b] sm:$0xff] }
 0x2c7   : > { %v2214_v16 = vpop.f32.mrb[146].mxu0  ;;  %v9902_v36 = vpop.f32.mrb[111].mxu1 }
 0x2c8   : > { %v12527_v54 = vadd.f32 %v2214_v16, %v2093_v7  ;;  %v9934_v39 = vpop.f32.mrb[147].mxu0 }
 0x2c9   : > { %10116 = vmatmul.mubr.msk.bf16.gmra.mrb[216].mxu1 %vm546_vm3, %v2920_v25  ;;  %v3224_v25 = vld [vmem:[#allocation2 + $0x43] sm:$0xff] }
 0x2ca   : > { %10148 = vmatmul.mubr.msk.bf16.gmra.mrb[252].mxu0 %vm546_vm3, %v3079_v48  ;;  %10155 = vmatprep.mubr.msk.bf16.mxu1 %vm11411_vm1, %v11410_v3 }
 0x2cb   : > { %10187 = vmatprep.mubr.msk.bf16.mxu0 %vm11411_vm1, %v11410_v3 }
 0x2cc   : > { %v2098_v18 = vpop.f32.mrb[112].mxu1 }
 0x2cd   : > { %v2219_v31 = vpop.f32.mrb[148].mxu0  ;;  %v9905_v2 = vpop.f32.mrb[113].mxu1 }
 0x2ce   : > { %v12535_v32 = vadd.f32 %v2219_v31, %v2098_v18  ;;  %v9937_v10 = vpop.f32.mrb[149].mxu0  ;;  %v2101_v27 = vpop.f32.mrb[114].mxu1  ;;  %v3223_v18 = vld [vmem:[#allocation2 + $0x3b] sm:$0xff] }
 0x2cf   : > { %v2222_v44 = vpop.f32.mrb[150].mxu0  ;;  %v9906_v24 = vpop.f32.mrb[115].mxu1  ;;  %v3234_v10 = vpack.c.bf16 %v3224_v25, %v3223_v18 }
 0x2d0   : > { %v12537_v51 = vadd.f32 %v2222_v44, %v2101_v27  ;;  %v9938_v20 = vpop.f32.mrb[151].mxu0 }
 0x2d1   : > { %10156 = vmatmul.mubr.msk.bf16.vlgmr.msra.gmra.mrb[220].mxu1 %vm546_vm3, %v3232_v0 }
 0x2d2   : > { %10159 = vmatprep.mubr.msk.bf16.mxu1 %vm11411_vm1, %v11410_v3 }
 0x2d4   : > { %v2106_v61 = vpop.f32.mrb[116].mxu1 }
 0x2d5   : > { %v2227_v6 = vpop.f32.mrb[152].mxu0  ;;  %v9909_v14 = vpop.f32.mrb[117].mxu1 }
 0x2d6   : > { %v12542_v45 = vadd.f32 %v2227_v6, %v2106_v61  ;;  %v9941_v26 = vpop.f32.mrb[153].mxu0  ;;  %v2109_v19 = vpop.f32.mrb[118].mxu1 }
 0x2d7   : > { %v2230_v42 = vpop.f32.mrb[154].mxu0  ;;  %v9910_v49 = vpop.f32.mrb[119].mxu1 }
 0x2d8   : > { %v12544_v23 = vadd.f32 %v2230_v42, %v2109_v19  ;;  %v9942_v30 = vpop.f32.mrb[155].mxu0  ;;  %v3235_v42 = vpack.c.bf16 %v3226_v17, %v3225_v11 }
 0x2d9   : > { %10160 = vmatmul.mubr.msk.bf16.gmra.mrb[224].mxu1 %vm546_vm3, %v3233_v57  ;;  %v3228_v30 = vld [vmem:[#allocation2 + $0x63] sm:$0xff] }
 0x2da   : > { %10163 = vmatprep.mubr.msk.bf16.mxu1 %vm11411_vm1, %v11410_v3 }
 0x2dc   : > { %v2114_v40 = vpop.f32.mrb[120].mxu1 }
 0x2dd   : > { %v2235_v43 = vpop.f32.mrb[156].mxu0  ;;  %v9913_v7 = vpop.f32.mrb[121].mxu1 }
 0x2de   : > { %v12549_v48 = vadd.f32 %v2235_v43, %v2114_v40  ;;  %v9945_v16 = vpop.f32.mrb[157].mxu0  ;;  %v2117_v36 = vpop.f32.mrb[122].mxu1 }
 0x2df   : > { %v2238_v39 = vpop.f32.mrb[158].mxu0  ;;  %v9914_v56 = vpop.f32.mrb[123].mxu1  ;;  %v3227_v16 = vld [vmem:[#allocation2 + $0x5b] sm:$0xff] }
 0x2e0   : > { %v12551_v31 = vadd.f32 %v2238_v39, %v2117_v36  ;;  %v9946_v2 = vpop.f32.mrb[159].mxu0  ;;  %v3236_v56 = vpack.c.bf16 %v3228_v30, %v3227_v16 }
 0x2e1   : > { %10164 = vmatmul.mubr.msk.bf16.gmra.mrb[228].mxu1 %vm546_vm3, %v3234_v10 }
 0x2e2   : > { %10167 = vmatprep.mubr.msk.bf16.mxu1 %vm11411_vm1, %v11410_v3 }
 0x2e4   : > { %v2122_v27 = vpop.f32.mrb[124].mxu1 }
 0x2e5   : > { %v2243_v44 = vpop.f32.mrb[160].mxu0  ;;  %v9917_v20 = vpop.f32.mrb[125].mxu1 }
 0x2e6   : > { %v12556_v24 = vadd.f32 %v2243_v44, %v2122_v27  ;;  %v9949_v0 = vpop.f32.mrb[161].mxu0  ;;  %v2125_v61 = vpop.f32.mrb[126].mxu1  ;;  %v3229_v27 = vld [vmem:[#allocation2 + $0x6b] sm:$0xff]  ;;  %v3230_v44 = vld [vmem:[#allocation2 + $0x73] sm:$0xff] }
 0x2e7   : > { %v2246_v6 = vpop.f32.mrb[162].mxu0  ;;  %v9918_v26 = vpop.f32.mrb[127].mxu1 }
 0x2e8   : > { %v12558_v14 = vadd.f32 %v2246_v6, %v2125_v61  ;;  %v9950_v19 = vpop.f32.mrb[163].mxu0 }
 0x2e9   : > { %10168 = vmatmul.mubr.msk.bf16.gmra.mrb[232].mxu1 %vm546_vm3, %v3235_v42  ;;  %v3237_v19 = vpack.c.bf16 %v3230_v44, %v3229_v27  ;;  %v3231_v42 = vld [vmem:[#allocation2 + $0x7b] sm:$0xf] }
 0x2ea   : > { %10171 = vmatprep.mubr.msk.bf16.mxu1 %vm11411_vm1, %v11410_v3 }
 0x2ec   : > { %v2130_v29 = vpop.f32.mrb[128].mxu1 }
 0x2ed   : > { %v2251_v49 = vpop.f32.mrb[164].mxu0  ;;  %v9921_v40 = vpop.f32.mrb[129].mxu1 }
 0x2ee   : > { %v12563_v57 = vadd.f32 %v2251_v49, %v2130_v29  ;;  %v9953_v43 = vpop.f32.mrb[165].mxu0  ;;  %v2133_v25 = vpop.f32.mrb[130].mxu1 }
 0x2ef   : > { %v2254_v7 = vpop.f32.mrb[166].mxu0  ;;  %v9922_v39 = vpop.f32.mrb[131].mxu1 }
 0x2f0   : > { %v12565_v36 = vadd.f32 %v2254_v7, %v2133_v25  ;;  %v9954_v18 = vpop.f32.mrb[167].mxu0  ;;  %v3238_v25 = vpack.c.bf16 %v3231_v42, %v3231_v42 }
 0x2f1   : > { %10172 = vmatmul.mubr.msk.bf16.gmra.mrb[236].mxu1 %vm546_vm3, %v3236_v56 }
 0x2f2   : > { %10175 = vmatprep.mubr.msk.bf16.mxu1 %vm11411_vm1, %v11410_v3 }
 0x2f4   : > { %v2138_v2 = vpop.f32.mrb[132].mxu1 }
 0x2f5   : > { %v2259_v10 = vpop.f32.mrb[168].mxu0  ;;  %v9925_v20 = vpop.f32.mrb[133].mxu1 }
 0x2f6   : > { %v12570_v17 = vadd.f32 %v2259_v10, %v2138_v2  ;;  %v9957_v0 = vpop.f32.mrb[169].mxu0  ;;  %v2141_v61 = vpop.f32.mrb[134].mxu1 }
 0x2f7   : > { %v2262_v6 = vpop.f32.mrb[170].mxu0  ;;  %v9926_v11 = vpop.f32.mrb[135].mxu1 }
 0x2f8   : > { %v9958_v26 = vpop.f32.mrb[171].mxu0 }
 0x2f9   : > { %10176 = vmatmul.mubr.msk.bf16.gmra.mrb[240].mxu1 %vm546_vm3, %v3237_v19 }
 0x2fa   : > { %10179 = vmatprep.mubr.msk.bf16.mxu1 %vm11411_vm1, %v11410_v3 }
 0x2fc   : > { %v2357_v29 = vpop.f32.mrb[136].mxu1 }
 0x2fd   : > { %v2516_v49 = vpop.f32.mrb[172].mxu0  ;;  %v2411_v30 = vadd.f32 %v2357_v29, %v12525_v60  ;;  %v9965_v40 = vpop.f32.mrb[137].mxu1  ;;  %v11286_v29 = vld [vmem:[%s14686_s3 + $0xa0] sm:$0xff]  }
 0x2fe   : > { %v9997_v43 = vpop.f32.mrb[173].mxu0  ;;  %v2360_v7 = vpop.f32.mrb[138].mxu1  ;;  %10184 = vmatpush3.bf16.msra.mxu0 %v11286_v29 }
 0x2ff   : > { %v2519_v16 = vpop.f32.mrb[174].mxu0  ;;  %v12576_v39 = vadd.f32 %v2516_v49, %v2411_v30  ;;  %v2412_v18 = vadd.f32 %v2360_v7, %v12527_v54  ;;  %v9966_v56 = vpop.f32.mrb[139].mxu1  ;;  %10185 = vmatprep.subr.bf16.mxu0 %v11410_v3 }
 0x300   : > { %v9998_v2 = vpop.f32.mrb[175].mxu0 }
 0x301   : > { %v12579_v10 = vadd.f32 %v2519_v16, %v2412_v18  ;;  %10180 = vmatmul.mubr.msk.bf16.gmra.mrb[244].mxu1 %vm546_vm3, %v3238_v25 }
 0x302   : > { %10219 = vmatprep.mubr.msk.bf16.mxu1 %vm11411_vm1, %v11410_v3 }
 0x304   : > { %v2365_v27 = vpop.f32.mrb[140].mxu1 }
 0x305   : > { %v2524_v60 = vpop.f32.mrb[176].mxu0  ;;  %v2413_v44 = vadd.f32 %v2365_v27, %v12535_v32  ;;  %v9969_v20 = vpop.f32.mrb[141].mxu1 }
 0x306   : > { %v10001_v0 = vpop.f32.mrb[177].mxu0  ;;  %v2368_v61 = vpop.f32.mrb[142].mxu1 }
 0x307   : > { %v2527_v6 = vpop.f32.mrb[178].mxu0  ;;  %v12585_v11 = vadd.f32 %v2524_v60, %v2413_v44  ;;  %v2414_v54 = vadd.f32 %v2368_v61, %v12537_v51  ;;  %v9970_v26 = vpop.f32.mrb[143].mxu1 }
 0x308   : > { %v10002_v19 = vpop.f32.mrb[179].mxu0 }
 0x309   : > { %v12588_v42 = vadd.f32 %v2527_v6, %v2414_v54 }
 0x30c   : > { %v2373_v49 = vpop.f32.mrb[144].mxu1 }
 0x30d   : > { %v2532_v30 = vpop.f32.mrb[180].mxu0  ;;  %v2415_v32 = vadd.f32 %v2373_v49, %v12542_v45  ;;  %v9973_v40 = vpop.f32.mrb[145].mxu1 }
 0x30e   : > { %v10005_v43 = vpop.f32.mrb[181].mxu0  ;;  %v2376_v25 = vpop.f32.mrb[146].mxu1 }
 0x30f   : > { %v2535_v7 = vpop.f32.mrb[182].mxu0  ;;  %v12595_v51 = vadd.f32 %v2532_v30, %v2415_v32  ;;  %v2416_v16 = vadd.f32 %v2376_v25, %v12544_v23  ;;  %v9974_v18 = vpop.f32.mrb[147].mxu1 }
 0x310   : > { %v10006_v56 = vpop.f32.mrb[183].mxu0 }
 0x311   : > { %v12598_v2 = vadd.f32 %v2535_v7, %v2416_v16 }
 0x314   : > { %v2381_v27 = vpop.f32.mrb[148].mxu1 }
 0x315   : > { %v2540_v60 = vpop.f32.mrb[184].mxu0  ;;  %v2417_v44 = vadd.f32 %v2381_v27, %v12549_v48  ;;  %v9977_v20 = vpop.f32.mrb[149].mxu1 }
 0x316   : > { %v10009_v0 = vpop.f32.mrb[185].mxu0  ;;  %v2384_v61 = vpop.f32.mrb[150].mxu1 }
 0x317   : > { %v2543_v45 = vpop.f32.mrb[186].mxu0  ;;  %v12601_v6 = vadd.f32 %v2540_v60, %v2417_v44  ;;  %v2418_v54 = vadd.f32 %v2384_v61, %v12551_v31  ;;  %v9978_v26 = vpop.f32.mrb[151].mxu1 }
 0x318   : > { %v10010_v19 = vpop.f32.mrb[187].mxu0 }
 0x319   : > { %v12604_v29 = vadd.f32 %v2543_v45, %v2418_v54 }
 0x31c   : > { %v2389_v23 = vpop.f32.mrb[152].mxu1 }
 0x31d   : > { %v2548_v49 = vpop.f32.mrb[188].mxu0  ;;  %v2419_v30 = vadd.f32 %v2389_v23, %v12556_v24  ;;  %v9981_v32 = vpop.f32.mrb[153].mxu1 }
 0x31e   : > { %v10013_v40 = vpop.f32.mrb[189].mxu0  ;;  %v2392_v43 = vpop.f32.mrb[154].mxu1 }
 0x31f   : > { %v2551_v48 = vpop.f32.mrb[190].mxu0  ;;  %v12607_v25 = vadd.f32 %v2548_v49, %v2419_v30  ;;  %v2420_v7 = vadd.f32 %v2392_v43, %v12558_v14  ;;  %v9982_v16 = vpop.f32.mrb[155].mxu1 }
 0x320   : > { %v10014_v18 = vpop.f32.mrb[191].mxu0  ;;  %v11288_v16 = vld [vmem:[%s14686_s3 + $0x90] sm:$0xff]  }
 0x321   : > { %v12610_v56 = vadd.f32 %v2551_v48, %v2420_v7  ;;  %10216 = vmatpush3.bf16.msra.mxu1 %v11288_v16 }
 0x322   : > { %10217 = vmatprep.subr.bf16.mxu1 %v11410_v3 }
 0x324   : > { %v2397_v31 = vpop.f32.mrb[156].mxu1 }
 0x325   : > { %v2556_v27 = vpop.f32.mrb[192].mxu0  ;;  %v2421_v60 = vadd.f32 %v2397_v31, %v12563_v57  ;;  %v9985_v44 = vpop.f32.mrb[157].mxu1  ;;  %v11287_v57 = vld [vmem:[%s14686_s3 + $0xa8] sm:$0xff]  }
 0x326   : > { %v10017_v20 = vpop.f32.mrb[193].mxu0  ;;  %v2400_v0 = vpop.f32.mrb[158].mxu1  ;;  %10186 = vmatpush3.bf16.msra.mxu0 %v11287_v57 }
 0x327   : > { %v2559_v24 = vpop.f32.mrb[194].mxu0  ;;  %v12613_v61 = vadd.f32 %v2556_v27, %v2421_v60  ;;  %v2422_v45 = vadd.f32 %v2400_v0, %v12565_v36  ;;  %v9986_v54 = vpop.f32.mrb[159].mxu1  ;;  %10247 = vmatprep.subr.bf16.mxu0 %v11410_v3  ;;  %v11289_v0 = vld [vmem:[%s14686_s3 + $0x98] sm:$0xff]  }
 0x328   : > { %v10018_v26 = vpop.f32.mrb[195].mxu0  ;;  %10218 = vmatpush3.bf16.msra.mxu1 %v11289_v0 }
 0x329   : > { %v12616_v19 = vadd.f32 %v2559_v24, %v2422_v45  ;;  %10279 = vmatprep.subr.bf16.mxu1 %v11410_v3 }
 0x32c   : > { %v2405_v14 = vpop.f32.mrb[160].mxu1 }
 0x32d   : > { %v2564_v23 = vpop.f32.mrb[196].mxu0  ;;  %v2423_v49 = vadd.f32 %v2405_v14, %v12570_v17  ;;  %v9989_v30 = vpop.f32.mrb[161].mxu1 }
 0x32e   : > { %v10021_v32 = vpop.f32.mrb[197].mxu0  ;;  %v2408_v40 = vpop.f32.mrb[162].mxu1 }
 0x32f   : > { %v2567_v43 = vpop.f32.mrb[198].mxu0  ;;  %v12622_v48 = vadd.f32 %v2564_v23, %v2423_v49  ;;  %v9990_v7 = vpop.f32.mrb[163].mxu1 }
 0x330   : > { %v10022_v36 = vpop.f32.mrb[199].mxu0 }
 0x334   : > { %v2675_v17 = vpop.f32.mrb[164].mxu1 }
 0x335   : > { %v2834_v18 = vpop.f32.mrb[200].mxu0  ;;  %v2729_v31 = vadd.f32 %v2675_v17, %v12576_v39  ;;  %v10029_v27 = vpop.f32.mrb[165].mxu1 }
 0x336   : > { %v10061_v60 = vpop.f32.mrb[201].mxu0  ;;  %v2678_v44 = vpop.f32.mrb[166].mxu1 }
 0x337   : > { %v2837_v20 = vpop.f32.mrb[202].mxu0  ;;  %v12633_v24 = vadd.f32 %v2834_v18, %v2729_v31  ;;  %v2730_v45 = vadd.f32 %v2678_v44, %v12579_v10  ;;  %v10030_v54 = vpop.f32.mrb[167].mxu1 }
 0x338   : > { %v10062_v26 = vpop.f32.mrb[203].mxu0 }
 0x339   : > { %v12636_v14 = vadd.f32 %v2837_v20, %v2730_v45 }
 0x33c   : > { %v2683_v39 = vpop.f32.mrb[168].mxu1 }
 0x33d   : > { %v2842_v23 = vpop.f32.mrb[204].mxu0  ;;  %v2731_v49 = vadd.f32 %v2683_v39, %v12585_v11  ;;  %v10033_v30 = vpop.f32.mrb[169].mxu1 }
 0x33e   : > { %v10065_v32 = vpop.f32.mrb[205].mxu0  ;;  %v2686_v57 = vpop.f32.mrb[170].mxu1 }
 0x33f   : > { %v2845_v40 = vpop.f32.mrb[206].mxu0  ;;  %v12640_v43 = vadd.f32 %v2842_v23, %v2731_v49  ;;  %v2732_v7 = vadd.f32 %v2686_v57, %v12588_v42  ;;  %v10034_v10 = vpop.f32.mrb[171].mxu1 }
 0x340   : > { %v10066_v36 = vpop.f32.mrb[207].mxu0 }
 0x341   : > { %v12643_v16 = vadd.f32 %v2845_v40, %v2732_v7 }
 0x344   : > { %v2691_v17 = vpop.f32.mrb[172].mxu1 }
 0x345   : > { %v2850_v18 = vpop.f32.mrb[208].mxu0  ;;  %v2733_v31 = vadd.f32 %v2691_v17, %v12595_v51  ;;  %v10037_v27 = vpop.f32.mrb[173].mxu1 }
 0x346   : > { %v10069_v60 = vpop.f32.mrb[209].mxu0  ;;  %v2694_v44 = vpop.f32.mrb[174].mxu1 }
 0x347   : > { %v2853_v11 = vpop.f32.mrb[210].mxu0  ;;  %v12646_v20 = vadd.f32 %v2850_v18, %v2733_v31  ;;  %v2734_v0 = vadd.f32 %v2694_v44, %v12598_v2  ;;  %v10038_v45 = vpop.f32.mrb[175].mxu1 }
 0x348   : > { %v10070_v54 = vpop.f32.mrb[211].mxu0 }
 0x349   : > { %v12649_v26 = vadd.f32 %v2853_v11, %v2734_v0 }
 0x34c   : > { %v2699_v42 = vpop.f32.mrb[176].mxu1 }
 0x34d   : > { %v2858_v39 = vpop.f32.mrb[212].mxu0  ;;  %v2735_v23 = vadd.f32 %v2699_v42, %v12601_v6  ;;  %v10041_v49 = vpop.f32.mrb[177].mxu1 }
 0x34e   : > { %v10073_v30 = vpop.f32.mrb[213].mxu0  ;;  %v2702_v32 = vpop.f32.mrb[178].mxu1 }
 0x34f   : > { %v2861_v51 = vpop.f32.mrb[214].mxu0  ;;  %v12652_v57 = vadd.f32 %v2858_v39, %v2735_v23  ;;  %v2736_v40 = vadd.f32 %v2702_v32, %v12604_v29  ;;  %v10042_v7 = vpop.f32.mrb[179].mxu1 }
 0x350   : > { %v10074_v10 = vpop.f32.mrb[215].mxu0 }
 0x351   : > { %v12655_v36 = vadd.f32 %v2861_v51, %v2736_v40 }
 0x354   : > { %v2707_v2 = vpop.f32.mrb[180].mxu1 }
 0x355   : > { %v2866_v17 = vpop.f32.mrb[216].mxu0  ;;  %v2737_v18 = vadd.f32 %v2707_v2, %v12607_v25  ;;  %v10045_v31 = vpop.f32.mrb[181].mxu1 }
 0x356   : > { %v10077_v27 = vpop.f32.mrb[217].mxu0  ;;  %v2710_v60 = vpop.f32.mrb[182].mxu1 }
 0x357   : > { %v2869_v6 = vpop.f32.mrb[218].mxu0  ;;  %v12658_v44 = vadd.f32 %v2866_v17, %v2737_v18  ;;  %v2738_v11 = vadd.f32 %v2710_v60, %v12610_v56  ;;  %v10046_v0 = vpop.f32.mrb[183].mxu1 }
 0x358   : > { %v10078_v45 = vpop.f32.mrb[219].mxu0 }
 0x359   : > { %v12661_v54 = vadd.f32 %v2869_v6, %v2738_v11 }
 0x35c   : > { %v2715_v29 = vpop.f32.mrb[184].mxu1 }
 0x35d   : > { %v2874_v42 = vpop.f32.mrb[220].mxu0  ;;  %v2739_v39 = vadd.f32 %v2715_v29, %v12613_v61  ;;  %v10049_v23 = vpop.f32.mrb[185].mxu1 }
 0x35e   : > { %v10081_v49 = vpop.f32.mrb[221].mxu0  ;;  %v2718_v30 = vpop.f32.mrb[186].mxu1 }
 0x35f   : > { %v2877_v25 = vpop.f32.mrb[222].mxu0  ;;  %v12664_v32 = vadd.f32 %v2874_v42, %v2739_v39  ;;  %v2740_v51 = vadd.f32 %v2718_v30, %v12616_v19  ;;  %v10050_v40 = vpop.f32.mrb[187].mxu1 }
 0x360   : > { %v10082_v7 = vpop.f32.mrb[223].mxu0 }
 0x361   : > { %v12667_v10 = vadd.f32 %v2877_v25, %v2740_v51 }
 0x364   : > { %v2723_v56 = vpop.f32.mrb[188].mxu1 }
 0x365   : > { %v2882_v2 = vpop.f32.mrb[224].mxu0  ;;  %v2741_v17 = vadd.f32 %v2723_v56, %v12622_v48  ;;  %v10053_v18 = vpop.f32.mrb[189].mxu1 }
 0x366   : > { %v10085_v31 = vpop.f32.mrb[225].mxu0  ;;  %v2726_v27 = vpop.f32.mrb[190].mxu1 }
 0x367   : > { %v2885_v61 = vpop.f32.mrb[226].mxu0  ;;  %v12670_v60 = vadd.f32 %v2882_v2, %v2741_v17  ;;  %v10054_v6 = vpop.f32.mrb[191].mxu1 }
 0x368   : > { %v10086_v11 = vpop.f32.mrb[227].mxu0 }
 0x36c   : > { %v2993_v0 = vpop.f32.mrb[192].mxu1 }
 0x36d   : > { %v3152_v45 = vpop.f32.mrb[228].mxu0  ;;  %v3047_v19 = vadd.f32 %v2993_v0, %v12633_v24  ;;  %v10093_v29 = vpop.f32.mrb[193].mxu1 }
 0x36e   : > { %v10125_v42 = vpop.f32.mrb[229].mxu0  ;;  %v2996_v39 = vpop.f32.mrb[194].mxu1 }
 0x36f   : > { %v3155_v23 = vpop.f32.mrb[230].mxu0  ;;  %v12673_v49 = vadd.f32 %v3152_v45, %v3047_v19  ;;  %v3048_v48 = vadd.f32 %v2996_v39, %v12636_v14  ;;  %v10094_v30 = vpop.f32.mrb[195].mxu1 }
 0x370   : > { %v10126_v25 = vpop.f32.mrb[231].mxu0 }
 0x371   : > { %v12676_v51 = vadd.f32 %v3155_v23, %v3048_v48 }
 0x374   : > { %v3001_v40 = vpop.f32.mrb[196].mxu1 }
 0x375   : > { %v3160_v7 = vpop.f32.mrb[232].mxu0  ;;  %v3049_v56 = vadd.f32 %v3001_v40, %v12640_v43  ;;  %v10097_v2 = vpop.f32.mrb[197].mxu1 }
 0x376   : > { %v10129_v17 = vpop.f32.mrb[233].mxu0  ;;  %v3004_v18 = vpop.f32.mrb[198].mxu1 }
 0x377   : > { %v3163_v24 = vpop.f32.mrb[234].mxu0  ;;  %v12679_v31 = vadd.f32 %v3160_v7, %v3049_v56  ;;  %v3050_v27 = vadd.f32 %v3004_v18, %v12643_v16  ;;  %v10098_v61 = vpop.f32.mrb[199].mxu1 }
 0x378   : > { %v10130_v6 = vpop.f32.mrb[235].mxu0 }
 0x379   : > { %v12682_v11 = vadd.f32 %v3163_v24, %v3050_v27 }
 0x37c   : > { %v3009_v14 = vpop.f32.mrb[200].mxu1 }
 0x37d   : > { %v3168_v0 = vpop.f32.mrb[236].mxu0  ;;  %v3051_v45 = vadd.f32 %v3009_v14, %v12646_v20  ;;  %v10101_v19 = vpop.f32.mrb[201].mxu1 }
 0x37e   : > { %v10133_v29 = vpop.f32.mrb[237].mxu0  ;;  %v3012_v42 = vpop.f32.mrb[202].mxu1 }
 0x37f   : > { %v3171_v43 = vpop.f32.mrb[238].mxu0  ;;  %v12685_v39 = vadd.f32 %v3168_v0, %v3051_v45  ;;  %v3052_v23 = vadd.f32 %v3012_v42, %v12649_v26  ;;  %v10102_v48 = vpop.f32.mrb[203].mxu1 }
 0x380   : > { %v10134_v30 = vpop.f32.mrb[239].mxu0 }
 0x381   : > { %v12688_v25 = vadd.f32 %v3171_v43, %v3052_v23 }
 0x384   : > { %v3017_v16 = vpop.f32.mrb[204].mxu1 }
 0x385   : > { %v3176_v40 = vpop.f32.mrb[240].mxu0  ;;  %v3053_v7 = vadd.f32 %v3017_v16, %v12652_v57  ;;  %v10105_v56 = vpop.f32.mrb[205].mxu1 }
 0x386   : > { %v10137_v2 = vpop.f32.mrb[241].mxu0  ;;  %v3020_v17 = vpop.f32.mrb[206].mxu1 }
 0x387   : > { %v3179_v20 = vpop.f32.mrb[242].mxu0  ;;  %v12691_v18 = vadd.f32 %v3176_v40, %v3053_v7  ;;  %v3054_v24 = vadd.f32 %v3020_v17, %v12655_v36  ;;  %v10106_v27 = vpop.f32.mrb[207].mxu1 }
 0x388   : > { %v10138_v61 = vpop.f32.mrb[243].mxu0 }
 0x389   : > { %v12694_v6 = vadd.f32 %v3179_v20, %v3054_v24 }
 0x38c   : > { %v3025_v26 = vpop.f32.mrb[208].mxu1 }
 0x38d   : > { %v3184_v14 = vpop.f32.mrb[244].mxu0  ;;  %v3055_v0 = vadd.f32 %v3025_v26, %v12658_v44  ;;  %v10109_v45 = vpop.f32.mrb[209].mxu1 }
 0x38e   : > { %v10141_v19 = vpop.f32.mrb[245].mxu0  ;;  %v3028_v29 = vpop.f32.mrb[210].mxu1 }
 0x38f   : > { %v3187_v57 = vpop.f32.mrb[246].mxu0  ;;  %v12697_v42 = vadd.f32 %v3184_v14, %v3055_v0  ;;  %v3056_v43 = vadd.f32 %v3028_v29, %v12661_v54  ;;  %v10110_v23 = vpop.f32.mrb[211].mxu1 }
 0x390   : > { %v10142_v48 = vpop.f32.mrb[247].mxu0 }
 0x391   : > { %v12700_v30 = vadd.f32 %v3187_v57, %v3056_v43 }
 0x394   : > { %v3033_v36 = vpop.f32.mrb[212].mxu1 }
 0x395   : > { %v3192_v16 = vpop.f32.mrb[248].mxu0  ;;  %v3057_v40 = vadd.f32 %v3033_v36, %v12664_v32  ;;  %v10113_v7 = vpop.f32.mrb[213].mxu1 }
 0x396   : > { %v10145_v56 = vpop.f32.mrb[249].mxu0  ;;  %v3036_v2 = vpop.f32.mrb[214].mxu1 }
 0x397   : > { %v3195_v44 = vpop.f32.mrb[250].mxu0  ;;  %v12703_v17 = vadd.f32 %v3192_v16, %v3057_v40  ;;  %v3058_v20 = vadd.f32 %v3036_v2, %v12667_v10  ;;  %v10114_v24 = vpop.f32.mrb[215].mxu1  ;;  %v12714_v10 = vld [vmem:[%s14664_s4] ss:$0 sm:$0xff] }
 0x398   : > { %v10146_v27 = vpop.f32.mrb[251].mxu0 }
 0x399   : > { %v12706_v61 = vadd.f32 %v3195_v44, %v3058_v20 }
 0x39c   : > { %v3041_v54 = vpop.f32.mrb[216].mxu1 }
 0x39d   : > { %v3200_v26 = vpop.f32.mrb[252].mxu0  ;;  %v3059_v14 = vadd.f32 %v3041_v54, %v12670_v60  ;;  %v10117_v0 = vpop.f32.mrb[217].mxu1 }
 0x39e   : > { %v10149_v45 = vpop.f32.mrb[253].mxu0  ;;  %v3044_v19 = vpop.f32.mrb[218].mxu1 }
 0x39f   : > { %v3203_v32 = vpop.f32.mrb[254].mxu0  ;;  %v12709_v29 = vadd.f32 %v3200_v26, %v3059_v14  ;;  %v10118_v57 = vpop.f32.mrb[219].mxu1 }
 0x3a0   : > { %v10150_v43 = vpop.f32.mrb[255].mxu0  ;;  %v3462_v32 = vld [vmem:[#allocation2 + $0x6] sm:$0xff] }
 0x3a1   : > { %v3437_v57 = vld [vmem:[#allocation2 + $0x5] sm:$0xff] }
 0x3a4   : > { %v3311_v23 = vpop.f32.mrb[220].mxu1 }
 0x3a5   : > { %v3365_v48 = vadd.f32 %v3311_v23, %v12673_v49  ;;  %v10157_v36 = vpop.f32.mrb[221].mxu1 }
 0x3a6   : > { %v3314_v16 = vpop.f32.mrb[222].mxu1 }
 0x3a7   : > { %v3385_v60 = vadd.f32 %v12714_v10, %v3365_v48  ;;  %v3366_v40 = vadd.f32 %v3314_v16, %v12676_v51  ;;  %v10158_v7 = vpop.f32.mrb[223].mxu1 }
 0x3a9   : > { %v3398_v56 = vmax.f32 %v3385_v60, 0.0  ;;  %v3386_v2 = vadd.f32 %v12714_v10, %v3366_v40 }
 0x3ab   : > { %v3411_v44 = vmul.f32 %v3398_v56, %v12159_v13  ;;  %v3399_v20 = vmax.f32 %v3386_v2, 0.0  ;;  %v11290_v56 = vld [vmem:[%s14686_s3 + $0xb0] sm:$0xff]   ;;  %v11292_v2 = vld [vmem:[%s14686_s3 + $0xc0] sm:$0xff]  }
 0x3ac   : > { %v3319_v24 = vpop.f32.mrb[224].mxu1 }
 0x3ad   : > { %3424 = vst.msk [vmem:[#allocation2 + $0x10] sm:$0xff] %vm546_vm3, %v3411_v44  ;;  %v3412_v27 = vmul.f32 %v3399_v20, %v12167_v21  ;;  %v3367_v49 = vadd.f32 %v3319_v24, %v12679_v31  ;;  %v10161_v54 = vpop.f32.mrb[225].mxu1 }
 0x3ae   : > { %v3322_v26 = vpop.f32.mrb[226].mxu1  ;;  %v11291_v54 = vld [vmem:[%s14686_s3 + $0xb8] sm:$0xff]  }
 0x3af   : > { %3425 = vst.msk [vmem:[#allocation2 + $0x18] sm:$0xff] %vm546_vm3, %v3412_v27  ;;  %v3387_v51 = vadd.f32 %v12714_v10, %v3367_v49  ;;  %v3368_v14 = vadd.f32 %v3322_v26, %v12682_v11  ;;  %v10162_v0 = vpop.f32.mrb[227].mxu1 }
 0x3b1   : > { %v3400_v45 = vmax.f32 %v3387_v51, 0.0  ;;  %v3388_v19 = vadd.f32 %v12714_v10, %v3368_v14 }
 0x3b3   : > { %v3413_v43 = vmul.f32 %v3400_v45, %v12175_v63  ;;  %v3401_v23 = vmax.f32 %v3388_v19, 0.0 }
 0x3b4   : > { %v3327_v48 = vpop.f32.mrb[228].mxu1  ;;  %v3463_v36 = vld [vmem:[#allocation2 + $0xe] sm:$0xff] }
 0x3b5   : > { %v3438_v31 = vld [vmem:[#allocation2 + $0xd] sm:$0xff]  ;;  %3426 = vst.msk [vmem:[#allocation2 + $0x20] sm:$0xff] %vm546_vm3, %v3413_v43  ;;  %v3414_v16 = vmul.f32 %v3401_v23, %v12185_v12  ;;  %v3369_v60 = vadd.f32 %v3327_v48, %v12685_v39  ;;  %v10165_v40 = vpop.f32.mrb[229].mxu1  ;;  %v3475_v11 = vpack.c.bf16 %v3463_v36, %v3462_v32 }
 0x3b6   : > { %v3450_v7 = vpack.c.bf16 %v3438_v31, %v3437_v57  ;;  %v3330_v44 = vpop.f32.mrb[230].mxu1  ;;  %v3464_v14 = vld [vmem:[#allocation2 + $0x16] sm:$0xff] }
 0x3b7   : > { %3427 = vst.msk [vmem:[#allocation2 + $0x28] sm:$0xff] %vm546_vm3, %v3414_v16  ;;  %v3389_v20 = vadd.f32 %v12714_v10, %v3369_v60  ;;  %v3370_v24 = vadd.f32 %v3330_v44, %v12688_v25  ;;  %v10166_v27 = vpop.f32.mrb[231].mxu1  ;;  %10188 = vmatmul.mubr.msk.bf16.vlgmr.msra.gmra.mrb[0].mxu0 %vm546_vm3, %v3475_v11  ;;  %v11293_v25 = vld [vmem:[%s14686_s3 + $0xc8] sm:$0xff]   ;;  %v3439_v19 = vld [vmem:[#allocation2 + $0x15] sm:$0xff] }
 0x3b8   : > { %10220 = vmatmul.mubr.msk.bf16.vlgmr.msra.gmra.mrb[248].mxu1 %vm546_vm3, %v3450_v7  ;;  %10191 = vmatprep.mubr.msk.bf16.mxu0 %vm11411_vm1, %v11410_v3 }
 0x3b9   : > { %10223 = vmatprep.mubr.msk.bf16.mxu1 %vm11411_vm1, %v11410_v3  ;;  %v3402_v39 = vmax.f32 %v3389_v20, 0.0  ;;  %v3390_v49 = vadd.f32 %v12714_v10, %v3370_v24  ;;  %10248 = vmatpush3.bf16.msra.mxu0 %v11290_v56 }
 0x3ba   : > { %10280 = vmatpush3.bf16.msra.mxu1 %v11292_v2  ;;  %10249 = vmatprep.subr.bf16.mxu0 %v11410_v3 }
 0x3bb   : > { %10281 = vmatprep.subr.bf16.mxu1 %v11410_v3  ;;  %v3415_v26 = vmul.f32 %v3402_v39, %v12213_v1  ;;  %v3403_v51 = vmax.f32 %v3390_v49, 0.0 }
 0x3bc   : > { %v3335_v0 = vpop.f32.mrb[232].mxu1  ;;  %v3465_v45 = vld [vmem:[#allocation2 + $0x1e] sm:$0xff] }
 0x3bd   : > { %v3440_v32 = vld [vmem:[#allocation2 + $0x1d] sm:$0xff]  ;;  %3428 = vst.msk [vmem:[#allocation2 + $0x30] sm:$0xff] %vm546_vm3, %v3415_v26  ;;  %v3416_v57 = vmul.f32 %v3403_v51, %v12223_v41  ;;  %v3371_v43 = vadd.f32 %v3335_v0, %v12691_v18  ;;  %v10169_v23 = vpop.f32.mrb[233].mxu1  ;;  %v3476_v48 = vpack.c.bf16 %v3465_v45, %v3464_v14  ;;  %10250 = vmatpush3.bf16.msra.mxu0 %v11291_v54 }
 0x3be   : > { %v3451_v36 = vpack.c.bf16 %v3440_v32, %v3439_v19  ;;  %v3338_v31 = vpop.f32.mrb[234].mxu1  ;;  %10282 = vmatpush3.bf16.msra.mxu1 %v11293_v25  ;;  %10311 = vmatprep.subr.bf16.mxu0 %v11410_v3  ;;  %v3441_v20 = vld [vmem:[#allocation2 + $0x25] sm:$0xff] }
 0x3bf   : > { %3429 = vst.msk [vmem:[#allocation2 + $0x38] sm:$0xff] %vm546_vm3, %v3416_v57  ;;  %v3391_v16 = vadd.f32 %v12714_v10, %v3371_v43  ;;  %v3372_v60 = vadd.f32 %v3338_v31, %v12694_v6  ;;  %v10170_v40 = vpop.f32.mrb[235].mxu1  ;;  %10192 = vmatmul.mubr.msk.bf16.gmra.mrb[4].mxu0 %vm546_vm3, %v3476_v48  ;;  %10343 = vmatprep.subr.bf16.mxu1 %v11410_v3  ;;  %v3466_v6 = vld [vmem:[#allocation2 + $0x26] sm:$0xff] }
 0x3c0   : > { %10224 = vmatmul.mubr.msk.bf16.gmra.mrb[252].mxu1 %vm546_vm3, %v3451_v36  ;;  %10195 = vmatprep.mubr.msk.bf16.mxu0 %vm11411_vm1, %v11410_v3 }
 0x3c1   : > { %10227 = vmatprep.mubr.msk.bf16.mxu1 %vm11411_vm1, %v11410_v3  ;;  %v3404_v18 = vmax.f32 %v3391_v16, 0.0  ;;  %v3392_v11 = vadd.f32 %v12714_v10, %v3372_v60 }
 0x3c3   : > { %v3417_v7 = vmul.f32 %v3404_v18, %v12244_v35  ;;  %v3405_v56 = vmax.f32 %v3392_v11, 0.0 }
 0x3c4   : > { %v3343_v2 = vpop.f32.mrb[236].mxu1  ;;  %v3467_v44 = vld [vmem:[#allocation2 + $0x2e] sm:$0xff] }
 0x3c5   : > { %v3442_v24 = vld [vmem:[#allocation2 + $0x2d] sm:$0xff]  ;;  %3430 = vst.msk [vmem:[#allocation2 + $0x40] sm:$0xff] %vm546_vm3, %v3417_v7  ;;  %v3418_v27 = vmul.f32 %v3405_v56, %v12249_v8  ;;  %v3373_v39 = vadd.f32 %v3343_v2, %v12697_v42  ;;  %v10173_v49 = vpop.f32.mrb[237].mxu1  ;;  %v3477_v54 = vpack.c.bf16 %v3467_v44, %v3466_v6 }
 0x3c6   : > { %v3452_v25 = vpack.c.bf16 %v3442_v24, %v3441_v20  ;;  %v3346_v26 = vpop.f32.mrb[238].mxu1  ;;  %v3468_v57 = vld [vmem:[#allocation2 + $0x36] sm:$0xff] }
 0x3c7   : > { %3431 = vst.msk [vmem:[#allocation2 + $0x48] sm:$0xff] %vm546_vm3, %v3418_v27  ;;  %v3393_v51 = vadd.f32 %v12714_v10, %v3373_v39  ;;  %v3374_v14 = vadd.f32 %v3346_v26, %v12700_v30  ;;  %v10174_v0 = vpop.f32.mrb[239].mxu1  ;;  %10196 = vmatmul.mubr.msk.bf16.gmra.mrb[8].mxu0 %vm546_vm3, %v3477_v54  ;;  %v3443_v23 = vld [vmem:[#allocation2 + $0x35] sm:$0xff] }
 0x3c8   : > { %10228 = vmatmul.mubr.msk.bf16.gmra.mrb[0].mxu1 %vm546_vm3, %v3452_v25  ;;  %10199 = vmatprep.mubr.msk.bf16.mxu0 %vm11411_vm1, %v11410_v3 }
 0x3c9   : > { %10231 = vmatprep.mubr.msk.bf16.mxu1 %vm11411_vm1, %v11410_v3  ;;  %v3406_v42 = vmax.f32 %v3393_v51, 0.0  ;;  %v3394_v45 = vadd.f32 %v12714_v10, %v3374_v14 }
 0x3cb   : > { %v3419_v19 = vmul.f32 %v3406_v42, %v12268_v47  ;;  %v3407_v32 = vmax.f32 %v3394_v45, 0.0 }
 0x3cc   : > { %v3351_v43 = vpop.f32.mrb[240].mxu1  ;;  %v3469_v30 = vld [vmem:[#allocation2 + $0x3e] sm:$0xff] }
 0x3cd   : > { %v3444_v48 = vld [vmem:[#allocation2 + $0x3d] sm:$0xff]  ;;  %3432 = vst.msk [vmem:[#allocation2 + $0x50] sm:$0xff] %vm546_vm3, %v3419_v19  ;;  %v3420_v36 = vmul.f32 %v3407_v32, %v12273_v38  ;;  %v3375_v31 = vadd.f32 %v3351_v43, %v12703_v17  ;;  %v10177_v16 = vpop.f32.mrb[241].mxu1  ;;  %v3478_v60 = vpack.c.bf16 %v3469_v30, %v3468_v57 }
 0x3ce   : > { %v3453_v40 = vpack.c.bf16 %v3444_v48, %v3443_v23  ;;  %v3354_v18 = vpop.f32.mrb[242].mxu1  ;;  %v3470_v20 = vld [vmem:[#allocation2 + $0x46] sm:$0xff] }
 0x3cf   : > { %3433 = vst.msk [vmem:[#allocation2 + $0x58] sm:$0xff] %vm546_vm3, %v3420_v36  ;;  %v3395_v11 = vadd.f32 %v12714_v10, %v3375_v31  ;;  %v3376_v7 = vadd.f32 %v3354_v18, %v12706_v61  ;;  %v10178_v56 = vpop.f32.mrb[243].mxu1  ;;  %10200 = vmatmul.mubr.msk.bf16.gmra.mrb[12].mxu0 %vm546_vm3, %v3478_v60  ;;  %v3445_v27 = vld [vmem:[#allocation2 + $0x45] sm:$0xff]  ;;  %v3730_v60 = vld [vmem:[#allocation2 + $0xf] sm:$0xff] }
 0x3d0   : > { %10232 = vmatmul.mubr.msk.bf16.gmra.mrb[4].mxu1 %vm546_vm3, %v3453_v40  ;;  %10203 = vmatprep.mubr.msk.bf16.mxu0 %vm11411_vm1, %v11410_v3  ;;  %v3729_v16 = vld [vmem:[#allocation2 + $0x7] sm:$0xff]  ;;  %v3889_v40 = vld [vmem:[#allocation2 + $0x17] sm:$0xff] }
 0x3d1   : > { %10235 = vmatprep.mubr.msk.bf16.mxu1 %vm11411_vm1, %v11410_v3  ;;  %v3408_v17 = vmax.f32 %v3395_v11, 0.0  ;;  %v3396_v6 = vadd.f32 %v12714_v10, %v3376_v7  ;;  %v3742_v18 = vpack.c.bf16 %v3730_v60, %v3729_v16  ;;  %v3901_v11 = vpack.c.bf16 %v3889_v40, %v3730_v60  ;;  %v11294_v7 = vld [vmem:[%s14686_s3 + $0xd0] sm:$0xff]   ;;  %v11296_v56 = vld [vmem:[%s14686_s3 + $0xe0] sm:$0xff]  }
 0x3d2   : > { %v4206_v16 = vld [vmem:[#allocation2 + $0x11] sm:$0xff] }
 0x3d3   : > { %v3421_v2 = vmul.f32 %v3408_v17, %v12292_v52  ;;  %v3409_v44 = vmax.f32 %v3396_v6, 0.0  ;;  %v11295_v17 = vld [vmem:[%s14686_s3 + $0xd8] sm:$0xff]   ;;  %v11297_v6 = vld [vmem:[%s14686_s3 + $0xe8] sm:$0xff]  }
 0x3d4   : > { %v3359_v24 = vpop.f32.mrb[244].mxu1  ;;  %v3471_v61 = vld [vmem:[#allocation2 + $0x4e] sm:$0xff] }
 0x3d5   : > { %v3446_v39 = vld [vmem:[#allocation2 + $0x4d] sm:$0xff]  ;;  %3434 = vst.msk [vmem:[#allocation2 + $0x60] sm:$0xff] %vm546_vm3, %v3421_v2  ;;  %v3422_v49 = vmul.f32 %v3409_v44, %v12297_v59  ;;  %v3377_v54 = vadd.f32 %v3359_v24, %v12709_v29  ;;  %v3479_v25 = vpack.c.bf16 %v3471_v61, %v3470_v20  ;;  %v10181_v51 = vpop.f32.mrb[245].mxu1  ;;  %v3732_v2 = vld [vmem:[#allocation2 + $0x1f] sm:$0xff] }
 0x3d6   : > { %v3454_v26 = vpack.c.bf16 %v3446_v39, %v3445_v27  ;;  %v3362_v14 = vpop.f32.mrb[246].mxu1  ;;  %v3472_v19 = vld [vmem:[#allocation2 + $0x56] sm:$0xff]  ;;  %v3891_v44 = vld [vmem:[#allocation2 + $0x27] sm:$0xff]  ;;  %v3743_v20 = vpack.c.bf16 %v3732_v2, %v3889_v40 }
 0x3d7   : > { %3435 = vst.msk [vmem:[#allocation2 + $0x68] sm:$0xff] %vm546_vm3, %v3422_v49  ;;  %v3397_v0 = vadd.f32 %v12714_v10, %v3377_v54  ;;  %10204 = vmatmul.mubr.msk.bf16.gmra.mrb[16].mxu0 %vm546_vm3, %v3479_v25  ;;  %v10182_v42 = vpop.f32.mrb[247].mxu1  ;;  %v3447_v57 = vld [vmem:[#allocation2 + $0x55] sm:$0xff]  ;;  %v3902_v24 = vpack.c.bf16 %v3891_v44, %v3732_v2  ;;  %v3736_v54 = vld [vmem:[#allocation2 + $0x3f] sm:$0xff]  ;;  %v3895_v25 = vld [vmem:[#allocation2 + $0x47] sm:$0xff] }
 0x3d8   : > { %10236 = vmatmul.mubr.msk.bf16.gmra.mrb[8].mxu1 %vm546_vm3, %v3454_v26  ;;  %10207 = vmatprep.mubr.msk.bf16.mxu0 %vm11411_vm1, %v11410_v3  ;;  %v3734_v61 = vld [vmem:[#allocation2 + $0x2f] sm:$0xff]  ;;  %v3893_v27 = vld [vmem:[#allocation2 + $0x37] sm:$0xff]  ;;  %v3904_v51 = vpack.c.bf16 %v3895_v25, %v3736_v54  ;;  %v4049_v2 = vld [vmem:[#allocation2 + $0x20] sm:$0xff] }
 0x3d9   : > { %10239 = vmatprep.mubr.msk.bf16.mxu1 %vm11411_vm1, %v11410_v3  ;;  %v3410_v29 = vmax.f32 %v3397_v0, 0.0  ;;  %v3744_v39 = vpack.c.bf16 %v3734_v61, %v3891_v44  ;;  %v3903_v49 = vpack.c.bf16 %v3893_v27, %v3734_v61  ;;  %v3745_v26 = vpack.c.bf16 %v3736_v54, %v3893_v27  ;;  %v3738_v14 = vld [vmem:[#allocation2 + $0x4f] sm:$0xff]  ;;  %v3897_v0 = vld [vmem:[#allocation2 + $0x57] sm:$0xff]  ;;  %v12909_v44 = vld [vmem:[#allocation2 + $0x21] sm:$0xff] }
 0x3da   : > { %v3746_v42 = vpack.c.bf16 %v3738_v14, %v3895_v25  ;;  %v4052_v61 = vld [vmem:[#allocation2 + $0x38] sm:$0xff] }
 0x3db   : > { %v3423_v45 = vmul.f32 %v3410_v29, %v12314_v22  ;;  %v3905_v29 = vpack.c.bf16 %v3897_v0, %v3738_v14  ;;  %v12921_v27 = vld [vmem:[#allocation2 + $0x39] sm:$0xff] }
 0x3dc   : > { %v3473_v32 = vld [vmem:[#allocation2 + $0x5e] sm:$0xff] }
 0x3dd   : > { %v3448_v43 = vld [vmem:[#allocation2 + $0x5d] sm:$0xff]  ;;  %3436 = vst.msk [vmem:[#allocation2 + $0x70] sm:$0xf] %vm1972_vm4, %v3423_v45  ;;  %v3480_v10 = vpack.c.bf16 %v3473_v32, %v3472_v19 }
 0x3de   : > { %v3455_v30 = vpack.c.bf16 %v3448_v43, %v3447_v57  ;;  %v3474_v23 = vld [vmem:[#allocation2 + $0x66] sm:$0xf] }
 0x3df   : > { %10208 = vmatmul.mubr.msk.bf16.gmra.mrb[20].mxu0 %vm546_vm3, %v3480_v10  ;;  %v3449_v48 = vld [vmem:[#allocation2 + $0x65] sm:$0xf]  ;;  %v3481_v36 = vpack.c.bf16 %v3474_v23, %v3474_v23 }
 0x3e0   : > { %10240 = vmatmul.mubr.msk.bf16.gmra.mrb[12].mxu1 %vm546_vm3, %v3455_v30  ;;  %10211 = vmatprep.mubr.msk.bf16.mxu0 %vm11411_vm1, %v11410_v3  ;;  %v3456_v31 = vpack.c.bf16 %v3449_v48, %v3449_v48  ;;  %v3740_v45 = vld [vmem:[#allocation2 + $0x5f] sm:$0xff]  ;;  %v3899_v19 = vld [vmem:[#allocation2 + $0x67] sm:$0xff] }
 0x3e1   : > { %10243 = vmatprep.mubr.msk.bf16.mxu1 %vm11411_vm1, %v11410_v3  ;;  %v3747_v32 = vpack.c.bf16 %v3740_v45, %v3897_v0  ;;  %v3906_v57 = vpack.c.bf16 %v3899_v19, %v3740_v45  ;;  %v3741_v43 = vld [vmem:[#allocation2 + $0x67] sm:$0xf]  ;;  %v4048_v48 = vld [vmem:[#allocation2 + $0x18] sm:$0xff] }
 0x3e2   : > { %v3748_v30 = vpack.c.bf16 %v3741_v43, %v3741_v43  ;;  %v4053_v14 = vld [vmem:[#allocation2 + $0x40] sm:$0xff]  ;;  %v4056_v45 = vld [vmem:[#allocation2 + $0x58] sm:$0xff] }
 0x3e3   : > { %v4212_v0 = vld [vmem:[#allocation2 + $0x41] sm:$0xff]  ;;  %v12942_v19 = vld [vmem:[#allocation2 + $0x59] sm:$0xff] }
 0x3e4   : > { %v3900_v10 = vld [vmem:[#allocation2 + $0x6f] sm:$0xf] }
 0x3e5   : > { %v3907_v23 = vpack.c.bf16 %v3900_v10, %v3900_v10 }
 0x3e7   : > { %10212 = vmatmul.mubr.msk.bf16.gmra.mrb[24].mxu0 %vm546_vm3, %v3481_v36  ;;  %v12884_v36 = vld [vmem:[#allocation2 + $0x19] sm:$0xff] }
 0x3e8   : > { %10244 = vmatmul.mubr.msk.bf16.gmra.mrb[16].mxu1 %vm546_vm3, %v3456_v31  ;;  %10251 = vmatprep.mubr.msk.bf16.mxu0 %vm11411_vm1, %v11410_v3  ;;  %v4047_v31 = vld [vmem:[#allocation2 + $0x10] sm:$0xff]  ;;  %v4219_v40 = vpack.c.bf16 %v12884_v36, %v4206_v16 }
 0x3e9   : > { %10283 = vmatprep.mubr.msk.bf16.mxu1 %vm11411_vm1, %v11410_v3  ;;  %v4060_v60 = vpack.c.bf16 %v4048_v48, %v4047_v31  ;;  %v4057_v48 = vld [vmem:[#allocation2 + $0x60] sm:$0xff] }
 0x3ea   : > { %v4216_v31 = vld [vmem:[#allocation2 + $0x61] sm:$0xff] }
 0x3ef   : > { %10252 = vmatmul.mubr.msk.bf16.vlgmr.msra.gmra.mrb[28].mxu0 %vm546_vm3, %v3742_v18  ;;  %v11298_v18 = vld [vmem:[%s14686_s3 + $0xf0] sm:$0xff]  }
 0x3f0   : > { %10284 = vmatmul.mubr.msk.bf16.vlgmr.msra.gmra.mrb[20].mxu1 %vm546_vm3, %v3901_v11  ;;  %10255 = vmatprep.mubr.msk.bf16.mxu0 %vm11411_vm1, %v11410_v3  ;;  %v11300_v11 = vld [vmem:[%s14686_s3 + $0x100] sm:$0xff]  }
 0x3f1   : > { %10287 = vmatprep.mubr.msk.bf16.mxu1 %vm11411_vm1, %v11410_v3  ;;  %10312 = vmatpush3.bf16.msra.mxu0 %v11294_v7  ;;  %v11299_v7 = vld [vmem:[%s14686_s3 + $0xf8] sm:$0xff]  }
 0x3f2   : > { %10344 = vmatpush3.bf16.msra.mxu1 %v11296_v56  ;;  %10313 = vmatprep.subr.bf16.mxu0 %v11410_v3  ;;  %v11301_v56 = vld [vmem:[%s14686_s3 + $0x108] sm:$0xff]  }
 0x3f3   : > { %10345 = vmatprep.subr.bf16.mxu1 %v11410_v3 }
 0x3f5   : > { %10314 = vmatpush3.bf16.msra.mxu0 %v11295_v17  ;;  %v4050_v17 = vld [vmem:[#allocation2 + $0x28] sm:$0xff] }
 0x3f6   : > { %10346 = vmatpush3.bf16.msra.mxu1 %v11297_v6  ;;  %10375 = vmatprep.subr.bf16.mxu0 %v11410_v3  ;;  %v12905_v6 = vld [vmem:[#allocation2 + $0x29] sm:$0xff] }
 0x3f7   : > { %10407 = vmatprep.subr.bf16.mxu1 %v11410_v3  ;;  %10256 = vmatmul.mubr.msk.bf16.gmra.mrb[32].mxu0 %vm546_vm3, %v3743_v20  ;;  %v4061_v20 = vpack.c.bf16 %v4050_v17, %v4049_v2  ;;  %v4524_v17 = vld [vmem:[#allocation2 + $0x1a] sm:$0xff]  ;;  %v4378_v2 = vpack.c.bf16 %v12909_v44, %v12884_v36 }
 0x3f8   : > { %10288 = vmatmul.mubr.msk.bf16.gmra.mrb[24].mxu1 %vm546_vm3, %v3902_v24  ;;  %10259 = vmatprep.mubr.msk.bf16.mxu0 %vm11411_vm1, %v11410_v3  ;;  %v4220_v24 = vpack.c.bf16 %v12905_v6, %v12909_v44  ;;  %v11303_v36 = vld [vmem:[%s14686_s3 + $0x118] sm:$0xff]  }
 0x3f9   : > { %10291 = vmatprep.mubr.msk.bf16.mxu1 %vm11411_vm1, %v11410_v3  ;;  %v4527_v44 = vld [vmem:[#allocation2 + $0x32] sm:$0xff] }
 0x3ff   : > { %10260 = vmatmul.mubr.msk.bf16.gmra.mrb[36].mxu0 %vm546_vm3, %v3744_v39  ;;  %v4051_v39 = vld [vmem:[#allocation2 + $0x30] sm:$0xff] }
 0x400   : > { %10292 = vmatmul.mubr.msk.bf16.gmra.mrb[28].mxu1 %vm546_vm3, %v3903_v49  ;;  %10263 = vmatprep.mubr.msk.bf16.mxu0 %vm11411_vm1, %v11410_v3  ;;  %v12923_v49 = vld [vmem:[#allocation2 + $0x31] sm:$0xff]  ;;  %v4062_v54 = vpack.c.bf16 %v4052_v61, %v4051_v39 }
 0x401   : > { %10295 = vmatprep.mubr.msk.bf16.mxu1 %vm11411_vm1, %v11410_v3  ;;  %v4221_v25 = vpack.c.bf16 %v12921_v27, %v12923_v49  ;;  %v4526_v61 = vld [vmem:[#allocation2 + $0x2a] sm:$0xff]  ;;  %v4379_v39 = vpack.c.bf16 %v12923_v49, %v12905_v6  ;;  %v4531_v6 = vld [vmem:[#allocation2 + $0x52] sm:$0xff] }
 0x402   : > { %v4530_v49 = vld [vmem:[#allocation2 + $0x4a] sm:$0xff] }
 0x407   : > { %10264 = vmatmul.mubr.msk.bf16.gmra.mrb[40].mxu0 %vm546_vm3, %v3745_v26  ;;  %v4054_v26 = vld [vmem:[#allocation2 + $0x48] sm:$0xff] }
 0x408   : > { %10296 = vmatmul.mubr.msk.bf16.gmra.mrb[32].mxu1 %vm546_vm3, %v3904_v51  ;;  %10267 = vmatprep.mubr.msk.bf16.mxu0 %vm11411_vm1, %v11410_v3  ;;  %v12933_v51 = vld [vmem:[#allocation2 + $0x49] sm:$0xff] }
 0x409   : > { %10299 = vmatprep.mubr.msk.bf16.mxu1 %vm11411_vm1, %v11410_v3 }
 0x40f   : > { %10268 = vmatmul.mubr.msk.bf16.gmra.mrb[44].mxu0 %vm546_vm3, %v3746_v42  ;;  %v4063_v42 = vpack.c.bf16 %v4054_v26, %v4053_v14  ;;  %v4528_v26 = vld [vmem:[#allocation2 + $0x3a] sm:$0xff]  ;;  %v4380_v14 = vpack.c.bf16 %v4212_v0, %v12921_v27  ;;  %v4533_v27 = vld [vmem:[#allocation2 + $0x62] sm:$0xff] }
 0x410   : > { %10300 = vmatmul.mubr.msk.bf16.gmra.mrb[36].mxu1 %vm546_vm3, %v3905_v29  ;;  %10271 = vmatprep.mubr.msk.bf16.mxu0 %vm11411_vm1, %v11410_v3  ;;  %v4222_v29 = vpack.c.bf16 %v12933_v51, %v4212_v0  ;;  %v4532_v0 = vld [vmem:[#allocation2 + $0x5a] sm:$0xff] }
 0x411   : > { %10303 = vmatprep.mubr.msk.bf16.mxu1 %vm11411_vm1, %v11410_v3 }
 0x417   : > { %10272 = vmatmul.mubr.msk.bf16.gmra.mrb[48].mxu0 %vm546_vm3, %v3747_v32  ;;  %v4055_v32 = vld [vmem:[#allocation2 + $0x50] sm:$0xff] }
 0x418   : > { %10304 = vmatmul.mubr.msk.bf16.gmra.mrb[40].mxu1 %vm546_vm3, %v3906_v57  ;;  %10275 = vmatprep.mubr.msk.bf16.mxu0 %vm11411_vm1, %v11410_v3  ;;  %v4214_v57 = vld [vmem:[#allocation2 + $0x51] sm:$0xff]  ;;  %v4064_v43 = vpack.c.bf16 %v4056_v45, %v4055_v32  ;;  %v4540_v45 = vpack.c.bf16 %v4531_v6, %v4530_v49  ;;  %v4382_v32 = vpack.c.bf16 %v4216_v31, %v12942_v19 }
 0x419   : > { %10307 = vmatprep.mubr.msk.bf16.mxu1 %vm11411_vm1, %v11410_v3  ;;  %v4223_v10 = vpack.c.bf16 %v12942_v19, %v4214_v57  ;;  %v4377_v19 = vld [vmem:[#allocation2 + $0x79] sm:$0xf] }
 0x41f   : > { %10276 = vmatmul.mubr.msk.bf16.gmra.mrb[52].mxu0 %vm546_vm3, %v3748_v30  ;;  %v4058_v30 = vld [vmem:[#allocation2 + $0x68] sm:$0xff] }
 0x420   : > { %10308 = vmatmul.mubr.msk.bf16.gmra.mrb[44].mxu1 %vm546_vm3, %v3907_v23  ;;  %10315 = vmatprep.mubr.msk.bf16.mxu0 %vm11411_vm1, %v11410_v3  ;;  %v12951_v23 = vld [vmem:[#allocation2 + $0x69] sm:$0xff]  ;;  %v4065_v16 = vpack.c.bf16 %v4058_v30, %v4057_v48 }
 0x421   : > { %10347 = vmatprep.mubr.msk.bf16.mxu1 %vm11411_vm1, %v11410_v3 }
 0x427   : > { %10316 = vmatmul.mubr.msk.bf16.vlgmr.msra.gmra.mrb[56].mxu0 %vm546_vm3, %v4060_v60  ;;  %v4224_v60 = vpack.c.bf16 %v12951_v23, %v4216_v31  ;;  %v4536_v31 = vld [vmem:[#allocation2 + $0x7a] sm:$0xf] }
 0x428   : > { %10348 = vmatmul.mubr.msk.bf16.vlgmr.msra.gmra.mrb[48].mxu1 %vm546_vm3, %v4219_v40  ;;  %10319 = vmatprep.mubr.msk.bf16.mxu0 %vm11411_vm1, %v11410_v3  ;;  %v4059_v40 = vld [vmem:[#allocation2 + $0x70] sm:$0xf] }
 0x429   : > { %10351 = vmatprep.mubr.msk.bf16.mxu1 %vm11411_vm1, %v11410_v3  ;;  %10376 = vmatpush3.bf16.msra.mxu0 %v11298_v18  ;;  %v4218_v18 = vld [vmem:[#allocation2 + $0x71] sm:$0xf] }
 0x42a   : > { %10408 = vmatpush3.bf16.msra.mxu1 %v11300_v11  ;;  %10377 = vmatprep.subr.bf16.mxu0 %v11410_v3  ;;  %v4066_v11 = vpack.c.bf16 %v4059_v40, %v4059_v40 }
 0x42b   : > { %10409 = vmatprep.subr.bf16.mxu1 %v11410_v3 }
 0x42d   : > { %10378 = vmatpush3.bf16.msra.mxu0 %v11299_v7  ;;  %v4225_v7 = vpack.c.bf16 %v4218_v18, %v4218_v18 }
 0x42e   : > { %10410 = vmatpush3.bf16.msra.mxu1 %v11301_v56  ;;  %10439 = vmatprep.subr.bf16.mxu0 %v11410_v3  ;;  %v4525_v56 = vld [vmem:[#allocation2 + $0x22] sm:$0xff] }
 0x42f   : > { %10471 = vmatprep.subr.bf16.mxu1 %v11410_v3  ;;  %10320 = vmatmul.mubr.msk.bf16.gmra.mrb[60].mxu0 %vm546_vm3, %v4061_v20  ;;  %v4537_v20 = vpack.c.bf16 %v4525_v56, %v4524_v17 }
 0x430   : > { %10352 = vmatmul.mubr.msk.bf16.gmra.mrb[52].mxu1 %vm546_vm3, %v4220_v24  ;;  %10323 = vmatprep.mubr.msk.bf16.mxu0 %vm11411_vm1, %v11410_v3  ;;  %v11302_v24 = vld [vmem:[%s14686_s3 + $0x110] sm:$0xff]  }
 0x431   : > { %10355 = vmatprep.mubr.msk.bf16.mxu1 %vm11411_vm1, %v11410_v3 }
 0x437   : > { %10324 = vmatmul.mubr.msk.bf16.gmra.mrb[64].mxu0 %vm546_vm3, %v4062_v54  ;;  %v4538_v54 = vpack.c.bf16 %v4527_v44, %v4526_v61  ;;  %v4684_v61 = vld [vmem:[#allocation2 + $0x23] sm:$0xff] }
 0x438   : > { %10356 = vmatmul.mubr.msk.bf16.gmra.mrb[56].mxu1 %vm546_vm3, %v4221_v25  ;;  %10327 = vmatprep.mubr.msk.bf16.mxu0 %vm11411_vm1, %v11410_v3  ;;  %v4529_v25 = vld [vmem:[#allocation2 + $0x42] sm:$0xff] }
 0x439   : > { %10359 = vmatprep.mubr.msk.bf16.mxu1 %vm11411_vm1, %v11410_v3 }
 0x43f   : > { %10328 = vmatmul.mubr.msk.bf16.gmra.mrb[68].mxu0 %vm546_vm3, %v4063_v42  ;;  %v4539_v42 = vpack.c.bf16 %v4529_v25, %v4528_v26 }
 0x440   : > { %10360 = vmatmul.mubr.msk.bf16.gmra.mrb[60].mxu1 %vm546_vm3, %v4222_v29  ;;  %10331 = vmatprep.mubr.msk.bf16.mxu0 %vm11411_vm1, %v11410_v3  ;;  %v4381_v29 = vpack.c.bf16 %v4214_v57, %v12933_v51  ;;  %v4376_v51 = vld [vmem:[#allocation2 + $0x71] sm:$0xff] }
 0x441   : > { %10363 = vmatprep.mubr.msk.bf16.mxu1 %vm11411_vm1, %v11410_v3  ;;  %v4534_v57 = vld [vmem:[#allocation2 + $0x6a] sm:$0xff]  ;;  %v4383_v30 = vpack.c.bf16 %v4376_v51, %v12951_v23  ;;  %v4384_v23 = vpack.c.bf16 %v4377_v19, %v4377_v19 }
 0x447   : > { %10332 = vmatmul.mubr.msk.bf16.gmra.mrb[72].mxu0 %vm546_vm3, %v4064_v43  ;;  %v4541_v43 = vpack.c.bf16 %v4533_v27, %v4532_v0 }
 0x448   : > { %10364 = vmatmul.mubr.msk.bf16.gmra.mrb[64].mxu1 %vm546_vm3, %v4223_v10  ;;  %10335 = vmatprep.mubr.msk.bf16.mxu0 %vm11411_vm1, %v11410_v3  ;;  %v4535_v10 = vld [vmem:[#allocation2 + $0x72] sm:$0xff] }
 0x449   : > { %10367 = vmatprep.mubr.msk.bf16.mxu1 %vm11411_vm1, %v11410_v3  ;;  %v4542_v48 = vpack.c.bf16 %v4535_v10, %v4534_v57 }
 0x44f   : > { %10336 = vmatmul.mubr.msk.bf16.gmra.mrb[76].mxu0 %vm546_vm3, %v4065_v16 }
 0x450   : > { %10368 = vmatmul.mubr.msk.bf16.gmra.mrb[68].mxu1 %vm546_vm3, %v4224_v60  ;;  %10339 = vmatprep.mubr.msk.bf16.mxu0 %vm11411_vm1, %v11410_v3 }
 0x451   : > { %10371 = vmatprep.mubr.msk.bf16.mxu1 %vm11411_vm1, %v11410_v3 }
 0x457   : > { %10340 = vmatmul.mubr.msk.bf16.gmra.mrb[80].mxu0 %vm546_vm3, %v4066_v11 }
 0x458   : > { %10372 = vmatmul.mubr.msk.bf16.gmra.mrb[72].mxu1 %vm546_vm3, %v4225_v7  ;;  %10379 = vmatprep.mubr.msk.bf16.mxu0 %vm11411_vm1, %v11410_v3  ;;  %v4543_v7 = vpack.c.bf16 %v4536_v31, %v4536_v31 }
 0x459   : > { %10411 = vmatprep.mubr.msk.bf16.mxu1 %vm11411_vm1, %v11410_v3 }
 0x45f   : > { %10380 = vmatmul.mubr.msk.bf16.vlgmr.msra.gmra.mrb[84].mxu0 %vm546_vm3, %v4378_v2 }
 0x460   : > { %10412 = vmatmul.mubr.msk.bf16.vlgmr.msra.gmra.mrb[76].mxu1 %vm546_vm3, %v4537_v20  ;;  %10383 = vmatprep.mubr.msk.bf16.mxu0 %vm11411_vm1, %v11410_v3 }
 0x461   : > { %10415 = vmatprep.mubr.msk.bf16.mxu1 %vm11411_vm1, %v11410_v3  ;;  %10440 = vmatpush3.bf16.msra.mxu0 %v11302_v24 }
 0x462   : > { %10441 = vmatprep.subr.bf16.mxu0 %v11410_v3 }
 0x465   : > { %10442 = vmatpush3.bf16.msra.mxu0 %v11303_v36 }
 0x466   : > { %10503 = vmatprep.subr.bf16.mxu0 %v11410_v3 }
 0x467   : > { %10384 = vmatmul.mubr.msk.bf16.gmra.mrb[88].mxu0 %vm546_vm3, %v4379_v39 }
 0x468   : > { %10416 = vmatmul.mubr.msk.bf16.gmra.mrb[80].mxu1 %vm546_vm3, %v4538_v54  ;;  %10387 = vmatprep.mubr.msk.bf16.mxu0 %vm11411_vm1, %v11410_v3 }
 0x469   : > { %10419 = vmatprep.mubr.msk.bf16.mxu1 %vm11411_vm1, %v11410_v3 }
 0x46f   : > { %10388 = vmatmul.mubr.msk.bf16.gmra.mrb[92].mxu0 %vm546_vm3, %v4380_v14 }
 0x470   : > { %10420 = vmatmul.mubr.msk.bf16.gmra.mrb[84].mxu1 %vm546_vm3, %v4539_v42  ;;  %10391 = vmatprep.mubr.msk.bf16.mxu0 %vm11411_vm1, %v11410_v3  ;;  %v4683_v42 = vld [vmem:[#allocation2 + $0x1b] sm:$0xff] }
 0x471   : > { %10423 = vmatprep.mubr.msk.bf16.mxu1 %vm11411_vm1, %v11410_v3 }
 0x477   : > { %10392 = vmatmul.mubr.msk.bf16.gmra.mrb[96].mxu0 %vm546_vm3, %v4381_v29 }
 0x478   : > { %10424 = vmatmul.mubr.msk.bf16.gmra.mrb[88].mxu1 %vm546_vm3, %v4540_v45  ;;  %10395 = vmatprep.mubr.msk.bf16.mxu0 %vm11411_vm1, %v11410_v3  ;;  %v4696_v45 = vpack.c.bf16 %v4684_v61, %v4683_v42  ;;  %v4690_v42 = vld [vmem:[#allocation2 + $0x53] sm:$0xff] }
 0x479   : > { %10427 = vmatprep.mubr.msk.bf16.mxu1 %vm11411_vm1, %v11410_v3 }
 0x47f   : > { %10396 = vmatmul.mubr.msk.bf16.gmra.mrb[100].mxu0 %vm546_vm3, %v4382_v32  ;;  %v4686_v32 = vld [vmem:[#allocation2 + $0x33] sm:$0xff] }
 0x480   : > { %10428 = vmatmul.mubr.msk.bf16.gmra.mrb[92].mxu1 %vm546_vm3, %v4541_v43  ;;  %10399 = vmatprep.mubr.msk.bf16.mxu0 %vm11411_vm1, %v11410_v3 }
 0x481   : > { %10431 = vmatprep.mubr.msk.bf16.mxu1 %vm11411_vm1, %v11410_v3 }
 0x487   : > { %10400 = vmatmul.mubr.msk.bf16.gmra.mrb[104].mxu0 %vm546_vm3, %v4383_v30 }
 0x488   : > { %10432 = vmatmul.mubr.msk.bf16.gmra.mrb[96].mxu1 %vm546_vm3, %v4542_v48  ;;  %10403 = vmatprep.mubr.msk.bf16.mxu0 %vm11411_vm1, %v11410_v3  ;;  %v4685_v48 = vld [vmem:[#allocation2 + $0x2b] sm:$0xff] }
 0x489   : > { %10435 = vmatprep.mubr.msk.bf16.mxu1 %vm11411_vm1, %v11410_v3 }
 0x48a   : > { %v3554_v16 = vpop.f32.mrb[0].mxu0 }
 0x48b   : > { %v3675_v60 = vpop.f32.mrb[248].mxu1  ;;  %v10189_v18 = vpop.f32.mrb[1].mxu0 }
 0x48c   : > { %v13018_v40 = vadd.f32 %v3675_v60, %v3554_v16  ;;  %v10221_v11 = vpop.f32.mrb[249].mxu1  ;;  %v3557_v56 = vpop.f32.mrb[2].mxu0  ;;  %v4697_v60 = vpack.c.bf16 %v4686_v32, %v4685_v48  ;;  %v4689_v32 = vld [vmem:[#allocation2 + $0x4b] sm:$0xff] }
 0x48d   : > { %v3678_v17 = vpop.f32.mrb[250].mxu1  ;;  %v10190_v20 = vpop.f32.mrb[3].mxu0 }
 0x48e   : > { %v13020_v2 = vadd.f32 %v3678_v17, %v3557_v56  ;;  %v10222_v24 = vpop.f32.mrb[251].mxu1 }
 0x48f   : > { %10404 = vmatmul.mubr.msk.bf16.gmra.mrb[108].mxu0 %vm546_vm3, %v4384_v23  ;;  %v4688_v23 = vld [vmem:[#allocation2 + $0x43] sm:$0xff] }
 0x490   : > { %10436 = vmatmul.mubr.msk.bf16.gmra.mrb[100].mxu1 %vm546_vm3, %v4543_v7  ;;  %10443 = vmatprep.mubr.msk.bf16.mxu0 %vm11411_vm1, %v11410_v3 }
 0x491   : > { %10475 = vmatprep.mubr.msk.bf16.mxu1 %vm11411_vm1, %v11410_v3 }
 0x492   : > { %v3562_v36 = vpop.f32.mrb[4].mxu0 }
 0x493   : > { %v3683_v44 = vpop.f32.mrb[252].mxu1  ;;  %v10193_v54 = vpop.f32.mrb[5].mxu0 }
 0x494   : > { %v13028_v39 = vadd.f32 %v3683_v44, %v3562_v36  ;;  %v10225_v25 = vpop.f32.mrb[253].mxu1  ;;  %v3565_v26 = vpop.f32.mrb[6].mxu0  ;;  %v4687_v36 = vld [vmem:[#allocation2 + $0x3b] sm:$0xff] }
 0x495   : > { %v3686_v14 = vpop.f32.mrb[254].mxu1  ;;  %v10194_v49 = vpop.f32.mrb[7].mxu0  ;;  %v4698_v25 = vpack.c.bf16 %v4688_v23, %v4687_v36 }
 0x496   : > { %v13030_v6 = vadd.f32 %v3686_v14, %v3565_v26  ;;  %v10226_v29 = vpop.f32.mrb[255].mxu1 }
 0x497   : > { %10444 = vmatmul.mubr.msk.bf16.vlgmr.msra.gmra.mrb[112].mxu0 %vm546_vm3, %v4696_v45 }
 0x498   : > { %10447 = vmatprep.mubr.msk.bf16.mxu0 %vm11411_vm1, %v11410_v3 }
 0x49a   : > { %v3570_v27 = vpop.f32.mrb[8].mxu0 }
 0x49b   : > { %v3691_v0 = vpop.f32.mrb[0].mxu1  ;;  %v10197_v51 = vpop.f32.mrb[9].mxu0 }
 0x49c   : > { %v13035_v43 = vadd.f32 %v3691_v0, %v3570_v27  ;;  %v10229_v57 = vpop.f32.mrb[1].mxu1  ;;  %v3573_v10 = vpop.f32.mrb[10].mxu0 }
 0x49d   : > { %v3694_v30 = vpop.f32.mrb[2].mxu1  ;;  %v10198_v31 = vpop.f32.mrb[11].mxu0 }
 0x49e   : > { %v13037_v19 = vadd.f32 %v3694_v30, %v3573_v10  ;;  %v10230_v16 = vpop.f32.mrb[3].mxu1  ;;  %v4699_v30 = vpack.c.bf16 %v4690_v42, %v4689_v32 }
 0x49f   : > { %10448 = vmatmul.mubr.msk.bf16.gmra.mrb[116].mxu0 %vm546_vm3, %v4697_v60  ;;  %v4692_v16 = vld [vmem:[#allocation2 + $0x63] sm:$0xff] }
 0x4a0   : > { %10451 = vmatprep.mubr.msk.bf16.mxu0 %vm11411_vm1, %v11410_v3 }
 0x4a2   : > { %v3578_v18 = vpop.f32.mrb[12].mxu0 }
 0x4a3   : > { %v3699_v11 = vpop.f32.mrb[4].mxu1  ;;  %v10201_v56 = vpop.f32.mrb[13].mxu0 }
 0x4a4   : > { %v13042_v7 = vadd.f32 %v3699_v11, %v3578_v18  ;;  %v10233_v17 = vpop.f32.mrb[5].mxu1  ;;  %v3581_v20 = vpop.f32.mrb[14].mxu0 }
 0x4a5   : > { %v3702_v24 = vpop.f32.mrb[6].mxu1  ;;  %v10202_v61 = vpop.f32.mrb[15].mxu0  ;;  %v4691_v17 = vld [vmem:[#allocation2 + $0x5b] sm:$0xff] }
 0x4a6   : > { %v13044_v44 = vadd.f32 %v3702_v24, %v3581_v20  ;;  %v10234_v54 = vpop.f32.mrb[7].mxu1  ;;  %v4700_v61 = vpack.c.bf16 %v4692_v16, %v4691_v17 }
 0x4a7   : > { %10452 = vmatmul.mubr.msk.bf16.gmra.mrb[120].mxu0 %vm546_vm3, %v4698_v25 }
 0x4a8   : > { %10455 = vmatprep.mubr.msk.bf16.mxu0 %vm11411_vm1, %v11410_v3 }
 0x4aa   : > { %v3586_v26 = vpop.f32.mrb[16].mxu0 }
 0x4ab   : > { %v3707_v14 = vpop.f32.mrb[8].mxu1  ;;  %v10205_v29 = vpop.f32.mrb[17].mxu0 }
 0x4ac   : > { %v13049_v49 = vadd.f32 %v3707_v14, %v3586_v26  ;;  %v10237_v45 = vpop.f32.mrb[9].mxu1  ;;  %v3589_v27 = vpop.f32.mrb[18].mxu0  ;;  %v4693_v26 = vld [vmem:[#allocation2 + $0x6b] sm:$0xff]  ;;  %v4694_v14 = vld [vmem:[#allocation2 + $0x73] sm:$0xff] }
 0x4ad   : > { %v3710_v0 = vpop.f32.mrb[10].mxu1  ;;  %v10206_v57 = vpop.f32.mrb[19].mxu0 }
 0x4ae   : > { %v13051_v51 = vadd.f32 %v3710_v0, %v3589_v27  ;;  %v10238_v10 = vpop.f32.mrb[11].mxu1 }
 0x4af   : > { %10456 = vmatmul.mubr.msk.bf16.gmra.mrb[124].mxu0 %vm546_vm3, %v4699_v30  ;;  %v4701_v10 = vpack.c.bf16 %v4694_v14, %v4693_v26  ;;  %v4695_v30 = vld [vmem:[#allocation2 + $0x7b] sm:$0xf] }
 0x4b0   : > { %10459 = vmatprep.mubr.msk.bf16.mxu0 %vm11411_vm1, %v11410_v3 }
 0x4b2   : > { %v3594_v48 = vpop.f32.mrb[20].mxu0 }
 0x4b3   : > { %v3715_v31 = vpop.f32.mrb[12].mxu1  ;;  %v10209_v18 = vpop.f32.mrb[21].mxu0 }
 0x4b4   : > { %v13056_v60 = vadd.f32 %v3715_v31, %v3594_v48  ;;  %v10241_v11 = vpop.f32.mrb[13].mxu1  ;;  %v3597_v23 = vpop.f32.mrb[22].mxu0 }
 0x4b5   : > { %v3718_v56 = vpop.f32.mrb[14].mxu1  ;;  %v10210_v24 = vpop.f32.mrb[23].mxu0 }
 0x4b6   : > { %v13058_v20 = vadd.f32 %v3718_v56, %v3597_v23  ;;  %v10242_v36 = vpop.f32.mrb[15].mxu1  ;;  %v4702_v23 = vpack.c.bf16 %v4695_v30, %v4695_v30 }
 0x4b7   : > { %10460 = vmatmul.mubr.msk.bf16.gmra.mrb[128].mxu0 %vm546_vm3, %v4700_v61 }
 0x4b8   : > { %10463 = vmatprep.mubr.msk.bf16.mxu0 %vm11411_vm1, %v11410_v3 }
 0x4ba   : > { %v3602_v54 = vpop.f32.mrb[24].mxu0 }
 0x4bb   : > { %v3723_v25 = vpop.f32.mrb[16].mxu1  ;;  %v10213_v29 = vpop.f32.mrb[25].mxu0 }
 0x4bc   : > { %v13063_v42 = vadd.f32 %v3723_v25, %v3602_v54  ;;  %v10245_v45 = vpop.f32.mrb[17].mxu1  ;;  %v3605_v27 = vpop.f32.mrb[26].mxu0 }
 0x4bd   : > { %v3726_v0 = vpop.f32.mrb[18].mxu1  ;;  %v10214_v32 = vpop.f32.mrb[27].mxu0 }
 0x4be   : > { %v10246_v57 = vpop.f32.mrb[19].mxu1 }
 0x4bf   : > { %10464 = vmatmul.mubr.msk.bf16.gmra.mrb[132].mxu0 %vm546_vm3, %v4701_v10 }
 0x4c0   : > { %10467 = vmatprep.mubr.msk.bf16.mxu0 %vm11411_vm1, %v11410_v3 }
 0x4c2   : > { %v3821_v48 = vpop.f32.mrb[28].mxu0 }
 0x4c3   : > { %v3980_v31 = vpop.f32.mrb[20].mxu1  ;;  %v3875_v16 = vadd.f32 %v3821_v48, %v13018_v40  ;;  %v10253_v18 = vpop.f32.mrb[29].mxu0  ;;  %v11304_v48 = vld [vmem:[%s14686_s3 + $0x130] sm:$0xff]  }
 0x4c4   : > { %v10285_v11 = vpop.f32.mrb[21].mxu1  ;;  %v3824_v56 = vpop.f32.mrb[30].mxu0  ;;  %10472 = vmatpush3.bf16.msra.mxu1 %v11304_v48 }
 0x4c5   : > { %v3983_v17 = vpop.f32.mrb[22].mxu1  ;;  %v13069_v24 = vadd.f32 %v3980_v31, %v3875_v16  ;;  %v3876_v36 = vadd.f32 %v3824_v56, %v13020_v2  ;;  %v10254_v61 = vpop.f32.mrb[31].mxu0  ;;  %10473 = vmatprep.subr.bf16.mxu1 %v11410_v3 }
 0x4c6   : > { %v10286_v54 = vpop.f32.mrb[23].mxu1 }
 0x4c7   : > { %v13072_v25 = vadd.f32 %v3983_v17, %v3876_v36  ;;  %10468 = vmatmul.mubr.msk.bf16.gmra.mrb[136].mxu0 %vm546_vm3, %v4702_v23 }
 0x4c8   : > { %10507 = vmatprep.mubr.msk.bf16.mxu0 %vm11411_vm1, %v11410_v3 }
 0x4ca   : > { %v3829_v26 = vpop.f32.mrb[32].mxu0 }
 0x4cb   : > { %v3988_v40 = vpop.f32.mrb[24].mxu1  ;;  %v3877_v14 = vadd.f32 %v3829_v26, %v13028_v39  ;;  %v10257_v29 = vpop.f32.mrb[33].mxu0 }
 0x4cc   : > { %v10289_v45 = vpop.f32.mrb[25].mxu1  ;;  %v3832_v27 = vpop.f32.mrb[34].mxu0 }
 0x4cd   : > { %v3991_v0 = vpop.f32.mrb[26].mxu1  ;;  %v13078_v32 = vadd.f32 %v3988_v40, %v3877_v14  ;;  %v3878_v2 = vadd.f32 %v3832_v27, %v13030_v6  ;;  %v10258_v57 = vpop.f32.mrb[35].mxu0 }
 0x4ce   : > { %v10290_v10 = vpop.f32.mrb[27].mxu1 }
 0x4cf   : > { %v13081_v30 = vadd.f32 %v3991_v0, %v3878_v2 }
 0x4d2   : > { %v3837_v31 = vpop.f32.mrb[36].mxu0 }
 0x4d3   : > { %v3996_v16 = vpop.f32.mrb[28].mxu1  ;;  %v3879_v39 = vadd.f32 %v3837_v31, %v13035_v43  ;;  %v10261_v18 = vpop.f32.mrb[37].mxu0 }
 0x4d4   : > { %v10293_v11 = vpop.f32.mrb[29].mxu1  ;;  %v3840_v23 = vpop.f32.mrb[38].mxu0 }
 0x4d5   : > { %v3999_v56 = vpop.f32.mrb[30].mxu1  ;;  %v13088_v6 = vadd.f32 %v3996_v16, %v3879_v39  ;;  %v3880_v17 = vadd.f32 %v3840_v23, %v13037_v19  ;;  %v10262_v36 = vpop.f32.mrb[39].mxu0 }
 0x4d6   : > { %v10294_v61 = vpop.f32.mrb[31].mxu1 }
 0x4d7   : > { %v13091_v54 = vadd.f32 %v3999_v56, %v3880_v17 }
 0x4da   : > { %v3845_v26 = vpop.f32.mrb[40].mxu0 }
 0x4db   : > { %v4004_v40 = vpop.f32.mrb[32].mxu1  ;;  %v3881_v14 = vadd.f32 %v3845_v26, %v13042_v7  ;;  %v10265_v29 = vpop.f32.mrb[41].mxu0 }
 0x4dc   : > { %v10297_v45 = vpop.f32.mrb[33].mxu1  ;;  %v3848_v27 = vpop.f32.mrb[42].mxu0 }
 0x4dd   : > { %v4007_v43 = vpop.f32.mrb[34].mxu1  ;;  %v13094_v0 = vadd.f32 %v4004_v40, %v3881_v14  ;;  %v3882_v2 = vadd.f32 %v3848_v27, %v13044_v44  ;;  %v10266_v57 = vpop.f32.mrb[43].mxu0 }
 0x4de   : > { %v10298_v10 = vpop.f32.mrb[35].mxu1 }
 0x4df   : > { %v13097_v48 = vadd.f32 %v4007_v43, %v3882_v2 }
 0x4e2   : > { %v3853_v19 = vpop.f32.mrb[44].mxu0 }
 0x4e3   : > { %v4012_v31 = vpop.f32.mrb[36].mxu1  ;;  %v3883_v16 = vadd.f32 %v3853_v19, %v13049_v49  ;;  %v10269_v39 = vpop.f32.mrb[45].mxu0 }
 0x4e4   : > { %v10301_v18 = vpop.f32.mrb[37].mxu1  ;;  %v3856_v11 = vpop.f32.mrb[46].mxu0 }
 0x4e5   : > { %v4015_v7 = vpop.f32.mrb[38].mxu1  ;;  %v13100_v23 = vadd.f32 %v4012_v31, %v3883_v16  ;;  %v3884_v56 = vadd.f32 %v3856_v11, %v13051_v51  ;;  %v10270_v17 = vpop.f32.mrb[47].mxu0 }
 0x4e6   : > { %v10302_v36 = vpop.f32.mrb[39].mxu1 }
 0x4e7   : > { %v13103_v61 = vadd.f32 %v4015_v7, %v3884_v56 }
 0x4ea   : > { %v3861_v44 = vpop.f32.mrb[48].mxu0 }
 0x4eb   : > { %v4020_v26 = vpop.f32.mrb[40].mxu1  ;;  %v3885_v40 = vadd.f32 %v3861_v44, %v13056_v60  ;;  %v10273_v14 = vpop.f32.mrb[49].mxu0  ;;  %v11306_v44 = vld [vmem:[%s14686_s3 + $0x120] sm:$0xff]  }
 0x4ec   : > { %v10305_v29 = vpop.f32.mrb[41].mxu1  ;;  %v3864_v45 = vpop.f32.mrb[50].mxu0  ;;  %10504 = vmatpush3.bf16.msra.mxu0 %v11306_v44 }
 0x4ed   : > { %v4023_v49 = vpop.f32.mrb[42].mxu1  ;;  %v13106_v27 = vadd.f32 %v4020_v26, %v3885_v40  ;;  %v3886_v43 = vadd.f32 %v3864_v45, %v13058_v20  ;;  %v10274_v2 = vpop.f32.mrb[51].mxu0  ;;  %v11305_v20 = vld [vmem:[%s14686_s3 + $0x138] sm:$0xff]   ;;  %10505 = vmatprep.subr.bf16.mxu0 %v11410_v3 }
 0x4ee   : > { %v10306_v57 = vpop.f32.mrb[43].mxu1  ;;  %10474 = vmatpush3.bf16.msra.mxu1 %v11305_v20 }
 0x4ef   : > { %v13109_v10 = vadd.f32 %v4023_v49, %v3886_v43  ;;  %10535 = vmatprep.subr.bf16.mxu1 %v11410_v3  ;;  %v11307_v57 = vld [vmem:[%s14686_s3 + $0x128] sm:$0xff]  }
 0x4f0   : > { %10506 = vmatpush3.bf16.msra.mxu0 %v11307_v57 }
 0x4f1   : > { %10567 = vmatprep.subr.bf16.mxu0 %v11410_v3 }
 0x4f2   : > { %v3869_v51 = vpop.f32.mrb[52].mxu0 }
 0x4f3   : > { %v4028_v19 = vpop.f32.mrb[44].mxu1  ;;  %v3887_v31 = vadd.f32 %v3869_v51, %v13063_v42  ;;  %v10277_v16 = vpop.f32.mrb[53].mxu0 }
 0x4f4   : > { %v10309_v39 = vpop.f32.mrb[45].mxu1  ;;  %v3872_v18 = vpop.f32.mrb[54].mxu0 }
 0x4f5   : > { %v4031_v60 = vpop.f32.mrb[46].mxu1  ;;  %v13112_v11 = vadd.f32 %v4028_v19, %v3887_v31  ;;  %v10278_v7 = vpop.f32.mrb[55].mxu0 }
 0x4f6   : > { %v10310_v56 = vpop.f32.mrb[47].mxu1 }
 0x4fa   : > { %v4139_v17 = vpop.f32.mrb[56].mxu0 }
 0x4fb   : > { %v4298_v36 = vpop.f32.mrb[48].mxu1  ;;  %v4193_v42 = vadd.f32 %v4139_v17, %v13069_v24  ;;  %v10317_v26 = vpop.f32.mrb[57].mxu0 }
 0x4fc   : > { %v10349_v40 = vpop.f32.mrb[49].mxu1  ;;  %v4142_v14 = vpop.f32.mrb[58].mxu0 }
 0x4fd   : > { %v4301_v29 = vpop.f32.mrb[50].mxu1  ;;  %v13122_v45 = vadd.f32 %v4298_v36, %v4193_v42  ;;  %v4194_v49 = vadd.f32 %v4142_v14, %v13072_v25  ;;  %v10318_v43 = vpop.f32.mrb[59].mxu0 }
 0x4fe   : > { %v10350_v2 = vpop.f32.mrb[51].mxu1 }
 0x4ff   : > { %v13129_v51 = vadd.f32 %v4301_v29, %v4194_v49 }
 0x502   : > { %v4147_v24 = vpop.f32.mrb[60].mxu0 }
 0x503   : > { %v4306_v19 = vpop.f32.mrb[52].mxu1  ;;  %v4195_v31 = vadd.f32 %v4147_v24, %v13078_v32  ;;  %v10321_v16 = vpop.f32.mrb[61].mxu0 }
 0x504   : > { %v10353_v39 = vpop.f32.mrb[53].mxu1  ;;  %v4150_v25 = vpop.f32.mrb[62].mxu0 }
 0x505   : > { %v4309_v18 = vpop.f32.mrb[54].mxu1  ;;  %v13133_v60 = vadd.f32 %v4306_v19, %v4195_v31  ;;  %v4196_v7 = vadd.f32 %v4150_v25, %v13081_v30  ;;  %v10322_v56 = vpop.f32.mrb[63].mxu0 }
 0x506   : > { %v10354_v20 = vpop.f32.mrb[55].mxu1 }
 0x507   : > { %v13136_v17 = vadd.f32 %v4309_v18, %v4196_v7 }
 0x50a   : > { %v4155_v36 = vpop.f32.mrb[64].mxu0 }
 0x50b   : > { %v4314_v44 = vpop.f32.mrb[56].mxu1  ;;  %v4197_v42 = vadd.f32 %v4155_v36, %v13088_v6  ;;  %v10325_v26 = vpop.f32.mrb[65].mxu0 }
 0x50c   : > { %v10357_v40 = vpop.f32.mrb[57].mxu1  ;;  %v4158_v14 = vpop.f32.mrb[66].mxu0 }
 0x50d   : > { %v4317_v32 = vpop.f32.mrb[58].mxu1  ;;  %v13139_v29 = vadd.f32 %v4314_v44, %v4197_v42  ;;  %v4198_v49 = vadd.f32 %v4158_v14, %v13091_v54  ;;  %v10326_v43 = vpop.f32.mrb[67].mxu0 }
 0x50e   : > { %v10358_v2 = vpop.f32.mrb[59].mxu1 }
 0x50f   : > { %v13142_v57 = vadd.f32 %v4317_v32, %v4198_v49 }
 0x512   : > { %v4163_v30 = vpop.f32.mrb[68].mxu0 }
 0x513   : > { %v4322_v24 = vpop.f32.mrb[60].mxu1  ;;  %v4199_v19 = vadd.f32 %v4163_v30, %v13094_v0  ;;  %v10329_v31 = vpop.f32.mrb[69].mxu0 }
 0x514   : > { %v10361_v16 = vpop.f32.mrb[61].mxu1  ;;  %v4166_v39 = vpop.f32.mrb[70].mxu0 }
 0x515   : > { %v4325_v6 = vpop.f32.mrb[62].mxu1  ;;  %v13145_v25 = vadd.f32 %v4322_v24, %v4199_v19  ;;  %v4200_v18 = vadd.f32 %v4166_v39, %v13097_v48  ;;  %v10330_v7 = vpop.f32.mrb[71].mxu0 }
 0x516   : > { %v10362_v56 = vpop.f32.mrb[63].mxu1 }
 0x517   : > { %v13148_v20 = vadd.f32 %v4325_v6, %v4200_v18 }
 0x51a   : > { %v4171_v54 = vpop.f32.mrb[72].mxu0 }
 0x51b   : > { %v4330_v36 = vpop.f32.mrb[64].mxu1  ;;  %v4201_v44 = vadd.f32 %v4171_v54, %v13100_v23  ;;  %v10333_v42 = vpop.f32.mrb[73].mxu0 }
 0x51c   : > { %v10365_v26 = vpop.f32.mrb[65].mxu1  ;;  %v4174_v40 = vpop.f32.mrb[74].mxu0 }
 0x51d   : > { %v4333_v0 = vpop.f32.mrb[66].mxu1  ;;  %v13151_v14 = vadd.f32 %v4330_v36, %v4201_v44  ;;  %v4202_v32 = vadd.f32 %v4174_v40, %v13103_v61  ;;  %v10334_v49 = vpop.f32.mrb[75].mxu0 }
 0x51e   : > { %v10366_v43 = vpop.f32.mrb[67].mxu1 }
 0x51f   : > { %v13154_v2 = vadd.f32 %v4333_v0, %v4202_v32 }
 0x522   : > { %v4179_v48 = vpop.f32.mrb[76].mxu0 }
 0x523   : > { %v4338_v30 = vpop.f32.mrb[68].mxu1  ;;  %v4203_v24 = vadd.f32 %v4179_v48, %v13106_v27  ;;  %v10337_v19 = vpop.f32.mrb[77].mxu0 }
 0x524   : > { %v10369_v31 = vpop.f32.mrb[69].mxu1  ;;  %v4182_v16 = vpop.f32.mrb[78].mxu0 }
 0x525   : > { %v4341_v23 = vpop.f32.mrb[70].mxu1  ;;  %v13157_v39 = vadd.f32 %v4338_v30, %v4203_v24  ;;  %v4204_v6 = vadd.f32 %v4182_v16, %v13109_v10  ;;  %v10338_v18 = vpop.f32.mrb[79].mxu0 }
 0x526   : > { %v10370_v7 = vpop.f32.mrb[71].mxu1 }
 0x527   : > { %v13160_v56 = vadd.f32 %v4341_v23, %v4204_v6 }
 0x52a   : > { %v4187_v61 = vpop.f32.mrb[80].mxu0 }
 0x52b   : > { %v4346_v54 = vpop.f32.mrb[72].mxu1  ;;  %v4205_v36 = vadd.f32 %v4187_v61, %v13112_v11  ;;  %v10341_v44 = vpop.f32.mrb[81].mxu0 }
 0x52c   : > { %v10373_v42 = vpop.f32.mrb[73].mxu1  ;;  %v4190_v26 = vpop.f32.mrb[82].mxu0 }
 0x52d   : > { %v4349_v27 = vpop.f32.mrb[74].mxu1  ;;  %v13163_v40 = vadd.f32 %v4346_v54, %v4205_v36  ;;  %v10342_v0 = vpop.f32.mrb[83].mxu0 }
 0x52e   : > { %v10374_v32 = vpop.f32.mrb[75].mxu1 }
 0x532   : > { %v4457_v49 = vpop.f32.mrb[84].mxu0 }
 0x533   : > { %v4616_v43 = vpop.f32.mrb[76].mxu1  ;;  %v4511_v10 = vadd.f32 %v4457_v49, %v13122_v45  ;;  %v10381_v48 = vpop.f32.mrb[85].mxu0 }
 0x534   : > { %v10413_v30 = vpop.f32.mrb[77].mxu1  ;;  %v4460_v24 = vpop.f32.mrb[86].mxu0 }
 0x535   : > { %v4619_v19 = vpop.f32.mrb[78].mxu1  ;;  %v13166_v31 = vadd.f32 %v4616_v43, %v4511_v10  ;;  %v4512_v11 = vadd.f32 %v4460_v24, %v13129_v51  ;;  %v10382_v16 = vpop.f32.mrb[87].mxu0 }
 0x536   : > { %v10414_v23 = vpop.f32.mrb[79].mxu1 }
 0x537   : > { %v13169_v6 = vadd.f32 %v4619_v19, %v4512_v11 }
 0x53a   : > { %v4465_v18 = vpop.f32.mrb[88].mxu0 }
 0x53b   : > { %v4624_v7 = vpop.f32.mrb[80].mxu1  ;;  %v4513_v61 = vadd.f32 %v4465_v18, %v13133_v60  ;;  %v10385_v54 = vpop.f32.mrb[89].mxu0 }
 0x53c   : > { %v10417_v36 = vpop.f32.mrb[81].mxu1  ;;  %v4468_v44 = vpop.f32.mrb[90].mxu0 }
 0x53d   : > { %v4627_v45 = vpop.f32.mrb[82].mxu1  ;;  %v13172_v42 = vadd.f32 %v4624_v7, %v4513_v61  ;;  %v4514_v26 = vadd.f32 %v4468_v44, %v13136_v17  ;;  %v10386_v27 = vpop.f32.mrb[91].mxu0 }
 0x53e   : > { %v10418_v0 = vpop.f32.mrb[83].mxu1 }
 0x53f   : > { %v13175_v32 = vadd.f32 %v4627_v45, %v4514_v26 }
 0x542   : > { %v4473_v51 = vpop.f32.mrb[92].mxu0 }
 0x543   : > { %v4632_v49 = vpop.f32.mrb[84].mxu1  ;;  %v4515_v43 = vadd.f32 %v4473_v51, %v13139_v29  ;;  %v10389_v10 = vpop.f32.mrb[93].mxu0 }
 0x544   : > { %v10421_v48 = vpop.f32.mrb[85].mxu1  ;;  %v4476_v30 = vpop.f32.mrb[94].mxu0 }
 0x545   : > { %v4635_v60 = vpop.f32.mrb[86].mxu1  ;;  %v13178_v24 = vadd.f32 %v4632_v49, %v4515_v43  ;;  %v4516_v19 = vadd.f32 %v4476_v30, %v13142_v57  ;;  %v10390_v11 = vpop.f32.mrb[95].mxu0 }
 0x546   : > { %v10422_v16 = vpop.f32.mrb[87].mxu1 }
 0x547   : > { %v13181_v23 = vadd.f32 %v4635_v60, %v4516_v19 }
 0x54a   : > { %v4481_v17 = vpop.f32.mrb[96].mxu0 }
 0x54b   : > { %v4640_v18 = vpop.f32.mrb[88].mxu1  ;;  %v4517_v7 = vadd.f32 %v4481_v17, %v13145_v25  ;;  %v10393_v61 = vpop.f32.mrb[97].mxu0 }
 0x54c   : > { %v10425_v54 = vpop.f32.mrb[89].mxu1  ;;  %v4484_v36 = vpop.f32.mrb[98].mxu0 }
 0x54d   : > { %v4643_v29 = vpop.f32.mrb[90].mxu1  ;;  %v13184_v44 = vadd.f32 %v4640_v18, %v4517_v7  ;;  %v4518_v45 = vadd.f32 %v4484_v36, %v13148_v20  ;;  %v10394_v26 = vpop.f32.mrb[99].mxu0 }
 0x54e   : > { %v10426_v27 = vpop.f32.mrb[91].mxu1 }
 0x54f   : > { %v13187_v0 = vadd.f32 %v4643_v29, %v4518_v45 }
 0x552   : > { %v4489_v57 = vpop.f32.mrb[100].mxu0 }
 0x553   : > { %v4648_v51 = vpop.f32.mrb[92].mxu1  ;;  %v4519_v49 = vadd.f32 %v4489_v57, %v13151_v14  ;;  %v10397_v43 = vpop.f32.mrb[101].mxu0 }
 0x554   : > { %v10429_v10 = vpop.f32.mrb[93].mxu1  ;;  %v4492_v48 = vpop.f32.mrb[102].mxu0 }
 0x555   : > { %v4651_v25 = vpop.f32.mrb[94].mxu1  ;;  %v13190_v30 = vadd.f32 %v4648_v51, %v4519_v49  ;;  %v4520_v60 = vadd.f32 %v4492_v48, %v13154_v2  ;;  %v10398_v19 = vpop.f32.mrb[103].mxu0 }
 0x556   : > { %v10430_v11 = vpop.f32.mrb[95].mxu1 }
 0x557   : > { %v13193_v16 = vadd.f32 %v4651_v25, %v4520_v60 }
 0x55a   : > { %v4497_v20 = vpop.f32.mrb[104].mxu0 }
 0x55b   : > { %v4656_v17 = vpop.f32.mrb[96].mxu1  ;;  %v4521_v18 = vadd.f32 %v4497_v20, %v13157_v39  ;;  %v10401_v7 = vpop.f32.mrb[105].mxu0 }
 0x55c   : > { %v10433_v61 = vpop.f32.mrb[97].mxu1  ;;  %v4500_v54 = vpop.f32.mrb[106].mxu0 }
 0x55d   : > { %v4659_v14 = vpop.f32.mrb[98].mxu1  ;;  %v13196_v36 = vadd.f32 %v4656_v17, %v4521_v18  ;;  %v4522_v29 = vadd.f32 %v4500_v54, %v13160_v56  ;;  %v10402_v45 = vpop.f32.mrb[107].mxu0  ;;  %v13207_v56 = vld [vmem:[%s14664_s4 + $0x1] ss:$0 sm:$0xff] }
 0x55e   : > { %v10434_v26 = vpop.f32.mrb[99].mxu1 }
 0x55f   : > { %v13199_v27 = vadd.f32 %v4659_v14, %v4522_v29 }
 0x562   : > { %v4505_v2 = vpop.f32.mrb[108].mxu0 }
 0x563   : > { %v4664_v57 = vpop.f32.mrb[100].mxu1  ;;  %v4523_v51 = vadd.f32 %v4505_v2, %v13163_v40  ;;  %v10405_v49 = vpop.f32.mrb[109].mxu0 }
 0x564   : > { %v10437_v43 = vpop.f32.mrb[101].mxu1  ;;  %v4508_v10 = vpop.f32.mrb[110].mxu0 }
 0x565   : > { %v4667_v39 = vpop.f32.mrb[102].mxu1  ;;  %v13202_v48 = vadd.f32 %v4664_v57, %v4523_v51  ;;  %v10406_v25 = vpop.f32.mrb[111].mxu0 }
 0x566   : > { %v10438_v60 = vpop.f32.mrb[103].mxu1 }
 0x567   : > { %v4940_v60 = vld [vmem:[#allocation2 + $0x6] sm:$0xff] }
 0x56a   : > { %v4775_v19 = vpop.f32.mrb[112].mxu0 }
 0x56b   : > { %v4829_v11 = vadd.f32 %v4775_v19, %v13166_v31  ;;  %v10445_v20 = vpop.f32.mrb[113].mxu0 }
 0x56c   : > { %v4778_v17 = vpop.f32.mrb[114].mxu0 }
 0x56d   : > { %v4850_v40 = vadd.f32 %v13207_v56, %v4829_v11  ;;  %v4830_v18 = vadd.f32 %v4778_v17, %v13169_v6  ;;  %v10446_v7 = vpop.f32.mrb[115].mxu0  ;;  %v4915_v17 = vld [vmem:[#allocation2 + $0x5] sm:$0xff] }
 0x56f   : > { %v4863_v61 = vadd.f32 %v4850_v40, %v12165_v15  ;;  %v4851_v54 = vadd.f32 %v13207_v56, %v4830_v18 }
 0x571   : > { %v4876_v14 = vmax.f32 %v4863_v61, 0.0  ;;  %v4864_v29 = vadd.f32 %v4851_v54, %v12172_v55 }
 0x572   : > { %v4783_v45 = vpop.f32.mrb[116].mxu0 }
 0x573   : > { %v13216_v26 = vmul.f32 %v4876_v14, %v12159_v13  ;;  %v4877_v2 = vmax.f32 %v4864_v29, 0.0  ;;  %v4831_v31 = vadd.f32 %v4783_v45, %v13172_v42  ;;  %v10449_v57 = vpop.f32.mrb[117].mxu0  ;;  %v11310_v45 = vld [vmem:[%s14686_s3 + $0x150] sm:$0xff]  }
 0x574   : > { %v4786_v51 = vpop.f32.mrb[118].mxu0 }
 0x575   : > { %4902 = vst.msk [vmem:[#allocation2 + $0x10] sm:$0xff] %vm546_vm3, %v13216_v26  ;;  %v13222_v6 = vmul.f32 %v4877_v2, %v12167_v21  ;;  %v4852_v15 = vadd.f32 %v13207_v56, %v4831_v31  ;;  %v4832_v49 = vadd.f32 %v4786_v51, %v13175_v32  ;;  %v10450_v55 = vpop.f32.mrb[119].mxu0 }
 0x577   : > { %4903 = vst.msk [vmem:[#allocation2 + $0x18] sm:$0xff] %vm546_vm3, %v13222_v6  ;;  %v4865_v43 = vadd.f32 %v4852_v15, %v12183_v33  ;;  %v4853_v42 = vadd.f32 %v13207_v56, %v4832_v49  ;;  %v11311_v15 = vld [vmem:[%s14686_s3 + $0x158] sm:$0xff]  }
 0x579   : > { %v4878_v10 = vmax.f32 %v4865_v43, 0.0  ;;  %v4866_v39 = vadd.f32 %v4853_v42, %v12190_v53 }
 0x57a   : > { %v4791_v25 = vpop.f32.mrb[120].mxu0 }
 0x57b   : > { %v13232_v19 = vmul.f32 %v4878_v10, %v12175_v63  ;;  %v4879_v11 = vmax.f32 %v4866_v39, 0.0  ;;  %v4833_v20 = vadd.f32 %v4791_v25, %v13178_v24  ;;  %v10453_v32 = vpop.f32.mrb[121].mxu0  ;;  %v11308_v24 = vld [vmem:[%s14686_s3 + $0x140] sm:$0xff]  }
 0x57c   : > { %v4794_v40 = vpop.f32.mrb[122].mxu0  ;;  %v4941_v18 = vld [vmem:[#allocation2 + $0xe] sm:$0xff] }
 0x57d   : > { %v4916_v7 = vld [vmem:[#allocation2 + $0xd] sm:$0xff]  ;;  %4904 = vst.msk [vmem:[#allocation2 + $0x20] sm:$0xff] %vm546_vm3, %v13232_v19  ;;  %v13238_v33 = vmul.f32 %v4879_v11, %v12185_v12  ;;  %v4854_v53 = vadd.f32 %v13207_v56, %v4833_v20  ;;  %v4834_v61 = vadd.f32 %v4794_v40, %v13181_v23  ;;  %v10454_v54 = vpop.f32.mrb[123].mxu0  ;;  %v4953_v14 = vpack.c.bf16 %v4941_v18, %v4940_v60 }
 0x57e   : > { %v4928_v29 = vpack.c.bf16 %v4916_v7, %v4915_v17  ;;  %v4942_v10 = vld [vmem:[#allocation2 + $0x16] sm:$0xff] }
 0x57f   : > { %4905 = vst.msk [vmem:[#allocation2 + $0x28] sm:$0xff] %vm546_vm3, %v13238_v33  ;;  %v4867_v2 = vadd.f32 %v4854_v53, %v12221_v46  ;;  %v4855_v31 = vadd.f32 %v13207_v56, %v4834_v61  ;;  %10476 = vmatmul.mubr.msk.bf16.vlgmr.msra.gmra.mrb[104].mxu1 %vm546_vm3, %v4953_v14  ;;  %v11309_v46 = vld [vmem:[%s14686_s3 + $0x148] sm:$0xff]  }
 0x580   : > { %10508 = vmatmul.mubr.msk.bf16.vlgmr.msra.gmra.mrb[140].mxu0 %vm546_vm3, %v4928_v29  ;;  %10479 = vmatprep.mubr.msk.bf16.mxu1 %vm11411_vm1, %v11410_v3 }
 0x581   : > { %v4880_v23 = vmax.f32 %v4867_v2, 0.0  ;;  %v4868_v57 = vadd.f32 %v4855_v31, %v12228_v50  ;;  %10511 = vmatprep.mubr.msk.bf16.mxu0 %vm11411_vm1, %v11410_v3  ;;  %10536 = vmatpush3.bf16.msra.mxu1 %v11308_v24 }
 0x582   : > { %v4799_v51 = vpop.f32.mrb[124].mxu0  ;;  %10537 = vmatprep.subr.bf16.mxu1 %v11410_v3  ;;  %10568 = vmatpush3.bf16.msra.mxu0 %v11310_v45 }
 0x583   : > { %v13267_v49 = vmul.f32 %v4880_v23, %v12213_v1  ;;  %v4881_v50 = vmax.f32 %v4868_v57, 0.0  ;;  %v4835_v55 = vadd.f32 %v4799_v51, %v13184_v44  ;;  %v10457_v43 = vpop.f32.mrb[125].mxu0  ;;  %10569 = vmatprep.subr.bf16.mxu0 %v11410_v3  ;;  %v4917_v44 = vld [vmem:[#allocation2 + $0x15] sm:$0xff] }
 0x584   : > { %v4802_v42 = vpop.f32.mrb[126].mxu0  ;;  %v4943_v39 = vld [vmem:[#allocation2 + $0x1e] sm:$0xff] }
 0x585   : > { %v4918_v25 = vld [vmem:[#allocation2 + $0x1d] sm:$0xff]  ;;  %4906 = vst.msk [vmem:[#allocation2 + $0x30] sm:$0xff] %vm546_vm3, %v13267_v49  ;;  %v13274_v60 = vmul.f32 %v4881_v50, %v12223_v41  ;;  %v4856_v11 = vadd.f32 %v13207_v56, %v4835_v55  ;;  %v4836_v20 = vadd.f32 %v4802_v42, %v13187_v0  ;;  %v10458_v32 = vpop.f32.mrb[127].mxu0  ;;  %v4954_v17 = vpack.c.bf16 %v4943_v39, %v4942_v10 }
 0x586   : > { %10538 = vmatpush3.bf16.msra.mxu1 %v11309_v46  ;;  %v4929_v40 = vpack.c.bf16 %v4918_v25, %v4917_v44  ;;  %10570 = vmatpush3.bf16.msra.mxu0 %v11311_v15  ;;  %v4944_v45 = vld [vmem:[#allocation2 + $0x26] sm:$0xff] }
 0x587   : > { %10599 = vmatprep.subr.bf16.mxu1 %v11410_v3  ;;  %4907 = vst.msk [vmem:[#allocation2 + $0x38] sm:$0xff] %vm546_vm3, %v13274_v60  ;;  %v4869_v18 = vadd.f32 %v4856_v11, %v12247_v34  ;;  %v4857_v7 = vadd.f32 %v13207_v56, %v4836_v20  ;;  %10480 = vmatmul.mubr.msk.bf16.gmra.mrb[108].mxu1 %vm546_vm3, %v4954_v17  ;;  %v4919_v15 = vld [vmem:[#allocation2 + $0x25] sm:$0xff] }
 0x588   : > { %10631 = vmatprep.subr.bf16.mxu0 %v11410_v3  ;;  %10512 = vmatmul.mubr.msk.bf16.gmra.mrb[144].mxu0 %vm546_vm3, %v4929_v40 }
 0x589   : > { %10483 = vmatprep.mubr.msk.bf16.mxu1 %vm11411_vm1, %v11410_v3  ;;  %v4882_v0 = vmax.f32 %v4869_v18, 0.0  ;;  %v4870_v53 = vadd.f32 %v4857_v7, %v12254_v5  ;;  %10515 = vmatprep.mubr.msk.bf16.mxu0 %vm11411_vm1, %v11410_v3 }
 0x58a   : > { %v4807_v61 = vpop.f32.mrb[128].mxu0 }
 0x58b   : > { %v13292_v34 = vmul.f32 %v4882_v0, %v12244_v35  ;;  %v4883_v54 = vmax.f32 %v4870_v53, 0.0  ;;  %v4837_v14 = vadd.f32 %v4807_v61, %v13190_v30  ;;  %v10461_v24 = vpop.f32.mrb[129].mxu0 }
 0x58c   : > { %v4810_v29 = vpop.f32.mrb[130].mxu0  ;;  %v4945_v2 = vld [vmem:[#allocation2 + $0x2e] sm:$0xff] }
 0x58d   : > { %v4920_v31 = vld [vmem:[#allocation2 + $0x2d] sm:$0xff]  ;;  %4908 = vst.msk [vmem:[#allocation2 + $0x40] sm:$0xff] %vm546_vm3, %v13292_v34  ;;  %v13298_v5 = vmul.f32 %v4883_v54, %v12249_v8  ;;  %v4858_v23 = vadd.f32 %v13207_v56, %v4837_v14  ;;  %v4838_v57 = vadd.f32 %v4810_v29, %v13193_v16  ;;  %v10462_v46 = vpop.f32.mrb[131].mxu0  ;;  %v4955_v51 = vpack.c.bf16 %v4945_v2, %v4944_v45 }
 0x58e   : > { %v4930_v50 = vpack.c.bf16 %v4920_v31, %v4919_v15  ;;  %v4946_v20 = vld [vmem:[#allocation2 + $0x36] sm:$0xff] }
 0x58f   : > { %4909 = vst.msk [vmem:[#allocation2 + $0x48] sm:$0xff] %vm546_vm3, %v13298_v5  ;;  %v4871_v30 = vadd.f32 %v4858_v23, %v12271_v28  ;;  %v4859_v55 = vadd.f32 %v13207_v56, %v4838_v57  ;;  %10484 = vmatmul.mubr.msk.bf16.gmra.mrb[112].mxu1 %vm546_vm3, %v4955_v51  ;;  %v4921_v0 = vld [vmem:[#allocation2 + $0x35] sm:$0xff] }
 0x590   : > { %10516 = vmatmul.mubr.msk.bf16.gmra.mrb[148].mxu0 %vm546_vm3, %v4930_v50  ;;  %10487 = vmatprep.mubr.msk.bf16.mxu1 %vm11411_vm1, %v11410_v3 }
 0x591   : > { %v4884_v43 = vmax.f32 %v4871_v30, 0.0  ;;  %v4872_v16 = vadd.f32 %v4859_v55, %v12278_v62  ;;  %10519 = vmatprep.mubr.msk.bf16.mxu0 %vm11411_vm1, %v11410_v3 }
 0x592   : > { %v4815_v42 = vpop.f32.mrb[132].mxu0 }
 0x593   : > { %v13314_v10 = vmul.f32 %v4884_v43, %v12268_v47  ;;  %v4885_v28 = vmax.f32 %v4872_v16, 0.0  ;;  %v4839_v39 = vadd.f32 %v4815_v42, %v13196_v36  ;;  %v10465_v25 = vpop.f32.mrb[133].mxu0 }
 0x594   : > { %v4818_v11 = vpop.f32.mrb[134].mxu0  ;;  %v4947_v32 = vld [vmem:[#allocation2 + $0x3e] sm:$0xff] }
 0x595   : > { %v4922_v17 = vld [vmem:[#allocation2 + $0x3d] sm:$0xff]  ;;  %4910 = vst.msk [vmem:[#allocation2 + $0x50] sm:$0xff] %vm546_vm3, %v13314_v10  ;;  %v13320_v62 = vmul.f32 %v4885_v28, %v12273_v38  ;;  %v4860_v44 = vadd.f32 %v13207_v56, %v4839_v39  ;;  %v4840_v40 = vadd.f32 %v4818_v11, %v13199_v27  ;;  %v10466_v18 = vpop.f32.mrb[135].mxu0  ;;  %v4956_v7 = vpack.c.bf16 %v4947_v32, %v4946_v20 }
 0x596   : > { %v4931_v53 = vpack.c.bf16 %v4922_v17, %v4921_v0  ;;  %v4948_v45 = vld [vmem:[#allocation2 + $0x46] sm:$0xff] }
 0x597   : > { %4911 = vst.msk [vmem:[#allocation2 + $0x58] sm:$0xff] %vm546_vm3, %v13320_v62  ;;  %v4873_v36 = vadd.f32 %v4860_v44, %v12295_v58  ;;  %v4861_v61 = vadd.f32 %v13207_v56, %v4840_v40  ;;  %10488 = vmatmul.mubr.msk.bf16.gmra.mrb[116].mxu1 %vm546_vm3, %v4956_v7  ;;  %v4923_v23 = vld [vmem:[#allocation2 + $0x45] sm:$0xff]  ;;  %v5208_v44 = vld [vmem:[#allocation2 + $0xf] sm:$0xff]  ;;  %v5367_v40 = vld [vmem:[#allocation2 + $0x17] sm:$0xff] }
 0x598   : > { %10520 = vmatmul.mubr.msk.bf16.gmra.mrb[152].mxu0 %vm546_vm3, %v4931_v53  ;;  %10491 = vmatprep.mubr.msk.bf16.mxu1 %vm11411_vm1, %v11410_v3  ;;  %v5207_v17 = vld [vmem:[#allocation2 + $0x7] sm:$0xff]  ;;  %v5379_v0 = vpack.c.bf16 %v5367_v40, %v5208_v44  ;;  %v11314_v53 = vld [vmem:[%s14686_s3 + $0x170] sm:$0xff]  }
 0x599   : > { %v4886_v54 = vmax.f32 %v4873_v36, 0.0  ;;  %v4874_v27 = vadd.f32 %v4861_v61, %v12302_v4  ;;  %10523 = vmatprep.mubr.msk.bf16.mxu0 %vm11411_vm1, %v11410_v3  ;;  %v5220_v18 = vpack.c.bf16 %v5208_v44, %v5207_v17  ;;  %v11312_v7 = vld [vmem:[%s14686_s3 + $0x160] sm:$0xff]   ;;  %v11313_v36 = vld [vmem:[%s14686_s3 + $0x168] sm:$0xff]   ;;  %v5684_v44 = vld [vmem:[#allocation2 + $0x11] sm:$0xff] }
 0x59a   : > { %v4823_v14 = vpop.f32.mrb[136].mxu0  ;;  %v5210_v61 = vld [vmem:[#allocation2 + $0x1f] sm:$0xff] }
 0x59b   : > { %v13336_v24 = vmul.f32 %v4886_v54, %v12292_v52  ;;  %v4887_v58 = vmax.f32 %v4874_v27, 0.0  ;;  %v4841_v29 = vadd.f32 %v4823_v14, %v13202_v48  ;;  %v10469_v2 = vpop.f32.mrb[137].mxu0  ;;  %v11315_v54 = vld [vmem:[%s14686_s3 + $0x178] sm:$0xff]   ;;  %v5369_v27 = vld [vmem:[#allocation2 + $0x27] sm:$0xff]  ;;  %v5221_v14 = vpack.c.bf16 %v5210_v61, %v5367_v40 }
 0x59c   : > { %v4949_v31 = vld [vmem:[#allocation2 + $0x4e] sm:$0xff]  ;;  %v4826_v46 = vpop.f32.mrb[138].mxu0  ;;  %v11316_v40 = vld [vmem:[%s14686_s3 + $0x180] sm:$0xff]  }
 0x59d   : > { %v4924_v57 = vld [vmem:[#allocation2 + $0x4d] sm:$0xff]  ;;  %4912 = vst.msk [vmem:[#allocation2 + $0x60] sm:$0xff] %vm546_vm3, %v13336_v24  ;;  %v13342_v4 = vmul.f32 %v4887_v58, %v12297_v59  ;;  %v4862_v51 = vadd.f32 %v13207_v56, %v4841_v29  ;;  %v4957_v15 = vpack.c.bf16 %v4949_v31, %v4948_v45  ;;  %v10470_v30 = vpop.f32.mrb[139].mxu0  ;;  %v5380_v58 = vpack.c.bf16 %v5369_v27, %v5210_v61  ;;  %v5371_v45 = vld [vmem:[#allocation2 + $0x37] sm:$0xff] }
 0x59e   : > { %v4932_v50 = vpack.c.bf16 %v4924_v57, %v4923_v23  ;;  %v4950_v43 = vld [vmem:[#allocation2 + $0x56] sm:$0xff]  ;;  %v5214_v23 = vld [vmem:[#allocation2 + $0x3f] sm:$0xff]  ;;  %v5373_v57 = vld [vmem:[#allocation2 + $0x47] sm:$0xff] }
 0x59f   : > { %4913 = vst.msk [vmem:[#allocation2 + $0x68] sm:$0xff] %vm546_vm3, %v13342_v4  ;;  %v4875_v48 = vadd.f32 %v4862_v51, %v12317_v37  ;;  %10492 = vmatmul.mubr.msk.bf16.gmra.mrb[120].mxu1 %vm546_vm3, %v4957_v15  ;;  %v4925_v42 = vld [vmem:[#allocation2 + $0x55] sm:$0xff]  ;;  %v5223_v46 = vpack.c.bf16 %v5214_v23, %v5371_v45  ;;  %v5382_v51 = vpack.c.bf16 %v5373_v57, %v5214_v23  ;;  %v13451_v61 = vld [vmem:[#allocation2 + $0x29] sm:$0xff] }
 0x5a0   : > { %10524 = vmatmul.mubr.msk.bf16.gmra.mrb[156].mxu0 %vm546_vm3, %v4932_v50  ;;  %10495 = vmatprep.mubr.msk.bf16.mxu1 %vm11411_vm1, %v11410_v3  ;;  %v5212_v29 = vld [vmem:[#allocation2 + $0x2f] sm:$0xff]  ;;  %v5375_v50 = vld [vmem:[#allocation2 + $0x57] sm:$0xff] }
 0x5a1   : > { %v4888_v55 = vmax.f32 %v4875_v48, 0.0  ;;  %10527 = vmatprep.mubr.msk.bf16.mxu0 %vm11411_vm1, %v11410_v3  ;;  %v5222_v2 = vpack.c.bf16 %v5212_v29, %v5369_v27  ;;  %v5381_v31 = vpack.c.bf16 %v5371_v45, %v5212_v29  ;;  %v5216_v15 = vld [vmem:[#allocation2 + $0x4f] sm:$0xff]  ;;  %v5530_v29 = vld [vmem:[#allocation2 + $0x38] sm:$0xff] }
 0x5a2   : > { %v5224_v30 = vpack.c.bf16 %v5216_v15, %v5373_v57  ;;  %v5383_v48 = vpack.c.bf16 %v5375_v50, %v5216_v15  ;;  %v13466_v45 = vld [vmem:[#allocation2 + $0x39] sm:$0xff]  ;;  %v13468_v23 = vld [vmem:[#allocation2 + $0x31] sm:$0xff] }
 0x5a3   : > { %v13355_v56 = vmul.f32 %v4888_v55, %v12314_v22  ;;  %v5699_v57 = vpack.c.bf16 %v13466_v45, %v13468_v23  ;;  %v5531_v15 = vld [vmem:[#allocation2 + $0x40] sm:$0xff] }
 0x5a4   : > { %v4951_v16 = vld [vmem:[#allocation2 + $0x5e] sm:$0xff] }
 0x5a5   : > { %v4926_v28 = vld [vmem:[#allocation2 + $0x5d] sm:$0xff]  ;;  %4914 = vst.msk [vmem:[#allocation2 + $0x70] sm:$0xf] %vm1972_vm4, %v13355_v56  ;;  %v4958_v37 = vpack.c.bf16 %v4951_v16, %v4950_v43 }
 0x5a6   : > { %v4933_v39 = vpack.c.bf16 %v4926_v28, %v4925_v42  ;;  %v4952_v25 = vld [vmem:[#allocation2 + $0x66] sm:$0xf] }
 0x5a7   : > { %10496 = vmatmul.mubr.msk.bf16.gmra.mrb[124].mxu1 %vm546_vm3, %v4958_v37  ;;  %v4927_v11 = vld [vmem:[#allocation2 + $0x65] sm:$0xf]  ;;  %v4959_v20 = vpack.c.bf16 %v4952_v25, %v4952_v25 }
 0x5a8   : > { %10528 = vmatmul.mubr.msk.bf16.gmra.mrb[160].mxu0 %vm546_vm3, %v4933_v39  ;;  %10499 = vmatprep.mubr.msk.bf16.mxu1 %vm11411_vm1, %v11410_v3  ;;  %v4934_v32 = vpack.c.bf16 %v4927_v11, %v4927_v11  ;;  %v5218_v55 = vld [vmem:[#allocation2 + $0x5f] sm:$0xff]  ;;  %v5377_v43 = vld [vmem:[#allocation2 + $0x67] sm:$0xff] }
 0x5a9   : > { %10531 = vmatprep.mubr.msk.bf16.mxu0 %vm11411_vm1, %v11410_v3  ;;  %v5225_v16 = vpack.c.bf16 %v5218_v55, %v5375_v50  ;;  %v5384_v42 = vpack.c.bf16 %v5377_v43, %v5218_v55  ;;  %v5219_v28 = vld [vmem:[#allocation2 + $0x67] sm:$0xf]  ;;  %v5526_v11 = vld [vmem:[#allocation2 + $0x18] sm:$0xff] }
 0x5aa   : > { %v5226_v39 = vpack.c.bf16 %v5219_v28, %v5219_v28  ;;  %v5534_v55 = vld [vmem:[#allocation2 + $0x58] sm:$0xff] }
 0x5ab   : > { %v13487_v43 = vld [vmem:[#allocation2 + $0x59] sm:$0xff]  ;;  %v5692_v28 = vld [vmem:[#allocation2 + $0x51] sm:$0xff] }
 0x5ac   : > { %v5378_v37 = vld [vmem:[#allocation2 + $0x6f] sm:$0xf] }
 0x5ad   : > { %v5385_v25 = vpack.c.bf16 %v5378_v37, %v5378_v37  ;;  %v5701_v37 = vpack.c.bf16 %v13487_v43, %v5692_v28 }
 0x5af   : > { %10500 = vmatmul.mubr.msk.bf16.gmra.mrb[128].mxu1 %vm546_vm3, %v4959_v20  ;;  %v13429_v20 = vld [vmem:[#allocation2 + $0x19] sm:$0xff] }
 0x5b0   : > { %10532 = vmatmul.mubr.msk.bf16.gmra.mrb[164].mxu0 %vm546_vm3, %v4934_v32  ;;  %10539 = vmatprep.mubr.msk.bf16.mxu1 %vm11411_vm1, %v11410_v3  ;;  %v5525_v32 = vld [vmem:[#allocation2 + $0x10] sm:$0xff] }
 0x5b1   : > { %10571 = vmatprep.mubr.msk.bf16.mxu0 %vm11411_vm1, %v11410_v3  ;;  %v5538_v17 = vpack.c.bf16 %v5526_v11, %v5525_v32  ;;  %v5535_v11 = vld [vmem:[#allocation2 + $0x60] sm:$0xff] }
 0x5b7   : > { %10540 = vmatmul.mubr.msk.bf16.vlgmr.msra.gmra.mrb[132].mxu1 %vm546_vm3, %v5220_v18  ;;  %v5697_v18 = vpack.c.bf16 %v13429_v20, %v5684_v44 }
 0x5b8   : > { %10572 = vmatmul.mubr.msk.bf16.vlgmr.msra.gmra.mrb[168].mxu0 %vm546_vm3, %v5379_v0  ;;  %10543 = vmatprep.mubr.msk.bf16.mxu1 %vm11411_vm1, %v11410_v3  ;;  %v11317_v0 = vld [vmem:[%s14686_s3 + $0x188] sm:$0xff]  }
 0x5b9   : > { %10575 = vmatprep.mubr.msk.bf16.mxu0 %vm11411_vm1, %v11410_v3  ;;  %10600 = vmatpush3.bf16.msra.mxu1 %v11312_v7  ;;  %v11318_v7 = vld [vmem:[%s14686_s3 + $0x190] sm:$0xff]  }
 0x5ba   : > { %10601 = vmatprep.subr.bf16.mxu1 %v11410_v3  ;;  %10632 = vmatpush3.bf16.msra.mxu0 %v11314_v53  ;;  %v5528_v53 = vld [vmem:[#allocation2 + $0x28] sm:$0xff] }
 0x5bb   : > { %10633 = vmatprep.subr.bf16.mxu0 %v11410_v3 }
 0x5bd   : > { %10602 = vmatpush3.bf16.msra.mxu1 %v11313_v36  ;;  %v11319_v36 = vld [vmem:[%s14686_s3 + $0x198] sm:$0xff]  }
 0x5be   : > { %10634 = vmatpush3.bf16.msra.mxu0 %v11315_v54  ;;  %10663 = vmatprep.subr.bf16.mxu1 %v11410_v3  ;;  %v5527_v54 = vld [vmem:[#allocation2 + $0x20] sm:$0xff] }
 0x5bf   : > { %10544 = vmatmul.mubr.msk.bf16.gmra.mrb[136].mxu1 %vm546_vm3, %v5221_v14  ;;  %10695 = vmatprep.subr.bf16.mxu0 %v11410_v3  ;;  %v5539_v27 = vpack.c.bf16 %v5528_v53, %v5527_v54  ;;  %v13454_v14 = vld [vmem:[#allocation2 + $0x21] sm:$0xff] }
 0x5c0   : > { %10576 = vmatmul.mubr.msk.bf16.gmra.mrb[172].mxu0 %vm546_vm3, %v5380_v58  ;;  %10547 = vmatprep.mubr.msk.bf16.mxu1 %vm11411_vm1, %v11410_v3  ;;  %v5698_v58 = vpack.c.bf16 %v13451_v61, %v13454_v14  ;;  %v6003_v53 = vld [vmem:[#allocation2 + $0x22] sm:$0xff]  ;;  %v6002_v54 = vld [vmem:[#allocation2 + $0x1a] sm:$0xff] }
 0x5c1   : > { %10579 = vmatprep.mubr.msk.bf16.mxu0 %vm11411_vm1, %v11410_v3 }
 0x5c7   : > { %10548 = vmatmul.mubr.msk.bf16.gmra.mrb[140].mxu1 %vm546_vm3, %v5222_v2  ;;  %v5529_v2 = vld [vmem:[#allocation2 + $0x30] sm:$0xff] }
 0x5c8   : > { %10580 = vmatmul.mubr.msk.bf16.gmra.mrb[176].mxu0 %vm546_vm3, %v5381_v31  ;;  %10551 = vmatprep.mubr.msk.bf16.mxu1 %vm11411_vm1, %v11410_v3  ;;  %v5540_v31 = vpack.c.bf16 %v5530_v29, %v5529_v2  ;;  %v5857_v29 = vpack.c.bf16 %v13468_v23, %v13451_v61  ;;  %v6004_v2 = vld [vmem:[#allocation2 + $0x2a] sm:$0xff]  ;;  %v6009_v23 = vld [vmem:[#allocation2 + $0x52] sm:$0xff] }
 0x5c9   : > { %10583 = vmatprep.mubr.msk.bf16.mxu0 %vm11411_vm1, %v11410_v3 }
 0x5cf   : > { %10552 = vmatmul.mubr.msk.bf16.gmra.mrb[144].mxu1 %vm546_vm3, %v5223_v46  ;;  %v5532_v46 = vld [vmem:[#allocation2 + $0x48] sm:$0xff] }
 0x5d0   : > { %10584 = vmatmul.mubr.msk.bf16.gmra.mrb[180].mxu0 %vm546_vm3, %v5382_v51  ;;  %10555 = vmatprep.mubr.msk.bf16.mxu1 %vm11411_vm1, %v11410_v3  ;;  %v13478_v51 = vld [vmem:[#allocation2 + $0x49] sm:$0xff]  ;;  %v5541_v50 = vpack.c.bf16 %v5532_v46, %v5531_v15  ;;  %v6006_v15 = vld [vmem:[#allocation2 + $0x3a] sm:$0xff] }
 0x5d1   : > { %10587 = vmatprep.mubr.msk.bf16.mxu0 %vm11411_vm1, %v11410_v3 }
 0x5d7   : > { %10556 = vmatmul.mubr.msk.bf16.gmra.mrb[148].mxu1 %vm546_vm3, %v5224_v30  ;;  %v5690_v30 = vld [vmem:[#allocation2 + $0x41] sm:$0xff] }
 0x5d8   : > { %10588 = vmatmul.mubr.msk.bf16.gmra.mrb[184].mxu0 %vm546_vm3, %v5383_v48  ;;  %10559 = vmatprep.mubr.msk.bf16.mxu1 %vm11411_vm1, %v11410_v3  ;;  %v5700_v48 = vpack.c.bf16 %v13478_v51, %v5690_v30  ;;  %v5858_v46 = vpack.c.bf16 %v5690_v30, %v13466_v45  ;;  %v6011_v45 = vld [vmem:[#allocation2 + $0x62] sm:$0xff] }
 0x5d9   : > { %10591 = vmatprep.mubr.msk.bf16.mxu0 %vm11411_vm1, %v11410_v3 }
 0x5df   : > { %10560 = vmatmul.mubr.msk.bf16.gmra.mrb[152].mxu1 %vm546_vm3, %v5225_v16  ;;  %v5533_v16 = vld [vmem:[#allocation2 + $0x50] sm:$0xff] }
 0x5e0   : > { %10592 = vmatmul.mubr.msk.bf16.gmra.mrb[188].mxu0 %vm546_vm3, %v5384_v42  ;;  %10563 = vmatprep.mubr.msk.bf16.mxu1 %vm11411_vm1, %v11410_v3  ;;  %v5542_v42 = vpack.c.bf16 %v5534_v55, %v5533_v16  ;;  %v6010_v16 = vld [vmem:[#allocation2 + $0x5a] sm:$0xff] }
 0x5e1   : > { %10595 = vmatprep.mubr.msk.bf16.mxu0 %vm11411_vm1, %v11410_v3 }
 0x5e7   : > { %10564 = vmatmul.mubr.msk.bf16.gmra.mrb[156].mxu1 %vm546_vm3, %v5226_v39  ;;  %v5536_v39 = vld [vmem:[#allocation2 + $0x68] sm:$0xff] }
 0x5e8   : > { %10596 = vmatmul.mubr.msk.bf16.gmra.mrb[192].mxu0 %vm546_vm3, %v5385_v25  ;;  %10603 = vmatprep.mubr.msk.bf16.mxu1 %vm11411_vm1, %v11410_v3  ;;  %v13496_v25 = vld [vmem:[#allocation2 + $0x69] sm:$0xff]  ;;  %v5543_v32 = vpack.c.bf16 %v5536_v39, %v5535_v11 }
 0x5e9   : > { %10635 = vmatprep.mubr.msk.bf16.mxu0 %vm11411_vm1, %v11410_v3 }
 0x5ef   : > { %10604 = vmatmul.mubr.msk.bf16.vlgmr.msra.gmra.mrb[160].mxu1 %vm546_vm3, %v5538_v17  ;;  %v5694_v17 = vld [vmem:[#allocation2 + $0x61] sm:$0xff] }
 0x5f0   : > { %10636 = vmatmul.mubr.msk.bf16.vlgmr.msra.gmra.mrb[196].mxu0 %vm546_vm3, %v5697_v18  ;;  %10607 = vmatprep.mubr.msk.bf16.mxu1 %vm11411_vm1, %v11410_v3  ;;  %v5702_v44 = vpack.c.bf16 %v13496_v25, %v5694_v17  ;;  %v5696_v18 = vld [vmem:[#allocation2 + $0x71] sm:$0xf]  ;;  %v5860_v30 = vpack.c.bf16 %v5694_v17, %v13487_v43  ;;  %v5855_v43 = vld [vmem:[#allocation2 + $0x79] sm:$0xf] }
 0x5f1   : > { %10639 = vmatprep.mubr.msk.bf16.mxu0 %vm11411_vm1, %v11410_v3  ;;  %10664 = vmatpush3.bf16.msra.mxu1 %v11316_v40  ;;  %v5537_v40 = vld [vmem:[#allocation2 + $0x70] sm:$0xf] }
 0x5f2   : > { %10665 = vmatprep.subr.bf16.mxu1 %v11410_v3  ;;  %10696 = vmatpush3.bf16.msra.mxu0 %v11318_v7  ;;  %v5544_v7 = vpack.c.bf16 %v5537_v40, %v5537_v40 }
 0x5f3   : > { %10697 = vmatprep.subr.bf16.mxu0 %v11410_v3 }
 0x5f5   : > { %10666 = vmatpush3.bf16.msra.mxu1 %v11317_v0  ;;  %v5703_v0 = vpack.c.bf16 %v5696_v18, %v5696_v18  ;;  %v5862_v18 = vpack.c.bf16 %v5855_v43, %v5855_v43 }
 0x5f6   : > { %10698 = vmatpush3.bf16.msra.mxu0 %v11319_v36  ;;  %10727 = vmatprep.subr.bf16.mxu1 %v11410_v3  ;;  %v5856_v36 = vpack.c.bf16 %v13454_v14, %v13429_v20  ;;  %v11321_v20 = vld [vmem:[%s14686_s3 + $0x1a8] sm:$0xff]   ;;  %v6005_v14 = vld [vmem:[#allocation2 + $0x32] sm:$0xff] }
 0x5f7   : > { %10608 = vmatmul.mubr.msk.bf16.gmra.mrb[164].mxu1 %vm546_vm3, %v5539_v27  ;;  %10759 = vmatprep.subr.bf16.mxu0 %v11410_v3  ;;  %v11320_v27 = vld [vmem:[%s14686_s3 + $0x1a0] sm:$0xff]  }
 0x5f8   : > { %10640 = vmatmul.mubr.msk.bf16.gmra.mrb[200].mxu0 %vm546_vm3, %v5698_v58  ;;  %10611 = vmatprep.mubr.msk.bf16.mxu1 %vm11411_vm1, %v11410_v3  ;;  %v6015_v58 = vpack.c.bf16 %v6003_v53, %v6002_v54 }
 0x5f9   : > { %10643 = vmatprep.mubr.msk.bf16.mxu0 %vm11411_vm1, %v11410_v3 }
 0x5ff   : > { %10612 = vmatmul.mubr.msk.bf16.gmra.mrb[168].mxu1 %vm546_vm3, %v5540_v31  ;;  %v6016_v31 = vpack.c.bf16 %v6005_v14, %v6004_v2  ;;  %v6162_v14 = vld [vmem:[#allocation2 + $0x23] sm:$0xff] }
 0x600   : > { %10644 = vmatmul.mubr.msk.bf16.gmra.mrb[204].mxu0 %vm546_vm3, %v5699_v57  ;;  %10615 = vmatprep.mubr.msk.bf16.mxu1 %vm11411_vm1, %v11410_v3  ;;  %v6007_v57 = vld [vmem:[#allocation2 + $0x42] sm:$0xff] }
 0x601   : > { %10647 = vmatprep.mubr.msk.bf16.mxu0 %vm11411_vm1, %v11410_v3  ;;  %v6017_v61 = vpack.c.bf16 %v6007_v57, %v6006_v15  ;;  %v6161_v15 = vld [vmem:[#allocation2 + $0x1b] sm:$0xff] }
 0x607   : > { %10616 = vmatmul.mubr.msk.bf16.gmra.mrb[172].mxu1 %vm546_vm3, %v5541_v50  ;;  %v5859_v50 = vpack.c.bf16 %v5692_v28, %v13478_v51  ;;  %v5854_v51 = vld [vmem:[#allocation2 + $0x71] sm:$0xff] }
 0x608   : > { %10648 = vmatmul.mubr.msk.bf16.gmra.mrb[208].mxu0 %vm546_vm3, %v5700_v48  ;;  %10619 = vmatprep.mubr.msk.bf16.mxu1 %vm11411_vm1, %v11410_v3  ;;  %v6008_v48 = vld [vmem:[#allocation2 + $0x4a] sm:$0xff]  ;;  %v5861_v39 = vpack.c.bf16 %v5854_v51, %v13496_v25 }
 0x609   : > { %10651 = vmatprep.mubr.msk.bf16.mxu0 %vm11411_vm1, %v11410_v3  ;;  %v6018_v55 = vpack.c.bf16 %v6009_v23, %v6008_v48  ;;  %v6012_v28 = vld [vmem:[#allocation2 + $0x6a] sm:$0xff] }
 0x60f   : > { %10620 = vmatmul.mubr.msk.bf16.gmra.mrb[176].mxu1 %vm546_vm3, %v5542_v42  ;;  %v6019_v42 = vpack.c.bf16 %v6011_v45, %v6010_v16 }
 0x610   : > { %10652 = vmatmul.mubr.msk.bf16.gmra.mrb[212].mxu0 %vm546_vm3, %v5701_v37  ;;  %10623 = vmatprep.mubr.msk.bf16.mxu1 %vm11411_vm1, %v11410_v3  ;;  %v6013_v37 = vld [vmem:[#allocation2 + $0x72] sm:$0xff] }
 0x611   : > { %10655 = vmatprep.mubr.msk.bf16.mxu0 %vm11411_vm1, %v11410_v3  ;;  %v6020_v11 = vpack.c.bf16 %v6013_v37, %v6012_v28 }
 0x617   : > { %10624 = vmatmul.mubr.msk.bf16.gmra.mrb[180].mxu1 %vm546_vm3, %v5543_v32  ;;  %v6014_v32 = vld [vmem:[#allocation2 + $0x7a] sm:$0xf] }
 0x618   : > { %10656 = vmatmul.mubr.msk.bf16.gmra.mrb[216].mxu0 %vm546_vm3, %v5702_v44  ;;  %10627 = vmatprep.mubr.msk.bf16.mxu1 %vm11411_vm1, %v11410_v3  ;;  %v6021_v53 = vpack.c.bf16 %v6014_v32, %v6014_v32 }
 0x619   : > { %10659 = vmatprep.mubr.msk.bf16.mxu0 %vm11411_vm1, %v11410_v3 }
 0x61f   : > { %10628 = vmatmul.mubr.msk.bf16.gmra.mrb[184].mxu1 %vm546_vm3, %v5544_v7 }
 0x620   : > { %10660 = vmatmul.mubr.msk.bf16.gmra.mrb[220].mxu0 %vm546_vm3, %v5703_v0  ;;  %10667 = vmatprep.mubr.msk.bf16.mxu1 %vm11411_vm1, %v11410_v3 }
 0x621   : > { %10699 = vmatprep.mubr.msk.bf16.mxu0 %vm11411_vm1, %v11410_v3 }
 0x627   : > { %10668 = vmatmul.mubr.msk.bf16.vlgmr.msra.gmra.mrb[188].mxu1 %vm546_vm3, %v5856_v36 }
 0x628   : > { %10700 = vmatmul.mubr.msk.bf16.vlgmr.msra.gmra.mrb[224].mxu0 %vm546_vm3, %v6015_v58  ;;  %10671 = vmatprep.mubr.msk.bf16.mxu1 %vm11411_vm1, %v11410_v3 }
 0x629   : > { %10703 = vmatprep.mubr.msk.bf16.mxu0 %vm11411_vm1, %v11410_v3  ;;  %10728 = vmatpush3.bf16.msra.mxu1 %v11320_v27 }
 0x62a   : > { %10729 = vmatprep.subr.bf16.mxu1 %v11410_v3 }
 0x62d   : > { %10730 = vmatpush3.bf16.msra.mxu1 %v11321_v20 }
 0x62e   : > { %10791 = vmatprep.subr.bf16.mxu1 %v11410_v3 }
 0x62f   : > { %10672 = vmatmul.mubr.msk.bf16.gmra.mrb[192].mxu1 %vm546_vm3, %v5857_v29 }
 0x630   : > { %10704 = vmatmul.mubr.msk.bf16.gmra.mrb[228].mxu0 %vm546_vm3, %v6016_v31  ;;  %10675 = vmatprep.mubr.msk.bf16.mxu1 %vm11411_vm1, %v11410_v3 }
 0x631   : > { %10707 = vmatprep.mubr.msk.bf16.mxu0 %vm11411_vm1, %v11410_v3 }
 0x637   : > { %10676 = vmatmul.mubr.msk.bf16.gmra.mrb[196].mxu1 %vm546_vm3, %v5858_v46 }
 0x638   : > { %10708 = vmatmul.mubr.msk.bf16.gmra.mrb[232].mxu0 %vm546_vm3, %v6017_v61  ;;  %10679 = vmatprep.mubr.msk.bf16.mxu1 %vm11411_vm1, %v11410_v3 }
 0x639   : > { %10711 = vmatprep.mubr.msk.bf16.mxu0 %vm11411_vm1, %v11410_v3 }
 0x63f   : > { %10680 = vmatmul.mubr.msk.bf16.gmra.mrb[200].mxu1 %vm546_vm3, %v5859_v50  ;;  %v6174_v50 = vpack.c.bf16 %v6162_v14, %v6161_v15  ;;  %v6168_v15 = vld [vmem:[#allocation2 + $0x53] sm:$0xff] }
 0x640   : > { %10712 = vmatmul.mubr.msk.bf16.gmra.mrb[236].mxu0 %vm546_vm3, %v6018_v55  ;;  %10683 = vmatprep.mubr.msk.bf16.mxu1 %vm11411_vm1, %v11410_v3 }
 0x641   : > { %10715 = vmatprep.mubr.msk.bf16.mxu0 %vm11411_vm1, %v11410_v3 }
 0x647   : > { %10684 = vmatmul.mubr.msk.bf16.gmra.mrb[204].mxu1 %vm546_vm3, %v5860_v30  ;;  %v6164_v30 = vld [vmem:[#allocation2 + $0x33] sm:$0xff] }
 0x648   : > { %10716 = vmatmul.mubr.msk.bf16.gmra.mrb[240].mxu0 %vm546_vm3, %v6019_v42  ;;  %10687 = vmatprep.mubr.msk.bf16.mxu1 %vm11411_vm1, %v11410_v3 }
 0x649   : > { %10719 = vmatprep.mubr.msk.bf16.mxu0 %vm11411_vm1, %v11410_v3 }
 0x64f   : > { %10688 = vmatmul.mubr.msk.bf16.gmra.mrb[208].mxu1 %vm546_vm3, %v5861_v39  ;;  %v6163_v39 = vld [vmem:[#allocation2 + $0x2b] sm:$0xff] }
 0x650   : > { %10720 = vmatmul.mubr.msk.bf16.gmra.mrb[244].mxu0 %vm546_vm3, %v6020_v11  ;;  %10691 = vmatprep.mubr.msk.bf16.mxu1 %vm11411_vm1, %v11410_v3  ;;  %v6175_v32 = vpack.c.bf16 %v6164_v30, %v6163_v39  ;;  %v6167_v30 = vld [vmem:[#allocation2 + $0x4b] sm:$0xff] }
 0x651   : > { %10723 = vmatprep.mubr.msk.bf16.mxu0 %vm11411_vm1, %v11410_v3 }
 0x652   : > { %v5032_v17 = vpop.f32.mrb[104].mxu1 }
 0x653   : > { %v5153_v44 = vpop.f32.mrb[140].mxu0  ;;  %v10477_v40 = vpop.f32.mrb[105].mxu1 }
 0x654   : > { %v13563_v7 = vadd.f32 %v5153_v44, %v5032_v17  ;;  %v10509_v25 = vpop.f32.mrb[141].mxu0  ;;  %v5035_v0 = vpop.f32.mrb[106].mxu1 }
 0x655   : > { %v5156_v36 = vpop.f32.mrb[142].mxu0  ;;  %v10478_v54 = vpop.f32.mrb[107].mxu1 }
 0x656   : > { %v13565_v27 = vadd.f32 %v5156_v36, %v5035_v0  ;;  %v10510_v58 = vpop.f32.mrb[143].mxu0 }
 0x657   : > { %10692 = vmatmul.mubr.msk.bf16.gmra.mrb[212].mxu1 %vm546_vm3, %v5862_v18  ;;  %v6166_v18 = vld [vmem:[#allocation2 + $0x43] sm:$0xff]  ;;  %v6165_v58 = vld [vmem:[#allocation2 + $0x3b] sm:$0xff] }
 0x658   : > { %10724 = vmatmul.mubr.msk.bf16.gmra.mrb[248].mxu0 %vm546_vm3, %v6021_v53  ;;  %10731 = vmatprep.mubr.msk.bf16.mxu1 %vm11411_vm1, %v11410_v3 }
 0x659   : > { %10763 = vmatprep.mubr.msk.bf16.mxu0 %vm11411_vm1, %v11410_v3 }
 0x65a   : > { %v5040_v20 = vpop.f32.mrb[108].mxu1 }
 0x65b   : > { %v5161_v29 = vpop.f32.mrb[144].mxu0  ;;  %v10481_v2 = vpop.f32.mrb[109].mxu1 }
 0x65c   : > { %v13573_v31 = vadd.f32 %v5161_v29, %v5040_v20  ;;  %v10513_v57 = vpop.f32.mrb[145].mxu0  ;;  %v5043_v46 = vpop.f32.mrb[110].mxu1  ;;  %v6176_v29 = vpack.c.bf16 %v6166_v18, %v6165_v58 }
 0x65d   : > { %v5164_v61 = vpop.f32.mrb[146].mxu0  ;;  %v10482_v23 = vpop.f32.mrb[111].mxu1 }
 0x65e   : > { %v13575_v48 = vadd.f32 %v5164_v61, %v5043_v46  ;;  %v10514_v55 = vpop.f32.mrb[147].mxu0 }
 0x65f   : > { %10732 = vmatmul.mubr.msk.bf16.vlgmr.msra.gmra.mrb[216].mxu1 %vm546_vm3, %v6174_v50 }
 0x660   : > { %10735 = vmatprep.mubr.msk.bf16.mxu1 %vm11411_vm1, %v11410_v3 }
 0x662   : > { %v5048_v45 = vpop.f32.mrb[112].mxu1 }
 0x663   : > { %v5169_v16 = vpop.f32.mrb[148].mxu0  ;;  %v10485_v42 = vpop.f32.mrb[113].mxu1 }
 0x664   : > { %v13580_v51 = vadd.f32 %v5169_v16, %v5048_v45  ;;  %v10517_v28 = vpop.f32.mrb[149].mxu0  ;;  %v5051_v37 = vpop.f32.mrb[114].mxu1 }
 0x665   : > { %v5172_v11 = vpop.f32.mrb[150].mxu0  ;;  %v10486_v43 = vpop.f32.mrb[115].mxu1  ;;  %v6177_v28 = vpack.c.bf16 %v6168_v15, %v6167_v30 }
 0x666   : > { %v13582_v17 = vadd.f32 %v5172_v11, %v5051_v37  ;;  %v10518_v44 = vpop.f32.mrb[151].mxu0  ;;  %v6170_v43 = vld [vmem:[#allocation2 + $0x63] sm:$0xff] }
 0x667   : > { %10736 = vmatmul.mubr.msk.bf16.gmra.mrb[220].mxu1 %vm546_vm3, %v6175_v32 }
 0x668   : > { %10739 = vmatprep.mubr.msk.bf16.mxu1 %vm11411_vm1, %v11410_v3 }
 0x66a   : > { %v5056_v40 = vpop.f32.mrb[116].mxu1 }
 0x66b   : > { %v5177_v25 = vpop.f32.mrb[152].mxu0  ;;  %v10489_v0 = vpop.f32.mrb[117].mxu1 }
 0x66c   : > { %v13587_v53 = vadd.f32 %v5177_v25, %v5056_v40  ;;  %v10521_v36 = vpop.f32.mrb[153].mxu0  ;;  %v5059_v54 = vpop.f32.mrb[118].mxu1  ;;  %v6169_v0 = vld [vmem:[#allocation2 + $0x5b] sm:$0xff] }
 0x66d   : > { %v5180_v20 = vpop.f32.mrb[154].mxu0  ;;  %v10490_v14 = vpop.f32.mrb[119].mxu1  ;;  %v6178_v58 = vpack.c.bf16 %v6170_v43, %v6169_v0 }
 0x66e   : > { %v13589_v2 = vadd.f32 %v5180_v20, %v5059_v54  ;;  %v10522_v57 = vpop.f32.mrb[155].mxu0 }
 0x66f   : > { %10740 = vmatmul.mubr.msk.bf16.gmra.mrb[224].mxu1 %vm546_vm3, %v6176_v29  ;;  %v6171_v57 = vld [vmem:[#allocation2 + $0x6b] sm:$0xff] }
 0x670   : > { %10743 = vmatprep.mubr.msk.bf16.mxu1 %vm11411_vm1, %v11410_v3 }
 0x672   : > { %v5064_v46 = vpop.f32.mrb[120].mxu1 }
 0x673   : > { %v5185_v61 = vpop.f32.mrb[156].mxu0  ;;  %v10493_v23 = vpop.f32.mrb[121].mxu1 }
 0x674   : > { %v13594_v50 = vadd.f32 %v5185_v61, %v5064_v46  ;;  %v10525_v55 = vpop.f32.mrb[157].mxu0  ;;  %v5067_v45 = vpop.f32.mrb[122].mxu1  ;;  %v6172_v46 = vld [vmem:[#allocation2 + $0x73] sm:$0xff] }
 0x675   : > { %v5188_v16 = vpop.f32.mrb[158].mxu0  ;;  %v10494_v42 = vpop.f32.mrb[123].mxu1 }
 0x676   : > { %v13596_v37 = vadd.f32 %v5188_v16, %v5067_v45  ;;  %v10526_v39 = vpop.f32.mrb[159].mxu0  ;;  %v6179_v42 = vpack.c.bf16 %v6172_v46, %v6171_v57 }
 0x677   : > { %10744 = vmatmul.mubr.msk.bf16.gmra.mrb[228].mxu1 %vm546_vm3, %v6177_v28  ;;  %v6173_v39 = vld [vmem:[#allocation2 + $0x7b] sm:$0xf] }
 0x678   : > { %10747 = vmatprep.mubr.msk.bf16.mxu1 %vm11411_vm1, %v11410_v3 }
 0x67a   : > { %v5072_v11 = vpop.f32.mrb[124].mxu1 }
 0x67b   : > { %v5193_v32 = vpop.f32.mrb[160].mxu0  ;;  %v10497_v44 = vpop.f32.mrb[125].mxu1 }
 0x67c   : > { %v13601_v40 = vadd.f32 %v5193_v32, %v5072_v11  ;;  %v10529_v18 = vpop.f32.mrb[161].mxu0  ;;  %v5075_v25 = vpop.f32.mrb[126].mxu1 }
 0x67d   : > { %v5196_v36 = vpop.f32.mrb[162].mxu0  ;;  %v10498_v54 = vpop.f32.mrb[127].mxu1  ;;  %v6180_v18 = vpack.c.bf16 %v6173_v39, %v6173_v39 }
 0x67e   : > { %v13603_v20 = vadd.f32 %v5196_v36, %v5075_v25  ;;  %v10530_v14 = vpop.f32.mrb[163].mxu0 }
 0x67f   : > { %10748 = vmatmul.mubr.msk.bf16.gmra.mrb[232].mxu1 %vm546_vm3, %v6178_v58 }
 0x680   : > { %10751 = vmatprep.mubr.msk.bf16.mxu1 %vm11411_vm1, %v11410_v3 }
 0x682   : > { %v5080_v29 = vpop.f32.mrb[128].mxu1 }
 0x683   : > { %v5201_v15 = vpop.f32.mrb[164].mxu0  ;;  %v10501_v61 = vpop.f32.mrb[129].mxu1 }
 0x684   : > { %v13608_v23 = vadd.f32 %v5201_v15, %v5080_v29  ;;  %v10533_v55 = vpop.f32.mrb[165].mxu0  ;;  %v5083_v45 = vpop.f32.mrb[130].mxu1 }
 0x685   : > { %v5204_v30 = vpop.f32.mrb[166].mxu0  ;;  %v10502_v16 = vpop.f32.mrb[131].mxu1 }
 0x686   : > { %v10534_v28 = vpop.f32.mrb[167].mxu0 }
 0x687   : > { %10752 = vmatmul.mubr.msk.bf16.gmra.mrb[236].mxu1 %vm546_vm3, %v6179_v42 }
 0x688   : > { %10755 = vmatprep.mubr.msk.bf16.mxu1 %vm11411_vm1, %v11410_v3 }
 0x68a   : > { %v5299_v11 = vpop.f32.mrb[132].mxu1 }
 0x68b   : > { %v5353_v43 = vadd.f32 %v5299_v11, %v13563_v7  ;;  %v5458_v32 = vpop.f32.mrb[168].mxu0  ;;  %v10541_v44 = vpop.f32.mrb[133].mxu1  ;;  %v11322_v11 = vld [vmem:[%s14686_s3 + $0x1c0] sm:$0xff]  }
 0x68c   : > { %v10573_v25 = vpop.f32.mrb[169].mxu0  ;;  %v5302_v0 = vpop.f32.mrb[134].mxu1  ;;  %10760 = vmatpush3.bf16.msra.mxu0 %v11322_v11 }
 0x68d   : > { %v13614_v36 = vadd.f32 %v5458_v32, %v5353_v43  ;;  %v5354_v54 = vadd.f32 %v5302_v0, %v13565_v27  ;;  %v5461_v58 = vpop.f32.mrb[170].mxu0  ;;  %v10542_v14 = vpop.f32.mrb[135].mxu1  ;;  %10761 = vmatprep.subr.bf16.mxu0 %v11410_v3 }
 0x68e   : > { %v10574_v29 = vpop.f32.mrb[171].mxu0 }
 0x68f   : > { %v13617_v57 = vadd.f32 %v5461_v58, %v5354_v54  ;;  %10756 = vmatmul.mubr.msk.bf16.gmra.mrb[240].mxu1 %vm546_vm3, %v6180_v18 }
 0x690   : > { %10795 = vmatprep.mubr.msk.bf16.mxu1 %vm11411_vm1, %v11410_v3 }
 0x692   : > { %v5307_v7 = vpop.f32.mrb[136].mxu1 }
 0x693   : > { %v5355_v46 = vadd.f32 %v5307_v7, %v13573_v31  ;;  %v5466_v15 = vpop.f32.mrb[172].mxu0  ;;  %v10545_v61 = vpop.f32.mrb[137].mxu1 }
 0x694   : > { %v10577_v55 = vpop.f32.mrb[173].mxu0  ;;  %v5310_v45 = vpop.f32.mrb[138].mxu1 }
 0x695   : > { %v13623_v30 = vadd.f32 %v5466_v15, %v5355_v46  ;;  %v5356_v27 = vadd.f32 %v5310_v45, %v13575_v48  ;;  %v5469_v16 = vpop.f32.mrb[174].mxu0  ;;  %v10546_v42 = vpop.f32.mrb[139].mxu1 }
 0x696   : > { %v10578_v28 = vpop.f32.mrb[175].mxu0 }
 0x697   : > { %v13626_v39 = vadd.f32 %v5469_v16, %v5356_v27 }
 0x69a   : > { %v5315_v43 = vpop.f32.mrb[140].mxu1 }
 0x69b   : > { %v5357_v31 = vadd.f32 %v5315_v43, %v13580_v51  ;;  %v5474_v32 = vpop.f32.mrb[176].mxu0  ;;  %v10549_v44 = vpop.f32.mrb[141].mxu1 }
 0x69c   : > { %v10581_v18 = vpop.f32.mrb[177].mxu0  ;;  %v5318_v25 = vpop.f32.mrb[142].mxu1 }
 0x69d   : > { %v13633_v48 = vadd.f32 %v5474_v32, %v5357_v31  ;;  %v5358_v0 = vadd.f32 %v5318_v25, %v13582_v17  ;;  %v5477_v54 = vpop.f32.mrb[178].mxu0  ;;  %v10550_v58 = vpop.f32.mrb[143].mxu1 }
 0x69e   : > { %v10582_v14 = vpop.f32.mrb[179].mxu0 }
 0x69f   : > { %v13636_v29 = vadd.f32 %v5477_v54, %v5358_v0 }
 0x6a2   : > { %v5323_v7 = vpop.f32.mrb[144].mxu1 }
 0x6a3   : > { %v5359_v46 = vadd.f32 %v5323_v7, %v13587_v53  ;;  %v5482_v15 = vpop.f32.mrb[180].mxu0  ;;  %v10553_v61 = vpop.f32.mrb[145].mxu1 }
 0x6a4   : > { %v10585_v55 = vpop.f32.mrb[181].mxu0  ;;  %v5326_v51 = vpop.f32.mrb[146].mxu1 }
 0x6a5   : > { %v13639_v45 = vadd.f32 %v5482_v15, %v5359_v46  ;;  %v5360_v27 = vadd.f32 %v5326_v51, %v13589_v2  ;;  %v5485_v16 = vpop.f32.mrb[182].mxu0  ;;  %v10554_v42 = vpop.f32.mrb[147].mxu1 }
 0x6a6   : > { %v10586_v28 = vpop.f32.mrb[183].mxu0 }
 0x6a7   : > { %v13642_v17 = vadd.f32 %v5485_v16, %v5360_v27 }
 0x6aa   : > { %v5331_v11 = vpop.f32.mrb[148].mxu1 }
 0x6ab   : > { %v5361_v43 = vadd.f32 %v5331_v11, %v13594_v50  ;;  %v5490_v31 = vpop.f32.mrb[184].mxu0  ;;  %v10557_v32 = vpop.f32.mrb[149].mxu1 }
 0x6ac   : > { %v10589_v44 = vpop.f32.mrb[185].mxu0  ;;  %v5334_v53 = vpop.f32.mrb[150].mxu1 }
 0x6ad   : > { %v13645_v18 = vadd.f32 %v5490_v31, %v5361_v43  ;;  %v5362_v25 = vadd.f32 %v5334_v53, %v13596_v37  ;;  %v5493_v0 = vpop.f32.mrb[186].mxu0  ;;  %v10558_v54 = vpop.f32.mrb[151].mxu1 }
 0x6ae   : > { %v10590_v58 = vpop.f32.mrb[187].mxu0 }
 0x6af   : > { %v13648_v2 = vadd.f32 %v5493_v0, %v5362_v25 }
 0x6b2   : > { %v5339_v14 = vpop.f32.mrb[152].mxu1 }
 0x6b3   : > { %v5363_v7 = vadd.f32 %v5339_v14, %v13601_v40  ;;  %v5498_v46 = vpop.f32.mrb[188].mxu0  ;;  %v10561_v15 = vpop.f32.mrb[153].mxu1  ;;  %v11323_v40 = vld [vmem:[%s14686_s3 + $0x1c8] sm:$0xff]  }
 0x6b4   : > { %v10593_v61 = vpop.f32.mrb[189].mxu0  ;;  %v5342_v50 = vpop.f32.mrb[154].mxu1  ;;  %10762 = vmatpush3.bf16.msra.mxu0 %v11323_v40 }
 0x6b5   : > { %v13651_v55 = vadd.f32 %v5498_v46, %v5363_v7  ;;  %v5364_v51 = vadd.f32 %v5342_v50, %v13603_v20  ;;  %v5501_v27 = vpop.f32.mrb[190].mxu0  ;;  %v10562_v16 = vpop.f32.mrb[155].mxu1  ;;  %10823 = vmatprep.subr.bf16.mxu0 %v11410_v3  ;;  %v11325_v61 = vld [vmem:[%s14686_s3 + $0x1b8] sm:$0xff]  }
 0x6b6   : > { %v10594_v42 = vpop.f32.mrb[191].mxu0 }
 0x6b7   : > { %v13654_v37 = vadd.f32 %v5501_v27, %v5364_v51 }
 0x6ba   : > { %v5347_v28 = vpop.f32.mrb[156].mxu1 }
 0x6bb   : > { %v5365_v11 = vadd.f32 %v5347_v28, %v13608_v23  ;;  %v5506_v43 = vpop.f32.mrb[192].mxu0  ;;  %v10565_v31 = vpop.f32.mrb[157].mxu1  ;;  %v11324_v23 = vld [vmem:[%s14686_s3 + $0x1b0] sm:$0xff]  }
 0x6bc   : > { %v10597_v32 = vpop.f32.mrb[193].mxu0  ;;  %v5350_v44 = vpop.f32.mrb[158].mxu1  ;;  %10792 = vmatpush3.bf16.msra.mxu1 %v11324_v23 }
 0x6bd   : > { %v13660_v53 = vadd.f32 %v5506_v43, %v5365_v11  ;;  %v5509_v25 = vpop.f32.mrb[194].mxu0  ;;  %v10566_v20 = vpop.f32.mrb[159].mxu1  ;;  %10793 = vmatprep.subr.bf16.mxu1 %v11410_v3 }
 0x6be   : > { %v10598_v0 = vpop.f32.mrb[195].mxu0 }
 0x6c0   : > { %10794 = vmatpush3.bf16.msra.mxu1 %v11325_v61 }
 0x6c1   : > { %10855 = vmatprep.subr.bf16.mxu1 %v11410_v3 }
 0x6c2   : > { %v5617_v54 = vpop.f32.mrb[160].mxu1 }
 0x6c3   : > { %v5671_v58 = vadd.f32 %v5617_v54, %v13614_v36  ;;  %v5776_v14 = vpop.f32.mrb[196].mxu0  ;;  %v10605_v7 = vpop.f32.mrb[161].mxu1 }
 0x6c4   : > { %v10637_v46 = vpop.f32.mrb[197].mxu0  ;;  %v5620_v15 = vpop.f32.mrb[162].mxu1 }
 0x6c5   : > { %v13671_v50 = vadd.f32 %v5776_v14, %v5671_v58  ;;  %v5672_v51 = vadd.f32 %v5620_v15, %v13617_v57  ;;  %v5779_v27 = vpop.f32.mrb[198].mxu0  ;;  %v10606_v16 = vpop.f32.mrb[163].mxu1 }
 0x6c6   : > { %v10638_v42 = vpop.f32.mrb[199].mxu0 }
 0x6c7   : > { %v13674_v28 = vadd.f32 %v5779_v27, %v5672_v51 }
 0x6ca   : > { %v5625_v36 = vpop.f32.mrb[164].mxu1 }
 0x6cb   : > { %v5673_v11 = vadd.f32 %v5625_v36, %v13623_v30  ;;  %v5784_v43 = vpop.f32.mrb[200].mxu0  ;;  %v10609_v31 = vpop.f32.mrb[165].mxu1 }
 0x6cc   : > { %v10641_v40 = vpop.f32.mrb[201].mxu0  ;;  %v5628_v32 = vpop.f32.mrb[166].mxu1 }
 0x6cd   : > { %v13678_v44 = vadd.f32 %v5784_v43, %v5673_v11  ;;  %v5674_v25 = vadd.f32 %v5628_v32, %v13626_v39  ;;  %v5787_v57 = vpop.f32.mrb[202].mxu0  ;;  %v10610_v20 = vpop.f32.mrb[167].mxu1 }
 0x6ce   : > { %v10642_v0 = vpop.f32.mrb[203].mxu0 }
 0x6cf   : > { %v13681_v23 = vadd.f32 %v5787_v57, %v5674_v25 }
 0x6d2   : > { %v5633_v54 = vpop.f32.mrb[168].mxu1 }
 0x6d3   : > { %v5675_v58 = vadd.f32 %v5633_v54, %v13633_v48  ;;  %v5792_v14 = vpop.f32.mrb[204].mxu0  ;;  %v10613_v7 = vpop.f32.mrb[169].mxu1 }
 0x6d4   : > { %v10645_v46 = vpop.f32.mrb[205].mxu0  ;;  %v5636_v30 = vpop.f32.mrb[170].mxu1 }
 0x6d5   : > { %v13684_v15 = vadd.f32 %v5792_v14, %v5675_v58  ;;  %v5676_v61 = vadd.f32 %v5636_v30, %v13636_v29  ;;  %v5795_v51 = vpop.f32.mrb[206].mxu0  ;;  %v10614_v27 = vpop.f32.mrb[171].mxu1 }
 0x6d6   : > { %v10646_v16 = vpop.f32.mrb[207].mxu0 }
 0x6d7   : > { %v13687_v39 = vadd.f32 %v5795_v51, %v5676_v61 }
 0x6da   : > { %v5641_v42 = vpop.f32.mrb[172].mxu1 }
 0x6db   : > { %v5677_v36 = vadd.f32 %v5641_v42, %v13639_v45  ;;  %v5800_v11 = vpop.f32.mrb[208].mxu0  ;;  %v10617_v43 = vpop.f32.mrb[173].mxu1 }
 0x6dc   : > { %v10649_v31 = vpop.f32.mrb[209].mxu0  ;;  %v5644_v48 = vpop.f32.mrb[174].mxu1 }
 0x6dd   : > { %v13690_v40 = vadd.f32 %v5800_v11, %v5677_v36  ;;  %v5678_v32 = vadd.f32 %v5644_v48, %v13642_v17  ;;  %v5803_v25 = vpop.f32.mrb[210].mxu0  ;;  %v10618_v57 = vpop.f32.mrb[175].mxu1 }
 0x6de   : > { %v10650_v20 = vpop.f32.mrb[211].mxu0 }
 0x6df   : > { %v13693_v29 = vadd.f32 %v5803_v25, %v5678_v32 }
 0x6e2   : > { %v5649_v0 = vpop.f32.mrb[176].mxu1 }
 0x6e3   : > { %v5679_v54 = vadd.f32 %v5649_v0, %v13645_v18  ;;  %v5808_v58 = vpop.f32.mrb[212].mxu0  ;;  %v10621_v14 = vpop.f32.mrb[177].mxu1 }
 0x6e4   : > { %v10653_v7 = vpop.f32.mrb[213].mxu0  ;;  %v5652_v45 = vpop.f32.mrb[178].mxu1 }
 0x6e5   : > { %v13696_v46 = vadd.f32 %v5808_v58, %v5679_v54  ;;  %v5680_v30 = vadd.f32 %v5652_v45, %v13648_v2  ;;  %v5811_v61 = vpop.f32.mrb[214].mxu0  ;;  %v10622_v51 = vpop.f32.mrb[179].mxu1 }
 0x6e6   : > { %v10654_v27 = vpop.f32.mrb[215].mxu0 }
 0x6e7   : > { %v13699_v17 = vadd.f32 %v5811_v61, %v5680_v30 }
 0x6ea   : > { %v5657_v16 = vpop.f32.mrb[180].mxu1 }
 0x6eb   : > { %v5681_v42 = vadd.f32 %v5657_v16, %v13651_v55  ;;  %v5816_v36 = vpop.f32.mrb[216].mxu0  ;;  %v10625_v11 = vpop.f32.mrb[181].mxu1 }
 0x6ec   : > { %v10657_v43 = vpop.f32.mrb[217].mxu0  ;;  %v5660_v18 = vpop.f32.mrb[182].mxu1 }
 0x6ed   : > { %v13702_v31 = vadd.f32 %v5816_v36, %v5681_v42  ;;  %v5682_v48 = vadd.f32 %v5660_v18, %v13654_v37  ;;  %v5819_v32 = vpop.f32.mrb[218].mxu0  ;;  %v10626_v25 = vpop.f32.mrb[183].mxu1 }
 0x6ee   : > { %v10658_v57 = vpop.f32.mrb[219].mxu0 }
 0x6ef   : > { %v13705_v2 = vadd.f32 %v5819_v32, %v5682_v48 }
 0x6f2   : > { %v5665_v20 = vpop.f32.mrb[184].mxu1 }
 0x6f3   : > { %v5683_v0 = vadd.f32 %v5665_v20, %v13660_v53  ;;  %v5824_v54 = vpop.f32.mrb[220].mxu0  ;;  %v10629_v58 = vpop.f32.mrb[185].mxu1 }
 0x6f4   : > { %v10661_v14 = vpop.f32.mrb[221].mxu0  ;;  %v5668_v55 = vpop.f32.mrb[186].mxu1 }
 0x6f5   : > { %v13708_v7 = vadd.f32 %v5824_v54, %v5683_v0  ;;  %v5827_v45 = vpop.f32.mrb[222].mxu0  ;;  %v10630_v30 = vpop.f32.mrb[187].mxu1 }
 0x6f6   : > { %v10662_v61 = vpop.f32.mrb[223].mxu0 }
 0x6fa   : > { %v5935_v51 = vpop.f32.mrb[188].mxu1 }
 0x6fb   : > { %v5989_v37 = vadd.f32 %v5935_v51, %v13671_v50  ;;  %v6094_v27 = vpop.f32.mrb[224].mxu0  ;;  %v10669_v16 = vpop.f32.mrb[189].mxu1 }
 0x6fc   : > { %v10701_v42 = vpop.f32.mrb[225].mxu0  ;;  %v5938_v36 = vpop.f32.mrb[190].mxu1 }
 0x6fd   : > { %v13711_v11 = vadd.f32 %v6094_v27, %v5989_v37  ;;  %v5990_v53 = vadd.f32 %v5938_v36, %v13674_v28  ;;  %v6097_v43 = vpop.f32.mrb[226].mxu0  ;;  %v10670_v18 = vpop.f32.mrb[191].mxu1 }
 0x6fe   : > { %v10702_v48 = vpop.f32.mrb[227].mxu0 }
 0x6ff   : > { %v13714_v32 = vadd.f32 %v6097_v43, %v5990_v53 }
 0x702   : > { %v5943_v25 = vpop.f32.mrb[192].mxu1 }
 0x703   : > { %v5991_v57 = vadd.f32 %v5943_v25, %v13678_v44  ;;  %v6102_v20 = vpop.f32.mrb[228].mxu0  ;;  %v10673_v0 = vpop.f32.mrb[193].mxu1 }
 0x704   : > { %v10705_v54 = vpop.f32.mrb[229].mxu0  ;;  %v5946_v50 = vpop.f32.mrb[194].mxu1 }
 0x705   : > { %v13717_v58 = vadd.f32 %v6102_v20, %v5991_v57  ;;  %v5992_v14 = vadd.f32 %v5946_v50, %v13681_v23  ;;  %v6105_v55 = vpop.f32.mrb[230].mxu0  ;;  %v10674_v45 = vpop.f32.mrb[195].mxu1 }
 0x706   : > { %v10706_v30 = vpop.f32.mrb[231].mxu0 }
 0x707   : > { %v13720_v28 = vadd.f32 %v6105_v55, %v5992_v14 }
 0x70a   : > { %v5951_v61 = vpop.f32.mrb[196].mxu1 }
 0x70b   : > { %v5993_v51 = vadd.f32 %v5951_v61, %v13684_v15  ;;  %v6110_v37 = vpop.f32.mrb[232].mxu0  ;;  %v10677_v27 = vpop.f32.mrb[197].mxu1 }
 0x70c   : > { %v10709_v16 = vpop.f32.mrb[233].mxu0  ;;  %v5954_v44 = vpop.f32.mrb[198].mxu1 }
 0x70d   : > { %v13723_v42 = vadd.f32 %v6110_v37, %v5993_v51  ;;  %v5994_v36 = vadd.f32 %v5954_v44, %v13687_v39  ;;  %v6113_v53 = vpop.f32.mrb[234].mxu0  ;;  %v10678_v43 = vpop.f32.mrb[199].mxu1 }
 0x70e   : > { %v10710_v18 = vpop.f32.mrb[235].mxu0 }
 0x70f   : > { %v13726_v23 = vadd.f32 %v6113_v53, %v5994_v36 }
 0x712   : > { %v5959_v48 = vpop.f32.mrb[200].mxu1 }
 0x713   : > { %v5995_v25 = vadd.f32 %v5959_v48, %v13690_v40  ;;  %v6118_v57 = vpop.f32.mrb[236].mxu0  ;;  %v10681_v20 = vpop.f32.mrb[201].mxu1 }
 0x714   : > { %v10713_v0 = vpop.f32.mrb[237].mxu0  ;;  %v5962_v15 = vpop.f32.mrb[202].mxu1 }
 0x715   : > { %v13729_v54 = vadd.f32 %v6118_v57, %v5995_v25  ;;  %v5996_v50 = vadd.f32 %v5962_v15, %v13693_v29  ;;  %v6121_v14 = vpop.f32.mrb[238].mxu0  ;;  %v10682_v55 = vpop.f32.mrb[203].mxu1 }
 0x716   : > { %v10714_v45 = vpop.f32.mrb[239].mxu0 }
 0x717   : > { %v13732_v39 = vadd.f32 %v6121_v14, %v5996_v50 }
 0x71a   : > { %v5967_v30 = vpop.f32.mrb[204].mxu1 }
 0x71b   : > { %v5997_v61 = vadd.f32 %v5967_v30, %v13696_v46  ;;  %v6126_v51 = vpop.f32.mrb[240].mxu0  ;;  %v10685_v37 = vpop.f32.mrb[205].mxu1 }
 0x71c   : > { %v10717_v27 = vpop.f32.mrb[241].mxu0  ;;  %v5970_v40 = vpop.f32.mrb[206].mxu1 }
 0x71d   : > { %v13735_v16 = vadd.f32 %v6126_v51, %v5997_v61  ;;  %v5998_v44 = vadd.f32 %v5970_v40, %v13699_v17  ;;  %v6129_v36 = vpop.f32.mrb[242].mxu0  ;;  %v10686_v53 = vpop.f32.mrb[207].mxu1 }
 0x71e   : > { %v10718_v43 = vpop.f32.mrb[243].mxu0 }
 0x71f   : > { %v13738_v29 = vadd.f32 %v6129_v36, %v5998_v44 }
 0x722   : > { %v5975_v18 = vpop.f32.mrb[208].mxu1 }
 0x723   : > { %v5999_v48 = vadd.f32 %v5975_v18, %v13702_v31  ;;  %v6134_v25 = vpop.f32.mrb[244].mxu0  ;;  %v10689_v57 = vpop.f32.mrb[209].mxu1 }
 0x724   : > { %v10721_v20 = vpop.f32.mrb[245].mxu0  ;;  %v5978_v46 = vpop.f32.mrb[210].mxu1 }
 0x725   : > { %v13741_v0 = vadd.f32 %v6134_v25, %v5999_v48  ;;  %v6000_v15 = vadd.f32 %v5978_v46, %v13705_v2  ;;  %v6137_v50 = vpop.f32.mrb[246].mxu0  ;;  %v10690_v14 = vpop.f32.mrb[211].mxu1  ;;  %v13752_v2 = vld [vmem:[%s14664_s4 + $0x2] ss:$0 sm:$0xff] }
 0x726   : > { %v10722_v55 = vpop.f32.mrb[247].mxu0 }
 0x727   : > { %v13744_v17 = vadd.f32 %v6137_v50, %v6000_v15 }
 0x72a   : > { %v5983_v45 = vpop.f32.mrb[212].mxu1 }
 0x72b   : > { %v6001_v30 = vadd.f32 %v5983_v45, %v13708_v7  ;;  %v10693_v61 = vpop.f32.mrb[213].mxu1  ;;  %v6142_v51 = vpop.f32.mrb[248].mxu0 }
 0x72c   : > { %v5986_v37 = vpop.f32.mrb[214].mxu1  ;;  %v10725_v31 = vpop.f32.mrb[249].mxu0 }
 0x72d   : > { %v13747_v27 = vadd.f32 %v6142_v51, %v6001_v30  ;;  %v10694_v40 = vpop.f32.mrb[215].mxu1  ;;  %v6145_v44 = vpop.f32.mrb[250].mxu0 }
 0x72e   : > { %v10726_v36 = vpop.f32.mrb[251].mxu0  ;;  %v6405_v40 = vld [vmem:[#allocation2 + $0x6] sm:$0xff] }
 0x72f   : > { %v6380_v44 = vld [vmem:[#allocation2 + $0x5] sm:$0xff] }
 0x732   : > { %v6253_v53 = vpop.f32.mrb[216].mxu1 }
 0x733   : > { %v6307_v43 = vadd.f32 %v6253_v53, %v13711_v11  ;;  %v10733_v18 = vpop.f32.mrb[217].mxu1 }
 0x734   : > { %v6256_v48 = vpop.f32.mrb[218].mxu1 }
 0x735   : > { %v6328_v7 = vadd.f32 %v13752_v2, %v6307_v43  ;;  %v6308_v25 = vadd.f32 %v6256_v48, %v13714_v32  ;;  %v10734_v57 = vpop.f32.mrb[219].mxu1 }
 0x737   : > { %v6341_v20 = vmax.f32 %v6328_v7, 0.0  ;;  %v6329_v46 = vadd.f32 %v13752_v2, %v6308_v25 }
 0x739   : > { %v6354_v15 = vmul.f32 %v6341_v20, %v12159_v13  ;;  %v6342_v50 = vmax.f32 %v6329_v46, 0.0  ;;  %v11326_v20 = vld [vmem:[%s14686_s3 + $0x1d0] sm:$0xff]   ;;  %v11328_v46 = vld [vmem:[%s14686_s3 + $0x1e0] sm:$0xff]  }
 0x73a   : > { %v6261_v14 = vpop.f32.mrb[220].mxu1 }
 0x73b   : > { %6367 = vst.msk [vmem:[#allocation2 + $0x10] sm:$0xff] %vm546_vm3, %v6354_v15  ;;  %v6355_v55 = vmul.f32 %v6342_v50, %v12167_v21  ;;  %v6309_v11 = vadd.f32 %v6261_v14, %v13717_v58  ;;  %v10737_v45 = vpop.f32.mrb[221].mxu1 }
 0x73c   : > { %v6264_v30 = vpop.f32.mrb[222].mxu1  ;;  %v11327_v45 = vld [vmem:[%s14686_s3 + $0x1d8] sm:$0xff]  }
 0x73d   : > { %6368 = vst.msk [vmem:[#allocation2 + $0x18] sm:$0xff] %vm546_vm3, %v6355_v55  ;;  %v6330_v32 = vadd.f32 %v13752_v2, %v6309_v11  ;;  %v6310_v61 = vadd.f32 %v6264_v30, %v13720_v28  ;;  %v10738_v51 = vpop.f32.mrb[223].mxu1 }
 0x73f   : > { %v6343_v37 = vmax.f32 %v6330_v32, 0.0  ;;  %v6331_v31 = vadd.f32 %v13752_v2, %v6310_v61 }
 0x741   : > { %v6356_v36 = vmul.f32 %v6343_v37, %v12175_v63  ;;  %v6344_v53 = vmax.f32 %v6331_v31, 0.0 }
 0x742   : > { %v6269_v43 = vpop.f32.mrb[224].mxu1  ;;  %v6406_v18 = vld [vmem:[#allocation2 + $0xe] sm:$0xff] }
 0x743   : > { %v6381_v58 = vld [vmem:[#allocation2 + $0xd] sm:$0xff]  ;;  %6369 = vst.msk [vmem:[#allocation2 + $0x20] sm:$0xff] %vm546_vm3, %v6356_v36  ;;  %v6357_v48 = vmul.f32 %v6344_v53, %v12185_v12  ;;  %v6311_v7 = vadd.f32 %v6269_v43, %v13723_v42  ;;  %v10741_v25 = vpop.f32.mrb[225].mxu1  ;;  %v6418_v28 = vpack.c.bf16 %v6406_v18, %v6405_v40 }
 0x744   : > { %v6393_v57 = vpack.c.bf16 %v6381_v58, %v6380_v44  ;;  %v6272_v15 = vpop.f32.mrb[226].mxu1  ;;  %v6407_v61 = vld [vmem:[#allocation2 + $0x16] sm:$0xff] }
 0x745   : > { %6370 = vst.msk [vmem:[#allocation2 + $0x28] sm:$0xff] %vm546_vm3, %v6357_v48  ;;  %v6332_v50 = vadd.f32 %v13752_v2, %v6311_v7  ;;  %v6312_v14 = vadd.f32 %v6272_v15, %v13726_v23  ;;  %v10742_v55 = vpop.f32.mrb[227].mxu1  ;;  %10764 = vmatmul.mubr.msk.bf16.vlgmr.msra.gmra.mrb[252].mxu0 %vm546_vm3, %v6418_v28  ;;  %v11329_v23 = vld [vmem:[%s14686_s3 + $0x1e8] sm:$0xff]   ;;  %v6382_v31 = vld [vmem:[#allocation2 + $0x15] sm:$0xff] }
 0x746   : > { %10796 = vmatmul.mubr.msk.bf16.vlgmr.msra.gmra.mrb[244].mxu1 %vm546_vm3, %v6393_v57  ;;  %10767 = vmatprep.mubr.msk.bf16.mxu0 %vm11411_vm1, %v11410_v3 }
 0x747   : > { %10799 = vmatprep.mubr.msk.bf16.mxu1 %vm11411_vm1, %v11410_v3  ;;  %v6345_v42 = vmax.f32 %v6332_v50, 0.0  ;;  %v6333_v11 = vadd.f32 %v13752_v2, %v6312_v14  ;;  %10824 = vmatpush3.bf16.msra.mxu0 %v11326_v20 }
 0x748   : > { %10856 = vmatpush3.bf16.msra.mxu1 %v11328_v46  ;;  %10825 = vmatprep.subr.bf16.mxu0 %v11410_v3 }
 0x749   : > { %10857 = vmatprep.subr.bf16.mxu1 %v11410_v3  ;;  %v6358_v30 = vmul.f32 %v6345_v42, %v12213_v1  ;;  %v6346_v32 = vmax.f32 %v6333_v11, 0.0 }
 0x74a   : > { %v6277_v51 = vpop.f32.mrb[228].mxu1  ;;  %v6408_v37 = vld [vmem:[#allocation2 + $0x1e] sm:$0xff] }
 0x74b   : > { %v6383_v40 = vld [vmem:[#allocation2 + $0x1d] sm:$0xff]  ;;  %6371 = vst.msk [vmem:[#allocation2 + $0x30] sm:$0xff] %vm546_vm3, %v6358_v30  ;;  %v6359_v44 = vmul.f32 %v6346_v32, %v12223_v41  ;;  %v6313_v36 = vadd.f32 %v6277_v51, %v13729_v54  ;;  %v10745_v53 = vpop.f32.mrb[229].mxu1  ;;  %v6419_v43 = vpack.c.bf16 %v6408_v37, %v6407_v61  ;;  %10826 = vmatpush3.bf16.msra.mxu0 %v11327_v45 }
 0x74c   : > { %v6394_v18 = vpack.c.bf16 %v6383_v40, %v6382_v31  ;;  %v6280_v58 = vpop.f32.mrb[230].mxu1  ;;  %10858 = vmatpush3.bf16.msra.mxu1 %v11329_v23  ;;  %10887 = vmatprep.subr.bf16.mxu0 %v11410_v3  ;;  %v6384_v50 = vld [vmem:[#allocation2 + $0x25] sm:$0xff] }
 0x74d   : > { %6372 = vst.msk [vmem:[#allocation2 + $0x38] sm:$0xff] %vm546_vm3, %v6359_v44  ;;  %v6334_v48 = vadd.f32 %v13752_v2, %v6313_v36  ;;  %v6314_v7 = vadd.f32 %v6280_v58, %v13732_v39  ;;  %v10746_v25 = vpop.f32.mrb[231].mxu1  ;;  %10768 = vmatmul.mubr.msk.bf16.gmra.mrb[0].mxu0 %vm546_vm3, %v6419_v43  ;;  %10919 = vmatprep.subr.bf16.mxu1 %v11410_v3  ;;  %v6409_v39 = vld [vmem:[#allocation2 + $0x26] sm:$0xff] }
 0x74e   : > { %10800 = vmatmul.mubr.msk.bf16.gmra.mrb[248].mxu1 %vm546_vm3, %v6394_v18  ;;  %10771 = vmatprep.mubr.msk.bf16.mxu0 %vm11411_vm1, %v11410_v3 }
 0x74f   : > { %10803 = vmatprep.mubr.msk.bf16.mxu1 %vm11411_vm1, %v11410_v3  ;;  %v6347_v54 = vmax.f32 %v6334_v48, 0.0  ;;  %v6335_v28 = vadd.f32 %v13752_v2, %v6314_v7 }
 0x751   : > { %v6360_v57 = vmul.f32 %v6347_v54, %v12244_v35  ;;  %v6348_v20 = vmax.f32 %v6335_v28, 0.0 }
 0x752   : > { %v6285_v46 = vpop.f32.mrb[232].mxu1  ;;  %v6410_v15 = vld [vmem:[#allocation2 + $0x2e] sm:$0xff] }
 0x753   : > { %v6385_v14 = vld [vmem:[#allocation2 + $0x2d] sm:$0xff]  ;;  %6373 = vst.msk [vmem:[#allocation2 + $0x40] sm:$0xff] %vm546_vm3, %v6360_v57  ;;  %v6361_v55 = vmul.f32 %v6348_v20, %v12249_v8  ;;  %v6315_v42 = vadd.f32 %v6285_v46, %v13735_v16  ;;  %v10749_v11 = vpop.f32.mrb[233].mxu1  ;;  %v6420_v45 = vpack.c.bf16 %v6410_v15, %v6409_v39 }
 0x754   : > { %v6395_v23 = vpack.c.bf16 %v6385_v14, %v6384_v50  ;;  %v6288_v30 = vpop.f32.mrb[234].mxu1  ;;  %v6411_v44 = vld [vmem:[#allocation2 + $0x36] sm:$0xff] }
 0x755   : > { %6374 = vst.msk [vmem:[#allocation2 + $0x48] sm:$0xff] %vm546_vm3, %v6361_v55  ;;  %v6336_v32 = vadd.f32 %v13752_v2, %v6315_v42  ;;  %v6316_v61 = vadd.f32 %v6288_v30, %v13738_v29  ;;  %v10750_v51 = vpop.f32.mrb[235].mxu1  ;;  %10772 = vmatmul.mubr.msk.bf16.gmra.mrb[4].mxu0 %vm546_vm3, %v6420_v45  ;;  %v6386_v53 = vld [vmem:[#allocation2 + $0x35] sm:$0xff] }
 0x756   : > { %10804 = vmatmul.mubr.msk.bf16.gmra.mrb[252].mxu1 %vm546_vm3, %v6395_v23  ;;  %10775 = vmatprep.mubr.msk.bf16.mxu0 %vm11411_vm1, %v11410_v3 }
 0x757   : > { %10807 = vmatprep.mubr.msk.bf16.mxu1 %vm11411_vm1, %v11410_v3  ;;  %v6349_v16 = vmax.f32 %v6336_v32, 0.0  ;;  %v6337_v37 = vadd.f32 %v13752_v2, %v6316_v61 }
 0x759   : > { %v6362_v31 = vmul.f32 %v6349_v16, %v12268_v47  ;;  %v6350_v40 = vmax.f32 %v6337_v37, 0.0 }
 0x75a   : > { %v6293_v36 = vpop.f32.mrb[236].mxu1  ;;  %v6412_v29 = vld [vmem:[#allocation2 + $0x3e] sm:$0xff] }
 0x75b   : > { %v6387_v43 = vld [vmem:[#allocation2 + $0x3d] sm:$0xff]  ;;  %6375 = vst.msk [vmem:[#allocation2 + $0x50] sm:$0xff] %vm546_vm3, %v6362_v31  ;;  %v6363_v18 = vmul.f32 %v6350_v40, %v12273_v38  ;;  %v6317_v58 = vadd.f32 %v6293_v36, %v13741_v0  ;;  %v10753_v48 = vpop.f32.mrb[237].mxu1  ;;  %v6421_v7 = vpack.c.bf16 %v6412_v29, %v6411_v44 }
 0x75c   : > { %v6396_v25 = vpack.c.bf16 %v6387_v43, %v6386_v53  ;;  %v6296_v54 = vpop.f32.mrb[238].mxu1  ;;  %v6413_v50 = vld [vmem:[#allocation2 + $0x46] sm:$0xff] }
 0x75d   : > { %6376 = vst.msk [vmem:[#allocation2 + $0x58] sm:$0xff] %vm546_vm3, %v6363_v18  ;;  %v6338_v28 = vadd.f32 %v13752_v2, %v6317_v58  ;;  %v6318_v57 = vadd.f32 %v6296_v54, %v13744_v17  ;;  %v10754_v20 = vpop.f32.mrb[239].mxu1  ;;  %10776 = vmatmul.mubr.msk.bf16.gmra.mrb[8].mxu0 %vm546_vm3, %v6421_v7  ;;  %v6388_v55 = vld [vmem:[#allocation2 + $0x45] sm:$0xff]  ;;  %v6673_v7 = vld [vmem:[#allocation2 + $0xf] sm:$0xff] }
 0x75e   : > { %10808 = vmatmul.mubr.msk.bf16.gmra.mrb[0].mxu1 %vm546_vm3, %v6396_v25  ;;  %10779 = vmatprep.mubr.msk.bf16.mxu0 %vm11411_vm1, %v11410_v3  ;;  %v6672_v48 = vld [vmem:[#allocation2 + $0x7] sm:$0xff]  ;;  %v6832_v25 = vld [vmem:[#allocation2 + $0x17] sm:$0xff] }
 0x75f   : > { %10811 = vmatprep.mubr.msk.bf16.mxu1 %vm11411_vm1, %v11410_v3  ;;  %v6351_v0 = vmax.f32 %v6338_v28, 0.0  ;;  %v6339_v39 = vadd.f32 %v13752_v2, %v6318_v57  ;;  %v6685_v54 = vpack.c.bf16 %v6673_v7, %v6672_v48  ;;  %v6844_v28 = vpack.c.bf16 %v6832_v25, %v6673_v7  ;;  %v11330_v57 = vld [vmem:[%s14686_s3 + $0x1f0] sm:$0xff]   ;;  %v11332_v20 = vld [vmem:[%s14686_s3 + $0x200] sm:$0xff]  }
 0x760   : > { %v7149_v48 = vld [vmem:[#allocation2 + $0x11] sm:$0xff] }
 0x761   : > { %v6364_v46 = vmul.f32 %v6351_v0, %v12292_v52  ;;  %v6352_v15 = vmax.f32 %v6339_v39, 0.0  ;;  %v11331_v0 = vld [vmem:[%s14686_s3 + $0x1f8] sm:$0xff]   ;;  %v11333_v39 = vld [vmem:[%s14686_s3 + $0x208] sm:$0xff]  }
 0x762   : > { %v6301_v14 = vpop.f32.mrb[240].mxu1  ;;  %v6414_v17 = vld [vmem:[#allocation2 + $0x4e] sm:$0xff] }
 0x763   : > { %v6389_v42 = vld [vmem:[#allocation2 + $0x4d] sm:$0xff]  ;;  %6377 = vst.msk [vmem:[#allocation2 + $0x60] sm:$0xff] %vm546_vm3, %v6364_v46  ;;  %v6365_v11 = vmul.f32 %v6352_v15, %v12297_v59  ;;  %v6319_v45 = vadd.f32 %v6301_v14, %v13747_v27  ;;  %v6422_v23 = vpack.c.bf16 %v6414_v17, %v6413_v50  ;;  %v10757_v32 = vpop.f32.mrb[241].mxu1  ;;  %v6675_v46 = vld [vmem:[#allocation2 + $0x1f] sm:$0xff] }
 0x764   : > { %v6397_v30 = vpack.c.bf16 %v6389_v42, %v6388_v55  ;;  %v6304_v61 = vpop.f32.mrb[242].mxu1  ;;  %v6415_v31 = vld [vmem:[#allocation2 + $0x56] sm:$0xff]  ;;  %v6834_v15 = vld [vmem:[#allocation2 + $0x27] sm:$0xff]  ;;  %v6686_v50 = vpack.c.bf16 %v6675_v46, %v6832_v25 }
 0x765   : > { %6378 = vst.msk [vmem:[#allocation2 + $0x68] sm:$0xff] %vm546_vm3, %v6365_v11  ;;  %v6340_v51 = vadd.f32 %v13752_v2, %v6319_v45  ;;  %10780 = vmatmul.mubr.msk.bf16.gmra.mrb[12].mxu0 %vm546_vm3, %v6422_v23  ;;  %v10758_v16 = vpop.f32.mrb[243].mxu1  ;;  %v6390_v44 = vld [vmem:[#allocation2 + $0x55] sm:$0xff]  ;;  %v6845_v14 = vpack.c.bf16 %v6834_v15, %v6675_v46  ;;  %v6679_v45 = vld [vmem:[#allocation2 + $0x3f] sm:$0xff]  ;;  %v6838_v23 = vld [vmem:[#allocation2 + $0x47] sm:$0xff] }
 0x766   : > { %10812 = vmatmul.mubr.msk.bf16.gmra.mrb[4].mxu1 %vm546_vm3, %v6397_v30  ;;  %10783 = vmatprep.mubr.msk.bf16.mxu0 %vm11411_vm1, %v11410_v3  ;;  %v6677_v17 = vld [vmem:[#allocation2 + $0x2f] sm:$0xff]  ;;  %v6836_v55 = vld [vmem:[#allocation2 + $0x37] sm:$0xff]  ;;  %v6847_v32 = vpack.c.bf16 %v6838_v23, %v6679_v45  ;;  %v6992_v46 = vld [vmem:[#allocation2 + $0x20] sm:$0xff] }
 0x767   : > { %10815 = vmatprep.mubr.msk.bf16.mxu1 %vm11411_vm1, %v11410_v3  ;;  %v6353_v27 = vmax.f32 %v6340_v51, 0.0  ;;  %v6687_v42 = vpack.c.bf16 %v6677_v17, %v6834_v15  ;;  %v6846_v11 = vpack.c.bf16 %v6836_v55, %v6677_v17  ;;  %v6688_v30 = vpack.c.bf16 %v6679_v45, %v6836_v55  ;;  %v6681_v61 = vld [vmem:[#allocation2 + $0x4f] sm:$0xff]  ;;  %v6840_v51 = vld [vmem:[#allocation2 + $0x57] sm:$0xff]  ;;  %v13947_v15 = vld [vmem:[#allocation2 + $0x21] sm:$0xff] }
 0x768   : > { %v6689_v16 = vpack.c.bf16 %v6681_v61, %v6838_v23  ;;  %v6995_v17 = vld [vmem:[#allocation2 + $0x38] sm:$0xff] }
 0x769   : > { %v6366_v37 = vmul.f32 %v6353_v27, %v12314_v22  ;;  %v6848_v27 = vpack.c.bf16 %v6840_v51, %v6681_v61  ;;  %v13959_v55 = vld [vmem:[#allocation2 + $0x39] sm:$0xff] }
 0x76a   : > { %v6416_v40 = vld [vmem:[#allocation2 + $0x5e] sm:$0xff] }
 0x76b   : > { %v6391_v36 = vld [vmem:[#allocation2 + $0x5d] sm:$0xff]  ;;  %6379 = vst.msk [vmem:[#allocation2 + $0x70] sm:$0xf] %vm1972_vm4, %v6366_v37  ;;  %v6423_v2 = vpack.c.bf16 %v6416_v40, %v6415_v31 }
 0x76c   : > { %v6398_v29 = vpack.c.bf16 %v6391_v36, %v6390_v44  ;;  %v6417_v53 = vld [vmem:[#allocation2 + $0x66] sm:$0xf] }
 0x76d   : > { %10784 = vmatmul.mubr.msk.bf16.gmra.mrb[16].mxu0 %vm546_vm3, %v6423_v2  ;;  %v6392_v43 = vld [vmem:[#allocation2 + $0x65] sm:$0xf]  ;;  %v6424_v18 = vpack.c.bf16 %v6417_v53, %v6417_v53 }
 0x76e   : > { %10816 = vmatmul.mubr.msk.bf16.gmra.mrb[8].mxu1 %vm546_vm3, %v6398_v29  ;;  %10787 = vmatprep.mubr.msk.bf16.mxu0 %vm11411_vm1, %v11410_v3  ;;  %v6399_v58 = vpack.c.bf16 %v6392_v43, %v6392_v43  ;;  %v6683_v37 = vld [vmem:[#allocation2 + $0x5f] sm:$0xff]  ;;  %v6842_v31 = vld [vmem:[#allocation2 + $0x67] sm:$0xff] }
 0x76f   : > { %10819 = vmatprep.mubr.msk.bf16.mxu1 %vm11411_vm1, %v11410_v3  ;;  %v6690_v40 = vpack.c.bf16 %v6683_v37, %v6840_v51  ;;  %v6849_v44 = vpack.c.bf16 %v6842_v31, %v6683_v37  ;;  %v6684_v36 = vld [vmem:[#allocation2 + $0x67] sm:$0xf]  ;;  %v6991_v43 = vld [vmem:[#allocation2 + $0x18] sm:$0xff] }
 0x770   : > { %v6691_v29 = vpack.c.bf16 %v6684_v36, %v6684_v36  ;;  %v6996_v61 = vld [vmem:[#allocation2 + $0x40] sm:$0xff]  ;;  %v6999_v37 = vld [vmem:[#allocation2 + $0x58] sm:$0xff] }
 0x771   : > { %v7155_v51 = vld [vmem:[#allocation2 + $0x41] sm:$0xff]  ;;  %v13980_v31 = vld [vmem:[#allocation2 + $0x59] sm:$0xff] }
 0x772   : > { %v6843_v2 = vld [vmem:[#allocation2 + $0x6f] sm:$0xf] }
 0x773   : > { %v6850_v53 = vpack.c.bf16 %v6843_v2, %v6843_v2 }
 0x775   : > { %10788 = vmatmul.mubr.msk.bf16.gmra.mrb[20].mxu0 %vm546_vm3, %v6424_v18  ;;  %v13922_v18 = vld [vmem:[#allocation2 + $0x19] sm:$0xff] }
 0x776   : > { %10820 = vmatmul.mubr.msk.bf16.gmra.mrb[12].mxu1 %vm546_vm3, %v6399_v58  ;;  %10827 = vmatprep.mubr.msk.bf16.mxu0 %vm11411_vm1, %v11410_v3  ;;  %v6990_v58 = vld [vmem:[#allocation2 + $0x10] sm:$0xff]  ;;  %v7162_v25 = vpack.c.bf16 %v13922_v18, %v7149_v48 }
 0x777   : > { %10859 = vmatprep.mubr.msk.bf16.mxu1 %vm11411_vm1, %v11410_v3  ;;  %v7003_v7 = vpack.c.bf16 %v6991_v43, %v6990_v58  ;;  %v7000_v43 = vld [vmem:[#allocation2 + $0x60] sm:$0xff] }
 0x778   : > { %v7159_v58 = vld [vmem:[#allocation2 + $0x61] sm:$0xff] }
 0x77d   : > { %10828 = vmatmul.mubr.msk.bf16.vlgmr.msra.gmra.mrb[24].mxu0 %vm546_vm3, %v6685_v54  ;;  %v11334_v54 = vld [vmem:[%s14686_s3 + $0x210] sm:$0xff]  }
 0x77e   : > { %10860 = vmatmul.mubr.msk.bf16.vlgmr.msra.gmra.mrb[16].mxu1 %vm546_vm3, %v6844_v28  ;;  %10831 = vmatprep.mubr.msk.bf16.mxu0 %vm11411_vm1, %v11410_v3  ;;  %v11336_v28 = vld [vmem:[%s14686_s3 + $0x220] sm:$0xff]  }
 0x77f   : > { %10863 = vmatprep.mubr.msk.bf16.mxu1 %vm11411_vm1, %v11410_v3  ;;  %10888 = vmatpush3.bf16.msra.mxu0 %v11330_v57  ;;  %v11335_v57 = vld [vmem:[%s14686_s3 + $0x218] sm:$0xff]  }
 0x780   : > { %10920 = vmatpush3.bf16.msra.mxu1 %v11332_v20  ;;  %10889 = vmatprep.subr.bf16.mxu0 %v11410_v3  ;;  %v11337_v20 = vld [vmem:[%s14686_s3 + $0x228] sm:$0xff]  }
 0x781   : > { %10921 = vmatprep.subr.bf16.mxu1 %v11410_v3 }
 0x783   : > { %10890 = vmatpush3.bf16.msra.mxu0 %v11331_v0  ;;  %v6993_v0 = vld [vmem:[#allocation2 + $0x28] sm:$0xff] }
 0x784   : > { %10922 = vmatpush3.bf16.msra.mxu1 %v11333_v39  ;;  %10951 = vmatprep.subr.bf16.mxu0 %v11410_v3  ;;  %v13943_v39 = vld [vmem:[#allocation2 + $0x29] sm:$0xff] }
 0x785   : > { %10983 = vmatprep.subr.bf16.mxu1 %v11410_v3  ;;  %10832 = vmatmul.mubr.msk.bf16.gmra.mrb[28].mxu0 %vm546_vm3, %v6686_v50  ;;  %v7004_v50 = vpack.c.bf16 %v6993_v0, %v6992_v46  ;;  %v7467_v0 = vld [vmem:[#allocation2 + $0x1a] sm:$0xff]  ;;  %v7321_v46 = vpack.c.bf16 %v13947_v15, %v13922_v18 }
 0x786   : > { %10864 = vmatmul.mubr.msk.bf16.gmra.mrb[20].mxu1 %vm546_vm3, %v6845_v14  ;;  %10835 = vmatprep.mubr.msk.bf16.mxu0 %vm11411_vm1, %v11410_v3  ;;  %v7163_v14 = vpack.c.bf16 %v13943_v39, %v13947_v15  ;;  %v11339_v18 = vld [vmem:[%s14686_s3 + $0x238] sm:$0xff]  }
 0x787   : > { %10867 = vmatprep.mubr.msk.bf16.mxu1 %vm11411_vm1, %v11410_v3  ;;  %v7470_v15 = vld [vmem:[#allocation2 + $0x32] sm:$0xff] }
 0x78d   : > { %10836 = vmatmul.mubr.msk.bf16.gmra.mrb[32].mxu0 %vm546_vm3, %v6687_v42  ;;  %v6994_v42 = vld [vmem:[#allocation2 + $0x30] sm:$0xff] }
 0x78e   : > { %10868 = vmatmul.mubr.msk.bf16.gmra.mrb[24].mxu1 %vm546_vm3, %v6846_v11  ;;  %10839 = vmatprep.mubr.msk.bf16.mxu0 %vm11411_vm1, %v11410_v3  ;;  %v13961_v11 = vld [vmem:[#allocation2 + $0x31] sm:$0xff]  ;;  %v7005_v45 = vpack.c.bf16 %v6995_v17, %v6994_v42 }
 0x78f   : > { %10871 = vmatprep.mubr.msk.bf16.mxu1 %vm11411_vm1, %v11410_v3  ;;  %v7164_v23 = vpack.c.bf16 %v13959_v55, %v13961_v11  ;;  %v7469_v17 = vld [vmem:[#allocation2 + $0x2a] sm:$0xff]  ;;  %v7322_v42 = vpack.c.bf16 %v13961_v11, %v13943_v39  ;;  %v7474_v39 = vld [vmem:[#allocation2 + $0x52] sm:$0xff] }
 0x790   : > { %v7473_v11 = vld [vmem:[#allocation2 + $0x4a] sm:$0xff] }
 0x795   : > { %10840 = vmatmul.mubr.msk.bf16.gmra.mrb[36].mxu0 %vm546_vm3, %v6688_v30  ;;  %v6997_v30 = vld [vmem:[#allocation2 + $0x48] sm:$0xff] }
 0x796   : > { %10872 = vmatmul.mubr.msk.bf16.gmra.mrb[28].mxu1 %vm546_vm3, %v6847_v32  ;;  %10843 = vmatprep.mubr.msk.bf16.mxu0 %vm11411_vm1, %v11410_v3  ;;  %v13971_v32 = vld [vmem:[#allocation2 + $0x49] sm:$0xff] }
 0x797   : > { %10875 = vmatprep.mubr.msk.bf16.mxu1 %vm11411_vm1, %v11410_v3 }
 0x79d   : > { %10844 = vmatmul.mubr.msk.bf16.gmra.mrb[40].mxu0 %vm546_vm3, %v6689_v16  ;;  %v7006_v16 = vpack.c.bf16 %v6997_v30, %v6996_v61  ;;  %v7471_v30 = vld [vmem:[#allocation2 + $0x3a] sm:$0xff]  ;;  %v7323_v61 = vpack.c.bf16 %v7155_v51, %v13959_v55  ;;  %v7476_v55 = vld [vmem:[#allocation2 + $0x62] sm:$0xff] }
 0x79e   : > { %10876 = vmatmul.mubr.msk.bf16.gmra.mrb[32].mxu1 %vm546_vm3, %v6848_v27  ;;  %10847 = vmatprep.mubr.msk.bf16.mxu0 %vm11411_vm1, %v11410_v3  ;;  %v7165_v27 = vpack.c.bf16 %v13971_v32, %v7155_v51  ;;  %v7475_v51 = vld [vmem:[#allocation2 + $0x5a] sm:$0xff] }
 0x79f   : > { %10879 = vmatprep.mubr.msk.bf16.mxu1 %vm11411_vm1, %v11410_v3 }
 0x7a5   : > { %10848 = vmatmul.mubr.msk.bf16.gmra.mrb[44].mxu0 %vm546_vm3, %v6690_v40  ;;  %v6998_v40 = vld [vmem:[#allocation2 + $0x50] sm:$0xff] }
 0x7a6   : > { %10880 = vmatmul.mubr.msk.bf16.gmra.mrb[36].mxu1 %vm546_vm3, %v6849_v44  ;;  %10851 = vmatprep.mubr.msk.bf16.mxu0 %vm11411_vm1, %v11410_v3  ;;  %v7157_v44 = vld [vmem:[#allocation2 + $0x51] sm:$0xff]  ;;  %v7007_v36 = vpack.c.bf16 %v6999_v37, %v6998_v40  ;;  %v7483_v37 = vpack.c.bf16 %v7474_v39, %v7473_v11  ;;  %v7325_v40 = vpack.c.bf16 %v7159_v58, %v13980_v31 }
 0x7a7   : > { %10883 = vmatprep.mubr.msk.bf16.mxu1 %vm11411_vm1, %v11410_v3  ;;  %v7166_v2 = vpack.c.bf16 %v13980_v31, %v7157_v44  ;;  %v7320_v31 = vld [vmem:[#allocation2 + $0x79] sm:$0xf] }
 0x7ad   : > { %10852 = vmatmul.mubr.msk.bf16.gmra.mrb[48].mxu0 %vm546_vm3, %v6691_v29  ;;  %v7001_v29 = vld [vmem:[#allocation2 + $0x68] sm:$0xff] }
 0x7ae   : > { %10884 = vmatmul.mubr.msk.bf16.gmra.mrb[40].mxu1 %vm546_vm3, %v6850_v53  ;;  %10891 = vmatprep.mubr.msk.bf16.mxu0 %vm11411_vm1, %v11410_v3  ;;  %v13989_v53 = vld [vmem:[#allocation2 + $0x69] sm:$0xff]  ;;  %v7008_v48 = vpack.c.bf16 %v7001_v29, %v7000_v43 }
 0x7af   : > { %10923 = vmatprep.mubr.msk.bf16.mxu1 %vm11411_vm1, %v11410_v3 }
 0x7b5   : > { %10892 = vmatmul.mubr.msk.bf16.vlgmr.msra.gmra.mrb[52].mxu0 %vm546_vm3, %v7003_v7  ;;  %v7167_v7 = vpack.c.bf16 %v13989_v53, %v7159_v58  ;;  %v7479_v58 = vld [vmem:[#allocation2 + $0x7a] sm:$0xf] }
 0x7b6   : > { %10924 = vmatmul.mubr.msk.bf16.vlgmr.msra.gmra.mrb[44].mxu1 %vm546_vm3, %v7162_v25  ;;  %10895 = vmatprep.mubr.msk.bf16.mxu0 %vm11411_vm1, %v11410_v3  ;;  %v7002_v25 = vld [vmem:[#allocation2 + $0x70] sm:$0xf] }
 0x7b7   : > { %10927 = vmatprep.mubr.msk.bf16.mxu1 %vm11411_vm1, %v11410_v3  ;;  %10952 = vmatpush3.bf16.msra.mxu0 %v11334_v54  ;;  %v7161_v54 = vld [vmem:[#allocation2 + $0x71] sm:$0xf] }
 0x7b8   : > { %10984 = vmatpush3.bf16.msra.mxu1 %v11336_v28  ;;  %10953 = vmatprep.subr.bf16.mxu0 %v11410_v3  ;;  %v7009_v28 = vpack.c.bf16 %v7002_v25, %v7002_v25 }
 0x7b9   : > { %10985 = vmatprep.subr.bf16.mxu1 %v11410_v3 }
 0x7bb   : > { %10954 = vmatpush3.bf16.msra.mxu0 %v11335_v57  ;;  %v7168_v57 = vpack.c.bf16 %v7161_v54, %v7161_v54 }
 0x7bc   : > { %10986 = vmatpush3.bf16.msra.mxu1 %v11337_v20  ;;  %11015 = vmatprep.subr.bf16.mxu0 %v11410_v3  ;;  %v7468_v20 = vld [vmem:[#allocation2 + $0x22] sm:$0xff] }
 0x7bd   : > { %11047 = vmatprep.subr.bf16.mxu1 %v11410_v3  ;;  %10896 = vmatmul.mubr.msk.bf16.gmra.mrb[56].mxu0 %vm546_vm3, %v7004_v50  ;;  %v7480_v50 = vpack.c.bf16 %v7468_v20, %v7467_v0 }
 0x7be   : > { %10928 = vmatmul.mubr.msk.bf16.gmra.mrb[48].mxu1 %vm546_vm3, %v7163_v14  ;;  %10899 = vmatprep.mubr.msk.bf16.mxu0 %vm11411_vm1, %v11410_v3  ;;  %v11338_v14 = vld [vmem:[%s14686_s3 + $0x230] sm:$0xff]   ;;  %s11352_s3 = scalar_lea.vmem %s11351_s2, 32 }
 0x7bf   : > { %10931 = vmatprep.mubr.msk.bf16.mxu1 %vm11411_vm1, %v11410_v3  ;;  %p11354_p1 = scmp.lt.s32.totalorder %s11352_s3, %s11346_s22 }
 0x7c1   : > { %p11355_p2 = por %p11354_p1, %p11353_p0 }
 0x7c3   : > { %p11356_p3 = pnand %p11355_p2, %p11349_p13 }
 0x7c5   : > { %10900 = vmatmul.mubr.msk.bf16.gmra.mrb[60].mxu0 %vm546_vm3, %v7005_v45  ;;  %v7481_v45 = vpack.c.bf16 %v7470_v15, %v7469_v17  ;;  %v7627_v17 = vld [vmem:[#allocation2 + $0x23] sm:$0xff] }
 0x7c6   : > { %10932 = vmatmul.mubr.msk.bf16.gmra.mrb[52].mxu1 %vm546_vm3, %v7164_v23  ;;  %10903 = vmatprep.mubr.msk.bf16.mxu0 %vm11411_vm1, %v11410_v3  ;;  %v7472_v23 = vld [vmem:[#allocation2 + $0x42] sm:$0xff] }
 0x7c7   : > { %10935 = vmatprep.mubr.msk.bf16.mxu1 %vm11411_vm1, %v11410_v3 }
 0x7cd   : > { %10904 = vmatmul.mubr.msk.bf16.gmra.mrb[64].mxu0 %vm546_vm3, %v7006_v16  ;;  %v7482_v16 = vpack.c.bf16 %v7472_v23, %v7471_v30 }
 0x7ce   : > { %10936 = vmatmul.mubr.msk.bf16.gmra.mrb[56].mxu1 %vm546_vm3, %v7165_v27  ;;  %10907 = vmatprep.mubr.msk.bf16.mxu0 %vm11411_vm1, %v11410_v3  ;;  %v7324_v27 = vpack.c.bf16 %v7157_v44, %v13971_v32  ;;  %v7319_v32 = vld [vmem:[#allocation2 + $0x71] sm:$0xff] }
 0x7cf   : > { %10939 = vmatprep.mubr.msk.bf16.mxu1 %vm11411_vm1, %v11410_v3  ;;  %v7477_v44 = vld [vmem:[#allocation2 + $0x6a] sm:$0xff]  ;;  %v7326_v29 = vpack.c.bf16 %v7319_v32, %v13989_v53  ;;  %v7327_v53 = vpack.c.bf16 %v7320_v31, %v7320_v31 }
 0x7d5   : > { %10908 = vmatmul.mubr.msk.bf16.gmra.mrb[68].mxu0 %vm546_vm3, %v7007_v36  ;;  %v7484_v36 = vpack.c.bf16 %v7476_v55, %v7475_v51 }
 0x7d6   : > { %10940 = vmatmul.mubr.msk.bf16.gmra.mrb[60].mxu1 %vm546_vm3, %v7166_v2  ;;  %10911 = vmatprep.mubr.msk.bf16.mxu0 %vm11411_vm1, %v11410_v3  ;;  %v7478_v2 = vld [vmem:[#allocation2 + $0x72] sm:$0xff] }
 0x7d7   : > { %10943 = vmatprep.mubr.msk.bf16.mxu1 %vm11411_vm1, %v11410_v3  ;;  %v7485_v43 = vpack.c.bf16 %v7478_v2, %v7477_v44 }
 0x7dd   : > { %10912 = vmatmul.mubr.msk.bf16.gmra.mrb[72].mxu0 %vm546_vm3, %v7008_v48 }
 0x7de   : > { %10944 = vmatmul.mubr.msk.bf16.gmra.mrb[64].mxu1 %vm546_vm3, %v7167_v7  ;;  %10915 = vmatprep.mubr.msk.bf16.mxu0 %vm11411_vm1, %v11410_v3 }
 0x7df   : > { %10947 = vmatprep.mubr.msk.bf16.mxu1 %vm11411_vm1, %v11410_v3 }
 0x7e5   : > { %10916 = vmatmul.mubr.msk.bf16.gmra.mrb[76].mxu0 %vm546_vm3, %v7009_v28 }
 0x7e6   : > { %10948 = vmatmul.mubr.msk.bf16.gmra.mrb[68].mxu1 %vm546_vm3, %v7168_v57  ;;  %10955 = vmatprep.mubr.msk.bf16.mxu0 %vm11411_vm1, %v11410_v3  ;;  %v7486_v57 = vpack.c.bf16 %v7479_v58, %v7479_v58 }
 0x7e7   : > { %10987 = vmatprep.mubr.msk.bf16.mxu1 %vm11411_vm1, %v11410_v3 }
 0x7ed   : > { %10956 = vmatmul.mubr.msk.bf16.vlgmr.msra.gmra.mrb[80].mxu0 %vm546_vm3, %v7321_v46 }
 0x7ee   : > { %10988 = vmatmul.mubr.msk.bf16.vlgmr.msra.gmra.mrb[72].mxu1 %vm546_vm3, %v7480_v50  ;;  %10959 = vmatprep.mubr.msk.bf16.mxu0 %vm11411_vm1, %v11410_v3 }
 0x7ef   : > { %10991 = vmatprep.mubr.msk.bf16.mxu1 %vm11411_vm1, %v11410_v3  ;;  %11016 = vmatpush3.bf16.msra.mxu0 %v11338_v14 }
 0x7f0   : > { %11017 = vmatprep.subr.bf16.mxu0 %v11410_v3 }
 0x7f3   : > { %11018 = vmatpush3.bf16.msra.mxu0 %v11339_v18 }
 0x7f5   : > { %10960 = vmatmul.mubr.msk.bf16.gmra.mrb[84].mxu0 %vm546_vm3, %v7322_v42 }
 0x7f6   : > { %10992 = vmatmul.mubr.msk.bf16.gmra.mrb[76].mxu1 %vm546_vm3, %v7481_v45  ;;  %10963 = vmatprep.mubr.msk.bf16.mxu0 %vm11411_vm1, %v11410_v3 }
 0x7f7   : > { %10995 = vmatprep.mubr.msk.bf16.mxu1 %vm11411_vm1, %v11410_v3 }
 0x7fd   : > { %10964 = vmatmul.mubr.msk.bf16.gmra.mrb[88].mxu0 %vm546_vm3, %v7323_v61 }
 0x7fe   : > { %10996 = vmatmul.mubr.msk.bf16.gmra.mrb[80].mxu1 %vm546_vm3, %v7482_v16  ;;  %10967 = vmatprep.mubr.msk.bf16.mxu0 %vm11411_vm1, %v11410_v3  ;;  %v7626_v16 = vld [vmem:[#allocation2 + $0x1b] sm:$0xff] }
 0x7ff   : > { %10999 = vmatprep.mubr.msk.bf16.mxu1 %vm11411_vm1, %v11410_v3 }
 0x805   : > { %10968 = vmatmul.mubr.msk.bf16.gmra.mrb[92].mxu0 %vm546_vm3, %v7324_v27 }
 0x806   : > { %11000 = vmatmul.mubr.msk.bf16.gmra.mrb[84].mxu1 %vm546_vm3, %v7483_v37  ;;  %10971 = vmatprep.mubr.msk.bf16.mxu0 %vm11411_vm1, %v11410_v3  ;;  %v7639_v37 = vpack.c.bf16 %v7627_v17, %v7626_v16  ;;  %v7633_v16 = vld [vmem:[#allocation2 + $0x53] sm:$0xff] }
 0x807   : > { %11003 = vmatprep.mubr.msk.bf16.mxu1 %vm11411_vm1, %v11410_v3 }
 0x80d   : > { %10972 = vmatmul.mubr.msk.bf16.gmra.mrb[96].mxu0 %vm546_vm3, %v7325_v40  ;;  %v7629_v40 = vld [vmem:[#allocation2 + $0x33] sm:$0xff] }
 0x80e   : > { %11004 = vmatmul.mubr.msk.bf16.gmra.mrb[88].mxu1 %vm546_vm3, %v7484_v36  ;;  %10975 = vmatprep.mubr.msk.bf16.mxu0 %vm11411_vm1, %v11410_v3 }
 0x80f   : > { %11007 = vmatprep.mubr.msk.bf16.mxu1 %vm11411_vm1, %v11410_v3 }
 0x815   : > { %10976 = vmatmul.mubr.msk.bf16.gmra.mrb[100].mxu0 %vm546_vm3, %v7326_v29 }
 0x816   : > { %11008 = vmatmul.mubr.msk.bf16.gmra.mrb[92].mxu1 %vm546_vm3, %v7485_v43  ;;  %10979 = vmatprep.mubr.msk.bf16.mxu0 %vm11411_vm1, %v11410_v3  ;;  %v7628_v43 = vld [vmem:[#allocation2 + $0x2b] sm:$0xff] }
 0x817   : > { %11011 = vmatprep.mubr.msk.bf16.mxu1 %vm11411_vm1, %v11410_v3 }
 0x818   : > { %v6497_v48 = vpop.f32.mrb[252].mxu0 }
 0x819   : > { %v6618_v7 = vpop.f32.mrb[244].mxu1  ;;  %v10765_v54 = vpop.f32.mrb[253].mxu0 }
 0x81a   : > { %v14055_v25 = vadd.f32 %v6618_v7, %v6497_v48  ;;  %v10797_v28 = vpop.f32.mrb[245].mxu1  ;;  %v6500_v20 = vpop.f32.mrb[254].mxu0  ;;  %v7640_v7 = vpack.c.bf16 %v7629_v40, %v7628_v43  ;;  %v7632_v40 = vld [vmem:[#allocation2 + $0x4b] sm:$0xff] }
 0x81b   : > { %v6621_v0 = vpop.f32.mrb[246].mxu1  ;;  %v10766_v50 = vpop.f32.mrb[255].mxu0 }
 0x81c   : > { %v14057_v46 = vadd.f32 %v6621_v0, %v6500_v20  ;;  %v10798_v14 = vpop.f32.mrb[247].mxu1 }
 0x81d   : > { %10980 = vmatmul.mubr.msk.bf16.gmra.mrb[104].mxu0 %vm546_vm3, %v7327_v53  ;;  %v7631_v53 = vld [vmem:[#allocation2 + $0x43] sm:$0xff] }
 0x81e   : > { %11012 = vmatmul.mubr.msk.bf16.gmra.mrb[96].mxu1 %vm546_vm3, %v7486_v57  ;;  %11019 = vmatprep.mubr.msk.bf16.mxu0 %vm11411_vm1, %v11410_v3 }
 0x81f   : > { %11051 = vmatprep.mubr.msk.bf16.mxu1 %vm11411_vm1, %v11410_v3 }
 0x820   : > { %v6505_v18 = vpop.f32.mrb[0].mxu0 }
 0x821   : > { %v6626_v15 = vpop.f32.mrb[248].mxu1  ;;  %v10769_v45 = vpop.f32.mrb[1].mxu0 }
 0x822   : > { %v14065_v42 = vadd.f32 %v6626_v15, %v6505_v18  ;;  %v10801_v23 = vpop.f32.mrb[249].mxu1  ;;  %v6508_v30 = vpop.f32.mrb[2].mxu0  ;;  %v7630_v18 = vld [vmem:[#allocation2 + $0x3b] sm:$0xff] }
 0x823   : > { %v6629_v61 = vpop.f32.mrb[250].mxu1  ;;  %v10770_v11 = vpop.f32.mrb[3].mxu0  ;;  %v7641_v23 = vpack.c.bf16 %v7631_v53, %v7630_v18 }
 0x824   : > { %v14067_v39 = vadd.f32 %v6629_v61, %v6508_v30  ;;  %v10802_v27 = vpop.f32.mrb[251].mxu1 }
 0x825   : > { %11020 = vmatmul.mubr.msk.bf16.vlgmr.msra.gmra.mrb[108].mxu0 %vm546_vm3, %v7639_v37 }
 0x826   : > { %11023 = vmatprep.mubr.msk.bf16.mxu0 %vm11411_vm1, %v11410_v3 }
 0x828   : > { %v6513_v55 = vpop.f32.mrb[4].mxu0 }
 0x829   : > { %v6634_v51 = vpop.f32.mrb[252].mxu1  ;;  %v10773_v32 = vpop.f32.mrb[5].mxu0 }
 0x82a   : > { %v14072_v36 = vadd.f32 %v6634_v51, %v6513_v55  ;;  %v10805_v44 = vpop.f32.mrb[253].mxu1  ;;  %v6516_v2 = vpop.f32.mrb[6].mxu0 }
 0x82b   : > { %v6637_v29 = vpop.f32.mrb[254].mxu1  ;;  %v10774_v58 = vpop.f32.mrb[7].mxu0 }
 0x82c   : > { %v14074_v31 = vadd.f32 %v6637_v29, %v6516_v2  ;;  %v10806_v48 = vpop.f32.mrb[255].mxu1  ;;  %v7642_v29 = vpack.c.bf16 %v7633_v16, %v7632_v40 }
 0x82d   : > { %11024 = vmatmul.mubr.msk.bf16.gmra.mrb[112].mxu0 %vm546_vm3, %v7640_v7  ;;  %v7635_v48 = vld [vmem:[#allocation2 + $0x63] sm:$0xff] }
 0x82e   : > { %11027 = vmatprep.mubr.msk.bf16.mxu0 %vm11411_vm1, %v11410_v3 }
 0x830   : > { %v6521_v54 = vpop.f32.mrb[8].mxu0 }
 0x831   : > { %v6642_v28 = vpop.f32.mrb[0].mxu1  ;;  %v10777_v20 = vpop.f32.mrb[9].mxu0 }
 0x832   : > { %v14079_v57 = vadd.f32 %v6642_v28, %v6521_v54  ;;  %v10809_v0 = vpop.f32.mrb[1].mxu1  ;;  %v6524_v50 = vpop.f32.mrb[10].mxu0 }
 0x833   : > { %v6645_v14 = vpop.f32.mrb[2].mxu1  ;;  %v10778_v17 = vpop.f32.mrb[11].mxu0  ;;  %v7634_v0 = vld [vmem:[#allocation2 + $0x5b] sm:$0xff] }
 0x834   : > { %v14081_v15 = vadd.f32 %v6645_v14, %v6524_v50  ;;  %v10810_v45 = vpop.f32.mrb[3].mxu1  ;;  %v7643_v17 = vpack.c.bf16 %v7635_v48, %v7634_v0 }
 0x835   : > { %11028 = vmatmul.mubr.msk.bf16.gmra.mrb[116].mxu0 %vm546_vm3, %v7641_v23 }
 0x836   : > { %11031 = vmatprep.mubr.msk.bf16.mxu0 %vm11411_vm1, %v11410_v3 }
 0x838   : > { %v6529_v30 = vpop.f32.mrb[12].mxu0 }
 0x839   : > { %v6650_v61 = vpop.f32.mrb[4].mxu1  ;;  %v10781_v27 = vpop.f32.mrb[13].mxu0 }
 0x83a   : > { %v14086_v11 = vadd.f32 %v6650_v61, %v6529_v30  ;;  %v10813_v37 = vpop.f32.mrb[5].mxu1  ;;  %v6532_v55 = vpop.f32.mrb[14].mxu0  ;;  %v7636_v30 = vld [vmem:[#allocation2 + $0x6b] sm:$0xff]  ;;  %v7637_v61 = vld [vmem:[#allocation2 + $0x73] sm:$0xff] }
 0x83b   : > { %v6653_v51 = vpop.f32.mrb[6].mxu1  ;;  %v10782_v44 = vpop.f32.mrb[15].mxu0 }
 0x83c   : > { %v14088_v32 = vadd.f32 %v6653_v51, %v6532_v55  ;;  %v10814_v2 = vpop.f32.mrb[7].mxu1 }
 0x83d   : > { %11032 = vmatmul.mubr.msk.bf16.gmra.mrb[120].mxu0 %vm546_vm3, %v7642_v29  ;;  %v7644_v2 = vpack.c.bf16 %v7637_v61, %v7636_v30  ;;  %v7638_v29 = vld [vmem:[#allocation2 + $0x7b] sm:$0xf] }
 0x83e   : > { %11035 = vmatprep.mubr.msk.bf16.mxu0 %vm11411_vm1, %v11410_v3 }
 0x840   : > { %v6537_v43 = vpop.f32.mrb[16].mxu0 }
 0x841   : > { %v6658_v58 = vpop.f32.mrb[8].mxu1  ;;  %v10785_v54 = vpop.f32.mrb[17].mxu0 }
 0x842   : > { %v14093_v7 = vadd.f32 %v6658_v58, %v6537_v43  ;;  %v10817_v28 = vpop.f32.mrb[9].mxu1  ;;  %v6540_v53 = vpop.f32.mrb[18].mxu0 }
 0x843   : > { %v6661_v20 = vpop.f32.mrb[10].mxu1  ;;  %v10786_v14 = vpop.f32.mrb[19].mxu0 }
 0x844   : > { %v14095_v50 = vadd.f32 %v6661_v20, %v6540_v53  ;;  %v10818_v18 = vpop.f32.mrb[11].mxu1  ;;  %v7645_v53 = vpack.c.bf16 %v7638_v29, %v7638_v29  ;;  %v11340_v29 = vld [vmem:[%s14665_s5] sm:$0xff]  }
 0x845   : > { %11036 = vmatmul.mubr.msk.bf16.gmra.mrb[124].mxu0 %vm546_vm3, %v7643_v17  ;;  %11048 = vmatpush3.bf16.msra.mxu1 %v11340_v29 }
 0x846   : > { %11039 = vmatprep.mubr.msk.bf16.mxu0 %vm11411_vm1, %v11410_v3  ;;  %11049 = vmatprep.subr.bf16.mxu1 %v11410_v3 }
 0x848   : > { %v6545_v45 = vpop.f32.mrb[20].mxu0 }
 0x849   : > { %v6666_v23 = vpop.f32.mrb[12].mxu1  ;;  %v10789_v27 = vpop.f32.mrb[21].mxu0 }
 0x84a   : > { %v14100_v16 = vadd.f32 %v6666_v23, %v6545_v45  ;;  %v10821_v37 = vpop.f32.mrb[13].mxu1  ;;  %v6548_v55 = vpop.f32.mrb[22].mxu0 }
 0x84b   : > { %v6669_v51 = vpop.f32.mrb[14].mxu1  ;;  %v10790_v40 = vpop.f32.mrb[23].mxu0 }
 0x84c   : > { %v10822_v44 = vpop.f32.mrb[15].mxu1 }
 0x84d   : > { %11040 = vmatmul.mubr.msk.bf16.gmra.mrb[128].mxu0 %vm546_vm3, %v7644_v2 }
 0x84e   : > { %11043 = vmatprep.mubr.msk.bf16.mxu0 %vm11411_vm1, %v11410_v3 }
 0x850   : > { %v6764_v43 = vpop.f32.mrb[24].mxu0 }
 0x851   : > { %v6923_v58 = vpop.f32.mrb[16].mxu1  ;;  %v6818_v48 = vadd.f32 %v6764_v43, %v14055_v25  ;;  %v10829_v54 = vpop.f32.mrb[25].mxu0 }
 0x852   : > { %v10861_v28 = vpop.f32.mrb[17].mxu1  ;;  %v6767_v20 = vpop.f32.mrb[26].mxu0 }
 0x853   : > { %v6926_v0 = vpop.f32.mrb[18].mxu1  ;;  %v14106_v14 = vadd.f32 %v6923_v58, %v6818_v48  ;;  %v6819_v18 = vadd.f32 %v6767_v20, %v14057_v46  ;;  %v10830_v17 = vpop.f32.mrb[27].mxu0 }
 0x854   : > { %v10862_v45 = vpop.f32.mrb[19].mxu1 }
 0x855   : > { %v14109_v23 = vadd.f32 %v6926_v0, %v6819_v18  ;;  %11044 = vmatmul.mubr.msk.bf16.gmra.mrb[132].mxu0 %vm546_vm3, %v7645_v53 }
 0x856   : > { %11105 = vmatprep.mubr.msk.f32.mxu0 %vm11411_vm1, %v11410_v3 }
 0x858   : > { %v6772_v30 = vpop.f32.mrb[28].mxu0 }
 0x859   : > { %v6931_v25 = vpop.f32.mrb[20].mxu1  ;;  %v6820_v61 = vadd.f32 %v6772_v30, %v14065_v42  ;;  %v10833_v27 = vpop.f32.mrb[29].mxu0 }
 0x85a   : > { %v10865_v37 = vpop.f32.mrb[21].mxu1  ;;  %v6775_v55 = vpop.f32.mrb[30].mxu0 }
 0x85b   : > { %v6934_v51 = vpop.f32.mrb[22].mxu1  ;;  %v14115_v40 = vadd.f32 %v6931_v25, %v6820_v61  ;;  %v6821_v46 = vadd.f32 %v6775_v55, %v14067_v39  ;;  %v10834_v44 = vpop.f32.mrb[31].mxu0 }
 0x85c   : > { %v10866_v2 = vpop.f32.mrb[23].mxu1 }
 0x85d   : > { %v14121_v43 = vadd.f32 %v6934_v51, %v6821_v46 }
 0x860   : > { %v6780_v42 = vpop.f32.mrb[32].mxu0 }
 0x861   : > { %v6939_v58 = vpop.f32.mrb[24].mxu1  ;;  %v6822_v48 = vadd.f32 %v6780_v42, %v14072_v36  ;;  %v10837_v54 = vpop.f32.mrb[33].mxu0 }
 0x862   : > { %v10869_v28 = vpop.f32.mrb[25].mxu1  ;;  %v6783_v53 = vpop.f32.mrb[34].mxu0 }
 0x863   : > { %v6942_v20 = vpop.f32.mrb[26].mxu1  ;;  %v14125_v39 = vadd.f32 %v6939_v58, %v6822_v48  ;;  %v6823_v0 = vadd.f32 %v6783_v53, %v14074_v31  ;;  %v10838_v18 = vpop.f32.mrb[35].mxu0 }
 0x864   : > { %v10870_v17 = vpop.f32.mrb[27].mxu1 }
 0x865   : > { %v14128_v45 = vadd.f32 %v6942_v20, %v6823_v0 }
 0x868   : > { %v6788_v30 = vpop.f32.mrb[36].mxu0 }
 0x869   : > { %v6947_v25 = vpop.f32.mrb[28].mxu1  ;;  %v6824_v61 = vadd.f32 %v6788_v30, %v14079_v57  ;;  %v10841_v27 = vpop.f32.mrb[37].mxu0 }
 0x86a   : > { %v10873_v37 = vpop.f32.mrb[29].mxu1  ;;  %v6791_v55 = vpop.f32.mrb[38].mxu0 }
 0x86b   : > { %v6950_v36 = vpop.f32.mrb[30].mxu1  ;;  %v14131_v51 = vadd.f32 %v6947_v25, %v6824_v61  ;;  %v6825_v46 = vadd.f32 %v6791_v55, %v14081_v15  ;;  %v10842_v44 = vpop.f32.mrb[39].mxu0  ;;  %v11341_v15 = vld [vmem:[%s14665_s5 + $0x8] sm:$0xff]  }
 0x86c   : > { %v10874_v2 = vpop.f32.mrb[31].mxu1  ;;  %11050 = vmatpush3.bf16.msra.mxu1 %v11341_v15 }
 0x86d   : > { %v14134_v29 = vadd.f32 %v6950_v36, %v6825_v46  ;;  %11108 = vmatprep.subr.bf16.mxu1 %v11410_v3 }
 0x870   : > { %v6796_v31 = vpop.f32.mrb[40].mxu0 }
 0x871   : > { %v6955_v42 = vpop.f32.mrb[32].mxu1  ;;  %v6826_v58 = vadd.f32 %v6796_v31, %v14086_v11  ;;  %v10845_v48 = vpop.f32.mrb[41].mxu0 }
 0x872   : > { %v10877_v54 = vpop.f32.mrb[33].mxu1  ;;  %v6799_v28 = vpop.f32.mrb[42].mxu0 }
 0x873   : > { %v6958_v57 = vpop.f32.mrb[34].mxu1  ;;  %v14137_v53 = vadd.f32 %v6955_v42, %v6826_v58  ;;  %v6827_v20 = vadd.f32 %v6799_v28, %v14088_v32  ;;  %v10846_v0 = vpop.f32.mrb[43].mxu0 }
 0x874   : > { %v10878_v18 = vpop.f32.mrb[35].mxu1 }
 0x875   : > { %v14143_v17 = vadd.f32 %v6958_v57, %v6827_v20 }
 0x878   : > { %v6804_v11 = vpop.f32.mrb[44].mxu0 }
 0x879   : > { %v6963_v30 = vpop.f32.mrb[36].mxu1  ;;  %v6828_v25 = vadd.f32 %v6804_v11, %v14093_v7  ;;  %v10849_v61 = vpop.f32.mrb[45].mxu0 }
 0x87a   : > { %v10881_v27 = vpop.f32.mrb[37].mxu1  ;;  %v6807_v37 = vpop.f32.mrb[46].mxu0 }
 0x87b   : > { %v6966_v55 = vpop.f32.mrb[38].mxu1  ;;  %v14147_v32 = vadd.f32 %v6963_v30, %v6828_v25  ;;  %v6829_v36 = vadd.f32 %v6807_v37, %v14095_v50  ;;  %v10850_v46 = vpop.f32.mrb[47].mxu0 }
 0x87c   : > { %v10882_v44 = vpop.f32.mrb[39].mxu1 }
 0x87d   : > { %v14150_v2 = vadd.f32 %v6966_v55, %v6829_v36 }
 0x880   : > { %v6812_v31 = vpop.f32.mrb[48].mxu0 }
 0x881   : > { %v6971_v42 = vpop.f32.mrb[40].mxu1  ;;  %v6830_v58 = vadd.f32 %v6812_v31, %v14100_v16  ;;  %v10853_v48 = vpop.f32.mrb[49].mxu0 }
 0x882   : > { %v10885_v54 = vpop.f32.mrb[41].mxu1  ;;  %v6815_v28 = vpop.f32.mrb[50].mxu0 }
 0x883   : > { %v6974_v7 = vpop.f32.mrb[42].mxu1  ;;  %v14153_v57 = vadd.f32 %v6971_v42, %v6830_v58  ;;  %v10854_v20 = vpop.f32.mrb[51].mxu0 }
 0x884   : > { %v10886_v0 = vpop.f32.mrb[43].mxu1 }
 0x888   : > { %v7082_v18 = vpop.f32.mrb[52].mxu0 }
 0x889   : > { %v7241_v15 = vpop.f32.mrb[44].mxu1  ;;  %v7136_v50 = vadd.f32 %v7082_v18, %v14106_v14  ;;  %v10893_v11 = vpop.f32.mrb[53].mxu0 }
 0x88a   : > { %v10925_v30 = vpop.f32.mrb[45].mxu1  ;;  %v7085_v25 = vpop.f32.mrb[54].mxu0 }
 0x88b   : > { %v7244_v61 = vpop.f32.mrb[46].mxu1  ;;  %v14156_v27 = vadd.f32 %v7241_v15, %v7136_v50  ;;  %v7137_v16 = vadd.f32 %v7085_v25, %v14109_v23  ;;  %v10894_v37 = vpop.f32.mrb[55].mxu0 }
 0x88c   : > { %v10926_v55 = vpop.f32.mrb[47].mxu1 }
 0x88d   : > { %v14159_v36 = vadd.f32 %v7244_v61, %v7137_v16 }
 0x890   : > { %v7090_v46 = vpop.f32.mrb[56].mxu0 }
 0x891   : > { %v7249_v44 = vpop.f32.mrb[48].mxu1  ;;  %v7138_v31 = vadd.f32 %v7090_v46, %v14115_v40  ;;  %v10897_v42 = vpop.f32.mrb[57].mxu0 }
 0x892   : > { %v10929_v58 = vpop.f32.mrb[49].mxu1  ;;  %v7093_v48 = vpop.f32.mrb[58].mxu0 }
 0x893   : > { %v7252_v14 = vpop.f32.mrb[50].mxu1  ;;  %v14162_v54 = vadd.f32 %v7249_v44, %v7138_v31  ;;  %v7139_v28 = vadd.f32 %v7093_v48, %v14121_v43  ;;  %v10898_v7 = vpop.f32.mrb[59].mxu0 }
 0x894   : > { %v10930_v20 = vpop.f32.mrb[51].mxu1 }
 0x895   : > { %v14165_v0 = vadd.f32 %v7252_v14, %v7139_v28 }
 0x898   : > { %v7098_v23 = vpop.f32.mrb[60].mxu0 }
 0x899   : > { %v7257_v18 = vpop.f32.mrb[52].mxu1  ;;  %v7140_v15 = vadd.f32 %v7098_v23, %v14125_v39  ;;  %v10901_v50 = vpop.f32.mrb[61].mxu0 }
 0x89a   : > { %v10933_v11 = vpop.f32.mrb[53].mxu1  ;;  %v7101_v30 = vpop.f32.mrb[62].mxu0 }
 0x89b   : > { %v7260_v40 = vpop.f32.mrb[54].mxu1  ;;  %v14168_v25 = vadd.f32 %v7257_v18, %v7140_v15  ;;  %v7141_v61 = vadd.f32 %v7101_v30, %v14128_v45  ;;  %v10902_v16 = vpop.f32.mrb[63].mxu0 }
 0x89c   : > { %v10934_v37 = vpop.f32.mrb[55].mxu1 }
 0x89d   : > { %v14171_v55 = vadd.f32 %v7260_v40, %v7141_v61 }
 0x8a0   : > { %v7106_v43 = vpop.f32.mrb[64].mxu0 }
 0x8a1   : > { %v7265_v46 = vpop.f32.mrb[56].mxu1  ;;  %v7142_v44 = vadd.f32 %v7106_v43, %v14131_v51  ;;  %v10905_v31 = vpop.f32.mrb[65].mxu0 }
 0x8a2   : > { %v10937_v42 = vpop.f32.mrb[57].mxu1  ;;  %v7109_v58 = vpop.f32.mrb[66].mxu0 }
 0x8a3   : > { %v7268_v39 = vpop.f32.mrb[58].mxu1  ;;  %v14174_v48 = vadd.f32 %v7265_v46, %v7142_v44  ;;  %v7143_v14 = vadd.f32 %v7109_v58, %v14134_v29  ;;  %v10906_v28 = vpop.f32.mrb[67].mxu0 }
 0x8a4   : > { %v10938_v7 = vpop.f32.mrb[59].mxu1 }
 0x8a5   : > { %v14177_v20 = vadd.f32 %v7268_v39, %v7143_v14 }
 0x8a8   : > { %v7114_v45 = vpop.f32.mrb[68].mxu0 }
 0x8a9   : > { %v7273_v23 = vpop.f32.mrb[60].mxu1  ;;  %v7144_v18 = vadd.f32 %v7114_v45, %v14137_v53  ;;  %v10909_v15 = vpop.f32.mrb[69].mxu0 }
 0x8aa   : > { %v10941_v50 = vpop.f32.mrb[61].mxu1  ;;  %v7117_v11 = vpop.f32.mrb[70].mxu0 }
 0x8ab   : > { %v7276_v51 = vpop.f32.mrb[62].mxu1  ;;  %v14180_v30 = vadd.f32 %v7273_v23, %v7144_v18  ;;  %v7145_v40 = vadd.f32 %v7117_v11, %v14143_v17  ;;  %v10910_v61 = vpop.f32.mrb[71].mxu0 }
 0x8ac   : > { %v10942_v16 = vpop.f32.mrb[63].mxu1 }
 0x8ad   : > { %v14183_v37 = vadd.f32 %v7276_v51, %v7145_v40 }
 0x8b0   : > { %v7122_v29 = vpop.f32.mrb[72].mxu0 }
 0x8b1   : > { %v7281_v43 = vpop.f32.mrb[64].mxu1  ;;  %v7146_v46 = vadd.f32 %v7122_v29, %v14147_v32  ;;  %v10913_v44 = vpop.f32.mrb[73].mxu0 }
 0x8b2   : > { %v10945_v31 = vpop.f32.mrb[65].mxu1  ;;  %v7125_v42 = vpop.f32.mrb[74].mxu0 }
 0x8b3   : > { %v7284_v53 = vpop.f32.mrb[66].mxu1  ;;  %v14186_v58 = vadd.f32 %v7281_v43, %v7146_v46  ;;  %v7147_v39 = vadd.f32 %v7125_v42, %v14150_v2  ;;  %v10914_v14 = vpop.f32.mrb[75].mxu0 }
 0x8b4   : > { %v10946_v28 = vpop.f32.mrb[67].mxu1 }
 0x8b5   : > { %v14189_v7 = vadd.f32 %v7284_v53, %v7147_v39 }
 0x8b8   : > { %v7130_v17 = vpop.f32.mrb[76].mxu0 }
 0x8b9   : > { %v7289_v45 = vpop.f32.mrb[68].mxu1  ;;  %v7148_v23 = vadd.f32 %v7130_v17, %v14153_v57  ;;  %v10917_v18 = vpop.f32.mrb[77].mxu0 }
 0x8ba   : > { %v10949_v15 = vpop.f32.mrb[69].mxu1  ;;  %v7133_v50 = vpop.f32.mrb[78].mxu0 }
 0x8bb   : > { %v7292_v32 = vpop.f32.mrb[70].mxu1  ;;  %v14192_v11 = vadd.f32 %v7289_v45, %v7148_v23  ;;  %v10918_v51 = vpop.f32.mrb[79].mxu0 }
 0x8bc   : > { %v10950_v40 = vpop.f32.mrb[71].mxu1 }
 0x8c0   : > { %v7400_v61 = vpop.f32.mrb[80].mxu0 }
 0x8c1   : > { %v7559_v16 = vpop.f32.mrb[72].mxu1  ;;  %v7454_v2 = vadd.f32 %v7400_v61, %v14156_v27  ;;  %v10957_v29 = vpop.f32.mrb[81].mxu0 }
 0x8c2   : > { %v10989_v43 = vpop.f32.mrb[73].mxu1  ;;  %v7403_v46 = vpop.f32.mrb[82].mxu0 }
 0x8c3   : > { %v7562_v44 = vpop.f32.mrb[74].mxu1  ;;  %v14195_v31 = vadd.f32 %v7559_v16, %v7454_v2  ;;  %v7455_v57 = vadd.f32 %v7403_v46, %v14159_v36  ;;  %v10958_v42 = vpop.f32.mrb[83].mxu0 }
 0x8c4   : > { %v10990_v53 = vpop.f32.mrb[75].mxu1 }
 0x8c5   : > { %v14198_v39 = vadd.f32 %v7562_v44, %v7455_v57 }
 0x8c8   : > { %v7408_v14 = vpop.f32.mrb[84].mxu0 }
 0x8c9   : > { %v7567_v28 = vpop.f32.mrb[76].mxu1  ;;  %v7456_v17 = vadd.f32 %v7408_v14, %v14162_v54  ;;  %v10961_v45 = vpop.f32.mrb[85].mxu0 }
 0x8ca   : > { %v10993_v23 = vpop.f32.mrb[77].mxu1  ;;  %v7411_v18 = vpop.f32.mrb[86].mxu0 }
 0x8cb   : > { %v7570_v27 = vpop.f32.mrb[78].mxu1  ;;  %v14201_v15 = vadd.f32 %v7567_v28, %v7456_v17  ;;  %v7457_v50 = vadd.f32 %v7411_v18, %v14165_v0  ;;  %v10962_v32 = vpop.f32.mrb[87].mxu0 }
 0x8cc   : > { %v10994_v51 = vpop.f32.mrb[79].mxu1 }
 0x8cd   : > { %v14204_v40 = vadd.f32 %v7570_v27, %v7457_v50 }
 0x8d0   : > { %v7416_v36 = vpop.f32.mrb[88].mxu0 }
 0x8d1   : > { %v7575_v61 = vpop.f32.mrb[80].mxu1  ;;  %v7458_v16 = vadd.f32 %v7416_v36, %v14168_v25  ;;  %v10965_v2 = vpop.f32.mrb[89].mxu0 }
 0x8d2   : > { %v10997_v29 = vpop.f32.mrb[81].mxu1  ;;  %v7419_v43 = vpop.f32.mrb[90].mxu0 }
 0x8d3   : > { %v7578_v54 = vpop.f32.mrb[82].mxu1  ;;  %v14207_v46 = vadd.f32 %v7575_v61, %v7458_v16  ;;  %v7459_v44 = vadd.f32 %v7419_v43, %v14171_v55  ;;  %v10966_v57 = vpop.f32.mrb[91].mxu0 }
 0x8d4   : > { %v10998_v42 = vpop.f32.mrb[83].mxu1 }
 0x8d5   : > { %v14210_v53 = vadd.f32 %v7578_v54, %v7459_v44 }
 0x8d8   : > { %v7424_v0 = vpop.f32.mrb[92].mxu0 }
 0x8d9   : > { %v7583_v14 = vpop.f32.mrb[84].mxu1  ;;  %v7460_v28 = vadd.f32 %v7424_v0, %v14174_v48  ;;  %v10969_v17 = vpop.f32.mrb[93].mxu0 }
 0x8da   : > { %v11001_v45 = vpop.f32.mrb[85].mxu1  ;;  %v7427_v23 = vpop.f32.mrb[94].mxu0 }
 0x8db   : > { %v7586_v25 = vpop.f32.mrb[86].mxu1  ;;  %v14213_v18 = vadd.f32 %v7583_v14, %v7460_v28  ;;  %v7461_v27 = vadd.f32 %v7427_v23, %v14177_v20  ;;  %v10970_v50 = vpop.f32.mrb[95].mxu0 }
 0x8dc   : > { %v11002_v32 = vpop.f32.mrb[87].mxu1 }
 0x8dd   : > { %v14216_v51 = vadd.f32 %v7586_v25, %v7461_v27 }
 0x8e0   : > { %v7432_v55 = vpop.f32.mrb[96].mxu0 }
 0x8e1   : > { %v7591_v36 = vpop.f32.mrb[88].mxu1  ;;  %v7462_v61 = vadd.f32 %v7432_v55, %v14180_v30  ;;  %v10973_v16 = vpop.f32.mrb[97].mxu0 }
 0x8e2   : > { %v11005_v2 = vpop.f32.mrb[89].mxu1  ;;  %v7435_v29 = vpop.f32.mrb[98].mxu0 }
 0x8e3   : > { %v7594_v48 = vpop.f32.mrb[90].mxu1  ;;  %v14219_v43 = vadd.f32 %v7591_v36, %v7462_v61  ;;  %v7463_v54 = vadd.f32 %v7435_v29, %v14183_v37  ;;  %v10974_v44 = vpop.f32.mrb[99].mxu0 }
 0x8e4   : > { %v11006_v57 = vpop.f32.mrb[91].mxu1 }
 0x8e5   : > { %v14222_v42 = vadd.f32 %v7594_v48, %v7463_v54 }
 0x8e8   : > { %v7440_v20 = vpop.f32.mrb[100].mxu0 }
 0x8e9   : > { %v7599_v0 = vpop.f32.mrb[92].mxu1  ;;  %v7464_v14 = vadd.f32 %v7440_v20, %v14186_v58  ;;  %v10977_v28 = vpop.f32.mrb[101].mxu0 }
 0x8ea   : > { %v11009_v17 = vpop.f32.mrb[93].mxu1  ;;  %v7443_v45 = vpop.f32.mrb[102].mxu0 }
 0x8eb   : > { %v7602_v30 = vpop.f32.mrb[94].mxu1  ;;  %v14225_v23 = vadd.f32 %v7599_v0, %v7464_v14  ;;  %v7465_v25 = vadd.f32 %v7443_v45, %v14189_v7  ;;  %v10978_v27 = vpop.f32.mrb[103].mxu0  ;;  %v14236_v7 = vld [vmem:[%s14664_s4 + $0x3] ss:$0 sm:$0xff] }
 0x8ec   : > { %v11010_v50 = vpop.f32.mrb[95].mxu1 }
 0x8ed   : > { %v14228_v32 = vadd.f32 %v7602_v30, %v7465_v25 }
 0x8f0   : > { %v7448_v37 = vpop.f32.mrb[104].mxu0 }
 0x8f1   : > { %v7607_v55 = vpop.f32.mrb[96].mxu1  ;;  %v7466_v36 = vadd.f32 %v7448_v37, %v14192_v11  ;;  %v10981_v61 = vpop.f32.mrb[105].mxu0 }
 0x8f2   : > { %v11013_v16 = vpop.f32.mrb[97].mxu1  ;;  %v7451_v2 = vpop.f32.mrb[106].mxu0 }
 0x8f3   : > { %v7610_v58 = vpop.f32.mrb[98].mxu1  ;;  %v14231_v29 = vadd.f32 %v7607_v55, %v7466_v36  ;;  %v10982_v48 = vpop.f32.mrb[107].mxu0 }
 0x8f4   : > { %v11014_v54 = vpop.f32.mrb[99].mxu1  ;;  %v11343_v48 = vld [vmem:[%s14667_s7 + $0x8] sm:$0xff]  }
 0x8f8   : > { %v7718_v44 = vpop.f32.mrb[108].mxu0 }
 0x8f9   : > { %v7772_v57 = vadd.f32 %v7718_v44, %v14195_v31  ;;  %v11021_v20 = vpop.f32.mrb[109].mxu0 }
 0x8fa   : > { %v7721_v0 = vpop.f32.mrb[110].mxu0 }
 0x8fb   : > { %v7793_v11 = vadd.f32 %v14236_v7, %v7772_v57  ;;  %v7773_v14 = vadd.f32 %v7721_v0, %v14198_v39  ;;  %v11022_v28 = vpop.f32.mrb[111].mxu0 }
 0x8fd   : > { %v7806_v17 = vadd.f32 %v7793_v11, %v13216_v26  ;;  %v7794_v45 = vadd.f32 %v14236_v7, %v7773_v14 }
 0x8ff   : > { %v7819_v30 = vmax.f32 %v7806_v17, 0.0  ;;  %v7807_v25 = vadd.f32 %v7794_v45, %v13222_v6  ;;  %v11342_v6 = vld [vmem:[%s14667_s7] sm:$0xff]  }
 0x900   : > { %v7726_v27 = vpop.f32.mrb[112].mxu0 }
 0x901   : > { %v7832_v50 = vmul.f32 %v7819_v30, %v12159_v13  ;;  %v7820_v37 = vmax.f32 %v7807_v25, 0.0  ;;  %v7774_v31 = vadd.f32 %v7726_v27, %v14201_v15  ;;  %v11025_v55 = vpop.f32.mrb[113].mxu0 }
 0x902   : > { %v7729_v36 = vpop.f32.mrb[114].mxu0 }
 0x903   : > { %7845 = vst.msk [vmem:[#allocation2 + $0x10] sm:$0xff] %vm546_vm3, %v7832_v50  ;;  %v7833_v39 = vmul.f32 %v7820_v37, %v12167_v21  ;;  %v7795_v61 = vadd.f32 %v14236_v7, %v7774_v31  ;;  %v7775_v26 = vadd.f32 %v7729_v36, %v14204_v40  ;;  %v11026_v16 = vpop.f32.mrb[115].mxu0 }
 0x905   : > { %7846 = vst.msk [vmem:[#allocation2 + $0x18] sm:$0xff] %vm546_vm3, %v7833_v39  ;;  %v14254_v13 = vpack.c.bf16 %v7833_v39, %v7832_v50  ;;  %v7808_v15 = vadd.f32 %v7795_v61, %v13232_v19  ;;  %v7796_v2 = vadd.f32 %v14236_v7, %v7775_v26 }
 0x907   : > { %v7821_v58 = vmax.f32 %v7808_v15, 0.0  ;;  %v7809_v21 = vadd.f32 %v7796_v2, %v13238_v33  ;;  %11052 = vmatmul.mubr.msk.bf16.vlgmr.msra.gmra.mrb[100].mxu1 %vm546_vm3, %v14254_v13 }
 0x908   : > { %v7734_v40 = vpop.f32.mrb[116].mxu0  ;;  %11055 = vmatprep.mubr.msk.bf16.mxu1 %vm11411_vm1, %v11410_v3  ;;  %11109 = vmatpush3.bf16.msra.mxu1 %v11342_v6 }
 0x909   : > { %v7834_v54 = vmul.f32 %v7821_v58, %v12175_v63  ;;  %v7822_v19 = vmax.f32 %v7809_v21, 0.0  ;;  %v7776_v44 = vadd.f32 %v7734_v40, %v14207_v46  ;;  %v11029_v57 = vpop.f32.mrb[117].mxu0  ;;  %11110 = vmatprep.subr.bf16.mxu1 %v11410_v3 }
 0x90a   : > { %v7737_v33 = vpop.f32.mrb[118].mxu0 }
 0x90b   : > { %7847 = vst.msk [vmem:[#allocation2 + $0x20] sm:$0xff] %vm546_vm3, %v7834_v54  ;;  %v7835_v20 = vmul.f32 %v7822_v19, %v12185_v12  ;;  %v7797_v0 = vadd.f32 %v14236_v7, %v7776_v44  ;;  %v7777_v11 = vadd.f32 %v7737_v33, %v14210_v53  ;;  %v11030_v14 = vpop.f32.mrb[119].mxu0 }
 0x90c   : > { %11111 = vmatpush3.bf16.msra.mxu1 %v11343_v48 }
 0x90d   : > { %7848 = vst.msk [vmem:[#allocation2 + $0x28] sm:$0xff] %vm546_vm3, %v7835_v20  ;;  %v14274_v63 = vpack.c.bf16 %v7835_v20, %v7834_v54  ;;  %v7810_v46 = vadd.f32 %v7797_v0, %v13267_v49  ;;  %v7798_v28 = vadd.f32 %v14236_v7, %v7777_v11 }
 0x90f   : > { %v7823_v17 = vmax.f32 %v7810_v46, 0.0  ;;  %v7811_v45 = vadd.f32 %v7798_v28, %v13274_v60  ;;  %11056 = vmatmul.mubr.msk.bf16.gmra.mrb[104].mxu1 %vm546_vm3, %v14274_v63 }
 0x910   : > { %v7742_v12 = vpop.f32.mrb[120].mxu0  ;;  %11059 = vmatprep.mubr.msk.bf16.mxu1 %vm11411_vm1, %v11410_v3 }
 0x911   : > { %v7836_v53 = vmul.f32 %v7823_v17, %v12213_v1  ;;  %v7824_v30 = vmax.f32 %v7811_v45, 0.0  ;;  %v7778_v25 = vadd.f32 %v7742_v12, %v14213_v18  ;;  %v11033_v27 = vpop.f32.mrb[121].mxu0 }
 0x912   : > { %v7745_v50 = vpop.f32.mrb[122].mxu0 }
 0x913   : > { %7849 = vst.msk [vmem:[#allocation2 + $0x30] sm:$0xff] %vm546_vm3, %v7836_v53  ;;  %v7837_v49 = vmul.f32 %v7824_v30, %v12223_v41  ;;  %v7799_v60 = vadd.f32 %v14236_v7, %v7778_v25  ;;  %v7779_v37 = vadd.f32 %v7745_v50, %v14216_v51  ;;  %v11034_v31 = vpop.f32.mrb[123].mxu0 }
 0x915   : > { %7850 = vst.msk [vmem:[#allocation2 + $0x38] sm:$0xff] %vm546_vm3, %v7837_v49  ;;  %v14290_v55 = vpack.c.bf16 %v7837_v49, %v7836_v53  ;;  %v7812_v1 = vadd.f32 %v7799_v60, %v13292_v34  ;;  %v7800_v36 = vadd.f32 %v14236_v7, %v7779_v37  ;;  %v11413_v37 = vmov 1  }
 0x917   : > { %v7825_v18 = vmax.f32 %v7812_v1, 0.0  ;;  %v7813_v39 = vadd.f32 %v7800_v36, %v13298_v5  ;;  %11060 = vmatmul.mubr.msk.bf16.gmra.mrb[108].mxu1 %vm546_vm3, %v14290_v55 }
 0x918   : > { %v7750_v41 = vpop.f32.mrb[124].mxu0  ;;  %11063 = vmatprep.mubr.msk.bf16.mxu1 %vm11411_vm1, %v11410_v3 }
 0x919   : > { %v7838_v51 = vmul.f32 %v7825_v18, %v12244_v35  ;;  %v7826_v61 = vmax.f32 %v7813_v39, 0.0  ;;  %v7780_v26 = vadd.f32 %v7750_v41, %v14219_v43  ;;  %v11037_v16 = vpop.f32.mrb[125].mxu0 }
 0x91a   : > { %v7753_v6 = vpop.f32.mrb[126].mxu0 }
 0x91b   : > { %7851 = vst.msk [vmem:[#allocation2 + $0x40] sm:$0xff] %vm546_vm3, %v7838_v51  ;;  %v7839_v34 = vmul.f32 %v7826_v61, %v12249_v8  ;;  %v7801_v5 = vadd.f32 %v14236_v7, %v7780_v26  ;;  %v7781_v15 = vadd.f32 %v7753_v6, %v14222_v42  ;;  %v11038_v2 = vpop.f32.mrb[127].mxu0 }
 0x91d   : > { %7852 = vst.msk [vmem:[#allocation2 + $0x48] sm:$0xff] %vm546_vm3, %v7839_v34  ;;  %v7861_v58 = vpack.c.bf16 %v7839_v34, %v7838_v51  ;;  %v7814_v21 = vadd.f32 %v7801_v5, %v13314_v10  ;;  %v7802_v35 = vadd.f32 %v14236_v7, %v7781_v15  ;;  %v11414_v34 = vmov 0.0|0.0  }
 0x91e   : > { %11169 = vmatprep.subr.bf16.mxu0 %v11414_v34 }
 0x91f   : > { %v7827_v40 = vmax.f32 %v7814_v21, 0.0  ;;  %v7815_v43 = vadd.f32 %v7802_v35, %v13320_v62  ;;  %11064 = vmatmul.mubr.msk.bf16.gmra.mrb[112].mxu1 %vm546_vm3, %v7861_v58 }
 0x920   : > { %v7758_v48 = vpop.f32.mrb[128].mxu0  ;;  %11067 = vmatprep.mubr.msk.bf16.mxu1 %vm11411_vm1, %v11410_v3 }
 0x921   : > { %v7840_v8 = vmul.f32 %v7827_v40, %v12268_v47  ;;  %v7828_v42 = vmax.f32 %v7815_v43, 0.0  ;;  %v7782_v54 = vadd.f32 %v7758_v48, %v14225_v23  ;;  %v11041_v19 = vpop.f32.mrb[129].mxu0 }
 0x922   : > { %v7761_v44 = vpop.f32.mrb[130].mxu0 }
 0x923   : > { %7853 = vst.msk [vmem:[#allocation2 + $0x50] sm:$0xff] %vm546_vm3, %v7840_v8  ;;  %v7841_v10 = vmul.f32 %v7828_v42, %v12273_v38  ;;  %v7803_v57 = vadd.f32 %v14236_v7, %v7782_v54  ;;  %v7783_v62 = vadd.f32 %v7761_v44, %v14228_v32  ;;  %v11042_v33 = vpop.f32.mrb[131].mxu0 }
 0x925   : > { %7854 = vst.msk [vmem:[#allocation2 + $0x58] sm:$0xff] %vm546_vm3, %v7841_v10  ;;  %v7862_v20 = vpack.c.bf16 %v7841_v10, %v7840_v8  ;;  %v7816_v0 = vadd.f32 %v7803_v57, %v13336_v24  ;;  %v7804_v47 = vadd.f32 %v14236_v7, %v7783_v62 }
 0x927   : > { %v7829_v11 = vmax.f32 %v7816_v0, 0.0  ;;  %v7817_v23 = vadd.f32 %v7804_v47, %v13342_v4  ;;  %11068 = vmatmul.mubr.msk.bf16.gmra.mrb[116].mxu1 %vm546_vm3, %v7862_v20 }
 0x928   : > { %v7766_v14 = vpop.f32.mrb[132].mxu0  ;;  %11071 = vmatprep.mubr.msk.bf16.mxu1 %vm11411_vm1, %v11410_v3 }
 0x929   : > { %v7842_v38 = vmul.f32 %v7829_v11, %v12292_v52  ;;  %v7830_v32 = vmax.f32 %v7817_v23, 0.0  ;;  %v7784_v46 = vadd.f32 %v7766_v14, %v14231_v29  ;;  %v11045_v28 = vpop.f32.mrb[133].mxu0 }
 0x92a   : > { %v7769_v17 = vpop.f32.mrb[134].mxu0 }
 0x92b   : > { %7855 = vst.msk [vmem:[#allocation2 + $0x60] sm:$0xff] %vm546_vm3, %v7842_v38  ;;  %v7843_v24 = vmul.f32 %v7830_v32, %v12297_v59  ;;  %v7805_v45 = vadd.f32 %v14236_v7, %v7784_v46  ;;  %v11046_v4 = vpop.f32.mrb[135].mxu0  ;;  %v14365_v59 = vld [vmem:[%s14666_s6] ss:$0 sm:$0xff] }
 0x92d   : > { %7856 = vst.msk [vmem:[#allocation2 + $0x68] sm:$0xff] %vm546_vm3, %v7843_v24  ;;  %v7863_v12 = vpack.c.bf16 %v7843_v24, %v7842_v38  ;;  %v7818_v53 = vadd.f32 %v7805_v45, %v13355_v56  ;;  %v14392_v45 = vld [vmem:[#allocation3] ss:$0 sm:$0xff] }
 0x92f   : > { %v7831_v30 = vmax.f32 %v7818_v53, 0.0  ;;  %11072 = vmatmul.mubr.msk.bf16.gmra.mrb[120].mxu1 %vm546_vm3, %v7863_v12 }
 0x930   : > { %11075 = vmatprep.mubr.msk.bf16.mxu1 %vm11411_vm1, %v11410_v3 }
 0x931   : > { %v7844_v52 = vmul.f32 %v7831_v30, %v12314_v22 }
 0x933   : > { %7857 = vst.msk [vmem:[#allocation2 + $0x70] sm:$0xf] %vm1972_vm4, %v7844_v52  ;;  %v7864_v29 = vpack.c.bf16 %v7844_v52, %v7844_v52 }
 0x937   : > { %11076 = vmatmul.mubr.msk.bf16.gmra.mrb[124].mxu1 %vm546_vm3, %v7864_v29 }
 0x938   : > { %11112 = vmatprep.mubr.msk.bf16.mxu1 %vm11411_vm1, %v11410_v3 }
 0x93f   : > { %11113 = vmatmul.mubr.msk.bf16.vlgmr.msra.gmra.mrb[128].mxu1 %vm546_vm3, %v14254_v13 }
 0x940   : > { %11116 = vmatprep.mubr.msk.bf16.mxu1 %vm11411_vm1, %v11410_v3 }
 0x947   : > { %11117 = vmatmul.mubr.msk.bf16.gmra.mrb[132].mxu1 %vm546_vm3, %v14274_v63 }
 0x948   : > { %11120 = vmatprep.mubr.msk.bf16.mxu1 %vm11411_vm1, %v11410_v3 }
 0x94f   : > { %11121 = vmatmul.mubr.msk.bf16.gmra.mrb[136].mxu1 %vm546_vm3, %v14290_v55 }
 0x950   : > { %11124 = vmatprep.mubr.msk.bf16.mxu1 %vm11411_vm1, %v11410_v3 }
 0x957   : > { %11125 = vmatmul.mubr.msk.bf16.gmra.mrb[140].mxu1 %vm546_vm3, %v7861_v58 }
 0x958   : > { %11128 = vmatprep.mubr.msk.bf16.mxu1 %vm11411_vm1, %v11410_v3 }
 0x95f   : > { %11129 = vmatmul.mubr.msk.bf16.gmra.mrb[144].mxu1 %vm546_vm3, %v7862_v20 }
 0x960   : > { %11132 = vmatprep.mubr.msk.bf16.mxu1 %vm11411_vm1, %v11410_v3 }
 0x967   : > { %11133 = vmatmul.mubr.msk.bf16.gmra.mrb[148].mxu1 %vm546_vm3, %v7863_v12 }
 0x968   : > { %11136 = vmatprep.mubr.msk.bf16.mxu1 %vm11411_vm1, %v11410_v3 }
 0x96f   : > { %11137 = vmatmul.mubr.msk.bf16.gmra.mrb[152].mxu1 %vm546_vm3, %v7864_v29 }
 0x9da   : > { %v7944_v22 = vpop.f32.mrb[100].mxu1 }
 0x9db   : > { %v7945_v56 = vadd.f32 %v14365_v59, %v7944_v22  ;;  %v11053_v7 = vpop.f32.mrb[101].mxu1 }
 0x9dc   : > { %v7947_v13 = vpop.f32.mrb[102].mxu1  ;;  %v8400_v7 = vld [vmem:[%s14670_s10 + $0x8] sm:$0xff] }
 0x9dd   : > { %v7998_v63 = vmax.f32 %v7945_v56, 0.0  ;;  %v7948_v25 = vadd.f32 %v14365_v59, %v7947_v13  ;;  %v11054_v27 = vpop.f32.mrb[103].mxu1 }
 0x9df   : > { %v7999_v50 = vmax.f32 %v7948_v25, 0.0  ;;  %8026 = vperm.xlu1 %11253, %v7998_v63  }
 0x9e1   : > { %8031 = vperm.xlu0 %11252, %v7999_v50  }
 0x9e2   : > { %v7952_v49 = vpop.f32.mrb[104].mxu1 }
 0x9e3   : > { %v7953_v60 = vadd.f32 %v14365_v59, %v7952_v49  ;;  %11254 = vset.pattern.permute.xlu1 %v11413_v37  ;;  %v11057_v31 = vpop.f32.mrb[105].mxu1 }
 0x9e4   : > { %8117 = vperm.xlu1 %11254, %v7998_v63   ;;  %v7955_v55 = vpop.f32.mrb[106].mxu1 }
 0x9e5   : > { %11255 = vset.pattern.permute.xlu0 %v11413_v37  ;;  %v11058_v1 = vpop.f32.mrb[107].mxu1  ;;  %v8000_v36 = vmax.f32 %v7953_v60, 0.0  ;;  %v7956_v18 = vadd.f32 %v14365_v59, %v7955_v55 }
 0x9e6   : > { %8121 = vperm.xlu0 %11255, %v7999_v50  }
 0x9e7   : > { %v8001_v41 = vmax.f32 %v7956_v18, 0.0  ;;  %v8401_v18 = vld [vmem:[%s14670_s10 + $0x10] sm:$0xff] }
 0x9e8   : > { %11256 = vset.pattern.permute.xlu1 %v11412_v9 }
 0x9e9   : > { %8036 = vperm.xlu1 %11256, %v8000_v36  }
 0x9ea   : > { %8125 = vperm.xlu0 %11255, %v8000_v36   ;;  %v7960_v39 = vpop.f32.mrb[108].mxu1 }
 0x9eb   : > { %v7961_v51 = vadd.f32 %v14365_v59, %v7960_v39  ;;  %v11061_v61 = vpop.f32.mrb[109].mxu1  ;;  %v8402_v39 = vld [vmem:[%s14670_s10 + $0x18] sm:$0xff] }
 0x9ec   : > { %v7963_v26 = vpop.f32.mrb[110].mxu1 }
 0x9ed   : > { %v8002_v16 = vmax.f32 %v7961_v51, 0.0  ;;  %8041 = vperm.xlu1 %11256, %v8001_v41   ;;  %v11062_v6 = vpop.f32.mrb[111].mxu1  ;;  %v7964_v5 = vadd.f32 %v14365_v59, %v7963_v26 }
 0x9ee   : > { %11258 = vset.pattern.permute.xlu0 %v11412_v9 }
 0x9ef   : > { %8046 = vperm.xlu0 %11258, %v8002_v16   ;;  %v8003_v15 = vmax.f32 %v7964_v5, 0.0 }
 0x9f1   : > { %11257 = vset.pattern.permute.xlu1 %v11413_v37 }
 0x9f2   : > { %8129 = vperm.xlu1 %11257, %v8001_v41   ;;  %v7968_v2 = vpop.f32.mrb[112].mxu1 }
 0x9f3   : > { %v7969_v58 = vadd.f32 %v14365_v59, %v7968_v2  ;;  %11260 = vset.pattern.permute.xlu0 %v11413_v37  ;;  %v11065_v21 = vpop.f32.mrb[113].mxu1 }
 0x9f4   : > { %8137 = vperm.xlu0 %11260, %v8003_v15   ;;  %v7971_v35 = vpop.f32.mrb[114].mxu1  ;;  %v8403_v21 = vld [vmem:[%s14670_s10 + $0x20] sm:$0xff] }
 0x9f5   : > { %v8004_v40 = vmax.f32 %v7969_v58, 0.0  ;;  %v11066_v43 = vpop.f32.mrb[115].mxu1  ;;  %v7972_v19 = vadd.f32 %v14365_v59, %v7971_v35  ;;  %v8404_v35 = vld [vmem:[%s14670_s10 + $0x28] sm:$0xff] }
 0x9f6   : > { %8133 = vperm.xlu1 %11257, %v8002_v16  }
 0x9f7   : > { %v8005_v62 = vmax.f32 %v7972_v19, 0.0 }
 0x9f8   : > { %8141 = vperm.xlu0 %11260, %v8004_v40  }
 0x9fa   : > { %11259 = vset.pattern.permute.xlu1 %v11412_v9  ;;  %v7976_v48 = vpop.f32.mrb[116].mxu1 }
 0x9fb   : > { %v7977_v8 = vadd.f32 %v14365_v59, %v7976_v48  ;;  %8051 = vperm.xlu1 %11259, %v8003_v15   ;;  %v11069_v42 = vpop.f32.mrb[117].mxu1 }
 0x9fc   : > { %v7979_v54 = vpop.f32.mrb[118].mxu1  ;;  %11262 = vset.pattern.permute.xlu0 %v11412_v9 }
 0x9fd   : > { %v8006_v44 = vmax.f32 %v7977_v8, 0.0  ;;  %v11070_v10 = vpop.f32.mrb[119].mxu1  ;;  %v7980_v57 = vadd.f32 %v14365_v59, %v7979_v54 }
 0x9ff   : > { %8056 = vperm.xlu1 %11259, %v8004_v40   ;;  %8066 = vperm.xlu0 %11262, %v8006_v44   ;;  %v8007_v33 = vmax.f32 %v7980_v57, 0.0 }
 0xa02   : > { %v7984_v20 = vpop.f32.mrb[120].mxu1 }
 0xa03   : > { %v7985_v0 = vadd.f32 %v14365_v59, %v7984_v20  ;;  %8061 = vperm.xlu1 %11259, %v8005_v62   ;;  %11264 = vset.pattern.permute.xlu0 %v11413_v37  ;;  %v11073_v47 = vpop.f32.mrb[121].mxu1  ;;  %v8406_v20 = vld [vmem:[%s14670_s10 + $0x38] sm:$0xff] }
 0xa04   : > { %8153 = vperm.xlu0 %11264, %v8007_v33   ;;  %v7987_v11 = vpop.f32.mrb[122].mxu1 }
 0xa05   : > { %v8008_v23 = vmax.f32 %v7985_v0, 0.0  ;;  %v11074_v14 = vpop.f32.mrb[123].mxu1  ;;  %v7988_v12 = vadd.f32 %v14365_v59, %v7987_v11 }
 0xa07   : > { %11261 = vset.pattern.permute.xlu1 %v11413_v37 }
 0xa08   : > { %8145 = vperm.xlu1 %11261, %v8005_v62   ;;  %8157 = vperm.xlu0 %11264, %v8008_v23  }
 0xa0a   : > { %v7992_v38 = vpop.f32.mrb[124].mxu1 }
 0xa0b   : > { %v7993_v32 = vadd.f32 %v14365_v59, %v7992_v38  ;;  %v11077_v46 = vpop.f32.mrb[125].mxu1  ;;  %v8009_v59 = vmax.f32 %v7988_v12, 0.0  ;;  %v8408_v12 = vld [vmem:[%s14670_s10 + $0x48] sm:$0xff] }
 0xa0c   : > { %8149 = vperm.xlu1 %11261, %v8006_v44   ;;  %v7995_v28 = vpop.f32.mrb[126].mxu1  ;;  %11266 = vset.pattern.permute.xlu0 %v11412_v9 }
 0xa0d   : > { %v8010_v17 = vmax.f32 %v7993_v32, 0.0  ;;  %v11078_v24 = vpop.f32.mrb[127].mxu1 }
 0xa0f   : > { %8086 = vperm.xlu0 %11266, %v8010_v17  }
 0xa10   : > { %11263 = vset.pattern.permute.xlu1 %v11412_v9  ;;  %v8399_v9 = vld [vmem:[%s14670_s10] sm:$0xff] }
 0xa11   : > { %8071 = vperm.xlu1 %11263, %v8007_v33   ;;  %v8405_v33 = vld [vmem:[%s14670_s10 + $0x30] sm:$0xff] }
 0xa12   : > { %v8332_v4 = vpop.f32.mrb[128].mxu1 }
 0xa13   : > { %v8333_v53 = vadd.f32 %v14392_v45, %v8332_v4  ;;  %v11114_v30 = vpop.f32.mrb[129].mxu1  ;;  %11267 = vset.pattern.permute.xlu0 %v11413_v37  ;;  %v8407_v4 = vld [vmem:[%s14670_s10 + $0x40] sm:$0xff] }
 0xa14   : > { %v8335_v52 = vpop.f32.mrb[130].mxu1 }
 0xa15   : > { %v8386_v29 = vmax.f32 %v8333_v53, 0.0  ;;  %v8336_v22 = vadd.f32 %v14392_v45, %v8335_v52  ;;  %8076 = vperm.xlu1 %11263, %v8008_v23   ;;  %v11115_v56 = vpop.f32.mrb[131].mxu1 }
 0xa17   : > { %v8387_v13 = vmax.f32 %v8336_v22, 0.0  ;;  %v14404_v63 = vmul.f32 %v8399_v9, %v8386_v29 }
 0xa19   : > { %v14406_v25 = vmul.f32 %v8400_v7, %v8387_v13  ;;  %8081 = vperm.xlu1 %11263, %v8009_v59  }
 0xa1a   : > { %v8340_v27 = vpop.f32.mrb[132].mxu1 }
 0xa1b   : > { %v11188_v50 = vpack.c.bf16 %v14406_v25, %v14404_v63  ;;  %v8341_v49 = vadd.f32 %v14392_v45, %v8340_v27  ;;  %v11118_v60 = vpop.f32.mrb[133].mxu1 }
 0xa1c   : > { %v8343_v31 = vpop.f32.mrb[134].mxu1  ;;  %v8410_v60 = vld [vmem:[%s14670_s10 + $0x58] sm:$0xff] }
 0xa1d   : > { %v8388_v55 = vmax.f32 %v8341_v49, 0.0  ;;  %v8344_v1 = vadd.f32 %v14392_v45, %v8343_v31  ;;  %11265 = vset.pattern.permute.xlu1 %v11413_v37  ;;  %v11119_v36 = vpop.f32.mrb[135].mxu1  ;;  %v8409_v49 = vld [vmem:[%s14670_s10 + $0x50] sm:$0xff] }
 0xa1e   : > { %8161 = vperm.xlu1 %11265, %v8009_v59  }
 0xa1f   : > { %v8389_v41 = vmax.f32 %v8344_v1, 0.0  ;;  %v14419_v51 = vmul.f32 %v8401_v18, %v8388_v55 }
 0xa21   : > { %v14421_v61 = vmul.f32 %v8402_v39, %v8389_v41 }
 0xa22   : > { %8165 = vperm.xlu1 %11265, %v8010_v17   ;;  %v8348_v26 = vpop.f32.mrb[136].mxu1 }
 0xa23   : > { %v11191_v37 = vpack.c.bf16 %v14421_v61, %v14419_v51  ;;  %v8349_v16 = vadd.f32 %v14392_v45, %v8348_v26  ;;  %v11122_v6 = vpop.f32.mrb[137].mxu1 }
 0xa24   : > { %v8351_v5 = vpop.f32.mrb[138].mxu1 }
 0xa25   : > { %v8390_v15 = vmax.f32 %v8349_v16, 0.0  ;;  %v8352_v2 = vadd.f32 %v14392_v45, %v8351_v5  ;;  %v11123_v58 = vpop.f32.mrb[139].mxu1  ;;  %v9153_v5 = vld [vmem:[%s14669_s9 + $0x68] sm:$0xff] }
 0xa27   : > { %v8391_v40 = vmax.f32 %v8352_v2, 0.0  ;;  %v14433_v43 = vmul.f32 %v8403_v21, %v8390_v15  ;;  %v8011_v15 = vld [vmem:[%s14669_s9] sm:$0xff]  ;;  %v8012_v2 = vld [vmem:[%s14669_s9 + $0x8] sm:$0xff]  ;;  %v9154_v21 = vld [vmem:[%s14669_s9 + $0x70] sm:$0xff] }
 0xa29   : > { %v14435_v48 = vmul.f32 %v8404_v35, %v8391_v40 }
 0xa2a   : > { %v8356_v8 = vpop.f32.mrb[140].mxu1 }
 0xa2b   : > { %v11194_v42 = vpack.c.bf16 %v14435_v48, %v14433_v43  ;;  %v8357_v54 = vadd.f32 %v14392_v45, %v8356_v8  ;;  %v11126_v19 = vpop.f32.mrb[141].mxu1 }
 0xa2c   : > { %v8359_v44 = vpop.f32.mrb[142].mxu1 }
 0xa2d   : > { %v8392_v10 = vmax.f32 %v8357_v54, 0.0  ;;  %v8360_v57 = vadd.f32 %v14392_v45, %v8359_v44  ;;  %v11127_v62 = vpop.f32.mrb[143].mxu1 }
 0xa2f   : > { %v8393_v0 = vmax.f32 %v8360_v57, 0.0  ;;  %v14447_v47 = vmul.f32 %v8405_v33, %v8392_v10 }
 0xa31   : > { %v14449_v11 = vmul.f32 %v8406_v20, %v8393_v0  ;;  %v8013_v0 = vld [vmem:[%s14669_s9 + $0x10] sm:$0xff] }
 0xa32   : > { %v8364_v23 = vpop.f32.mrb[144].mxu1 }
 0xa33   : > { %v11197_v14 = vpack.c.bf16 %v14449_v11, %v14447_v47  ;;  %v8365_v38 = vadd.f32 %v14392_v45, %v8364_v23  ;;  %v11130_v32 = vpop.f32.mrb[145].mxu1  ;;  %v9155_v23 = vld [vmem:[%s14669_s9 + $0x78] sm:$0xff] }
 0xa34   : > { %v8367_v46 = vpop.f32.mrb[146].mxu1  ;;  %v9156_v32 = vld [vmem:[%s14669_s9 + $0x80] sm:$0xff] }
 0xa35   : > { %v8394_v28 = vmax.f32 %v8365_v38, 0.0  ;;  %v8368_v17 = vadd.f32 %v14392_v45, %v8367_v46  ;;  %v11131_v24 = vpop.f32.mrb[147].mxu1  ;;  %v8014_v38 = vld [vmem:[%s14669_s9 + $0x18] sm:$0xff] }
 0xa37   : > { %v8395_v53 = vmax.f32 %v8368_v17, 0.0  ;;  %v14461_v30 = vmul.f32 %v8407_v4, %v8394_v28 }
 0xa39   : > { %v14463_v52 = vmul.f32 %v8408_v12, %v8395_v53 }
 0xa3a   : > { %v8372_v29 = vpop.f32.mrb[148].mxu1 }
 0xa3b   : > { %v11200_v22 = vpack.c.bf16 %v14463_v52, %v14461_v30  ;;  %v8373_v56 = vadd.f32 %v14392_v45, %v8372_v29  ;;  %v11134_v9 = vpop.f32.mrb[149].mxu1 }
 0xa3c   : > { %v8375_v7 = vpop.f32.mrb[150].mxu1 }
 0xa3d   : > { %v8396_v59 = vmax.f32 %v8373_v56, 0.0  ;;  %v8376_v13 = vadd.f32 %v14392_v45, %v8375_v7  ;;  %v11135_v27 = vpop.f32.mrb[151].mxu1  ;;  %v9157_v7 = vld [vmem:[%s14669_s9 + $0x88] sm:$0xff] }
 0xa3f   : > { %v8397_v31 = vmax.f32 %v8376_v13, 0.0  ;;  %v14475_v55 = vmul.f32 %v8409_v49, %v8396_v59  ;;  %v8015_v59 = vld [vmem:[%s14669_s9 + $0x20] sm:$0xff]  ;;  %v9158_v13 = vld [vmem:[%s14669_s9 + $0x90] sm:$0xff]  ;;  %v8016_v49 = vld [vmem:[%s14669_s9 + $0x28] sm:$0xff] }
 0xa41   : > { %v14477_v1 = vmul.f32 %v8410_v60, %v8397_v31 }
 0xa42   : > { %v14479_v36 = vpop.f32.mrb[152].mxu1 }
 0xa43   : > { %v11203_v18 = vpack.c.bf16 %v14477_v1, %v14475_v55  ;;  %v11138_v39 = vpop.f32.mrb[153].mxu1  ;;  %v8381_v63 = vadd.f32 %v14392_v45, %v14479_v36 }
 0xa44   : > { %v8383_v41 = vpop.f32.mrb[154].mxu1 }
 0xa45   : > { %v11139_v26 = vpop.f32.mrb[155].mxu1  ;;  %v8398_v25 = vmax.f32 %v8381_v63, 0.0 }
 0xa5e   : > { %v8027_v16 = vpop.permute.xlu1 %8026 }
 0xa5f   : > { %v8089_v8 = vmul.f32 %v8027_v16, %v8011_v15 }
 0xa60   : > { %v8032_v6 = vpop.permute.xlu0 %8031 }
 0xa61   : > { %v8090_v54 = vmul.f32 %v8032_v6, %v8012_v2 }
 0xa63   : > { %v8118_v58 = vpop.permute.xlu1 %8117 }
 0xa64   : > { %v8168_v35 = vmul.f32 %v9153_v5, %v8118_v58  ;;  %v8017_v58 = vld [vmem:[%s14669_s9 + $0x30] sm:$0xff] }
 0xa65   : > { %v8122_v40 = vpop.permute.xlu0 %8121 }
 0xa66   : > { %v8169_v19 = vmul.f32 %v9154_v21, %v8122_v40  ;;  %v8181_v44 = vadd.f32 %v8168_v35, %v8089_v8  ;;  %v9159_v35 = vld [vmem:[%s14669_s9 + $0x98] sm:$0xff]  ;;  %v9160_v8 = vld [vmem:[%s14669_s9 + $0xa0] sm:$0xff] }
 0xa67   : > { %v8018_v40 = vld [vmem:[%s14669_s9 + $0x38] sm:$0xff] }
 0xa68   : > { %v8182_v10 = vadd.f32 %v8169_v19, %v8090_v54  ;;  %v8037_v57 = vpop.permute.xlu1 %8036 }
 0xa69   : > { %v8126_v33 = vpop.permute.xlu0 %8125  ;;  %v8091_v46 = vmul.f32 %v8037_v57, %v8013_v0 }
 0xa6a   : > { %v11170_v62 = vpack.c.bf16 %v8182_v10, %v8181_v44  ;;  %v8170_v28 = vmul.f32 %v9155_v23, %v8126_v33 }
 0xa6c   : > { %11171 = vmatpush3.bf16.msra.mxu0 %v11170_v62  ;;  %v8042_v20 = vpop.permute.xlu1 %8041  ;;  %v8183_v53 = vadd.f32 %v8170_v28, %v8091_v46  ;;  %v9162_v46 = vld [vmem:[%s14669_s9 + $0xb0] sm:$0xff] }
 0xa6d   : > { %11172 = vmatprep.subr.bf16.mxu0 %v11414_v34  ;;  %v8092_v24 = vmul.f32 %v8042_v20, %v8014_v38  ;;  %v9161_v38 = vld [vmem:[%s14669_s9 + $0xa8] sm:$0xff] }
 0xa6e   : > { %v8047_v4 = vpop.permute.xlu0 %8046 }
 0xa6f   : > { %v8093_v39 = vmul.f32 %v8047_v4, %v8015_v59 }
 0xa71   : > { %v8130_v17 = vpop.permute.xlu1 %8129 }
 0xa72   : > { %v8171_v12 = vmul.f32 %v9156_v32, %v8130_v17  ;;  %v8019_v32 = vld [vmem:[%s14669_s9 + $0x40] sm:$0xff]  ;;  %v8020_v17 = vld [vmem:[%s14669_s9 + $0x48] sm:$0xff] }
 0xa73   : > { %v8138_v27 = vpop.permute.xlu0 %8137 }
 0xa74   : > { %v8184_v29 = vadd.f32 %v8171_v12, %v8092_v24  ;;  %v8173_v41 = vmul.f32 %v9158_v13, %v8138_v27  ;;  %v8021_v27 = vld [vmem:[%s14669_s9 + $0x50] sm:$0xff] }
 0xa75   : > { %v8134_v56 = vpop.permute.xlu1 %8133 }
 0xa76   : > { %v11173_v9 = vpack.c.bf16 %v8184_v29, %v8183_v53  ;;  %v8172_v60 = vmul.f32 %v9157_v7, %v8134_v56 }
 0xa77   : > { %v8142_v21 = vpop.permute.xlu0 %8141 }
 0xa78   : > { %11174 = vmatpush3.bf16.msra.mxu0 %v11173_v9  ;;  %v8185_v16 = vadd.f32 %v8172_v60, %v8093_v39  ;;  %v8174_v44 = vmul.f32 %v9159_v35, %v8142_v21  ;;  %v9164_v39 = vld [vmem:[%s14669_s9 + $0xc0] sm:$0xff] }
 0xa79   : > { %11175 = vmatprep.subr.bf16.mxu0 %v11414_v34  ;;  %v8023_v21 = vld [vmem:[%s14669_s9 + $0x60] sm:$0xf] }
 0xa7a   : > { %v8052_v31 = vpop.permute.xlu1 %8051 }
 0xa7b   : > { %v8094_v26 = vmul.f32 %v8052_v31, %v8016_v49  ;;  %v9163_v49 = vld [vmem:[%s14669_s9 + $0xb8] sm:$0xff] }
 0xa7c   : > { %v8022_v31 = vld [vmem:[%s14669_s9 + $0x58] sm:$0xff] }
 0xa7d   : > { %v8186_v6 = vadd.f32 %v8173_v41, %v8094_v26 }
 0xa7e   : > { %v8057_v5 = vpop.permute.xlu1 %8056  ;;  %v8067_v10 = vpop.permute.xlu0 %8066 }
 0xa7f   : > { %v11176_v15 = vpack.c.bf16 %v8186_v6, %v8185_v16  ;;  %v8095_v54 = vmul.f32 %v8057_v5, %v8017_v58  ;;  %v8097_v12 = vmul.f32 %v8067_v10, %v8019_v32  ;;  %v7865_v10 = vld [vmem:[%s14671_s11] sm:$0x1] }
 0xa81   : > { %11177 = vmatpush3.bf16.msra.mxu0 %v11176_v15  ;;  %v8187_v33 = vadd.f32 %v8174_v44, %v8095_v54  ;;  %v9165_v15 = vld [vmem:[%s14669_s9 + $0xc8] sm:$0xf] }
 0xa82   : > { %v8062_v2 = vpop.permute.xlu1 %8061  ;;  %11178 = vmatprep.subr.bf16.mxu0 %v11414_v34 }
 0xa83   : > { %v8096_v57 = vmul.f32 %v8062_v2, %v8018_v40  ;;  %v8154_v28 = vpop.permute.xlu0 %8153 }
 0xa84   : > { %v8177_v53 = vmul.f32 %v9162_v46, %v8154_v28 }
 0xa87   : > { %v8146_v19 = vpop.permute.xlu1 %8145  ;;  %v8158_v60 = vpop.permute.xlu0 %8157 }
 0xa88   : > { %v8175_v62 = vmul.f32 %v9160_v8, %v8146_v19  ;;  %v8178_v16 = vmul.f32 %v9163_v49, %v8158_v60 }
 0xa8a   : > { %v8188_v20 = vadd.f32 %v8175_v62, %v8096_v57 }
 0xa8b   : > { %v8150_v0 = vpop.permute.xlu1 %8149 }
 0xa8c   : > { %v11179_v23 = vpack.c.bf16 %v8188_v20, %v8187_v33  ;;  %v8176_v24 = vmul.f32 %v9161_v38, %v8150_v0 }
 0xa8e   : > { %11180 = vmatpush3.bf16.msra.mxu0 %v11179_v23  ;;  %v8189_v56 = vadd.f32 %v8176_v24, %v8097_v12  ;;  %v8087_v35 = vpop.permute.xlu0 %8086 }
 0xa8f   : > { %11181 = vmatprep.subr.bf16.mxu0 %v11414_v34  ;;  %v8101_v19 = vmul.f32 %v8087_v35, %v8023_v21 }
 0xa90   : > { %v8072_v4 = vpop.permute.xlu1 %8071 }
 0xa91   : > { %v8098_v29 = vmul.f32 %v8072_v4, %v8020_v17 }
 0xa93   : > { %v8190_v9 = vadd.f32 %v8177_v53, %v8098_v29 }
 0xa94   : > { %v8077_v7 = vpop.permute.xlu1 %8076 }
 0xa95   : > { %v11182_v59 = vpack.c.bf16 %v8190_v9, %v8189_v56  ;;  %v8099_v41 = vmul.f32 %v8077_v7, %v8021_v27 }
 0xa97   : > { %11183 = vmatpush3.bf16.msra.mxu0 %v11182_v59  ;;  %v8191_v2 = vadd.f32 %v8178_v16, %v8099_v41 }
 0xa98   : > { %v8082_v13 = vpop.permute.xlu1 %8081  ;;  %11184 = vmatprep.subr.bf16.mxu0 %v11414_v34 }
 0xa99   : > { %v8100_v6 = vmul.f32 %v8082_v13, %v8022_v31 }
 0xa9d   : > { %v8162_v26 = vpop.permute.xlu1 %8161 }
 0xa9e   : > { %v8179_v5 = vmul.f32 %v9164_v39, %v8162_v26 }
 0xaa0   : > { %v8192_v58 = vadd.f32 %v8179_v5, %v8100_v6 }
 0xaa1   : > { %v8166_v40 = vpop.permute.xlu1 %8165 }
 0xaa2   : > { %v11185_v8 = vpack.c.bf16 %v8192_v58, %v8191_v2  ;;  %v8180_v54 = vmul.f32 %v9165_v15, %v8166_v40 }
 0xaa4   : > { %11186 = vmatpush3.bf16.msra.mxu0 %v11185_v8  ;;  %v8193_v44 = vadd.f32 %v8180_v54, %v8101_v19 }
 0xaa5   : > { %11103 = vmatprep.subr.mxu0 %v11410_v3 }
 0xaa8   : > { %11104 = vmatpush3.msk.msra.mxu0 %vm8199_vm5, %v8193_v44 }
 0xaa9   : > { %11187 = vmatprep.subr.bf16.mxu0 %v11414_v34  ;;  %11106 = vmatmul.mubr.msk.f32.vlgmr.msra.gmra.mrb[136].mxu0 %vm8195_vm6, %v7865_v10 }
 0xaaa   : > { %11189 = vmatpush3.bf16.msra.mxu0 %v11188_v50  ;;  %11166 = vmatprep.mubr.msk.f32.mxu0 %vm11411_vm1, %v11410_v3  ;;  %v8411_v50 = vld [vmem:[%s14670_s10 + $0x60] sm:$0xf] }
 0xaab   : > { %11190 = vmatprep.subr.bf16.mxu0 %v11414_v34  ;;  %v8424_v51 = vmul.f32 %v8411_v50, %v8398_v25 }
 0xaae   : > { %11192 = vmatpush3.bf16.msra.mxu0 %v11191_v37 }
 0xaaf   : > { %11193 = vmatprep.subr.bf16.mxu0 %v11414_v34 }
 0xab2   : > { %11195 = vmatpush3.bf16.msra.mxu0 %v11194_v42 }
 0xab3   : > { %11196 = vmatprep.subr.bf16.mxu0 %v11414_v34 }
 0xab6   : > { %11198 = vmatpush3.bf16.msra.mxu0 %v11197_v14 }
 0xab7   : > { %11199 = vmatprep.subr.bf16.mxu0 %v11414_v34 }
 0xaba   : > { %11201 = vmatpush3.bf16.msra.mxu0 %v11200_v22 }
 0xabb   : > { %11202 = vmatprep.subr.bf16.mxu0 %v11414_v34  ;;  %v8194_v34 = vld [vmem:[%s14672_s12] sm:$0x1] }
 0xabe   : > { %11204 = vmatpush3.bf16.msra.mxu0 %v11203_v18 }
 0xabf   : > { %11164 = vmatprep.subr.mxu0 %v11410_v3 }
 0xac2   : > { %11165 = vmatpush3.msk.msra.mxu0 %vm8199_vm5, %v8424_v51 }
 0xac3   : > { %11167 = vmatmul.mubr.msk.f32.vlgmr.msra.gmra.mrb[138].mxu0 %vm8195_vm6, %v7865_v10 }
 0xb7c   : > { %v8269_v45 = vpop.f32.mrb[136].mxu0 }
 0xb7d   : > { %v8270_v61 = vadd.f32 %v8269_v45, %v8194_v34  ;;  %v11107_v37 = vpop.f32.mrb[137].mxu0 }
 0xb7f   : > { %8274 = vst.msk [vmem:[%s518_s13] sm:$0x1] %vm8273_vm7, %v8270_v61 }
 0xb80   : > { %11359 = shalt.err (!%p11356_p3)
}
 0xb81   : > { %s11360_s0 = scalar_lea.hbm %s14614_s21, 16  ;;  %s11364_s17 = scalar_lea.hbm %s14674_s15, 32 }
 0xb82   : > { %p11361_p4 = scmp.ne.s32.totalorder %s14614_s21, %s11360_s0  ;;  %p11365_p9 = scmp.lt.u32.totalorder %s14614_s21, %s14674_s15 }
 0xb83   : > { %p11366_p10 = scmp.lt.u32.totalorder %s11364_s17, %s11360_s0  ;;  %p11368_p12 = scmp.lt.u32.totalorder %s11360_s0, %s14614_s21 }
 0xb84   : > { %p11362_p7 = pnand %p11361_p4, %p11545_p5 }
 0xb85   : > { %p11367_p11 = por %p11366_p10, %p11365_p9 }
 0xb86   : > { %p11363_p8 = pneg %p11362_p7 }
 0xb87   : > { %p11369_p13 = por %p11368_p12, %p11367_p11 }
 0xb89   : > { %p11370_p0 = pnand %p11369_p13, %p11363_p8 }
 0xb8b   : > { %11373 = shalt.err (!%p11370_p0)
}
 0xb8c   : > { %11208 = dma.vmem_to_hbm [thread:$0]  (%p11545_p5), %s14616_s1, 16, %s14614_s21, %s8503_s20   ;;  %v8425_v3 = vld [vmem:[#allocation4] sm:$0x1]  ;;  %vm8500_vm8 = vcmask 0  }
 0xb8d   : > { %s531_s8 = scalar_lea.vmem %s14675_s16, %s11567_s24 }
 0xb96   : > { %v8495_v43 = vpop.f32.mrb[138].mxu0 }
 0xb97   : > { %v8496_v48 = vadd.f32 %v8495_v43, %v8425_v3  ;;  %v11168_v42 = vpop.f32.mrb[139].mxu0 }
 0xb99   : > { %11344 = vtanh.f32 %v8496_v48 }
 0xba3   : > { %v11345_v47 = vpop.eup %11344 }
 0xba4   : > { %8501 = vst.msk [vmem:[%s531_s8] sm:$0x1] %vm8500_vm8, %v11345_v47 }
 0xba5 PF: > { %p11214_p1 = scmp.ge.s32.totalorder %s11408_s28, 2  ;;  %s8533_s18 = sand.u32 1, %s11396_s25  }
 0xba6   : > { %s8534_s1 = scalar_lea.sflag [#allocation6], %s8533_s18 }
 0xba7   : > { %p11211_p5 = pnand %p11214_p1, %p11549_p6 }
 0xba9   : > { %11391 = dma.done.wait (!%p11211_p5), %s8534_s1, 16  }
 0xbaa   : > { %11393 = vsyncadd (!%p11211_p5), %s8534_s1, 4294967280  ;;  %s14688_s21 = sld [smem:[#allocation8_spill]]  ;;  %p31_p2 = scmp.ge.s32.totalorder %s11532_s29, 4  }
 0xbab   : > { %s14689_s25 = smov %s11400_s26  ;;  %s14690_s26 = smov %s11404_s27 }
 0xbac   : > { %s14692_s28 = smov %s11532_s29  ;;  %33 = sbr.rel (!%p31_p2) target bundleno = 8 (0x8), region = 174 }
 0xbb0   : > { %s14691_s27 = smov %s14688_s21 }
 0xbb3   :  { %8544 = vsyncpa [#allocation6], 1 }
 0xbb4   :  { %8546 = vsyncpa [#allocation6 + $0x1], 1 }

</bundles_post_ra>
